<compile_context>
chip_gen: v7x
topology: tpu7x:2x2x1
jax: 0.10.0
libtpu: 0.0.40
codegen_flags: <defaults>
</compile_context>

<pallas_src>
import functools

import jax
import jax.numpy as jnp
import numpy as np
from jax.experimental import pallas as pl
from jax.experimental.pallas import tpu as pltpu

EPS = 1e-5  # PyTorch InstanceNorm2d default


def _reflect_pad_into(pad_ref, xb, H, W):
    """Write reflection-pad-by-1 of xb (H, W, C) bf16 into pad_ref (>=H+2, >=W+2, C)."""
    pad_ref[1:H + 1, 1:W + 1, :] = xb                     # interior
    pad_ref[0:1, 1:W + 1, :] = xb[1:2]                    # top    <- row 1
    pad_ref[H + 1:H + 2, 1:W + 1, :] = xb[H - 2:H - 1]    # bottom <- row H-2
    # Column reflects read the already-written padded rows, so corners come
    # out exactly as PyTorch's sequential ReflectionPad2d (e.g. [0,0]=x[1,1]).
    pad_ref[:, 0:1, :] = pad_ref[:, 2:3, :]               # left   <- col 1
    pad_ref[:, W + 1:W + 2, :] = pad_ref[:, W - 1:W, :]   # right  <- col W-2


def _conv3x3_in(pad_ref, w_ref, H, W, C):
    """3x3 conv over the reflection-padded bf16 activation resident in pad_ref,
    as 9 accumulated MXU matmuls (bf16 operands, f32 accumulation), followed by
    InstanceNorm2d(affine=False, one-pass stats).  Returns (H*W, C) f32.

    w_ref: (9, Cin, Cout) bf16, tap index t = kh*3 + kw."""
    acc = None
    for kh in range(3):
        for kw in range(3):
            t = kh * 3 + kw
            view = pad_ref[kh:kh + H, kw:kw + W, :].reshape(H * W, C)
            part = jnp.dot(view, w_ref[t], preferred_element_type=jnp.float32)
            acc = part if acc is None else acc + part
    # (Bias omitted on purpose: it is cancelled exactly by the mean subtraction.)
    inv_hw = 1.0 / float(H * W)
    mean = jnp.sum(acc, axis=0, keepdims=True) * inv_hw
    ex2 = jnp.sum(acc * acc, axis=0, keepdims=True) * inv_hw
    var = jnp.maximum(ex2 - mean * mean, 0.0)
    return (acc - mean) * jax.lax.rsqrt(var + EPS)


def _basic_block_kernel(x_ref, w1_ref, w2_ref, o_ref, pad_ref, *, H, W, C):
    x = x_ref[0]                                          # (H, W, C) f32 block
    # ---- stage 1: reflect-pad + conv1 + IN1 + ReLU (all resident in VMEM) ----
    _reflect_pad_into(pad_ref, x.astype(jnp.bfloat16), H, W)
    y = _conv3x3_in(pad_ref, w1_ref, H, W, C)             # (H*W, C) f32
    y = jnp.maximum(y, 0.0)
    # ---- stage 2: reflect-pad + conv2 + IN2 (reuse the same pad scratch) ----
    _reflect_pad_into(pad_ref, y.reshape(H, W, C).astype(jnp.bfloat16), H, W)
    y = _conv3x3_in(pad_ref, w2_ref, H, W, C)             # (H*W, C) f32
    # ---- residual add (resident f32 input) + final ReLU ----
    out = jnp.maximum(y + x.astype(jnp.float32).reshape(H * W, C), 0.0)
    o_ref[0] = out.reshape(H, W, C).astype(o_ref.dtype)


@jax.jit
def basic_block_forward(x_nchw, w1, w2):
    """x_nchw: (N, C, H, W) f32.  wX: (3, 3, Cin, Cout) HWIO.
    Biases are intentionally not taken: bias-before-InstanceNorm(affine=False)
    is a mathematical no-op.  Assumes stride=1, downsample=None,
    inplanes == planes (module defaults)."""
    N, C, H, W = x_nchw.shape
    assert H >= 2 and W >= 2, "ReflectionPad2d(1) needs H, W >= 2"
    x = jnp.transpose(x_nchw, (0, 2, 3, 1))               # NCHW -> NHWC
    # Pre-flatten weights to (9, Cin, Cout) and cast to bf16 once.
    w1m = w1.reshape(9, C, C).astype(jnp.bfloat16)
    w2m = w2.reshape(9, C, C).astype(jnp.bfloat16)

    # Padded-width scratch rounded up to a sublane multiple of 8.
    Wp = ((W + 2 + 7) // 8) * 8

    kernel = functools.partial(_basic_block_kernel, H=H, W=W, C=C)
    out = pl.pallas_call(
        kernel,
        out_shape=jax.ShapeDtypeStruct((N, H, W, C), x.dtype),
        grid_spec=pltpu.PrefetchScalarGridSpec(
            num_scalar_prefetch=0,
            grid=(N,),
            in_specs=[
                pl.BlockSpec((1, H, W, C), lambda n: (n, 0, 0, 0)),
                pl.BlockSpec((9, C, C), lambda n: (0, 0, 0)),
                pl.BlockSpec((9, C, C), lambda n: (0, 0, 0)),
            ],
            out_specs=pl.BlockSpec((1, H, W, C), lambda n: (n, 0, 0, 0)),
            scratch_shapes=[pltpu.VMEM((H + 2, Wp, C), jnp.bfloat16)],
        ),
        compiler_params=pltpu.CompilerParams(
            dimension_semantics=("parallel",),
            # 48 MiB: safe on v7x (64 MiB physical); raise to ~96 MiB on
            # v5e/v6e (128 MiB) if larger whole-image blocks are desired.
            vmem_limit_bytes=48 * 1024 * 1024),
    )(x, w1m, w2m)
    return jnp.transpose(out, (0, 3, 1, 2))               # NHWC -> NCHW


# ---------------- pure-JAX f32 reference (correctness check) ----------------
# NOTE: the reference applies the conv biases, the kernel does not — matching
# results also verify that bias-before-IN(affine=False) cancels exactly.
def _ref_conv_in(x_nhwc, w, b):
    xp = jnp.pad(x_nhwc, ((0, 0), (1, 1), (1, 1), (0, 0)), mode="reflect")
    y = jax.lax.conv_general_dilated(
        xp, w, window_strides=(1, 1), padding="VALID",
        dimension_numbers=("NHWC", "HWIO", "NHWC"))
    y = y + b.reshape(1, 1, 1, -1)
    mean = jnp.mean(y, axis=(1, 2), keepdims=True)
    var = jnp.mean((y - mean) ** 2, axis=(1, 2), keepdims=True)
    return (y - mean) * jax.lax.rsqrt(var + EPS)


def _ref_forward(x_nchw, w1, b1, w2, b2):
    x = jnp.transpose(x_nchw, (0, 2, 3, 1))
    y = jnp.maximum(_ref_conv_in(x, w1, b1), 0.0)
    y = _ref_conv_in(y, w2, b2)
    return jnp.transpose(jnp.maximum(x + y, 0.0), (0, 3, 1, 2))  # final ReLU


if __name__ == "__main__":
    key = jax.random.PRNGKey(0)
    N, C, H, W = 2, 4, 16, 16
    kx, kw1, kb1, kw2, kb2 = jax.random.split(key, 5)

    x = jax.random.normal(kx, (N, C, H, W), jnp.float32)
    # Conv2d-like init, weights stored directly in HWIO (kh, kw, Cin, Cout).
    fan_in = C * 3 * 3
    bound = 1.0 / np.sqrt(fan_in)
    w1 = jax.random.uniform(kw1, (3, 3, C, C), jnp.float32, -bound, bound)
    b1 = jax.random.uniform(kb1, (C,), jnp.float32, -bound, bound)
    w2 = jax.random.uniform(kw2, (3, 3, C, C), jnp.float32, -bound, bound)
    b2 = jax.random.uniform(kb2, (C,), jnp.float32, -bound, bound)

    out = jax.block_until_ready(basic_block_forward(x, w1, w2))
    ref = jax.block_until_ready(_ref_forward(x, w1, b1, w2, b2))

    # Tolerance loosened vs. pure-f32 because the conv matmuls use bf16
    # operands (f32 accumulation); structural bugs would show up as O(1) diffs.
    np.testing.assert_allclose(np.asarray(out), np.asarray(ref),
                               atol=5e-2, rtol=5e-2)

    print("KERNEL_OK")
</pallas_src>

<mosaic_0001>
module attributes {stable_mosaic.version = 11 : i64} {
  func.func @_basic_block_kernel(%arg0: i32, %arg1: memref<1x16x16x4xf32, #tpu.memory_space<vmem>>, %arg2: memref<9x4x4xbf16, #tpu.memory_space<vmem>>, %arg3: memref<9x4x4xbf16, #tpu.memory_space<vmem>>, %arg4: memref<1x16x16x4xf32, #tpu.memory_space<vmem>>, %arg5: memref<18x24x4xbf16, #tpu.memory_space<vmem>>) attributes {dimension_semantics = [#tpu.dimension_semantics<parallel>], iteration_bounds = array<i64: 2>, scalar_prefetch = 0 : i64, scratch_operands = 1 : i64, tpu.core_type = #tpu.core_type<tc>, window_params = [{transform_indices = @transform_0, window_bounds = array<i64: 1, 16, 16, 4>}, {pipeline_mode = #tpu.pipeline_mode<synchronous>, transform_indices = @transform_1, window_bounds = array<i64: 9, 4, 4>}, {pipeline_mode = #tpu.pipeline_mode<synchronous>, transform_indices = @transform_2, window_bounds = array<i64: 9, 4, 4>}, {transform_indices = @transform_3, window_bounds = array<i64: 1, 16, 16, 4>}]} {
    %c0 = arith.constant 0 : index
    %c0_0 = arith.constant 0 : index
    %c0_1 = arith.constant 0 : index
    %c0_2 = arith.constant 0 : index
    %0 = vector.load %arg1[%c0, %c0_0, %c0_1, %c0_2] : memref<1x16x16x4xf32, #tpu.memory_space<vmem>>, vector<1x16x16x4xf32>
    %1 = vector.shape_cast %0 : vector<1x16x16x4xf32> to vector<16x16x4xf32>
    %2 = arith.truncf %1 : vector<16x16x4xf32> to vector<16x16x4xbf16>
    %c1 = arith.constant 1 : index
    %c1_3 = arith.constant 1 : index
    %c0_4 = arith.constant 0 : index
    %3 = vector.load %arg5[%c1, %c1_3, %c0_4] : memref<18x24x4xbf16, #tpu.memory_space<vmem>>, vector<16x16x4xbf16>
    tpu.vector_store %arg5[%c1, %c1_3, %c0_4], %2 {strides = array<i32>} : memref<18x24x4xbf16, #tpu.memory_space<vmem>>, vector<16x16x4xbf16>,
    %4 = vector.extract_strided_slice %2 {offsets = [1, 0, 0], sizes = [1, 16, 4], strides = [1, 1, 1]} : vector<16x16x4xbf16> to vector<1x16x4xbf16>
    %c0_5 = arith.constant 0 : index
    %c1_6 = arith.constant 1 : index
    %c0_7 = arith.constant 0 : index
    %5 = vector.load %arg5[%c0_5, %c1_6, %c0_7] : memref<18x24x4xbf16, #tpu.memory_space<vmem>>, vector<1x16x4xbf16>
    tpu.vector_store %arg5[%c0_5, %c1_6, %c0_7], %4 {strides = array<i32>} : memref<18x24x4xbf16, #tpu.memory_space<vmem>>, vector<1x16x4xbf16>,
    %6 = vector.extract_strided_slice %2 {offsets = [14, 0, 0], sizes = [1, 16, 4], strides = [1, 1, 1]} : vector<16x16x4xbf16> to vector<1x16x4xbf16>
    %c17 = arith.constant 17 : index
    %c1_8 = arith.constant 1 : index
    %c0_9 = arith.constant 0 : index
    %7 = vector.load %arg5[%c17, %c1_8, %c0_9] : memref<18x24x4xbf16, #tpu.memory_space<vmem>>, vector<1x16x4xbf16>
    tpu.vector_store %arg5[%c17, %c1_8, %c0_9], %6 {strides = array<i32>} : memref<18x24x4xbf16, #tpu.memory_space<vmem>>, vector<1x16x4xbf16>,
    %c0_10 = arith.constant 0 : index
    %c2 = arith.constant 2 : index
    %c0_11 = arith.constant 0 : index
    %8 = vector.load %arg5[%c0_10, %c2, %c0_11] : memref<18x24x4xbf16, #tpu.memory_space<vmem>>, vector<18x1x4xbf16>
    %c0_12 = arith.constant 0 : index
    %c0_13 = arith.constant 0 : index
    %c0_14 = arith.constant 0 : index
    %9 = vector.load %arg5[%c0_12, %c0_13, %c0_14] : memref<18x24x4xbf16, #tpu.memory_space<vmem>>, vector<18x1x4xbf16>
    tpu.vector_store %arg5[%c0_12, %c0_13, %c0_14], %8 {strides = array<i32>} : memref<18x24x4xbf16, #tpu.memory_space<vmem>>, vector<18x1x4xbf16>,
    %c0_15 = arith.constant 0 : index
    %c15 = arith.constant 15 : index
    %c0_16 = arith.constant 0 : index
    %10 = vector.load %arg5[%c0_15, %c15, %c0_16] : memref<18x24x4xbf16, #tpu.memory_space<vmem>>, vector<18x1x4xbf16>
    %c0_17 = arith.constant 0 : index
    %c17_18 = arith.constant 17 : index
    %c0_19 = arith.constant 0 : index
    %11 = vector.load %arg5[%c0_17, %c17_18, %c0_19] : memref<18x24x4xbf16, #tpu.memory_space<vmem>>, vector<18x1x4xbf16>
    tpu.vector_store %arg5[%c0_17, %c17_18, %c0_19], %10 {strides = array<i32>} : memref<18x24x4xbf16, #tpu.memory_space<vmem>>, vector<18x1x4xbf16>,
    %c0_20 = arith.constant 0 : index
    %c0_21 = arith.constant 0 : index
    %c0_22 = arith.constant 0 : index
    %12 = vector.load %arg5[%c0_20, %c0_21, %c0_22] : memref<18x24x4xbf16, #tpu.memory_space<vmem>>, vector<16x16x4xbf16>
    %13 = vector.shape_cast %12 : vector<16x16x4xbf16> to vector<256x4xbf16>
    %c0_23 = arith.constant 0 : index
    %c0_24 = arith.constant 0 : index
    %c0_25 = arith.constant 0 : index
    %14 = vector.load %arg2[%c0_23, %c0_24, %c0_25] : memref<9x4x4xbf16, #tpu.memory_space<vmem>>, vector<1x4x4xbf16>
    %15 = vector.shape_cast %14 : vector<1x4x4xbf16> to vector<4x4xbf16>
    %cst = arith.constant dense<0.000000e+00> : vector<256x4xf32>
    %16 = tpu.matmul %13, %15, %cst {dimension_numbers = #tpu.dot_dimension_numbers<[1], [0], [0], [1], [0, 0, 1, 1], [], []>} : vector<256x4xbf16>, vector<4x4xbf16>, vector<256x4xf32> -> vector<256x4xf32>
    %c0_26 = arith.constant 0 : index
    %c1_27 = arith.constant 1 : index
    %c0_28 = arith.constant 0 : index
    %17 = vector.load %arg5[%c0_26, %c1_27, %c0_28] : memref<18x24x4xbf16, #tpu.memory_space<vmem>>, vector<16x16x4xbf16>
    %18 = vector.shape_cast %17 : vector<16x16x4xbf16> to vector<256x4xbf16>
    %c1_29 = arith.constant 1 : index
    %c0_30 = arith.constant 0 : index
    %c0_31 = arith.constant 0 : index
    %19 = vector.load %arg2[%c1_29, %c0_30, %c0_31] : memref<9x4x4xbf16, #tpu.memory_space<vmem>>, vector<1x4x4xbf16>
    %20 = vector.shape_cast %19 : vector<1x4x4xbf16> to vector<4x4xbf16>
    %cst_32 = arith.constant dense<0.000000e+00> : vector<256x4xf32>
    %21 = tpu.matmul %18, %20, %cst_32 {dimension_numbers = #tpu.dot_dimension_numbers<[1], [0], [0], [1], [0, 0, 1, 1], [], []>} : vector<256x4xbf16>, vector<4x4xbf16>, vector<256x4xf32> -> vector<256x4xf32>
    %22 = arith.addf %16, %21 : vector<256x4xf32>
    %c0_33 = arith.constant 0 : index
    %c2_34 = arith.constant 2 : index
    %c0_35 = arith.constant 0 : index
    %23 = vector.load %arg5[%c0_33, %c2_34, %c0_35] : memref<18x24x4xbf16, #tpu.memory_space<vmem>>, vector<16x16x4xbf16>
    %24 = vector.shape_cast %23 : vector<16x16x4xbf16> to vector<256x4xbf16>
    %c2_36 = arith.constant 2 : index
    %c0_37 = arith.constant 0 : index
    %c0_38 = arith.constant 0 : index
    %25 = vector.load %arg2[%c2_36, %c0_37, %c0_38] : memref<9x4x4xbf16, #tpu.memory_space<vmem>>, vector<1x4x4xbf16>
    %26 = vector.shape_cast %25 : vector<1x4x4xbf16> to vector<4x4xbf16>
    %cst_39 = arith.constant dense<0.000000e+00> : vector<256x4xf32>
    %27 = tpu.matmul %24, %26, %cst_39 {dimension_numbers = #tpu.dot_dimension_numbers<[1], [0], [0], [1], [0, 0, 1, 1], [], []>} : vector<256x4xbf16>, vector<4x4xbf16>, vector<256x4xf32> -> vector<256x4xf32>
    %28 = arith.addf %22, %27 : vector<256x4xf32>
    %c1_40 = arith.constant 1 : index
    %c0_41 = arith.constant 0 : index
    %c0_42 = arith.constant 0 : index
    %29 = vector.load %arg5[%c1_40, %c0_41, %c0_42] : memref<18x24x4xbf16, #tpu.memory_space<vmem>>, vector<16x16x4xbf16>
    %30 = vector.shape_cast %29 : vector<16x16x4xbf16> to vector<256x4xbf16>
    %c3 = arith.constant 3 : index
    %c0_43 = arith.constant 0 : index
    %c0_44 = arith.constant 0 : index
    %31 = vector.load %arg2[%c3, %c0_43, %c0_44] : memref<9x4x4xbf16, #tpu.memory_space<vmem>>, vector<1x4x4xbf16>
    %32 = vector.shape_cast %31 : vector<1x4x4xbf16> to vector<4x4xbf16>
    %cst_45 = arith.constant dense<0.000000e+00> : vector<256x4xf32>
    %33 = tpu.matmul %30, %32, %cst_45 {dimension_numbers = #tpu.dot_dimension_numbers<[1], [0], [0], [1], [0, 0, 1, 1], [], []>} : vector<256x4xbf16>, vector<4x4xbf16>, vector<256x4xf32> -> vector<256x4xf32>
    %34 = arith.addf %28, %33 : vector<256x4xf32>
    %c1_46 = arith.constant 1 : index
    %c1_47 = arith.constant 1 : index
    %c0_48 = arith.constant 0 : index
    %35 = vector.load %arg5[%c1_46, %c1_47, %c0_48] : memref<18x24x4xbf16, #tpu.memory_space<vmem>>, vector<16x16x4xbf16>
    %36 = vector.shape_cast %35 : vector<16x16x4xbf16> to vector<256x4xbf16>
    %c4 = arith.constant 4 : index
    %c0_49 = arith.constant 0 : index
    %c0_50 = arith.constant 0 : index
    %37 = vector.load %arg2[%c4, %c0_49, %c0_50] : memref<9x4x4xbf16, #tpu.memory_space<vmem>>, vector<1x4x4xbf16>
    %38 = vector.shape_cast %37 : vector<1x4x4xbf16> to vector<4x4xbf16>
    %cst_51 = arith.constant dense<0.000000e+00> : vector<256x4xf32>
    %39 = tpu.matmul %36, %38, %cst_51 {dimension_numbers = #tpu.dot_dimension_numbers<[1], [0], [0], [1], [0, 0, 1, 1], [], []>} : vector<256x4xbf16>, vector<4x4xbf16>, vector<256x4xf32> -> vector<256x4xf32>
    %40 = arith.addf %34, %39 : vector<256x4xf32>
    %c1_52 = arith.constant 1 : index
    %c2_53 = arith.constant 2 : index
    %c0_54 = arith.constant 0 : index
    %41 = vector.load %arg5[%c1_52, %c2_53, %c0_54] : memref<18x24x4xbf16, #tpu.memory_space<vmem>>, vector<16x16x4xbf16>
    %42 = vector.shape_cast %41 : vector<16x16x4xbf16> to vector<256x4xbf16>
    %c5 = arith.constant 5 : index
    %c0_55 = arith.constant 0 : index
    %c0_56 = arith.constant 0 : index
    %43 = vector.load %arg2[%c5, %c0_55, %c0_56] : memref<9x4x4xbf16, #tpu.memory_space<vmem>>, vector<1x4x4xbf16>
    %44 = vector.shape_cast %43 : vector<1x4x4xbf16> to vector<4x4xbf16>
    %cst_57 = arith.constant dense<0.000000e+00> : vector<256x4xf32>
    %45 = tpu.matmul %42, %44, %cst_57 {dimension_numbers = #tpu.dot_dimension_numbers<[1], [0], [0], [1], [0, 0, 1, 1], [], []>} : vector<256x4xbf16>, vector<4x4xbf16>, vector<256x4xf32> -> vector<256x4xf32>
    %46 = arith.addf %40, %45 : vector<256x4xf32>
    %c2_58 = arith.constant 2 : index
    %c0_59 = arith.constant 0 : index
    %c0_60 = arith.constant 0 : index
    %47 = vector.load %arg5[%c2_58, %c0_59, %c0_60] : memref<18x24x4xbf16, #tpu.memory_space<vmem>>, vector<16x16x4xbf16>
    %48 = vector.shape_cast %47 : vector<16x16x4xbf16> to vector<256x4xbf16>
    %c6 = arith.constant 6 : index
    %c0_61 = arith.constant 0 : index
    %c0_62 = arith.constant 0 : index
    %49 = vector.load %arg2[%c6, %c0_61, %c0_62] : memref<9x4x4xbf16, #tpu.memory_space<vmem>>, vector<1x4x4xbf16>
    %50 = vector.shape_cast %49 : vector<1x4x4xbf16> to vector<4x4xbf16>
    %cst_63 = arith.constant dense<0.000000e+00> : vector<256x4xf32>
    %51 = tpu.matmul %48, %50, %cst_63 {dimension_numbers = #tpu.dot_dimension_numbers<[1], [0], [0], [1], [0, 0, 1, 1], [], []>} : vector<256x4xbf16>, vector<4x4xbf16>, vector<256x4xf32> -> vector<256x4xf32>
    %52 = arith.addf %46, %51 : vector<256x4xf32>
    %c2_64 = arith.constant 2 : index
    %c1_65 = arith.constant 1 : index
    %c0_66 = arith.constant 0 : index
    %53 = vector.load %arg5[%c2_64, %c1_65, %c0_66] : memref<18x24x4xbf16, #tpu.memory_space<vmem>>, vector<16x16x4xbf16>
    %54 = vector.shape_cast %53 : vector<16x16x4xbf16> to vector<256x4xbf16>
    %c7 = arith.constant 7 : index
    %c0_67 = arith.constant 0 : index
    %c0_68 = arith.constant 0 : index
    %55 = vector.load %arg2[%c7, %c0_67, %c0_68] : memref<9x4x4xbf16, #tpu.memory_space<vmem>>, vector<1x4x4xbf16>
    %56 = vector.shape_cast %55 : vector<1x4x4xbf16> to vector<4x4xbf16>
    %cst_69 = arith.constant dense<0.000000e+00> : vector<256x4xf32>
    %57 = tpu.matmul %54, %56, %cst_69 {dimension_numbers = #tpu.dot_dimension_numbers<[1], [0], [0], [1], [0, 0, 1, 1], [], []>} : vector<256x4xbf16>, vector<4x4xbf16>, vector<256x4xf32> -> vector<256x4xf32>
    %58 = arith.addf %52, %57 : vector<256x4xf32>
    %c2_70 = arith.constant 2 : index
    %c2_71 = arith.constant 2 : index
    %c0_72 = arith.constant 0 : index
    %59 = vector.load %arg5[%c2_70, %c2_71, %c0_72] : memref<18x24x4xbf16, #tpu.memory_space<vmem>>, vector<16x16x4xbf16>
    %60 = vector.shape_cast %59 : vector<16x16x4xbf16> to vector<256x4xbf16>
    %c8 = arith.constant 8 : index
    %c0_73 = arith.constant 0 : index
    %c0_74 = arith.constant 0 : index
    %61 = vector.load %arg2[%c8, %c0_73, %c0_74] : memref<9x4x4xbf16, #tpu.memory_space<vmem>>, vector<1x4x4xbf16>
    %62 = vector.shape_cast %61 : vector<1x4x4xbf16> to vector<4x4xbf16>
    %cst_75 = arith.constant dense<0.000000e+00> : vector<256x4xf32>
    %63 = tpu.matmul %60, %62, %cst_75 {dimension_numbers = #tpu.dot_dimension_numbers<[1], [0], [0], [1], [0, 0, 1, 1], [], []>} : vector<256x4xbf16>, vector<4x4xbf16>, vector<256x4xf32> -> vector<256x4xf32>
    %64 = arith.addf %58, %63 : vector<256x4xf32>
    %cst_76 = arith.constant dense<0.000000e+00> : vector<4xf32>
    %65 = vector.multi_reduction <add>, %64, %cst_76 [0] : vector<256x4xf32> to vector<4xf32>
    %66 = vector.shape_cast %65 : vector<4xf32> to vector<1x4xf32>
    %cst_77 = arith.constant 3.906250e-03 : f32
    %67 = vector.broadcast %cst_77 : f32 to vector<1x4xf32>
    %68 = arith.mulf %66, %67 : vector<1x4xf32>
    %69 = arith.mulf %64, %64 : vector<256x4xf32>
    %cst_78 = arith.constant dense<0.000000e+00> : vector<4xf32>
    %70 = vector.multi_reduction <add>, %69, %cst_78 [0] : vector<256x4xf32> to vector<4xf32>
    %71 = vector.shape_cast %70 : vector<4xf32> to vector<1x4xf32>
    %cst_79 = arith.constant 3.906250e-03 : f32
    %72 = vector.broadcast %cst_79 : f32 to vector<1x4xf32>
    %73 = arith.mulf %71, %72 : vector<1x4xf32>
    %74 = arith.mulf %68, %68 : vector<1x4xf32>
    %75 = arith.subf %73, %74 : vector<1x4xf32>
    %cst_80 = arith.constant 0.000000e+00 : f32
    %76 = vector.broadcast %cst_80 : f32 to vector<1x4xf32>
    %77 = arith.maximumf %75, %76 : vector<1x4xf32>
    %78 = vector.broadcast %68 : vector<1x4xf32> to vector<256x4xf32>
    %79 = arith.subf %64, %78 : vector<256x4xf32>
    %cst_81 = arith.constant 9.99999974E-6 : f32
    %80 = vector.broadcast %cst_81 : f32 to vector<1x4xf32>
    %81 = arith.addf %77, %80 : vector<1x4xf32>
    %82 = math.rsqrt %81 : vector<1x4xf32>
    %83 = vector.broadcast %82 : vector<1x4xf32> to vector<256x4xf32>
    %84 = arith.mulf %79, %83 : vector<256x4xf32>
    %cst_82 = arith.constant 0.000000e+00 : f32
    %85 = vector.broadcast %cst_82 : f32 to vector<256x4xf32>
    %86 = arith.maximumf %84, %85 : vector<256x4xf32>
    %87 = vector.shape_cast %86 : vector<256x4xf32> to vector<16x16x4xf32>
    %88 = arith.truncf %87 : vector<16x16x4xf32> to vector<16x16x4xbf16>
    %c1_83 = arith.constant 1 : index
    %c1_84 = arith.constant 1 : index
    %c0_85 = arith.constant 0 : index
    %89 = vector.load %arg5[%c1_83, %c1_84, %c0_85] : memref<18x24x4xbf16, #tpu.memory_space<vmem>>, vector<16x16x4xbf16>
    tpu.vector_store %arg5[%c1_83, %c1_84, %c0_85], %88 {strides = array<i32>} : memref<18x24x4xbf16, #tpu.memory_space<vmem>>, vector<16x16x4xbf16>,
    %90 = vector.extract_strided_slice %88 {offsets = [1, 0, 0], sizes = [1, 16, 4], strides = [1, 1, 1]} : vector<16x16x4xbf16> to vector<1x16x4xbf16>
    %c0_86 = arith.constant 0 : index
    %c1_87 = arith.constant 1 : index
    %c0_88 = arith.constant 0 : index
    %91 = vector.load %arg5[%c0_86, %c1_87, %c0_88] : memref<18x24x4xbf16, #tpu.memory_space<vmem>>, vector<1x16x4xbf16>
    tpu.vector_store %arg5[%c0_86, %c1_87, %c0_88], %90 {strides = array<i32>} : memref<18x24x4xbf16, #tpu.memory_space<vmem>>, vector<1x16x4xbf16>,
    %92 = vector.extract_strided_slice %88 {offsets = [14, 0, 0], sizes = [1, 16, 4], strides = [1, 1, 1]} : vector<16x16x4xbf16> to vector<1x16x4xbf16>
    %c17_89 = arith.constant 17 : index
    %c1_90 = arith.constant 1 : index
    %c0_91 = arith.constant 0 : index
    %93 = vector.load %arg5[%c17_89, %c1_90, %c0_91] : memref<18x24x4xbf16, #tpu.memory_space<vmem>>, vector<1x16x4xbf16>
    tpu.vector_store %arg5[%c17_89, %c1_90, %c0_91], %92 {strides = array<i32>} : memref<18x24x4xbf16, #tpu.memory_space<vmem>>, vector<1x16x4xbf16>,
    %c0_92 = arith.constant 0 : index
    %c2_93 = arith.constant 2 : index
    %c0_94 = arith.constant 0 : index
    %94 = vector.load %arg5[%c0_92, %c2_93, %c0_94] : memref<18x24x4xbf16, #tpu.memory_space<vmem>>, vector<18x1x4xbf16>
    %c0_95 = arith.constant 0 : index
    %c0_96 = arith.constant 0 : index
    %c0_97 = arith.constant 0 : index
    %95 = vector.load %arg5[%c0_95, %c0_96, %c0_97] : memref<18x24x4xbf16, #tpu.memory_space<vmem>>, vector<18x1x4xbf16>
    tpu.vector_store %arg5[%c0_95, %c0_96, %c0_97], %94 {strides = array<i32>} : memref<18x24x4xbf16, #tpu.memory_space<vmem>>, vector<18x1x4xbf16>,
    %c0_98 = arith.constant 0 : index
    %c15_99 = arith.constant 15 : index
    %c0_100 = arith.constant 0 : index
    %96 = vector.load %arg5[%c0_98, %c15_99, %c0_100] : memref<18x24x4xbf16, #tpu.memory_space<vmem>>, vector<18x1x4xbf16>
    %c0_101 = arith.constant 0 : index
    %c17_102 = arith.constant 17 : index
    %c0_103 = arith.constant 0 : index
    %97 = vector.load %arg5[%c0_101, %c17_102, %c0_103] : memref<18x24x4xbf16, #tpu.memory_space<vmem>>, vector<18x1x4xbf16>
    tpu.vector_store %arg5[%c0_101, %c17_102, %c0_103], %96 {strides = array<i32>} : memref<18x24x4xbf16, #tpu.memory_space<vmem>>, vector<18x1x4xbf16>,
    %c0_104 = arith.constant 0 : index
    %c0_105 = arith.constant 0 : index
    %c0_106 = arith.constant 0 : index
    %98 = vector.load %arg5[%c0_104, %c0_105, %c0_106] : memref<18x24x4xbf16, #tpu.memory_space<vmem>>, vector<16x16x4xbf16>
    %99 = vector.shape_cast %98 : vector<16x16x4xbf16> to vector<256x4xbf16>
    %c0_107 = arith.constant 0 : index
    %c0_108 = arith.constant 0 : index
    %c0_109 = arith.constant 0 : index
    %100 = vector.load %arg3[%c0_107, %c0_108, %c0_109] : memref<9x4x4xbf16, #tpu.memory_space<vmem>>, vector<1x4x4xbf16>
    %101 = vector.shape_cast %100 : vector<1x4x4xbf16> to vector<4x4xbf16>
    %cst_110 = arith.constant dense<0.000000e+00> : vector<256x4xf32>
    %102 = tpu.matmul %99, %101, %cst_110 {dimension_numbers = #tpu.dot_dimension_numbers<[1], [0], [0], [1], [0, 0, 1, 1], [], []>} : vector<256x4xbf16>, vector<4x4xbf16>, vector<256x4xf32> -> vector<256x4xf32>
    %c0_111 = arith.constant 0 : index
    %c1_112 = arith.constant 1 : index
    %c0_113 = arith.constant 0 : index
    %103 = vector.load %arg5[%c0_111, %c1_112, %c0_113] : memref<18x24x4xbf16, #tpu.memory_space<vmem>>, vector<16x16x4xbf16>
    %104 = vector.shape_cast %103 : vector<16x16x4xbf16> to vector<256x4xbf16>
    %c1_114 = arith.constant 1 : index
    %c0_115 = arith.constant 0 : index
    %c0_116 = arith.constant 0 : index
    %105 = vector.load %arg3[%c1_114, %c0_115, %c0_116] : memref<9x4x4xbf16, #tpu.memory_space<vmem>>, vector<1x4x4xbf16>
    %106 = vector.shape_cast %105 : vector<1x4x4xbf16> to vector<4x4xbf16>
    %cst_117 = arith.constant dense<0.000000e+00> : vector<256x4xf32>
    %107 = tpu.matmul %104, %106, %cst_117 {dimension_numbers = #tpu.dot_dimension_numbers<[1], [0], [0], [1], [0, 0, 1, 1], [], []>} : vector<256x4xbf16>, vector<4x4xbf16>, vector<256x4xf32> -> vector<256x4xf32>
    %108 = arith.addf %102, %107 : vector<256x4xf32>
    %c0_118 = arith.constant 0 : index
    %c2_119 = arith.constant 2 : index
    %c0_120 = arith.constant 0 : index
    %109 = vector.load %arg5[%c0_118, %c2_119, %c0_120] : memref<18x24x4xbf16, #tpu.memory_space<vmem>>, vector<16x16x4xbf16>
    %110 = vector.shape_cast %109 : vector<16x16x4xbf16> to vector<256x4xbf16>
    %c2_121 = arith.constant 2 : index
    %c0_122 = arith.constant 0 : index
    %c0_123 = arith.constant 0 : index
    %111 = vector.load %arg3[%c2_121, %c0_122, %c0_123] : memref<9x4x4xbf16, #tpu.memory_space<vmem>>, vector<1x4x4xbf16>
    %112 = vector.shape_cast %111 : vector<1x4x4xbf16> to vector<4x4xbf16>
    %cst_124 = arith.constant dense<0.000000e+00> : vector<256x4xf32>
    %113 = tpu.matmul %110, %112, %cst_124 {dimension_numbers = #tpu.dot_dimension_numbers<[1], [0], [0], [1], [0, 0, 1, 1], [], []>} : vector<256x4xbf16>, vector<4x4xbf16>, vector<256x4xf32> -> vector<256x4xf32>
    %114 = arith.addf %108, %113 : vector<256x4xf32>
    %c1_125 = arith.constant 1 : index
    %c0_126 = arith.constant 0 : index
    %c0_127 = arith.constant 0 : index
    %115 = vector.load %arg5[%c1_125, %c0_126, %c0_127] : memref<18x24x4xbf16, #tpu.memory_space<vmem>>, vector<16x16x4xbf16>
    %116 = vector.shape_cast %115 : vector<16x16x4xbf16> to vector<256x4xbf16>
    %c3_128 = arith.constant 3 : index
    %c0_129 = arith.constant 0 : index
    %c0_130 = arith.constant 0 : index
    %117 = vector.load %arg3[%c3_128, %c0_129, %c0_130] : memref<9x4x4xbf16, #tpu.memory_space<vmem>>, vector<1x4x4xbf16>
    %118 = vector.shape_cast %117 : vector<1x4x4xbf16> to vector<4x4xbf16>
    %cst_131 = arith.constant dense<0.000000e+00> : vector<256x4xf32>
    %119 = tpu.matmul %116, %118, %cst_131 {dimension_numbers = #tpu.dot_dimension_numbers<[1], [0], [0], [1], [0, 0, 1, 1], [], []>} : vector<256x4xbf16>, vector<4x4xbf16>, vector<256x4xf32> -> vector<256x4xf32>
    %120 = arith.addf %114, %119 : vector<256x4xf32>
    %c1_132 = arith.constant 1 : index
    %c1_133 = arith.constant 1 : index
    %c0_134 = arith.constant 0 : index
    %121 = vector.load %arg5[%c1_132, %c1_133, %c0_134] : memref<18x24x4xbf16, #tpu.memory_space<vmem>>, vector<16x16x4xbf16>
    %122 = vector.shape_cast %121 : vector<16x16x4xbf16> to vector<256x4xbf16>
    %c4_135 = arith.constant 4 : index
    %c0_136 = arith.constant 0 : index
    %c0_137 = arith.constant 0 : index
    %123 = vector.load %arg3[%c4_135, %c0_136, %c0_137] : memref<9x4x4xbf16, #tpu.memory_space<vmem>>, vector<1x4x4xbf16>
    %124 = vector.shape_cast %123 : vector<1x4x4xbf16> to vector<4x4xbf16>
    %cst_138 = arith.constant dense<0.000000e+00> : vector<256x4xf32>
    %125 = tpu.matmul %122, %124, %cst_138 {dimension_numbers = #tpu.dot_dimension_numbers<[1], [0], [0], [1], [0, 0, 1, 1], [], []>} : vector<256x4xbf16>, vector<4x4xbf16>, vector<256x4xf32> -> vector<256x4xf32>
    %126 = arith.addf %120, %125 : vector<256x4xf32>
    %c1_139 = arith.constant 1 : index
    %c2_140 = arith.constant 2 : index
    %c0_141 = arith.constant 0 : index
    %127 = vector.load %arg5[%c1_139, %c2_140, %c0_141] : memref<18x24x4xbf16, #tpu.memory_space<vmem>>, vector<16x16x4xbf16>
    %128 = vector.shape_cast %127 : vector<16x16x4xbf16> to vector<256x4xbf16>
    %c5_142 = arith.constant 5 : index
    %c0_143 = arith.constant 0 : index
    %c0_144 = arith.constant 0 : index
    %129 = vector.load %arg3[%c5_142, %c0_143, %c0_144] : memref<9x4x4xbf16, #tpu.memory_space<vmem>>, vector<1x4x4xbf16>
    %130 = vector.shape_cast %129 : vector<1x4x4xbf16> to vector<4x4xbf16>
    %cst_145 = arith.constant dense<0.000000e+00> : vector<256x4xf32>
    %131 = tpu.matmul %128, %130, %cst_145 {dimension_numbers = #tpu.dot_dimension_numbers<[1], [0], [0], [1], [0, 0, 1, 1], [], []>} : vector<256x4xbf16>, vector<4x4xbf16>, vector<256x4xf32> -> vector<256x4xf32>
    %132 = arith.addf %126, %131 : vector<256x4xf32>
    %c2_146 = arith.constant 2 : index
    %c0_147 = arith.constant 0 : index
    %c0_148 = arith.constant 0 : index
    %133 = vector.load %arg5[%c2_146, %c0_147, %c0_148] : memref<18x24x4xbf16, #tpu.memory_space<vmem>>, vector<16x16x4xbf16>
    %134 = vector.shape_cast %133 : vector<16x16x4xbf16> to vector<256x4xbf16>
    %c6_149 = arith.constant 6 : index
    %c0_150 = arith.constant 0 : index
    %c0_151 = arith.constant 0 : index
    %135 = vector.load %arg3[%c6_149, %c0_150, %c0_151] : memref<9x4x4xbf16, #tpu.memory_space<vmem>>, vector<1x4x4xbf16>
    %136 = vector.shape_cast %135 : vector<1x4x4xbf16> to vector<4x4xbf16>
    %cst_152 = arith.constant dense<0.000000e+00> : vector<256x4xf32>
    %137 = tpu.matmul %134, %136, %cst_152 {dimension_numbers = #tpu.dot_dimension_numbers<[1], [0], [0], [1], [0, 0, 1, 1], [], []>} : vector<256x4xbf16>, vector<4x4xbf16>, vector<256x4xf32> -> vector<256x4xf32>
    %138 = arith.addf %132, %137 : vector<256x4xf32>
    %c2_153 = arith.constant 2 : index
    %c1_154 = arith.constant 1 : index
    %c0_155 = arith.constant 0 : index
    %139 = vector.load %arg5[%c2_153, %c1_154, %c0_155] : memref<18x24x4xbf16, #tpu.memory_space<vmem>>, vector<16x16x4xbf16>
    %140 = vector.shape_cast %139 : vector<16x16x4xbf16> to vector<256x4xbf16>
    %c7_156 = arith.constant 7 : index
    %c0_157 = arith.constant 0 : index
    %c0_158 = arith.constant 0 : index
    %141 = vector.load %arg3[%c7_156, %c0_157, %c0_158] : memref<9x4x4xbf16, #tpu.memory_space<vmem>>, vector<1x4x4xbf16>
    %142 = vector.shape_cast %141 : vector<1x4x4xbf16> to vector<4x4xbf16>
    %cst_159 = arith.constant dense<0.000000e+00> : vector<256x4xf32>
    %143 = tpu.matmul %140, %142, %cst_159 {dimension_numbers = #tpu.dot_dimension_numbers<[1], [0], [0], [1], [0, 0, 1, 1], [], []>} : vector<256x4xbf16>, vector<4x4xbf16>, vector<256x4xf32> -> vector<256x4xf32>
    %144 = arith.addf %138, %143 : vector<256x4xf32>
    %c2_160 = arith.constant 2 : index
    %c2_161 = arith.constant 2 : index
    %c0_162 = arith.constant 0 : index
    %145 = vector.load %arg5[%c2_160, %c2_161, %c0_162] : memref<18x24x4xbf16, #tpu.memory_space<vmem>>, vector<16x16x4xbf16>
    %146 = vector.shape_cast %145 : vector<16x16x4xbf16> to vector<256x4xbf16>
    %c8_163 = arith.constant 8 : index
    %c0_164 = arith.constant 0 : index
    %c0_165 = arith.constant 0 : index
    %147 = vector.load %arg3[%c8_163, %c0_164, %c0_165] : memref<9x4x4xbf16, #tpu.memory_space<vmem>>, vector<1x4x4xbf16>
    %148 = vector.shape_cast %147 : vector<1x4x4xbf16> to vector<4x4xbf16>
    %cst_166 = arith.constant dense<0.000000e+00> : vector<256x4xf32>
    %149 = tpu.matmul %146, %148, %cst_166 {dimension_numbers = #tpu.dot_dimension_numbers<[1], [0], [0], [1], [0, 0, 1, 1], [], []>} : vector<256x4xbf16>, vector<4x4xbf16>, vector<256x4xf32> -> vector<256x4xf32>
    %150 = arith.addf %144, %149 : vector<256x4xf32>
    %cst_167 = arith.constant dense<0.000000e+00> : vector<4xf32>
    %151 = vector.multi_reduction <add>, %150, %cst_167 [0] : vector<256x4xf32> to vector<4xf32>
    %152 = vector.shape_cast %151 : vector<4xf32> to vector<1x4xf32>
    %cst_168 = arith.constant 3.906250e-03 : f32
    %153 = vector.broadcast %cst_168 : f32 to vector<1x4xf32>
    %154 = arith.mulf %152, %153 : vector<1x4xf32>
    %155 = arith.mulf %150, %150 : vector<256x4xf32>
    %cst_169 = arith.constant dense<0.000000e+00> : vector<4xf32>
    %156 = vector.multi_reduction <add>, %155, %cst_169 [0] : vector<256x4xf32> to vector<4xf32>
    %157 = vector.shape_cast %156 : vector<4xf32> to vector<1x4xf32>
    %cst_170 = arith.constant 3.906250e-03 : f32
    %158 = vector.broadcast %cst_170 : f32 to vector<1x4xf32>
    %159 = arith.mulf %157, %158 : vector<1x4xf32>
    %160 = arith.mulf %154, %154 : vector<1x4xf32>
    %161 = arith.subf %159, %160 : vector<1x4xf32>
    %cst_171 = arith.constant 0.000000e+00 : f32
    %162 = vector.broadcast %cst_171 : f32 to vector<1x4xf32>
    %163 = arith.maximumf %161, %162 : vector<1x4xf32>
    %164 = vector.broadcast %154 : vector<1x4xf32> to vector<256x4xf32>
    %165 = arith.subf %150, %164 : vector<256x4xf32>
    %cst_172 = arith.constant 9.99999974E-6 : f32
    %166 = vector.broadcast %cst_172 : f32 to vector<1x4xf32>
    %167 = arith.addf %163, %166 : vector<1x4xf32>
    %168 = math.rsqrt %167 : vector<1x4xf32>
    %169 = vector.broadcast %168 : vector<1x4xf32> to vector<256x4xf32>
    %170 = arith.mulf %165, %169 : vector<256x4xf32>
    %171 = vector.shape_cast %1 : vector<16x16x4xf32> to vector<256x4xf32>
    %172 = arith.addf %170, %171 : vector<256x4xf32>
    %cst_173 = arith.constant 0.000000e+00 : f32
    %173 = vector.broadcast %cst_173 : f32 to vector<256x4xf32>
    %174 = arith.maximumf %172, %173 : vector<256x4xf32>
    %175 = vector.shape_cast %174 : vector<256x4xf32> to vector<16x16x4xf32>
    %c0_174 = arith.constant 0 : index
    %c0_175 = arith.constant 0 : index
    %c0_176 = arith.constant 0 : index
    %c0_177 = arith.constant 0 : index
    %176 = vector.load %arg4[%c0_174, %c0_175, %c0_176, %c0_177] : memref<1x16x16x4xf32, #tpu.memory_space<vmem>>, vector<1x16x16x4xf32>
    %177 = vector.shape_cast %176 : vector<1x16x16x4xf32> to vector<16x16x4xf32>
    %178 = vector.shape_cast %175 : vector<16x16x4xf32> to vector<1x16x16x4xf32>
    tpu.vector_store %arg4[%c0_174, %c0_175, %c0_176, %c0_177], %178 {strides = array<i32>} : memref<1x16x16x4xf32, #tpu.memory_space<vmem>>, vector<1x16x16x4xf32>,
    return
  }
  func.func @transform_0(%arg0: i32) -> (i32, i32, i32, i32) {
    %c0_i32 = arith.constant 0 : i32
    %c0_i32_0 = arith.constant 0 : i32
    %c0_i32_1 = arith.constant 0 : i32
    %c0_i32_2 = arith.constant 0 : i32
    return %arg0, %c0_i32, %c0_i32_0, %c0_i32_1 : i32, i32, i32, i32
  }
  func.func @transform_1(%arg0: i32) -> (i32, i32, i32) {
    %c0_i32 = arith.constant 0 : i32
    %c0_i32_0 = arith.constant 0 : i32
    %c0_i32_1 = arith.constant 0 : i32
    %c0_i32_2 = arith.constant 0 : i32
    return %c0_i32, %c0_i32_0, %c0_i32_1 : i32, i32, i32
  }
  func.func @transform_2(%arg0: i32) -> (i32, i32, i32) {
    %c0_i32 = arith.constant 0 : i32
    %c0_i32_0 = arith.constant 0 : i32
    %c0_i32_1 = arith.constant 0 : i32
    %c0_i32_2 = arith.constant 0 : i32
    return %c0_i32, %c0_i32_0, %c0_i32_1 : i32, i32, i32
  }
  func.func @transform_3(%arg0: i32) -> (i32, i32, i32, i32) {
    %c0_i32 = arith.constant 0 : i32
    %c0_i32_0 = arith.constant 0 : i32
    %c0_i32_1 = arith.constant 0 : i32
    %c0_i32_2 = arith.constant 0 : i32
    return %arg0, %c0_i32, %c0_i32_0, %c0_i32_1 : i32, i32, i32, i32
  }
}

</mosaic_0001>

<bundles_post_ra>
// kernel: basic_block_forward.1
= control target key start
LH: loop header
LB: loop body
LE: loop exit
PB: predicated region body
PF: predicated region fallthrough
CT: control target
= control target key end

     0   :  { %s14180_s12 = smov 0   ;;  %s18836_s0 = inlined_call_operand.vmem [shape: f32[2,16,16,4], index: 0, kind: input, shape index: {}]   ;;  %s18837_s1 = inlined_call_operand.vmem [shape: bf16[9,4,4], index: 1, kind: input, shape index: {}]   ;;  %s18838_s2 = inlined_call_operand.vmem [shape: bf16[9,4,4], index: 2, kind: input, shape index: {}]   ;;  %s18839_s3 = inlined_call_operand.vmem [shape: f32[2,16,16,4], index: 3, kind: output, shape index: {}]  }
   0x1 LB: > { %s11647_s13 = sadd.s32 4294967295, %s14158_s12   ;;  %p11651_p0 = scmp.ge.s32.totalorder %s14158_s12, 1  ;;  %s14158_s12 = sphi %s14180_s12, %s13_s12  }
   0x2   : > { %p137_p1 = scmp.lt.s32.totalorder %s14158_s12, 3 }
   0x4   : > { %p138_p2 = pnand %p11651_p0, %p137_p1 }
   0x6   : > { %141 = sbr.rel (%p138_p2) target bundleno = 1966 (0x7ae), region = 32 }
   0xd   : > { %v11724_v0 = vld [vmem:[%s18837_s1 + $0x2] sm:$0x3]  ;;  %vm1581_vm0 = vcmask 1041408   ;;  %p161_p3 = scmp.lt.s32.totalorder %s11647_s13, 1  ;;  %v14199_v2 = vld [vmem:[%s18837_s1] sm:$0x3] }
   0xe   : > { %13978 = vmatprep.subr.msk.bf16.mxu0 %vm1581_vm0, %v11724_v0  ;;  %v1583_v1 = vsel %vm1581_vm0, %v11724_v0, 0  ;;  %vm300_vm1 = vsmask.f32 256  ;;  %vm301_vm2 = vsmask.f32 4368  ;;  %vm624_vm3 = vcmask 27648  }
   0xf   : > { %12855 = vmatpush3.bf16.msra.mxu0 %v1583_v1  ;;  %s19224_s13 = smov (!%p161_p3, %s11647_s13), 1  ;;  %vm625_vm4 = vsmask.f32 7938  ;;  %vm632_vm5 = vcmask 24576   ;;  %vm14217_vm6 = vmor %vm300_vm1, %vm301_vm2  ;;  %v18950_v17 = vmov 0  ;;  %v18953_v26 = vmov 0 }
  0x10   : > { %s12482_s16 = sshll.u32 %s19224_s13, 8  ;;  %13979 = vmatprep.subr.msk.bf16.mxu0 %vm1581_vm0, %v14199_v2  ;;  %v18951_v17 = vsel %vm14217_vm6, 4294967295, %v18950_v17  ;;  %vm14225_vm7 = vmand %vm624_vm3, %vm625_vm4  ;;  %v742_v27 = vld [vmem:[#allocation2] sm:$0xf]  ;;  %v746_v28 = vld [vmem:[#allocation2 + $0x8] sm:$0x1] }
  0x11   : > { %s14206_s21 = scalar_lea.vmem %s18836_s0, %s12482_s16  ;;  %18952 = vst [vmem:[#allocation3_spill] sm:$0xff] %v18951_v17  ;;  %v18954_v26 = vsel %vm14225_vm7, 4294967295, %v18953_v26  ;;  %vm14231_vm8 = vmand %vm632_vm5, %vm300_vm1  ;;  %v18956_v31 = vmov 0  ;;  %v627_v34 = vld [vmem:[#allocation2 + $0xc] sm:$0xf]  ;;  %vm1532_vm12 = vcmask 31744   ;;  %s18720_s10 = scalar_lea.vmem %s18839_s3, %s12482_s16 }
  0x12   : > { %v174_v3 = vld [vmem:[%s14206_s21 + $0x10] sm:$0xff]  ;;  %v175_v4 = vld [vmem:[%s14206_s21 + $0x18] sm:$0xff]  ;;  %v172_v7 = vld [vmem:[%s14206_s21] sm:$0xff]  ;;  %18955 = vst [vmem:[#allocation4_spill] sm:$0xff] %v18954_v26  ;;  %v18957_v31 = vsel %vm14231_vm8, 4294967295, %v18956_v31  ;;  %vm2086_vm14 = vcmask 1042432  }
  0x13   : > { %v12486_v5 = vpack.c.bf16 %v174_v3, %v174_v3  ;;  %v12487_v6 = vpack.c.bf16 %v175_v4, %v175_v4  ;;  %v173_v8 = vld [vmem:[%s14206_s21 + $0x8] sm:$0xff]  ;;  %v12484_v9 = vpack.c.bf16 %v172_v7, %v172_v7  ;;  %v176_v11 = vld [vmem:[%s14206_s21 + $0x20] sm:$0xff]  ;;  %v178_v22 = vld [vmem:[%s14206_s21 + $0x30] sm:$0xff]  ;;  %18958 = vst [vmem:[#allocation5_spill] sm:$0xff] %v18957_v31  ;;  %v14259_v4 = vsel %vm1581_vm0, %v14199_v2, 0 }
  0x14   : > { %v12485_v10 = vpack.c.bf16 %v173_v8, %v173_v8  ;;  %v177_v12 = vld [vmem:[%s14206_s21 + $0x28] sm:$0xff]  ;;  %v179_v23 = vld [vmem:[%s14206_s21 + $0x38] sm:$0xff]  ;;  %v12488_v29 = vpack.c.bf16 %v176_v11, %v176_v11  ;;  %v12490_v36 = vpack.c.bf16 %v178_v22, %v178_v22  ;;  %v634_v42 = vld [vmem:[#allocation2 + $0x14] sm:$0x1]  ;;  %vm1095_vm10 = vsmask.f32 3328 }
  0x15   : > { %v321_v13 = vshrl.u32 %v12486_v5, 16  ;;  %v324_v14 = vshll.u32 %v12486_v5, 16  ;;  %v329_v15 = vshrl.u32 %v12487_v6, 16  ;;  %v332_v16 = vshll.u32 %v12487_v6, 16  ;;  %v637_v35 = vld [vmem:[#allocation2 + $0x18] sm:$0xf]  ;;  %vm14270_vm9 = vmand %vm632_vm5, %vm625_vm4 }
  0x16   : > { %v304_v18 = vshrl.u32 %v12484_v9, 16  ;;  %v307_v19 = vshll.u32 %v12484_v9, 16  ;;  %v312_v20 = vshrl.u32 %v12485_v10, 16  ;;  %v315_v21 = vshll.u32 %v12485_v10, 16  ;;  %v641_v43 = vld [vmem:[#allocation2 + $0x20] sm:$0x1] }
  0x17   : > { %v323_v24 = vrot.slane %v321_v13, 7  ;;  %v331_v25 = vrot.slane %v329_v15, 7  ;;  %v12489_v30 = vpack.c.bf16 %v177_v12, %v177_v12  ;;  %v12491_v37 = vpack.c.bf16 %v179_v23, %v179_v23  ;;  %v180_v56 = vld [vmem:[%s14206_s21 + $0x40] sm:$0xff]  ;;  %v181_v61 = vld [vmem:[%s14206_s21 + $0x48] sm:$0xff]  ;;  %v182_v62 = vld [vmem:[%s14206_s21 + $0x50] sm:$0xff] }
  0x18   : > { %v306_v32 = vrot.slane %v304_v18, 7  ;;  %v314_v33 = vrot.slane %v312_v20, 7  ;;  %v338_v57 = vshrl.u32 %v12488_v29, 16  ;;  %v341_v58 = vshll.u32 %v12488_v29, 16  ;;  %v644_v7 = vld [vmem:[#allocation2 + $0x24] sm:$0xf] }
  0x19   : > { %v326_v38 = vor.u32 %v324_v14, %v323_v24  ;;  %v327_v39 = vrot.slane %v323_v24, 4  ;;  %v334_v40 = vor.u32 %v332_v16, %v331_v25  ;;  %v336_v41 = vrot.slane %v331_v25, 4  ;;  %v648_v9 = vld [vmem:[#allocation2 + $0x2c] sm:$0x1]  ;;  %v183_v13 = vld [vmem:[%s14206_s21 + $0x58] sm:$0xff] }
  0x1a   : > { %v309_v44 = vor.u32 %v307_v19, %v306_v32  ;;  %v310_v45 = vrot.slane %v306_v32, 4  ;;  %v317_v46 = vor.u32 %v315_v21, %v314_v33  ;;  %v319_v47 = vrot.slane %v314_v33, 4  ;;  %v651_v2 = vld [vmem:[#allocation2 + $0x30] sm:$0xf]  ;;  %v655_v25 = vld [vmem:[#allocation2 + $0x38] sm:$0x1] }
  0x1b   : > { %v335_v48 = vsel %vm14217_vm6, %v327_v39, %v334_v40  ;;  %v743_v49 = vsel %vm14225_vm7, %v326_v38, %v742_v27  ;;  %v747_v50 = vsel %vm14231_vm8, %v336_v41, %v746_v28  ;;  %v638_v51 = vsel %vm14225_vm7, %v326_v38, %v637_v35  ;;  %v184_v27 = vld [vmem:[%s14206_s21 + $0x60] sm:$0xff] }
  0x1c   : > { %640 = vst.msk [vmem:[#allocation2 + $0x1c] sm:$0xf] %vm624_vm3, %v335_v48  ;;  %744 = vst [vmem:[#allocation2] sm:$0xf] %v743_v49  ;;  %v318_v52 = vsel %vm14217_vm6, %v310_v45, %v317_v46  ;;  %v628_v53 = vsel %vm14225_vm7, %v309_v44, %v627_v34  ;;  %v635_v54 = vsel %vm14231_vm8, %v319_v47, %v634_v42  ;;  %v346_v59 = vshrl.u32 %v12489_v30, 16  ;;  %v186_v49 = vld [vmem:[%s14206_s21 + $0x70] sm:$0xff] }
  0x1d   : > { %745 = vst.msk [vmem:[#allocation2 + $0x4] sm:$0xf] %vm624_vm3, %v335_v48  ;;  %748 = vst [vmem:[#allocation2 + $0x8] sm:$0x1] %v747_v50  ;;  %v642_v55 = vsel %vm14231_vm8, %v336_v41, %v641_v43  ;;  %v349_v60 = vshll.u32 %v12489_v30, 16  ;;  %v355_v63 = vshrl.u32 %v12490_v36, 16  ;;  %v14261_v8 = vpack.c.bf16 %v180_v56, %v180_v56 }
  0x1e   : > { %639 = vst [vmem:[#allocation2 + $0x18] sm:$0xf] %v638_v51  ;;  %629 = vst [vmem:[#allocation2 + $0xc] sm:$0xf] %v628_v53  ;;  %v358_v0 = vshll.u32 %v12490_v36, 16  ;;  %v363_v1 = vshrl.u32 %v12491_v37, 16  ;;  %v14263_v12 = vpack.c.bf16 %v181_v61, %v181_v61  ;;  %v14266_v14 = vpack.c.bf16 %v182_v62, %v182_v62 }
  0x1f   : > { %631 = vst.msk [vmem:[#allocation2 + $0x10] sm:$0xf] %vm624_vm3, %v318_v52  ;;  %636 = vst [vmem:[#allocation2 + $0x14] sm:$0x1] %v635_v54  ;;  %v366_v3 = vshll.u32 %v12491_v37, 16  ;;  %v340_v5 = vrot.slane %v338_v57, 7  ;;  %v14281_v35 = vpack.c.bf16 %v183_v13, %v183_v13  ;;  %v14292_v48 = vpack.c.bf16 %v184_v27, %v184_v27 }
  0x20   : > { %643 = vst [vmem:[#allocation2 + $0x20] sm:$0x1] %v642_v55  ;;  %v348_v6 = vrot.slane %v346_v59, 7  ;;  %v357_v10 = vrot.slane %v355_v63, 7  ;;  %v365_v11 = vrot.slane %v363_v1, 7  ;;  %v18959_v20 = vmov 0 }
  0x21   : > { %v343_v15 = vor.u32 %v341_v58, %v340_v5  ;;  %v344_v16 = vrot.slane %v340_v5, 4  ;;  %v18960_v20 = vsel %vm14270_vm9, 4294967295, %v18959_v20  ;;  %v185_v36 = vld [vmem:[%s14206_s21 + $0x68] sm:$0xff]  ;;  %vm1096_vm11 = vsmask.f32 7440 }
  0x22   : > { %v351_v18 = vor.u32 %v349_v60, %v348_v6  ;;  %v353_v19 = vrot.slane %v348_v6, 4  ;;  %18961 = vst [vmem:[#allocation6_spill] sm:$0xff] %v18960_v20  ;;  %v360_v21 = vor.u32 %v358_v0, %v357_v10  ;;  %v361_v22 = vrot.slane %v357_v10, 4  ;;  %vm14338_vm13 = vmor %vm1095_vm10, %vm1096_vm11 }
  0x23   : > { %v368_v23 = vor.u32 %v366_v3, %v365_v11  ;;  %v370_v24 = vrot.slane %v365_v11, 4  ;;  %v757_v28 = vld [vmem:[#allocation2] sm:$0x2]  ;;  %v847_v29 = vld [vmem:[#allocation2] sm:$0x1]  ;;  %v645_v33 = vsel %vm14225_vm7, %v343_v15, %v644_v7  ;;  %v372_v55 = vshrl.u32 %v14261_v8, 16 }
  0x24   : > { %v901_v30 = vld [vmem:[#allocation2 + $0x4] sm:$0x8]  ;;  %v352_v32 = vsel %vm14217_vm6, %v344_v16, %v351_v18  ;;  %v649_v34 = vsel %vm14231_vm8, %v353_v19, %v648_v9  ;;  %v11688_v37 = vrot.slane %v757_v28, 9  ;;  %v992_v39 = vld [vmem:[#allocation2 + $0x8] sm:$0x1]  ;;  %v652_v42 = vsel %vm14225_vm7, %v360_v21, %v651_v2 }
  0x25   : > { %v11706_v38 = vrot.slane %v901_v30, 11  ;;  %v1047_v40 = vld [vmem:[#allocation2 + $0x4] sm:$0xf]  ;;  %646 = vst [vmem:[#allocation2 + $0x24] sm:$0xf] %v645_v33  ;;  %v369_v41 = vsel %vm14217_vm6, %v361_v22, %v368_v23  ;;  %v656_v47 = vsel %vm14231_vm8, %v370_v24, %v655_v25  ;;  %v375_v60 = vshll.u32 %v14261_v8, 16 }
  0x26   : > { %647 = vst.msk [vmem:[#allocation2 + $0x28] sm:$0xf] %vm624_vm3, %v352_v32  ;;  %650 = vst [vmem:[#allocation2 + $0x2c] sm:$0x1] %v649_v34  ;;  %v1108_v43 = vshll.u32 %v1047_v40, 16  ;;  %v1112_v44 = vshrl.u32 %v1047_v40, 16  ;;  %v848_v50 = vsel %vm14231_vm8, %v11688_v37, %v847_v29  ;;  %v14305_v3 = vpack.c.bf16 %v185_v36, %v185_v36 }
  0x27   : > { %v758_v45 = vld [vmem:[#allocation2 + $0xc] sm:$0x2]  ;;  %v850_v46 = vld [vmem:[#allocation2 + $0xc] sm:$0x1]  ;;  %653 = vst [vmem:[#allocation2 + $0x30] sm:$0xf] %v652_v42  ;;  %v993_v51 = vsel %vm14270_vm9, %v11706_v38, %v992_v39  ;;  %v14314_v19 = vpack.c.bf16 %v186_v49, %v186_v49 }
  0x28   : > { %654 = vst.msk [vmem:[#allocation2 + $0x34] sm:$0xf] %vm624_vm3, %v369_v41  ;;  %v11689_v52 = vrot.slane %v758_v45, 9  ;;  %v902_v53 = vld [vmem:[#allocation2 + $0x10] sm:$0x8]  ;;  %v14300_v56 = vrot.slane %v1108_v43, 5 }
  0x29   : > { %v995_v54 = vld [vmem:[#allocation2 + $0x14] sm:$0x1]  ;;  %657 = vst [vmem:[#allocation2 + $0x38] sm:$0x1] %v656_v47  ;;  %849 = vst [vmem:[#allocation2] sm:$0x1] %v848_v50 }
  0x2a   : > { %994 = vst [vmem:[#allocation2 + $0x8] sm:$0x1] %v993_v51  ;;  %v1114_v57 = vrot.slane %v1112_v44, 4  ;;  %v11707_v58 = vrot.slane %v902_v53, 11  ;;  %v1049_v59 = vld [vmem:[#allocation2 + $0x10] sm:$0xf]  ;;  %v851_v61 = vsel %vm14231_vm8, %v11689_v52, %v850_v46 }
  0x2b   : > { %v1132_v62 = vshll.u32 %v1049_v59, 16  ;;  %v1136_v63 = vshrl.u32 %v1049_v59, 16  ;;  %v759_v0 = vld [vmem:[#allocation2 + $0x18] sm:$0x2]  ;;  %v853_v1 = vld [vmem:[#allocation2 + $0x18] sm:$0x1] }
  0x2c   : > { %v1115_v5 = vor.u32 %v1114_v57, %v14300_v56  ;;  %852 = vst [vmem:[#allocation2 + $0xc] sm:$0x1] %v851_v61  ;;  %v996_v6 = vsel %vm14270_vm9, %v11707_v58, %v995_v54  ;;  %v11690_v7 = vrot.slane %v759_v0, 9  ;;  %v903_v9 = vld [vmem:[#allocation2 + $0x1c] sm:$0x8]  ;;  %v14310_v11 = vrot.slane %v372_v55, 7 }
  0x2d   : > { %v998_v10 = vld [vmem:[#allocation2 + $0x20] sm:$0x1]  ;;  %v658_v8 = vld [vmem:[#allocation2 + $0x3c] sm:$0xf]  ;;  %997 = vst [vmem:[#allocation2 + $0x14] sm:$0x1] %v996_v6 }
  0x2e   : > { %v14312_v13 = vrot.slane %v1132_v62, 5  ;;  %v1138_v15 = vrot.slane %v1136_v63, 4  ;;  %v11708_v16 = vrot.slane %v903_v9, 11  ;;  %v1051_v18 = vld [vmem:[#allocation2 + $0x1c] sm:$0xf]  ;;  %v854_v2 = vsel %vm14231_vm8, %v11690_v7, %v853_v1 }
  0x2f   : > { %v1156_v21 = vshll.u32 %v1051_v18, 16  ;;  %v1160_v22 = vshrl.u32 %v1051_v18, 16  ;;  %v760_v23 = vld [vmem:[#allocation2 + $0x24] sm:$0x2]  ;;  %v380_v24 = vshrl.u32 %v14263_v12, 16  ;;  %v377_v32 = vor.u32 %v375_v60, %v14310_v11  ;;  %v187_v51 = vld [vmem:[%s14206_s21 + $0x78] sm:$0xff] }
  0x30   : > { %v1139_v25 = vor.u32 %v1138_v15, %v14312_v13  ;;  %855 = vst [vmem:[#allocation2 + $0x18] sm:$0x1] %v854_v2  ;;  %v999_v27 = vsel %vm14270_vm9, %v11708_v16, %v998_v10  ;;  %v11691_v28 = vrot.slane %v760_v23, 9  ;;  %v856_v29 = vld [vmem:[#allocation2 + $0x24] sm:$0x1]  ;;  %v14323_v33 = vrot.slane %v1115_v5, 4 }
  0x31   : > { %v904_v30 = vld [vmem:[#allocation2 + $0x28] sm:$0x8]  ;;  %1000 = vst [vmem:[#allocation2 + $0x20] sm:$0x1] %v999_v27  ;;  %v14325_v34 = vrot.slane %v1156_v21, 5  ;;  %v1162_v36 = vrot.slane %v1160_v22, 4  ;;  %v659_v44 = vsel %vm14225_vm7, %v377_v32, %v658_v8  ;;  %v14346_v7 = vpack.c.bf16 %v187_v51, %v187_v51 }
  0x32   : > { %v11709_v37 = vrot.slane %v904_v30, 11  ;;  %v1001_v38 = vld [vmem:[#allocation2 + $0x2c] sm:$0x1]  ;;  %v1046_v39 = vld [vmem:[#allocation2] sm:$0xf]  ;;  %v14327_v41 = vrot.slane %v1139_v25, 4  ;;  %v857_v42 = vsel %vm14231_vm8, %v11691_v28, %v856_v29 }
  0x33   : > { %v1079_v40 = vld [vmem:[#allocation2 + $0x8] sm:$0x1]  ;;  %v378_v43 = vrot.slane %v14310_v11, 4  ;;  %v1099_v45 = vshrl.u32 %v1046_v39, 16  ;;  %v1102_v46 = vshll.u32 %v1046_v39, 16  ;;  %v1163_v49 = vor.u32 %v1162_v36, %v14325_v34 }
  0x34   : > { %v1118_v47 = vshll.u32 %v1079_v40, 16  ;;  %858 = vst [vmem:[#allocation2 + $0x24] sm:$0x1] %v857_v42  ;;  %v1053_v50 = vld [vmem:[#allocation2 + $0x28] sm:$0xf]  ;;  %v18962_v52 = vmov 0  ;;  %v1002_v54 = vsel %vm14270_vm9, %v11709_v37, %v1001_v38 }
  0x35   : > { %660 = vst [vmem:[#allocation2 + $0x3c] sm:$0xf] %v659_v44  ;;  %v18963_v52 = vsel %vm14338_vm13, 4294967295, %v18962_v52  ;;  %v1048_v53 = vld [vmem:[#allocation2 + $0xc] sm:$0xf]  ;;  %v1180_v55 = vshll.u32 %v1053_v50, 16 }
  0x36   : > { %18964 = vst [vmem:[#allocation7_spill] sm:$0xff] %v18963_v52  ;;  %v1184_v57 = vshrl.u32 %v1053_v50, 16  ;;  %v14344_v58 = vrot.slane %v380_v24, 7  ;;  %v1101_v59 = vrot.slane %v1099_v45, 4  ;;  %v1104_v60 = vrot.slane %v1102_v46, 5 }
  0x37   : > { %v1120_v61 = vrot.slane %v1118_v47, 5  ;;  %v1080_v62 = vld [vmem:[#allocation2 + $0x14] sm:$0x1]  ;;  %v1123_v63 = vshrl.u32 %v1048_v53, 16  ;;  %1003 = vst [vmem:[#allocation2 + $0x2c] sm:$0x1] %v1002_v54 }
  0x38   : > { %v1126_v0 = vshll.u32 %v1048_v53, 16  ;;  %v1142_v1 = vshll.u32 %v1080_v62, 16  ;;  %v1164_v5 = vrot.slane %v1163_v49, 4  ;;  %v761_v6 = vld [vmem:[#allocation2 + $0x30] sm:$0x2]  ;;  %v1105_v9 = vor.u32 %v1104_v60, %v1101_v59 }
  0x39   : > { %v1121_v10 = vsel %vm14338_vm13, %v14323_v33, %v1120_v61  ;;  %v1125_v8 = vrot.slane %v1123_v63, 4  ;;  %v1050_v15 = vld [vmem:[#allocation2 + $0x18] sm:$0xf]  ;;  %v14351_v16 = vrot.slane %v1180_v55, 5  ;;  %v1081_v21 = vld [vmem:[#allocation2 + $0x20] sm:$0x1] }
  0x3a   : > { %v1128_v18 = vrot.slane %v1126_v0, 5  ;;  %v1144_v2 = vrot.slane %v1142_v1, 5  ;;  %v1147_v22 = vshrl.u32 %v1050_v15, 16  ;;  %v1150_v23 = vshll.u32 %v1050_v15, 16  ;;  %v859_v42 = vld [vmem:[#allocation2 + $0x30] sm:$0x1] }
  0x3b   : > { %v1106_v24 = vrot.slane %v1105_v9, 4  ;;  %v1166_v25 = vshll.u32 %v1081_v21, 16  ;;  %v1186_v27 = vrot.slane %v1184_v57, 4  ;;  %v11692_v28 = vrot.slane %v761_v6, 9  ;;  %v1052_v36 = vld [vmem:[#allocation2 + $0x24] sm:$0xf] }
  0x3c   : > { %v1129_v29 = vor.u32 %v1128_v18, %v1125_v8  ;;  %v1145_v30 = vsel %vm14338_vm13, %v14327_v41, %v1144_v2  ;;  %v1149_v32 = vrot.slane %v1147_v22, 4  ;;  %v1152_v33 = vrot.slane %v1150_v23, 5  ;;  %v905_v50 = vld [vmem:[#allocation2 + $0x34] sm:$0x8]  ;;  %v1004_v61 = vld [vmem:[#allocation2 + $0x38] sm:$0x1] }
  0x3d   : > { %v1111_v37 = vsel %vm14338_vm13, %v1106_v24, %v14300_v56  ;;  %v1168_v38 = vrot.slane %v1166_v25, 5  ;;  %v1171_v39 = vshrl.u32 %v1052_v36, 16  ;;  %v1174_v40 = vshll.u32 %v1052_v36, 16  ;;  %v1055_v55 = vld [vmem:[#allocation2 + $0x34] sm:$0xf] }
  0x3e   : > { %v11725_v44 = vcombine.low %v1111_v37, %v1121_v10  ;;  %v1130_v45 = vrot.slane %v1129_v29, 4  ;;  %v1153_v46 = vor.u32 %v1152_v33, %v1149_v32  ;;  %v1082_v47 = vld [vmem:[#allocation2 + $0x2c] sm:$0x1]  ;;  %v1187_v49 = vor.u32 %v1186_v27, %v14351_v16  ;;  %v662_v21 = vld [vmem:[#allocation2 + $0x44] sm:$0x1] }
  0x3f   : > { %v1169_v41 = vsel %vm14338_vm13, %v1164_v5, %v1168_v38  ;;  %v1173_v51 = vrot.slane %v1171_v39, 4  ;;  %v1176_v53 = vrot.slane %v1174_v40, 5  ;;  %v1190_v54 = vshll.u32 %v1082_v47, 16  ;;  %v862_v24 = vld [vmem:[#allocation2 + $0x3c] sm:$0x1] }
  0x40   : > { %12856 = vmatprep.mubr.msk.bf16.mxu0 %vm1532_vm12, %v11725_v44  ;;  %v1135_v56 = vsel %vm14338_vm13, %v1130_v45, %v14312_v13  ;;  %v1154_v57 = vrot.slane %v1153_v46, 4  ;;  %v1188_v59 = vrot.slane %v1187_v49, 4  ;;  %v860_v60 = vsel %vm14231_vm8, %v11692_v28, %v859_v42  ;;  %v762_v13 = vld [vmem:[#allocation2 + $0x3c] sm:$0x2]  ;;  %v11805_v29 = vld [vmem:[%s18837_s1 + $0x4] sm:$0x3] }
  0x41   : > { %v11726_v62 = vcombine.low %v1135_v56, %v1145_v30  ;;  %v1177_v63 = vor.u32 %v1176_v53, %v1173_v51  ;;  %v1192_v0 = vrot.slane %v1190_v54, 5  ;;  %861 = vst [vmem:[#allocation2 + $0x30] sm:$0x1] %v860_v60  ;;  %v11710_v1 = vrot.slane %v905_v50, 11  ;;  %v665_v33 = vld [vmem:[#allocation2 + $0x48] sm:$0xf] }
  0x42   : > { %v1159_v5 = vsel %vm14338_vm13, %v1154_v57, %v14325_v34  ;;  %v1204_v6 = vshll.u32 %v1055_v55, 16  ;;  %v1208_v9 = vshrl.u32 %v1055_v55, 16  ;;  %v383_v10 = vshll.u32 %v14263_v12, 16  ;;  %v669_v49 = vld [vmem:[#allocation2 + $0x50] sm:$0x1] }
  0x43   : > { %12857 = vmatmul.mubr.msk.bf16.vlgmr.msra.gmra.mrb[0].mxu0 %vm1532_vm12, %v11726_v62  ;;  %v11727_v8 = vcombine.low %v1159_v5, %v1169_v41  ;;  %v1178_v15 = vrot.slane %v1177_v63, 4  ;;  %v1193_v18 = vsel %vm14338_vm13, %v1188_v59, %v1192_v0  ;;  %v1005_v2 = vsel %vm14270_vm9, %v11710_v1, %v1004_v61  ;;  %v672_v50 = vld [vmem:[#allocation2 + $0x54] sm:$0xf]  ;;  %v676_v54 = vld [vmem:[#allocation2 + $0x5c] sm:$0x1] }
  0x44   : > { %12889 = vmatpush3.bf16.msra.mxu0 %v14259_v4  ;;  %1006 = vst [vmem:[#allocation2 + $0x38] sm:$0x1] %v1005_v2  ;;  %v14378_v34 = vrot.slane %v1204_v6, 5  ;;  %v1210_v22 = vrot.slane %v1208_v9, 4  ;;  %v385_v12 = vor.u32 %v383_v10, %v14344_v58  ;;  %v387_v23 = vrot.slane %v14344_v58, 4 }
  0x45   : > { %12860 = vmatprep.mubr.msk.bf16.mxu0 %vm1532_vm12, %v11727_v8  ;;  %v1183_v25 = vsel %vm14338_vm13, %v1178_v15, %v14351_v16  ;;  %v11693_v27 = vrot.slane %v762_v13, 9  ;;  %v389_v28 = vshrl.u32 %v14266_v14, 16  ;;  %v392_v4 = vshll.u32 %v14266_v14, 16  ;;  %13980 = vmatprep.subr.msk.bf16.mxu0 %vm1581_vm0, %v11805_v29  ;;  %v189_v29 = vld [vmem:[%s14206_s21 + $0x88] sm:$0xff] }
  0x46   : > { %v11728_v30 = vcombine.low %v1183_v25, %v1193_v18  ;;  %v1211_v32 = vor.u32 %v1210_v22, %v14378_v34  ;;  %v386_v58 = vsel %vm14217_vm6, %v378_v43, %v385_v12  ;;  %v663_v16 = vsel %vm14231_vm8, %v387_v23, %v662_v21  ;;  %v188_v18 = vld [vmem:[%s14206_s21 + $0x80] sm:$0xff] }
  0x47   : > { %661 = vst.msk [vmem:[#allocation2 + $0x40] sm:$0xf] %vm624_vm3, %v386_v58  ;;  %664 = vst [vmem:[#allocation2 + $0x44] sm:$0x1] %v663_v16  ;;  %v863_v14 = vsel %vm14231_vm8, %v11693_v27, %v862_v24  ;;  %v391_v36 = vrot.slane %v389_v28, 7  ;;  %v397_v37 = vshrl.u32 %v14281_v35, 16 }
  0x48   : > { %v400_v11 = vshll.u32 %v14281_v35, 16  ;;  %v1054_v38 = vld [vmem:[#allocation2 + $0x30] sm:$0xf]  ;;  %v1212_v39 = vrot.slane %v1211_v32, 4  ;;  %864 = vst [vmem:[#allocation2 + $0x3c] sm:$0x1] %v863_v14 }
  0x49   : > { %v406_v43 = vshrl.u32 %v14292_v48, 16  ;;  %v409_v40 = vshll.u32 %v14292_v48, 16  ;;  %v414_v42 = vshrl.u32 %v14305_v3, 16  ;;  %v1195_v44 = vshrl.u32 %v1054_v38, 16 }
  0x4a   : > { %v1198_v45 = vshll.u32 %v1054_v38, 16  ;;  %v394_v46 = vor.u32 %v392_v4, %v391_v36  ;;  %v395_v47 = vrot.slane %v391_v36, 4  ;;  %v399_v41 = vrot.slane %v397_v37, 7  ;;  %v679_v38 = vld [vmem:[#allocation2 + $0x60] sm:$0xf] }
  0x4b   : > { %v408_v51 = vrot.slane %v406_v43, 7  ;;  %v416_v53 = vrot.slane %v414_v42, 7  ;;  %v417_v35 = vshll.u32 %v14305_v3, 16  ;;  %12861 = vmatmul.mubr.msk.bf16.gmra.mrb[4].mxu0 %vm1532_vm12, %v11728_v30  ;;  %v1083_v55 = vld [vmem:[#allocation2 + $0x38] sm:$0x1]  ;;  %v1197_v56 = vrot.slane %v1195_v44, 4 }
  0x4c   : > { %v1200_v57 = vrot.slane %v1198_v45, 5  ;;  %v666_v48 = vsel %vm14225_vm7, %v394_v46, %v665_v33  ;;  %v423_v59 = vshrl.u32 %v14314_v19, 16  ;;  %v1214_v60 = vshll.u32 %v1083_v55, 16  ;;  %v190_v33 = vld [vmem:[%s14206_s21 + $0x90] sm:$0xff] }
  0x4d   : > { %v402_v61 = vor.u32 %v400_v11, %v399_v41  ;;  %v404_v62 = vrot.slane %v399_v41, 4  ;;  %667 = vst [vmem:[#allocation2 + $0x48] sm:$0xf] %v666_v48  ;;  %v411_v63 = vor.u32 %v409_v40, %v408_v51  ;;  %v412_v1 = vrot.slane %v408_v51, 4  ;;  %v192_v41 = vld [vmem:[%s14206_s21 + $0xa0] sm:$0xff]  ;;  %v193_v51 = vld [vmem:[%s14206_s21 + $0xa8] sm:$0xff] }
  0x4e   : > { %v1201_v0 = vor.u32 %v1200_v57, %v1197_v56  ;;  %v419_v3 = vor.u32 %v417_v35, %v416_v53  ;;  %v421_v5 = vrot.slane %v416_v53, 4  ;;  %v1216_v6 = vrot.slane %v1214_v60, 5  ;;  %v906_v9 = vld [vmem:[#allocation2 + $0x40] sm:$0x8]  ;;  %v1007_v10 = vld [vmem:[#allocation2 + $0x44] sm:$0x1] }
  0x4f   : > { %v403_v13 = vsel %vm14217_vm6, %v395_v47, %v402_v61  ;;  %v670_v8 = vsel %vm14231_vm8, %v404_v62, %v669_v49  ;;  %v673_v15 = vsel %vm14225_vm7, %v411_v63, %v672_v50  ;;  %v11711_v21 = vrot.slane %v906_v9, 11  ;;  %v1056_v22 = vld [vmem:[#allocation2 + $0x3c] sm:$0xf]  ;;  %v1057_v12 = vld [vmem:[#allocation2 + $0x40] sm:$0xf] }
  0x50   : > { %v1202_v2 = vrot.slane %v1201_v0, 4  ;;  %668 = vst.msk [vmem:[#allocation2 + $0x4c] sm:$0xf] %vm624_vm3, %v403_v13  ;;  %671 = vst [vmem:[#allocation2 + $0x50] sm:$0x1] %v670_v8  ;;  %v420_v23 = vsel %vm14217_vm6, %v412_v1, %v419_v3  ;;  %v677_v24 = vsel %vm14231_vm8, %v421_v5, %v676_v54  ;;  %v1217_v25 = vsel %vm14338_vm13, %v1212_v39, %v1216_v6  ;;  %v191_v39 = vld [vmem:[%s14206_s21 + $0x98] sm:$0xff] }
  0x51   : > { %674 = vst [vmem:[#allocation2 + $0x54] sm:$0xf] %v673_v15  ;;  %v1219_v27 = vshrl.u32 %v1056_v22, 16  ;;  %v1222_v28 = vshll.u32 %v1056_v22, 16  ;;  %v1228_v4 = vshll.u32 %v1057_v12, 16  ;;  %v1008_v32 = vsel %vm14270_vm9, %v11711_v21, %v1007_v10 }
  0x52   : > { %675 = vst.msk [vmem:[#allocation2 + $0x58] sm:$0xf] %vm624_vm3, %v420_v23  ;;  %678 = vst [vmem:[#allocation2 + $0x5c] sm:$0x1] %v677_v24  ;;  %v1207_v30 = vsel %vm14338_vm13, %v1202_v2, %v14378_v34  ;;  %v1232_v58 = vshrl.u32 %v1057_v12, 16  ;;  %v14433_v16 = vrot.slane %v423_v59, 7  ;;  %v14440_v44 = vpack.c.bf16 %v188_v18, %v188_v18 }
  0x53   : > { %v11729_v14 = vcombine.low %v1207_v30, %v1217_v25  ;;  %1009 = vst [vmem:[#allocation2 + $0x44] sm:$0x1] %v1008_v32  ;;  %v1221_v36 = vrot.slane %v1219_v27, 4  ;;  %v1224_v37 = vrot.slane %v1222_v28, 5  ;;  %v14436_v11 = vrot.slane %v1228_v4, 5 }
  0x54   : > { %v1234_v43 = vrot.slane %v1232_v58, 4  ;;  %v763_v40 = vld [vmem:[#allocation2 + $0x48] sm:$0x2]  ;;  %v865_v34 = vld [vmem:[#allocation2 + $0x48] sm:$0x1]  ;;  %v426_v42 = vshll.u32 %v14314_v19, 16  ;;  %v14442_v45 = vpack.c.bf16 %v189_v29, %v189_v29  ;;  %v14455_v60 = vpack.c.bf16 %v190_v33, %v190_v33 }
  0x55   : > { %12864 = vmatprep.mubr.msk.bf16.mxu0 %vm1532_vm12, %v11729_v14  ;;  %v1225_v46 = vor.u32 %v1224_v37, %v1221_v36  ;;  %v11694_v47 = vrot.slane %v763_v40, 9  ;;  %v429_v49 = vrot.slane %v14433_v16, 4  ;;  %v431_v50 = vshrl.u32 %v14346_v7, 16  ;;  %v683_v21 = vld [vmem:[#allocation2 + $0x68] sm:$0x1] }
  0x56   : > { %v1235_v53 = vor.u32 %v1234_v43, %v14436_v11  ;;  %v428_v35 = vor.u32 %v426_v42, %v14433_v16  ;;  %v434_v19 = vshll.u32 %v14346_v7, 16  ;;  %v440_v54 = vshrl.u32 %v14440_v44, 16 }
  0x57   : > { %v1226_v55 = vrot.slane %v1225_v46, 4  ;;  %v866_v56 = vsel %vm14231_vm8, %v11694_v47, %v865_v34  ;;  %v907_v57 = vld [vmem:[#allocation2 + $0x4c] sm:$0x8]  ;;  %v1010_v48 = vld [vmem:[#allocation2 + $0x50] sm:$0x1]  ;;  %v433_v59 = vrot.slane %v431_v50, 7  ;;  %v14459_v7 = vpack.c.bf16 %v191_v39, %v191_v39 }
  0x58   : > { %v1236_v61 = vrot.slane %v1235_v53, 4  ;;  %867 = vst [vmem:[#allocation2 + $0x48] sm:$0x1] %v866_v56  ;;  %v11712_v62 = vrot.slane %v907_v57, 11  ;;  %v1059_v63 = vld [vmem:[#allocation2 + $0x4c] sm:$0xf]  ;;  %v680_v1 = vsel %vm14225_vm7, %v428_v35, %v679_v38  ;;  %v14466_v22 = vpack.c.bf16 %v192_v41, %v192_v41 }
  0x59   : > { %v764_v0 = vld [vmem:[#allocation2 + $0x54] sm:$0x2]  ;;  %v1231_v3 = vsel %vm14338_vm13, %v1226_v55, %v14436_v11  ;;  %v1252_v5 = vshll.u32 %v1059_v63, 16  ;;  %v1256_v6 = vshrl.u32 %v1059_v63, 16  ;;  %v868_v10 = vld [vmem:[#allocation2 + $0x54] sm:$0x1]  ;;  %v436_v2 = vor.u32 %v434_v19, %v433_v59 }
  0x5a   : > { %v11695_v9 = vrot.slane %v764_v0, 9  ;;  %681 = vst [vmem:[#allocation2 + $0x60] sm:$0xf] %v680_v1  ;;  %v1084_v13 = vld [vmem:[#allocation2 + $0x44] sm:$0x1]  ;;  %v1011_v8 = vsel %vm14270_vm9, %v11712_v62, %v1010_v48  ;;  %v14468_v12 = vpack.c.bf16 %v193_v51, %v193_v51  ;;  %v438_v33 = vrot.slane %v433_v59, 4 }
  0x5b   : > { %v908_v15 = vld [vmem:[#allocation2 + $0x58] sm:$0x8]  ;;  %v1013_v18 = vld [vmem:[#allocation2 + $0x5c] sm:$0x1]  ;;  %v1238_v23 = vshll.u32 %v1084_v13, 16  ;;  %v14470_v24 = vrot.slane %v1252_v5, 5  ;;  %v437_v32 = vsel %vm14217_vm6, %v429_v49, %v436_v2 }
  0x5c   : > { %1012 = vst [vmem:[#allocation2 + $0x50] sm:$0x1] %v1011_v8  ;;  %v1258_v25 = vrot.slane %v1256_v6, 4  ;;  %v869_v27 = vsel %vm14231_vm8, %v11695_v9, %v868_v10  ;;  %v14474_v28 = vld [vmem:[#allocation2 + $0x58] sm:$0xf]  ;;  %v11713_v4 = vrot.slane %v908_v15, 11  ;;  %v684_v42 = vsel %vm14231_vm8, %v438_v33, %v683_v21 }
  0x5d   : > { %870 = vst [vmem:[#allocation2 + $0x54] sm:$0x1] %v869_v27  ;;  %v1276_v29 = vshll.u32 %v14474_v28, 16  ;;  %v1280_v30 = vshrl.u32 %v14474_v28, 16  ;;  %v1240_v58 = vrot.slane %v1238_v23, 5  ;;  %v14482_v14 = vrot.slane %v440_v54, 7 }
  0x5e   : > { %v1259_v16 = vor.u32 %v1258_v25, %v14470_v24  ;;  %682 = vst.msk [vmem:[#allocation2 + $0x64] sm:$0xf] %vm624_vm3, %v437_v32  ;;  %v1014_v36 = vsel %vm14270_vm9, %v11713_v4, %v1013_v18  ;;  %v443_v38 = vshll.u32 %v14440_v44, 16  ;;  %v686_v39 = vld [vmem:[#allocation2 + $0x6c] sm:$0xf]  ;;  %v448_v19 = vshrl.u32 %v14442_v45, 16 }
  0x5f   : > { %v14486_v37 = vrot.slane %v1276_v29, 5  ;;  %v1282_v11 = vrot.slane %v1280_v30, 4  ;;  %v1241_v43 = vsel %vm14338_vm13, %v1236_v61, %v1240_v58  ;;  %v14491_v40 = vld [vmem:[#allocation2 + $0x48] sm:$0xf]  ;;  %1015 = vst [vmem:[#allocation2 + $0x5c] sm:$0x1] %v1014_v36 }
  0x60   : > { %v1260_v34 = vrot.slane %v1259_v16, 4  ;;  %v446_v46 = vrot.slane %v14482_v14, 4  ;;  %v11730_v47 = vcombine.low %v1231_v3, %v1241_v43  ;;  %v1243_v49 = vshrl.u32 %v14491_v40, 16  ;;  %685 = vst [vmem:[#allocation2 + $0x68] sm:$0x1] %v684_v42  ;;  %v194_v55 = vld [vmem:[%s14206_s21 + $0xb0] sm:$0xff] }
  0x61   : > { %v1246_v50 = vshll.u32 %v14491_v40, 16  ;;  %v1283_v44 = vor.u32 %v1282_v11, %v14486_v37  ;;  %v765_v41 = vld [vmem:[#allocation2 + $0x60] sm:$0x2]  ;;  %v871_v51 = vld [vmem:[#allocation2 + $0x60] sm:$0x1]  ;;  %v445_v35 = vor.u32 %v443_v38, %v14482_v14  ;;  %v451_v54 = vshll.u32 %v14442_v45, 16 }
  0x62   : > { %v11696_v53 = vrot.slane %v765_v41, 9  ;;  %12865 = vmatmul.mubr.msk.bf16.gmra.mrb[8].mxu0 %vm1532_vm12, %v11730_v47  ;;  %v1245_v57 = vrot.slane %v1243_v49, 4  ;;  %v457_v61 = vshrl.u32 %v14455_v60, 16  ;;  %v450_v1 = vrot.slane %v448_v19, 7  ;;  %v690_v29 = vld [vmem:[#allocation2 + $0x74] sm:$0x1] }
  0x63   : > { %v1085_v56 = vld [vmem:[#allocation2 + $0x50] sm:$0x1]  ;;  %v1248_v48 = vrot.slane %v1246_v50, 5  ;;  %v1284_v59 = vrot.slane %v1283_v44, 4  ;;  %v687_v3 = vsel %vm14225_vm7, %v445_v35, %v686_v39  ;;  %v14515_v13 = vpack.c.bf16 %v194_v55, %v194_v55  ;;  %v693_v44 = vld [vmem:[#allocation2 + $0x78] sm:$0xf] }
  0x64   : > { %v1262_v62 = vshll.u32 %v1085_v56, 16  ;;  %v14505_v63 = vld [vmem:[#allocation2 + $0x54] sm:$0xf]  ;;  %v872_v0 = vsel %vm14231_vm8, %v11696_v53, %v871_v51  ;;  %688 = vst [vmem:[#allocation2 + $0x6c] sm:$0xf] %v687_v3  ;;  %v453_v4 = vor.u32 %v451_v54, %v450_v1  ;;  %v455_v42 = vrot.slane %v450_v1, 4 }
  0x65   : > { %v1249_v45 = vor.u32 %v1248_v48, %v1245_v57  ;;  %v1267_v5 = vshrl.u32 %v14505_v63, 16  ;;  %v1270_v6 = vshll.u32 %v14505_v63, 16  ;;  %873 = vst [vmem:[#allocation2 + $0x60] sm:$0x1] %v872_v0  ;;  %v909_v9 = vld [vmem:[#allocation2 + $0x64] sm:$0x8] }
  0x66   : > { %v14513_v10 = vld [vmem:[#allocation2 + $0x64] sm:$0xf]  ;;  %v1264_v8 = vrot.slane %v1262_v62, 5  ;;  %v11714_v15 = vrot.slane %v909_v9, 11  ;;  %v1086_v23 = vld [vmem:[#allocation2 + $0x5c] sm:$0x1]  ;;  %v454_v38 = vsel %vm14217_vm6, %v446_v46, %v453_v4  ;;  %v691_v53 = vsel %vm14231_vm8, %v455_v42, %v690_v29 }
  0x67   : > { %v1300_v18 = vshll.u32 %v14513_v10, 16  ;;  %v1304_v2 = vshrl.u32 %v14513_v10, 16  ;;  %v1250_v21 = vrot.slane %v1249_v45, 4  ;;  %v1269_v25 = vrot.slane %v1267_v5, 4  ;;  %v1016_v58 = vld [vmem:[#allocation2 + $0x68] sm:$0x1] }
  0x68   : > { %v1272_v27 = vrot.slane %v1270_v6, 5  ;;  %v1265_v30 = vsel %vm14338_vm13, %v1260_v34, %v1264_v8  ;;  %v1286_v32 = vshll.u32 %v1086_v23, 16  ;;  %v1017_v11 = vsel %vm14270_vm9, %v11714_v15, %v1016_v58  ;;  %689 = vst.msk [vmem:[#allocation2 + $0x70] sm:$0xf] %vm624_vm3, %v454_v38  ;;  %v196_v54 = vld [vmem:[%s14206_s21 + $0xc0] sm:$0xff] }
  0x69   : > { %v14521_v16 = vrot.slane %v1300_v18, 5  ;;  %v1306_v33 = vrot.slane %v1304_v2, 4  ;;  %v1255_v14 = vsel %vm14338_vm13, %v1250_v21, %v14470_v24  ;;  %1018 = vst [vmem:[#allocation2 + $0x68] sm:$0x1] %v1017_v11  ;;  %v459_v49 = vrot.slane %v457_v61, 7  ;;  %v197_v61 = vld [vmem:[%s14206_s21 + $0xc8] sm:$0xff] }
  0x6a   : > { %v1273_v36 = vor.u32 %v1272_v27, %v1269_v25  ;;  %v11731_v39 = vcombine.low %v1255_v14, %v1265_v30  ;;  %v1288_v43 = vrot.slane %v1286_v32, 5  ;;  %v460_v24 = vshll.u32 %v14455_v60, 16  ;;  %v195_v60 = vld [vmem:[%s14206_s21 + $0xb8] sm:$0xff]  ;;  %692 = vst [vmem:[#allocation2 + $0x74] sm:$0x1] %v691_v53 }
  0x6b   : > { %v1307_v34 = vor.u32 %v1306_v33, %v14521_v16  ;;  %v465_v50 = vshrl.u32 %v14459_v7, 16  ;;  %v766_v35 = vld [vmem:[#allocation2 + $0x6c] sm:$0x2]  ;;  %v468_v19 = vshll.u32 %v14459_v7, 16  ;;  %v463_v1 = vrot.slane %v459_v49, 4 }
  0x6c   : > { %v1274_v47 = vrot.slane %v1273_v36, 4  ;;  %12868 = vmatprep.mubr.msk.bf16.mxu0 %vm1532_vm12, %v11731_v39  ;;  %v1289_v46 = vsel %vm14338_vm13, %v1284_v59, %v1288_v43  ;;  %v14537_v41 = vld [vmem:[#allocation2 + $0x60] sm:$0xf]  ;;  %v11697_v48 = vrot.slane %v766_v35, 9  ;;  %v874_v59 = vld [vmem:[#allocation2 + $0x6c] sm:$0x1]  ;;  %v462_v0 = vor.u32 %v460_v24, %v459_v49 }
  0x6d   : > { %v14539_v51 = vrot.slane %v1307_v34, 4  ;;  %v1291_v56 = vshrl.u32 %v14537_v41, 16  ;;  %v1294_v57 = vshll.u32 %v14537_v41, 16  ;;  %v467_v3 = vrot.slane %v465_v50, 7  ;;  %v697_v15 = vld [vmem:[#allocation2 + $0x80] sm:$0x1] }
  0x6e   : > { %v1279_v55 = vsel %vm14338_vm13, %v1274_v47, %v14486_v37  ;;  %v875_v5 = vsel %vm14231_vm8, %v11697_v48, %v874_v59  ;;  %v474_v6 = vshrl.u32 %v14466_v22, 16  ;;  %v694_v8 = vsel %vm14225_vm7, %v462_v0, %v693_v44  ;;  %v700_v38 = vld [vmem:[#allocation2 + $0x84] sm:$0xf]  ;;  %v198_v0 = vld [vmem:[%s14206_s21 + $0xd0] sm:$0xff] }
  0x6f   : > { %v11732_v62 = vcombine.low %v1279_v55, %v1289_v46  ;;  %v1293_v45 = vrot.slane %v1291_v56, 4  ;;  %v1296_v7 = vrot.slane %v1294_v57, 5  ;;  %876 = vst [vmem:[#allocation2 + $0x6c] sm:$0x1] %v875_v5  ;;  %v470_v37 = vor.u32 %v468_v19, %v467_v3  ;;  %v910_v23 = vld [vmem:[#allocation2 + $0x70] sm:$0x8] }
  0x70   : > { %v472_v9 = vrot.slane %v467_v3, 4  ;;  %v477_v18 = vshll.u32 %v14466_v22, 16  ;;  %v14559_v2 = vld [vmem:[#allocation2 + $0x68] sm:$0x1]  ;;  %v14561_v25 = vld [vmem:[#allocation2 + $0x70] sm:$0xf]  ;;  %v14563_v27 = vpack.c.bf16 %v195_v60, %v195_v60  ;;  %v14565_v4 = vpack.c.bf16 %v196_v54, %v196_v54 }
  0x71   : > { %12869 = vmatmul.mubr.msk.bf16.gmra.mrb[12].mxu0 %vm1532_vm12, %v11732_v62  ;;  %v1297_v21 = vor.u32 %v1296_v7, %v1293_v45  ;;  %695 = vst [vmem:[#allocation2 + $0x78] sm:$0xf] %v694_v8  ;;  %v14567_v29 = vpack.c.bf16 %v197_v61, %v197_v61  ;;  %v1310_v30 = vshll.u32 %v14559_v2, 16  ;;  %v11715_v32 = vrot.slane %v910_v23, 11  ;;  %v1019_v43 = vld [vmem:[#allocation2 + $0x74] sm:$0x1] }
  0x72   : > { %v1324_v58 = vshll.u32 %v14561_v25, 16  ;;  %v1328_v22 = vshrl.u32 %v14561_v25, 16  ;;  %v471_v14 = vsel %vm14217_vm6, %v463_v1, %v470_v37  ;;  %v698_v36 = vsel %vm14231_vm8, %v472_v9, %v697_v15  ;;  %v704_v60 = vld [vmem:[#allocation2 + $0x8c] sm:$0x1] }
  0x73   : > { %v1298_v33 = vrot.slane %v1297_v21, 4  ;;  %v476_v11 = vrot.slane %v474_v6, 7  ;;  %v1312_v39 = vrot.slane %v1310_v30, 5  ;;  %696 = vst.msk [vmem:[#allocation2 + $0x7c] sm:$0xf] %vm624_vm3, %v471_v14  ;;  %v482_v47 = vshrl.u32 %v14468_v12, 16 }
  0x74   : > { %v14576_v34 = vrot.slane %v1324_v58, 5  ;;  %v1330_v42 = vrot.slane %v1328_v22, 4  ;;  %699 = vst [vmem:[#allocation2 + $0x80] sm:$0x1] %v698_v36  ;;  %v1020_v24 = vsel %vm14270_vm9, %v11715_v32, %v1019_v43  ;;  %v485_v19 = vshll.u32 %v14468_v12, 16  ;;  %v199_v14 = vld [vmem:[%s14206_s21 + $0xd8] sm:$0xff] }
  0x75   : > { %v1303_v49 = vsel %vm14338_vm13, %v1298_v33, %v14521_v16  ;;  %v479_v50 = vor.u32 %v477_v18, %v476_v11  ;;  %v480_v44 = vrot.slane %v476_v11, 4  ;;  %v1313_v46 = vsel %vm14338_vm13, %v14539_v51, %v1312_v39  ;;  %1021 = vst [vmem:[#allocation2 + $0x74] sm:$0x1] %v1020_v24  ;;  %v707_v12 = vld [vmem:[#allocation2 + $0x90] sm:$0xf] }
  0x76   : > { %v1331_v53 = vor.u32 %v1330_v42, %v14576_v34  ;;  %v484_v35 = vrot.slane %v482_v47, 7  ;;  %v11733_v54 = vcombine.low %v1303_v49, %v1313_v46  ;;  %v14590_v55 = vld [vmem:[#allocation2 + $0x6c] sm:$0xf]  ;;  %v491_v56 = vshrl.u32 %v14515_v13, 16 }
  0x77   : > { %v701_v16 = vsel %vm14225_vm7, %v479_v50, %v700_v38  ;;  %v494_v57 = vshll.u32 %v14515_v13, 16  ;;  %v1315_v51 = vshrl.u32 %v14590_v55, 16  ;;  %v1318_v48 = vshll.u32 %v14590_v55, 16  ;;  %v711_v50 = vld [vmem:[#allocation2 + $0x98] sm:$0x1] }
  0x78   : > { %v14598_v59 = vrot.slane %v1331_v53, 4  ;;  %v767_v61 = vld [vmem:[#allocation2 + $0x78] sm:$0x2]  ;;  %v487_v62 = vor.u32 %v485_v19, %v484_v35  ;;  %702 = vst [vmem:[#allocation2 + $0x84] sm:$0xf] %v701_v16  ;;  %12872 = vmatprep.mubr.msk.bf16.mxu0 %vm1532_vm12, %v11733_v54  ;;  %v489_v45 = vrot.slane %v484_v35, 4  ;;  %v14613_v32 = vpack.c.bf16 %v198_v0, %v198_v0 }
  0x79   : > { %v11698_v1 = vrot.slane %v767_v61, 9  ;;  %v877_v3 = vld [vmem:[#allocation2 + $0x78] sm:$0x1]  ;;  %v493_v7 = vrot.slane %v491_v56, 7  ;;  %v499_v5 = vshrl.u32 %v14563_v27, 16  ;;  %v1317_v13 = vrot.slane %v1315_v51, 4 }
  0x7a   : > { %v1320_v6 = vrot.slane %v1318_v48, 5  ;;  %v488_v37 = vsel %vm14217_vm6, %v480_v44, %v487_v62  ;;  %v502_v9 = vshll.u32 %v14563_v27, 16  ;;  %v911_v15 = vld [vmem:[#allocation2 + $0x7c] sm:$0x8]  ;;  %v705_v23 = vsel %vm14231_vm8, %v489_v45, %v704_v60 }
  0x7b   : > { %v878_v8 = vsel %vm14231_vm8, %v11698_v1, %v877_v3  ;;  %v1022_v18 = vld [vmem:[#allocation2 + $0x80] sm:$0x1]  ;;  %v14608_v21 = vld [vmem:[#allocation2 + $0x7c] sm:$0xf]  ;;  %703 = vst.msk [vmem:[#allocation2 + $0x88] sm:$0xf] %vm624_vm3, %v488_v37  ;;  %v496_v30 = vor.u32 %v494_v57, %v493_v7  ;;  %v14628_v60 = vpack.c.bf16 %v199_v14, %v199_v14 }
  0x7c   : > { %v1321_v58 = vor.u32 %v1320_v6, %v1317_v13  ;;  %879 = vst [vmem:[#allocation2 + $0x78] sm:$0x1] %v878_v8  ;;  %v11716_v22 = vrot.slane %v911_v15, 11  ;;  %v1348_v27 = vshll.u32 %v14608_v21, 16  ;;  %v1352_v33 = vshrl.u32 %v14608_v21, 16 }
  0x7d   : > { %706 = vst [vmem:[#allocation2 + $0x8c] sm:$0x1] %v705_v23  ;;  %v14618_v36 = vld [vmem:[#allocation2 + $0x74] sm:$0x1]  ;;  %v497_v11 = vrot.slane %v493_v7, 4  ;;  %v501_v38 = vrot.slane %v499_v5, 7  ;;  %v708_v39 = vsel %vm14225_vm7, %v496_v30, %v707_v12 }
  0x7e   : > { %v508_v43 = vshrl.u32 %v14565_v4, 16  ;;  %v1322_v42 = vrot.slane %v1321_v58, 4  ;;  %v1334_v47 = vshll.u32 %v14618_v36, 16  ;;  %v1023_v49 = vsel %vm14270_vm9, %v11716_v22, %v1022_v18  ;;  %709 = vst [vmem:[#allocation2 + $0x90] sm:$0xf] %v708_v39 }
  0x7f   : > { %v14626_v24 = vrot.slane %v1348_v27, 5  ;;  %1024 = vst [vmem:[#allocation2 + $0x80] sm:$0x1] %v1023_v49  ;;  %v1354_v44 = vrot.slane %v1352_v33, 4  ;;  %v768_v46 = vld [vmem:[#allocation2 + $0x84] sm:$0x2]  ;;  %v504_v35 = vor.u32 %v502_v9, %v501_v38 }
  0x80   : > { %v880_v53 = vld [vmem:[#allocation2 + $0x84] sm:$0x1]  ;;  %v506_v19 = vrot.slane %v501_v38, 4  ;;  %v1327_v54 = vsel %vm14338_vm13, %v1322_v42, %v14576_v34  ;;  %v1336_v16 = vrot.slane %v1334_v47, 5  ;;  %v11699_v56 = vrot.slane %v768_v46, 9 }
  0x81   : > { %v510_v57 = vrot.slane %v508_v43, 7  ;;  %v714_v51 = vld [vmem:[#allocation2 + $0x9c] sm:$0xf]  ;;  %v1355_v48 = vor.u32 %v1354_v44, %v14626_v24  ;;  %v505_v61 = vsel %vm14217_vm6, %v497_v11, %v504_v35  ;;  %v511_v12 = vshll.u32 %v14565_v4, 16  ;;  %v718_v23 = vld [vmem:[#allocation2 + $0xa4] sm:$0x1] }
  0x82   : > { %v712_v62 = vsel %vm14231_vm8, %v506_v19, %v711_v50  ;;  %v1337_v0 = vsel %vm14338_vm13, %v14598_v59, %v1336_v16  ;;  %v881_v34 = vsel %vm14231_vm8, %v11699_v56, %v880_v53  ;;  %v912_v1 = vld [vmem:[#allocation2 + $0x88] sm:$0x8]  ;;  %710 = vst.msk [vmem:[#allocation2 + $0x94] sm:$0xf] %vm624_vm3, %v505_v61  ;;  %v516_v7 = vshrl.u32 %v14567_v29, 16 }
  0x83   : > { %v14644_v3 = vld [vmem:[#allocation2 + $0x88] sm:$0xf]  ;;  %713 = vst [vmem:[#allocation2 + $0x98] sm:$0x1] %v712_v62  ;;  %v514_v45 = vrot.slane %v510_v57, 4  ;;  %v11734_v5 = vcombine.low %v1327_v54, %v1337_v0  ;;  %v1356_v4 = vrot.slane %v1355_v48, 4  ;;  %v513_v59 = vor.u32 %v511_v12, %v510_v57 }
  0x84   : > { %v14648_v13 = vld [vmem:[#allocation2 + $0x78] sm:$0xf]  ;;  %882 = vst [vmem:[#allocation2 + $0x84] sm:$0x1] %v881_v34  ;;  %v11717_v6 = vrot.slane %v912_v1, 11  ;;  %v1372_v15 = vshll.u32 %v14644_v3, 16 }
  0x85   : > { %v1025_v37 = vld [vmem:[#allocation2 + $0x8c] sm:$0x1]  ;;  %v1339_v9 = vshrl.u32 %v14648_v13, 16  ;;  %v1342_v8 = vshll.u32 %v14648_v13, 16  ;;  %v1376_v18 = vshrl.u32 %v14644_v3, 16  ;;  %12873 = vmatmul.mubr.msk.bf16.gmra.mrb[16].mxu0 %vm1532_vm12, %v11734_v5  ;;  %v518_v27 = vrot.slane %v516_v7, 7 }
  0x86   : > { %v1026_v30 = vsel %vm14270_vm9, %v11717_v6, %v1025_v37  ;;  %v769_v58 = vld [vmem:[#allocation2 + $0x90] sm:$0x2]  ;;  %v883_v22 = vld [vmem:[#allocation2 + $0x90] sm:$0x1]  ;;  %v519_v33 = vshll.u32 %v14567_v29, 16  ;;  %v715_v14 = vsel %vm14225_vm7, %v513_v59, %v714_v51  ;;  %v14662_v43 = vrot.slane %v1372_v15, 5 }
  0x87   : > { %v14660_v11 = vld [vmem:[#allocation2 + $0x80] sm:$0x1]  ;;  %v1341_v38 = vrot.slane %v1339_v9, 4  ;;  %v1344_v39 = vrot.slane %v1342_v8, 5  ;;  %1027 = vst [vmem:[#allocation2 + $0x8c] sm:$0x1] %v1026_v30 }
  0x88   : > { %v1378_v42 = vrot.slane %v1376_v18, 4  ;;  %716 = vst [vmem:[#allocation2 + $0x9c] sm:$0xf] %v715_v14  ;;  %v1358_v47 = vshll.u32 %v14660_v11, 16  ;;  %v11700_v49 = vrot.slane %v769_v58, 9  ;;  %v521_v50 = vor.u32 %v519_v33, %v518_v27  ;;  %v200_v9 = vld [vmem:[%s14206_s21 + $0xe0] sm:$0xff] }
  0x89   : > { %v523_v44 = vrot.slane %v518_v27, 4  ;;  %v1345_v46 = vor.u32 %v1344_v39, %v1341_v38  ;;  %v525_v53 = vshrl.u32 %v14613_v32, 16  ;;  %v528_v35 = vshll.u32 %v14613_v32, 16  ;;  %v913_v16 = vld [vmem:[#allocation2 + $0x94] sm:$0x8] }
  0x8a   : > { %v1379_v29 = vor.u32 %v1378_v42, %v14662_v43  ;;  %v1360_v19 = vrot.slane %v1358_v47, 5  ;;  %v884_v54 = vsel %vm14231_vm8, %v11700_v49, %v883_v22  ;;  %v1028_v56 = vld [vmem:[#allocation2 + $0x98] sm:$0x1]  ;;  %v522_v57 = vsel %vm14217_vm6, %v514_v45, %v521_v50  ;;  %v14681_v45 = vld [vmem:[#allocation2 + $0x94] sm:$0xf] }
  0x8b   : > { %v719_v51 = vsel %vm14231_vm8, %v523_v44, %v718_v23  ;;  %v1346_v48 = vrot.slane %v1345_v46, 4  ;;  %v14674_v61 = vld [vmem:[#allocation2 + $0x84] sm:$0xf]  ;;  %885 = vst [vmem:[#allocation2 + $0x90] sm:$0x1] %v884_v54  ;;  %v11718_v12 = vrot.slane %v913_v16, 11 }
  0x8c   : > { %v1380_v62 = vrot.slane %v1379_v29, 4  ;;  %717 = vst.msk [vmem:[#allocation2 + $0xa0] sm:$0xf] %vm624_vm3, %v522_v57  ;;  %720 = vst [vmem:[#allocation2 + $0xa4] sm:$0x1] %v719_v51  ;;  %v527_v32 = vrot.slane %v525_v53, 7  ;;  %v1361_v0 = vsel %vm14338_vm13, %v1356_v4, %v1360_v19 }
  0x8d   : > { %v1363_v34 = vshrl.u32 %v14674_v61, 16  ;;  %v1366_v1 = vshll.u32 %v14674_v61, 16  ;;  %v533_v7 = vshrl.u32 %v14628_v60, 16  ;;  %v1351_v5 = vsel %vm14338_vm13, %v1346_v48, %v14626_v24  ;;  %v721_v4 = vld [vmem:[#allocation2 + $0xa8] sm:$0xf] }
  0x8e   : > { %v1029_v6 = vsel %vm14270_vm9, %v11718_v12, %v1028_v56  ;;  %v1396_v37 = vshll.u32 %v14681_v45, 16  ;;  %v1400_v59 = vshrl.u32 %v14681_v45, 16  ;;  %v11735_v8 = vcombine.low %v1351_v5, %v1361_v0  ;;  %v14692_v15 = vld [vmem:[#allocation2 + $0x8c] sm:$0x1]  ;;  %v725_v38 = vld [vmem:[#allocation2 + $0xb0] sm:$0x1] }
  0x8f   : > { %v1365_v18 = vrot.slane %v1363_v34, 4  ;;  %v1368_v23 = vrot.slane %v1366_v1, 5  ;;  %1030 = vst [vmem:[#allocation2 + $0x98] sm:$0x1] %v1029_v6  ;;  %v770_v30 = vld [vmem:[#allocation2 + $0x9c] sm:$0x2]  ;;  %v530_v58 = vor.u32 %v528_v35, %v527_v32  ;;  %v12512_v56 = vpack.c.bf16 %v200_v9, %v200_v9 }
  0x90   : > { %v1382_v22 = vshll.u32 %v14692_v15, 16  ;;  %v14695_v24 = vrot.slane %v1396_v37, 5  ;;  %v1402_v27 = vrot.slane %v1400_v59, 4  ;;  %v11701_v33 = vrot.slane %v770_v30, 9  ;;  %v886_v14 = vld [vmem:[#allocation2 + $0x9c] sm:$0x1]  ;;  %12876 = vmatprep.mubr.msk.bf16.mxu0 %vm1532_vm12, %v11735_v8 }
  0x91   : > { %v1369_v39 = vor.u32 %v1368_v23, %v1365_v18  ;;  %v531_v42 = vrot.slane %v527_v32, 4  ;;  %v535_v47 = vrot.slane %v533_v7, 7  ;;  %v536_v49 = vshll.u32 %v14628_v60, 16  ;;  %v201_v32 = vld [vmem:[%s14206_s21 + $0xe8] sm:$0xff] }
  0x92   : > { %v1384_v50 = vrot.slane %v1382_v22, 5  ;;  %v1403_v44 = vor.u32 %v1402_v27, %v14695_v24  ;;  %v887_v46 = vsel %vm14231_vm8, %v11701_v33, %v886_v14  ;;  %v722_v29 = vsel %vm14225_vm7, %v530_v58, %v721_v4  ;;  %v14704_v35 = vld [vmem:[#allocation2 + $0x90] sm:$0xf] }
  0x93   : > { %v1370_v53 = vrot.slane %v1369_v39, 4  ;;  %888 = vst [vmem:[#allocation2 + $0x9c] sm:$0x1] %v887_v46  ;;  %v914_v19 = vld [vmem:[#allocation2 + $0xa0] sm:$0x8]  ;;  %v538_v54 = vor.u32 %v536_v49, %v535_v47  ;;  %v540_v16 = vrot.slane %v535_v47, 4  ;;  %v12513_v18 = vpack.c.bf16 %v201_v32, %v201_v32 }
  0x94   : > { %723 = vst [vmem:[#allocation2 + $0xa8] sm:$0xf] %v722_v29  ;;  %v1385_v60 = vsel %vm14338_vm13, %v1380_v62, %v1384_v50  ;;  %v1387_v57 = vshrl.u32 %v14704_v35, 16  ;;  %v1390_v51 = vshll.u32 %v14704_v35, 16  ;;  %v1404_v48 = vrot.slane %v1403_v44, 4 }
  0x95   : > { %v1031_v12 = vld [vmem:[#allocation2 + $0xa4] sm:$0x1]  ;;  %v1375_v0 = vsel %vm14338_vm13, %v1370_v53, %v14662_v43  ;;  %v11719_v34 = vrot.slane %v914_v19, 11  ;;  %v14714_v1 = vld [vmem:[#allocation2 + $0xa0] sm:$0xf]  ;;  %v539_v7 = vsel %vm14217_vm6, %v531_v42, %v538_v54  ;;  %v726_v62 = vsel %vm14231_vm8, %v540_v16, %v725_v38 }
  0x96   : > { %v11736_v5 = vcombine.low %v1375_v0, %v1385_v60  ;;  %v14720_v6 = vld [vmem:[#allocation2 + $0x98] sm:$0x1]  ;;  %v1389_v37 = vrot.slane %v1387_v57, 4  ;;  %v1392_v59 = vrot.slane %v1390_v51, 5  ;;  %v1420_v4 = vshll.u32 %v14714_v1, 16 }
  0x97   : > { %724 = vst.msk [vmem:[#allocation2 + $0xac] sm:$0xf] %vm624_vm3, %v539_v7  ;;  %727 = vst [vmem:[#allocation2 + $0xb0] sm:$0x1] %v726_v62  ;;  %v1406_v43 = vshll.u32 %v14720_v6, 16  ;;  %v1032_v9 = vsel %vm14270_vm9, %v11719_v34, %v1031_v12  ;;  %v1424_v8 = vshrl.u32 %v14714_v1, 16 }
  0x98   : > { %12877 = vmatmul.mubr.msk.bf16.gmra.mrb[20].mxu0 %vm1532_vm12, %v11736_v5  ;;  %v1393_v23 = vor.u32 %v1392_v59, %v1389_v37  ;;  %1033 = vst [vmem:[#allocation2 + $0xa4] sm:$0x1] %v1032_v9  ;;  %v1422_v30 = vrot.slane %v1420_v4, 5  ;;  %v542_v58 = vshrl.u32 %v12512_v56, 16  ;;  %v545_v22 = vshll.u32 %v12512_v56, 16 }
  0x99   : > { %v1408_v27 = vrot.slane %v1406_v43, 5  ;;  %v1426_v33 = vrot.slane %v1424_v8, 4  ;;  %v550_v14 = vshrl.u32 %v12513_v18, 16  ;;  %v728_v38 = vld [vmem:[#allocation2 + $0xb4] sm:$0xf]  ;;  %v553_v56 = vshll.u32 %v12513_v18, 16 }
  0x9a   : > { %v1394_v39 = vrot.slane %v1393_v23, 4  ;;  %v14729_v42 = vld [vmem:[#allocation2 + $0x9c] sm:$0xf]  ;;  %v544_v49 = vrot.slane %v542_v58, 7  ;;  %vm2087_vm15 = vcmask 1046532  }
  0x9b   : > { %v771_v47 = vld [vmem:[#allocation2 + $0xa8] sm:$0x2]  ;;  %v1409_v50 = vsel %vm14338_vm13, %v1404_v48, %v1408_v27  ;;  %v1411_v44 = vshrl.u32 %v14729_v42, 16  ;;  %v1414_v46 = vshll.u32 %v14729_v42, 16  ;;  %v1427_v29 = vor.u32 %v1426_v33, %v1422_v30  ;;  %v889_v53 = vld [vmem:[#allocation2 + $0xa8] sm:$0x1]  ;;  %vm14878_vm1 = vmor %vm2086_vm14, %vm2087_vm15 }
  0x9c   : > { %v1399_v19 = vsel %vm14338_vm13, %v1394_v39, %v14695_v24  ;;  %v11702_v54 = vrot.slane %v771_v47, 9  ;;  %v14738_v16 = vor.u32 %v545_v22, %v544_v49  ;;  %v548_v32 = vrot.slane %v544_v49, 4  ;;  %v732_v48 = vld [vmem:[#allocation2 + $0xbc] sm:$0x1] }
  0x9d   : > { %v11737_v60 = vcombine.low %v1399_v19, %v1409_v50  ;;  %v1413_v57 = vrot.slane %v1411_v44, 4  ;;  %v1416_v51 = vrot.slane %v1414_v46, 5  ;;  %v14744_v5 = vrot.slane %v550_v14, 7 }
  0x9e   : > { %v915_v12 = vld [vmem:[#allocation2 + $0xac] sm:$0x8]  ;;  %v890_v0 = vsel %vm14231_vm8, %v11702_v54, %v889_v53  ;;  %v1034_v7 = vld [vmem:[#allocation2 + $0xb0] sm:$0x1]  ;;  %v729_v24 = vsel %vm14225_vm7, %v14738_v16, %v728_v38  ;;  %v1428_v4 = vrot.slane %v1427_v29, 4 }
  0x9f   : > { %v11720_v34 = vrot.slane %v915_v12, 11  ;;  %v14742_v62 = vld [vmem:[#allocation2 + $0xac] sm:$0xf]  ;;  %18965 = vst [vmem:[#allocation8_spill] sm:$0xff] %v14744_v5  ;;  %12880 = vmatprep.mubr.msk.bf16.mxu0 %vm1532_vm12, %v11737_v60  ;;  %v14750_v37 = vld [vmem:[#allocation2 + $0xa4] sm:$0x1]  ;;  %v1417_v59 = vor.u32 %v1416_v51, %v1413_v57  ;;  %v555_v23 = vor.u32 %v553_v56, %v14744_v5 }
  0xa0   : > { %891 = vst [vmem:[#allocation2 + $0xa8] sm:$0x1] %v890_v0  ;;  %v1444_v43 = vshll.u32 %v14742_v62, 16  ;;  %v1448_v9 = vshrl.u32 %v14742_v62, 16  ;;  %730 = vst [vmem:[#allocation2 + $0xb4] sm:$0xf] %v729_v24 }
  0xa1   : > { %v1430_v8 = vshll.u32 %v14750_v37, 16  ;;  %v1035_v18 = vsel %vm14270_vm9, %v11720_v34, %v1034_v7  ;;  %v18840_v58 = vrot.slane %v14744_v5, 4  ;;  %v1418_v22 = vrot.slane %v1417_v59, 4  ;;  %v15225_v20 = vld [vmem:[#allocation2 + $0xa4] sm:$0x1] }
  0xa2   : > { %1036 = vst [vmem:[#allocation2 + $0xb0] sm:$0x1] %v1035_v18  ;;  %v1446_v27 = vrot.slane %v1444_v43, 5  ;;  %v1450_v33 = vrot.slane %v1448_v9, 4  ;;  %v556_v38 = vsel %vm14217_vm6, %v548_v32, %v555_v23  ;;  %18972 = vst [vmem:[#allocation13_spill] sm:$0xff] %v15225_v20 }
  0xa3   : > { %v1432_v14 = vrot.slane %v1430_v8, 5  ;;  %v733_v39 = vsel %vm14231_vm8, %v18840_v58, %v732_v48  ;;  %v1423_v47 = vsel %vm14338_vm13, %v1418_v22, %v1422_v30  ;;  %731 = vst.msk [vmem:[#allocation2 + $0xb8] sm:$0xf] %vm624_vm3, %v556_v38  ;;  %753 = vst.msk [vmem:[#allocation2 + $0xd0] sm:$0xf] %vm624_vm3, %v556_v38 }
  0xa4   : > { %734 = vst [vmem:[#allocation2 + $0xbc] sm:$0x1] %v733_v39  ;;  %v1451_v50 = vor.u32 %v1450_v33, %v1446_v27  ;;  %v15195_v58 = vld [vmem:[#allocation2 + $0x94] sm:$0xf] }
  0xa5   : > { %v1433_v49 = vsel %vm14338_vm13, %v1428_v4, %v1432_v14  ;;  %18969 = vst [vmem:[#allocation10_spill] sm:$0xff] %v15195_v58 }
  0xa6   : > { %v11738_v44 = vcombine.low %v1423_v47, %v1433_v49  ;;  %v1452_v60 = vrot.slane %v1451_v50, 4 }
  0xa7   : > { %v14771_v46 = vld [vmem:[#allocation2 + $0xa8] sm:$0xf]  ;;  %v772_v29 = vld [vmem:[#allocation2 + $0xb4] sm:$0x2]  ;;  %v892_v53 = vld [vmem:[#allocation2 + $0xb4] sm:$0x1] }
  0xa8   : > { %12881 = vmatmul.mubr.msk.bf16.gmra.mrb[24].mxu0 %vm1532_vm12, %v11738_v44  ;;  %v1435_v19 = vshrl.u32 %v14771_v46, 16  ;;  %v1438_v30 = vshll.u32 %v14771_v46, 16  ;;  %v11703_v54 = vrot.slane %v772_v29, 9  ;;  %v2892_v5 = vld [vmem:[#allocation2 + $0xa8] sm:$0xf] }
  0xa9   : > { %v14776_v56 = vld [vmem:[#allocation2 + $0xb0] sm:$0x1] }
  0xaa   : > { %v1437_v57 = vrot.slane %v1435_v19, 4  ;;  %v1440_v51 = vrot.slane %v1438_v30, 5  ;;  %v1454_v12 = vshll.u32 %v14776_v56, 16  ;;  %v893_v32 = vsel %vm14231_vm8, %v11703_v54, %v892_v53  ;;  %v916_v48 = vld [vmem:[#allocation2 + $0xb8] sm:$0x8] }
  0xab   : > { %894 = vst [vmem:[#allocation2 + $0xb4] sm:$0x1] %v893_v32  ;;  %v1037_v0 = vld [vmem:[#allocation2 + $0xbc] sm:$0x1]  ;;  %v14781_v34 = vld [vmem:[#allocation2 + $0xb8] sm:$0xf] }
  0xac   : > { %v1441_v7 = vor.u32 %v1440_v51, %v1437_v57  ;;  %v1456_v24 = vrot.slane %v1454_v12, 5  ;;  %v11721_v59 = vrot.slane %v916_v48, 11  ;;  %v1468_v4 = vshll.u32 %v14781_v34, 16  ;;  %v14803_v51 = vld [vmem:[#allocation2 + $0x4] sm:$0xf] }
  0xad   : > { %v1472_v43 = vshrl.u32 %v14781_v34, 16  ;;  %v14089_v12 = vld [vmem:[#allocation2] sm:$0xf] }
  0xae   : > { %v1442_v9 = vrot.slane %v1441_v7, 4  ;;  %v1457_v8 = vsel %vm14338_vm13, %v1452_v60, %v1456_v24  ;;  %v1038_v18 = vsel %vm14270_vm9, %v11721_v59, %v1037_v0  ;;  %v1470_v23 = vrot.slane %v1468_v4, 5  ;;  %v14808_v0 = vld [vmem:[#allocation2 + $0x10] sm:$0xf]  ;;  %v14091_v7 = vld [vmem:[#allocation2 + $0xc] sm:$0xf] }
  0xaf   : > { %1039 = vst [vmem:[#allocation2 + $0xbc] sm:$0x1] %v1038_v18  ;;  %v1474_v22 = vrot.slane %v1472_v43, 4  ;;  %v11757_v32 = vcombine.low %v14089_v12, %v14803_v51  ;;  %v11758_v24 = vcombine.low %v14091_v7, %v14808_v0  ;;  %v14811_v59 = vld [vmem:[#allocation2 + $0x1c] sm:$0xf] }
  0xb0   : > { %v1447_v33 = vsel %vm14338_vm13, %v1442_v9, %v1446_v27  ;;  %v14093_v4 = vld [vmem:[#allocation2 + $0x18] sm:$0xf]  ;;  %v14094_v9 = vld [vmem:[%s18837_s1 + $0x4] sm:$0x3]  ;;  %v14821_v18 = vld [vmem:[%s18837_s1 + $0x6] sm:$0x3] }
  0xb1   : > { %v11739_v14 = vcombine.low %v1447_v33, %v1457_v8  ;;  %v1475_v49 = vor.u32 %v1474_v22, %v1470_v23  ;;  %v11759_v43 = vcombine.low %v14093_v4, %v14811_v59  ;;  %v2300_v8 = vsel %vm1581_vm0, %v14094_v9, 0  ;;  %v14096_v22 = vld [vmem:[#allocation2 + $0x24] sm:$0xf]  ;;  %v2038_v4 = vld [vmem:[#allocation2] sm:$0xe] }
  0xb2   : > { %v14791_v38 = vld [vmem:[#allocation2 + $0xb4] sm:$0xf] }
  0xb3   : > { %12884 = vmatprep.mubr.msk.bf16.mxu0 %vm1532_vm12, %v11739_v14  ;;  %v1459_v39 = vshrl.u32 %v14791_v38, 16  ;;  %v1462_v47 = vshll.u32 %v14791_v38, 16  ;;  %v1476_v19 = vrot.slane %v1475_v49, 4  ;;  %v14830_v14 = vld [vmem:[#allocation2 + $0x34] sm:$0xf] }
  0xb4   : > { %v14099_v49 = vld [vmem:[#allocation2 + $0x3c] sm:$0xf] }
  0xb5   : > { %v1461_v50 = vrot.slane %v1459_v39, 4  ;;  %v1464_v44 = vrot.slane %v1462_v47, 5  ;;  %v14098_v39 = vld [vmem:[#allocation2 + $0x30] sm:$0xf] }
  0xb6   : > { %v14796_v29 = vld [vmem:[#allocation2 + $0xbc] sm:$0x1]  ;;  %v11761_v47 = vcombine.low %v14098_v39, %v14830_v14 }
  0xb7   : > { %v1465_v53 = vor.u32 %v1464_v44, %v1461_v50  ;;  %v1478_v30 = vshll.u32 %v14796_v29, 16  ;;  %v14835_v50 = vld [vmem:[#allocation2 + $0x40] sm:$0xf] }
  0xb8   : > { %v11762_v44 = vcombine.low %v14099_v49, %v14835_v50  ;;  %v11789_v49 = vrot.slane %v2038_v4, 9 }
  0xb9   : > { %v1466_v54 = vrot.slane %v1465_v53, 4  ;;  %v1480_v27 = vrot.slane %v1478_v30, 5  ;;  %v14838_v53 = vld [vmem:[#allocation2 + $0x4c] sm:$0xf]  ;;  %v11764_v30 = vcombine.low %v14505_v63, %v14474_v28  ;;  %v735_v63 = vld [vmem:[#allocation2 + $0xc0] sm:$0xf] }
  0xbb   : > { %v1471_v60 = vsel %vm14338_vm13, %v1466_v54, %v1470_v23  ;;  %v1481_v57 = vsel %vm14338_vm13, %v1476_v19, %v1480_v27  ;;  %v14827_v23 = vld [vmem:[#allocation2 + $0x28] sm:$0xf]  ;;  %v11763_v19 = vcombine.low %v14491_v40, %v14838_v53  ;;  %v11765_v54 = vcombine.low %v14537_v41, %v14513_v10  ;;  %v202_v27 = vld [vmem:[%s14206_s21 + $0xf0] sm:$0xff] }
  0xbc   : > { %v11740_v48 = vcombine.low %v1471_v60, %v1481_v57  ;;  %v11760_v33 = vcombine.low %v14096_v22, %v14827_v23  ;;  %v12514_v60 = vpack.c.bf16 %v202_v27, %v202_v27  ;;  %v11766_v40 = vcombine.low %v14590_v55, %v14561_v25 }
  0xbd   : > { %v11767_v57 = vcombine.low %v14648_v13, %v14608_v21  ;;  %v11768_v41 = vcombine.low %v14674_v61, %v14644_v3  ;;  %v11769_v55 = vcombine.low %v14704_v35, %v14681_v45  ;;  %v203_v13 = vld [vmem:[%s14206_s21 + $0xf8] sm:$0xff]  ;;  %v11770_v61 = vcombine.low %v14729_v42, %v14714_v1 }
  0xbe   : > { %12885 = vmatmul.mubr.msk.bf16.gmra.mrb[28].mxu0 %vm1532_vm12, %v11740_v48  ;;  %v559_v12 = vshrl.u32 %v12514_v60, 16  ;;  %v562_v48 = vshll.u32 %v12514_v60, 16  ;;  %v12515_v7 = vpack.c.bf16 %v203_v13, %v203_v13  ;;  %v18966_v27 = vmov 0 }
  0xbf   : > { %12890 = vmatprep.mubr.msk.bf16.mxu0 %vm1532_vm12, %v11757_v32  ;;  %v18967_v27 = vsel %vm14878_vm1, 4294967295, %v18966_v27 }
  0xc0   : > { %v561_v32 = vrot.slane %v559_v12, 7  ;;  %18968 = vst [vmem:[#allocation9_spill] sm:$0xff] %v18967_v27  ;;  %v2040_v12 = vld [vmem:[#allocation2 + $0x18] sm:$0xe] }
  0xc1   : > { %v11791_v13 = vrot.slane %v2040_v12, 9  ;;  %v2043_v12 = vld [vmem:[#allocation2 + $0x3c] sm:$0xe] }
  0xc2   : > { %v564_v28 = vor.u32 %v562_v48, %v561_v32  ;;  %v565_v35 = vrot.slane %v561_v32, 4  ;;  %v2105_v32 = vrot.slane %v14811_v59, 5  ;;  %v14103_v48 = vld [vmem:[#allocation2 + $0x14] sm:$0x1] }
  0xc4   : > { %v736_v10 = vsel %vm14225_vm7, %v564_v28, %v735_v63  ;;  %v2101_v28 = vrot.slane %v14103_v48, 5  ;;  %v11772_v63 = vcombine.low %v14791_v38, %v14781_v34  ;;  %v2106_v38 = vsel %vm14878_vm1, %v11791_v13, %v2105_v32  ;;  %v2044_v48 = vld [vmem:[#allocation2 + $0x48] sm:$0xe] }
  0xc5   : > { %737 = vst [vmem:[#allocation2 + $0xc0] sm:$0xf] %v736_v10 }
  0xc6   : > { %12891 = vmatmul.mubr.msk.bf16.vlgmr.msra.gmra.mrb[0].mxu0 %vm1532_vm12, %v11758_v24  ;;  %v567_v24 = vshrl.u32 %v12515_v7, 16 }
  0xc7   : > { %12923 = vmatpush3.bf16.msra.mxu0 %v2300_v8  ;;  %12894 = vmatprep.mubr.msk.bf16.mxu0 %vm1532_vm12, %v11759_v43  ;;  %v2091_v43 = vrot.slane %v14803_v51, 5  ;;  %v570_v8 = vshll.u32 %v12515_v7, 16  ;;  %v14102_v51 = vld [vmem:[#allocation2 + $0x8] sm:$0x1]  ;;  %v14104_v7 = vld [vmem:[#allocation2 + $0x20] sm:$0x1] }
  0xc8   : > { %13981 = vmatprep.subr.msk.bf16.mxu0 %vm1581_vm0, %v14821_v18  ;;  %v14867_v9 = vrot.slane %v567_v24, 7  ;;  %v2108_v24 = vrot.slane %v14104_v7, 5  ;;  %v14108_v7 = vld [vmem:[#allocation2 + $0x50] sm:$0x1] }
  0xc9   : > { %v2092_v60 = vsel %vm14878_vm1, %v11789_v49, %v2091_v43 }
  0xcc   : > { %v773_v22 = vld [vmem:[#allocation2 + $0xc0] sm:$0x2] }
  0xcd   : > { %v11704_v39 = vrot.slane %v773_v22, 9  ;;  %v2119_v22 = vrot.slane %v14830_v14, 5 }
  0xce   : > { %12895 = vmatmul.mubr.msk.bf16.gmra.mrb[4].mxu0 %vm1532_vm12, %v11760_v33  ;;  %v572_v33 = vor.u32 %v570_v8, %v14867_v9 }
  0xcf   : > { %12898 = vmatprep.mubr.msk.bf16.mxu0 %vm1532_vm12, %v11761_v47  ;;  %v11771_v47 = vcombine.low %v14771_v46, %v14742_v62  ;;  %v2098_v46 = vrot.slane %v14808_v0, 5  ;;  %v2107_v0 = vrot.slane %v2105_v32, 4  ;;  %v2133_v32 = vrot.slane %v14838_v53, 5 }
  0xd1   : > { %v2109_v8 = vsel %vm14878_vm1, %v2107_v0, %v2108_v24  ;;  %v2135_v0 = vrot.slane %v2133_v32, 4  ;;  %v2136_v24 = vrot.slane %v14108_v7, 5  ;;  %v2049_v7 = vld [vmem:[#allocation2 + $0x84] sm:$0xe] }
  0xd6   : > { %12899 = vmatmul.mubr.msk.bf16.gmra.mrb[8].mxu0 %vm1532_vm12, %v11762_v44  ;;  %v895_v44 = vld [vmem:[#allocation2 + $0xc0] sm:$0x1] }
  0xd7   : > { %12902 = vmatprep.mubr.msk.bf16.mxu0 %vm1532_vm12, %v11763_v19  ;;  %v2093_v19 = vrot.slane %v2091_v43, 4  ;;  %v896_v42 = vsel %vm14231_vm8, %v11704_v39, %v895_v44  ;;  %v2112_v43 = vrot.slane %v14827_v23, 5  ;;  %v11808_v39 = vcombine.low %v2106_v38, %v2109_v8  ;;  %v14105_v44 = vld [vmem:[#allocation2 + $0x2c] sm:$0x1] }
  0xd8   : > { %897 = vst [vmem:[#allocation2 + $0xc0] sm:$0x1] %v896_v42  ;;  %v2137_v8 = vsel %vm14878_vm1, %v2135_v0, %v2136_v24  ;;  %v2050_v24 = vld [vmem:[#allocation2 + $0x90] sm:$0xe] }
  0xd9   : > { %v2114_v49 = vrot.slane %v2112_v43, 4 }
  0xde   : > { %12903 = vmatmul.mubr.msk.bf16.gmra.mrb[12].mxu0 %vm1532_vm12, %v11764_v30  ;;  %v2094_v30 = vrot.slane %v14102_v51, 5  ;;  %v2658_v51 = vsel %vm1581_vm0, %v14821_v18, 0 }
  0xdf   : > { %12906 = vmatprep.mubr.msk.bf16.mxu0 %vm1532_vm12, %v11765_v54  ;;  %v573_v54 = vsel %vm14217_vm6, %v565_v35, %v572_v33  ;;  %v2042_v35 = vld [vmem:[#allocation2 + $0x30] sm:$0xe] }
  0xe0   : > { %738 = vst.msk [vmem:[#allocation2 + $0xc4] sm:$0xf] %vm624_vm3, %v573_v54  ;;  %v11793_v23 = vrot.slane %v2042_v35, 9  ;;  %v14106_v54 = vld [vmem:[#allocation2 + $0x38] sm:$0x1] }
  0xe1   : > { %v2122_v42 = vrot.slane %v14106_v54, 5  ;;  %v2150_v54 = vrot.slane %v14559_v2, 5  ;;  %v2161_v2 = vrot.slane %v14608_v21, 5 }
  0xe6   : > { %12907 = vmatmul.mubr.msk.bf16.gmra.mrb[16].mxu0 %vm1532_vm12, %v11766_v40  ;;  %v2095_v40 = vsel %vm14878_vm1, %v2093_v19, %v2094_v30  ;;  %v2115_v19 = vrot.slane %v14105_v44, 5  ;;  %v2121_v30 = vrot.slane %v2119_v22, 4 }
  0xe7   : > { %12910 = vmatprep.mubr.msk.bf16.mxu0 %vm1532_vm12, %v11767_v57  ;;  %v2039_v57 = vld [vmem:[#allocation2 + $0xc] sm:$0xe]  ;;  %v11806_v10 = vcombine.low %v2092_v60, %v2095_v40  ;;  %v2126_v60 = vrot.slane %v14835_v50, 5  ;;  %v2120_v40 = vsel %vm14878_vm1, %v11793_v23, %v2119_v22  ;;  %v11795_v50 = vrot.slane %v2044_v48, 9  ;;  %v14110_v22 = vld [vmem:[#allocation2 + $0x64] sm:$0xf] }
  0xe8   : > { %v2116_v18 = vsel %vm14878_vm1, %v2114_v49, %v2115_v19  ;;  %v2147_v35 = vrot.slane %v14110_v22, 5  ;;  %v14111_v19 = vld [vmem:[#allocation2 + $0x5c] sm:$0x1] }
  0xe9   : > { %v2134_v38 = vsel %vm14878_vm1, %v11795_v50, %v2133_v32  ;;  %v2168_v50 = vrot.slane %v14644_v3, 5  ;;  %v2178_v3 = vrot.slane %v14720_v6, 5  ;;  %v2189_v6 = vrot.slane %v14742_v62, 5 }
  0xee   : > { %12911 = vmatmul.mubr.msk.bf16.gmra.mrb[20].mxu0 %vm1532_vm12, %v11768_v41  ;;  %v11790_v41 = vrot.slane %v2039_v57, 9  ;;  %v2123_v57 = vsel %vm14878_vm1, %v2121_v30, %v2122_v42  ;;  %v2149_v30 = vrot.slane %v2147_v35, 4 }
  0xef   : > { %12914 = vmatprep.mubr.msk.bf16.mxu0 %vm1532_vm12, %v11769_v55  ;;  %v2100_v55 = vrot.slane %v2098_v46, 4 }
  0xf0   : > { %v2099_v4 = vsel %vm14878_vm1, %v11790_v41, %v2098_v46  ;;  %v14910_v46 = vld [vmem:[%s18837_s1 + $0x8] sm:$0x3]  ;;  %v2128_v41 = vrot.slane %v2126_v60, 4 }
  0xf1   : > { %v2102_v59 = vsel %vm14878_vm1, %v2100_v55, %v2101_v28  ;;  %v14107_v55 = vld [vmem:[#allocation2 + $0x44] sm:$0x1] }
  0xf2   : > { %v11807_v33 = vcombine.low %v2099_v4, %v2102_v59  ;;  %v2129_v13 = vrot.slane %v14107_v55, 5  ;;  %v14109_v59 = vld [vmem:[#allocation2 + $0x58] sm:$0xf]  ;;  %v2163_v55 = vrot.slane %v2161_v2, 4 }
  0xf4   : > { %v2130_v4 = vsel %vm14878_vm1, %v2128_v41, %v2129_v13 }
  0xf6   : > { %12915 = vmatmul.mubr.msk.bf16.gmra.mrb[24].mxu0 %vm1532_vm12, %v11770_v61  ;;  %v2041_v61 = vld [vmem:[#allocation2 + $0x24] sm:$0xe] }
  0xf7   : > { %12918 = vmatprep.mubr.msk.bf16.mxu0 %vm1532_vm12, %v11771_v47  ;;  %v11792_v47 = vrot.slane %v2041_v61, 9  ;;  %v2045_v61 = vld [vmem:[#allocation2 + $0x54] sm:$0xe] }
  0xf8   : > { %v11796_v49 = vrot.slane %v2045_v61, 9 }
  0xf9   : > { %v2113_v14 = vsel %vm14878_vm1, %v11792_v47, %v2112_v43  ;;  %v2140_v43 = vrot.slane %v14109_v59, 5  ;;  %v11812_v47 = vcombine.low %v2134_v38, %v2137_v8  ;;  %v11800_v59 = vrot.slane %v2049_v7, 9  ;;  %v14008_v7 = vld [vmem:[#allocation2 + $0x3c] sm:$0xff]  }
  0xfa   : > { %v11809_v28 = vcombine.low %v2113_v14, %v2116_v18  ;;  %v2154_v18 = vrot.slane %v14561_v25, 5  ;;  %v2164_v25 = vrot.slane %v14660_v11, 5  ;;  %v2175_v11 = vrot.slane %v14681_v45, 5 }
  0xfb   : > { %v2142_v44 = vrot.slane %v2140_v43, 4  ;;  %v2141_v42 = vsel %vm14878_vm1, %v11796_v49, %v2140_v43  ;;  %v2170_v43 = vrot.slane %v2168_v50, 4  ;;  %v2171_v38 = vrot.slane %v14692_v15, 5 }
  0xfc   : > { %v11801_v8 = vrot.slane %v2050_v24, 9  ;;  %v2177_v61 = vrot.slane %v2175_v11, 4  ;;  %v2169_v22 = vsel %vm14878_vm1, %v11800_v59, %v2168_v50  ;;  %v3384_v50 = vsel %vm1581_vm0, %v14910_v46, 0  ;;  %v14011_v24 = vld [vmem:[#allocation2 + $0x60] sm:$0xff]   ;;  %v15021_v59 = vld [vmem:[#allocation2 + $0x10] sm:$0xf] }
  0xfd   : > { %v2172_v45 = vsel %vm14878_vm1, %v2170_v43, %v2171_v38  ;;  %v14013_v43 = vld [vmem:[#allocation2 + $0x78] sm:$0xff]  }
  0xfe   : > { %12919 = vmatmul.mubr.msk.bf16.gmra.mrb[28].mxu0 %vm1532_vm12, %v11772_v63  ;;  %v11810_v63 = vcombine.low %v2120_v40, %v2123_v57  ;;  %v2151_v40 = vsel %vm14878_vm1, %v2149_v30, %v2150_v54  ;;  %v2047_v57 = vld [vmem:[#allocation2 + $0x6c] sm:$0xe]  ;;  %v2179_v15 = vsel %vm14878_vm1, %v2177_v61, %v2178_v3  ;;  %v11817_v49 = vcombine.low %v2169_v22, %v2172_v45  ;;  %v14014_v61 = vld [vmem:[#allocation2 + $0x84] sm:$0xff]   ;;  %v2856_v45 = vld [vmem:[#allocation2 + $0x18] sm:$0xf] }
  0xff   : > { %12924 = vmatprep.mubr.msk.bf16.mxu0 %vm1532_vm12, %v11806_v10  ;;  %v11794_v10 = vrot.slane %v2043_v12, 9  ;;  %v2048_v12 = vld [vmem:[#allocation2 + $0x78] sm:$0xe]  ;;  %v2191_v54 = vrot.slane %v2189_v6, 4  ;;  %v2911_v3 = vshll.u32 %v15021_v59, 16  ;;  %v2915_v22 = vshrl.u32 %v15021_v59, 16 }
 0x100   : > { %v11799_v41 = vrot.slane %v2048_v12, 9  ;;  %v2199_v12 = vrot.slane %v14796_v29, 5  ;;  %v917_v29 = vld [vmem:[#allocation2 + $0xc4] sm:$0x8] }
 0x101   : > { %v2127_v53 = vsel %vm14878_vm1, %v11794_v10, %v2126_v60  ;;  %v2157_v10 = vrot.slane %v14618_v36, 5  ;;  %v2165_v36 = vsel %vm14878_vm1, %v2163_v55, %v2164_v25  ;;  %v14005_v25 = vld [vmem:[#allocation2 + $0x18] sm:$0xff]  }
 0x102   : > { %v2162_v0 = vsel %vm14878_vm1, %v11799_v41, %v2161_v2  ;;  %v14004_v41 = vld [vmem:[#allocation2 + $0xc] sm:$0xff]  }
 0x106   : > { %12925 = vmatmul.mubr.msk.bf16.vlgmr.msra.gmra.mrb[0].mxu0 %vm1532_vm12, %v11807_v33  ;;  %v2046_v33 = vld [vmem:[#allocation2 + $0x60] sm:$0xe] }
 0x107   : > { %12957 = vmatpush3.bf16.msra.mxu0 %v2658_v51  ;;  %12928 = vmatprep.mubr.msk.bf16.mxu0 %vm1532_vm12, %v11808_v39  ;;  %v11811_v39 = vcombine.low %v2127_v53, %v2130_v4  ;;  %v2143_v51 = vrot.slane %v14111_v19, 5  ;;  %v11797_v23 = vrot.slane %v2046_v33, 9  ;;  %v11816_v4 = vcombine.low %v2162_v0, %v2165_v36  ;;  %v15009_v0 = vld [vmem:[%s18837_s1 + $0xa] sm:$0x3]  ;;  %v14007_v36 = vld [vmem:[#allocation2 + $0x30] sm:$0xff]  }
 0x108   : > { %13982 = vmatprep.subr.msk.bf16.mxu0 %vm1581_vm0, %v14910_v46  ;;  %v2176_v33 = vsel %vm14878_vm1, %v11801_v8, %v2175_v11  ;;  %v14009_v46 = vld [vmem:[#allocation2 + $0x48] sm:$0xff]   ;;  %v14010_v11 = vld [vmem:[#allocation2 + $0x54] sm:$0xff]  }
 0x109   : > { %v2144_v14 = vsel %vm14878_vm1, %v2142_v44, %v2143_v51  ;;  %v2148_v60 = vsel %vm14878_vm1, %v11797_v23, %v2147_v35  ;;  %v2182_v35 = vrot.slane %v14714_v1, 5  ;;  %v11818_v44 = vcombine.low %v2176_v33, %v2179_v15 }
 0x10a   : > { %v11813_v32 = vcombine.low %v2141_v42, %v2144_v14  ;;  %v11814_v48 = vcombine.low %v2148_v60, %v2151_v40  ;;  %v2185_v23 = vrot.slane %v14750_v37, 5  ;;  %v2192_v1 = vrot.slane %v14776_v56, 5  ;;  %v2053_v60 = vld [vmem:[#allocation2 + $0xb4] sm:$0xe] }
 0x10b   : > { %v2184_v51 = vrot.slane %v2182_v35, 4  ;;  %v2196_v14 = vrot.slane %v14781_v34, 5 }
 0x10c   : > { %v2193_v37 = vsel %vm14878_vm1, %v2191_v54, %v2192_v1  ;;  %v14015_v54 = vld [vmem:[#allocation2 + $0x90] sm:$0xff]  }
 0x10d   : > { %v2186_v62 = vsel %vm14878_vm1, %v2184_v51, %v2185_v23  ;;  %v2198_v2 = vrot.slane %v2196_v14, 4  ;;  %v2859_v23 = vld [vmem:[#allocation2 + $0x24] sm:$0xf] }
 0x10e   : > { %12929 = vmatmul.mubr.msk.bf16.gmra.mrb[4].mxu0 %vm1532_vm12, %v11809_v28  ;;  %v11798_v28 = vrot.slane %v2047_v57, 9  ;;  %v11804_v57 = vrot.slane %v2053_v60, 9  ;;  %v15039_v60 = vld [vmem:[#allocation2 + $0x20] sm:$0x1] }
 0x10f   : > { %12932 = vmatprep.mubr.msk.bf16.mxu0 %vm1532_vm12, %v11810_v63  ;;  %v2156_v63 = vrot.slane %v2154_v18, 4 }
 0x110   : > { %v2155_v13 = vsel %vm14878_vm1, %v11798_v28, %v2154_v18  ;;  %v2197_v34 = vsel %vm14878_vm1, %v11804_v57, %v2196_v14  ;;  %v2200_v28 = vsel %vm14878_vm1, %v2198_v2, %v2199_v12  ;;  %v14016_v14 = vld [vmem:[#allocation2 + $0x9c] sm:$0xff]   ;;  %v2950_v57 = vshrl.u32 %v2859_v23, 16 }
 0x111   : > { %v2158_v21 = vsel %vm14878_vm1, %v2156_v63, %v2157_v10  ;;  %v11821_v10 = vcombine.low %v2197_v34, %v2200_v28  ;;  %v2953_v2 = vshll.u32 %v2859_v23, 16  ;;  %v2945_v34 = vshll.u32 %v15039_v60, 16  ;;  %v2862_v28 = vld [vmem:[#allocation2 + $0x30] sm:$0xf] }
 0x112   : > { %v11815_v53 = vcombine.low %v2155_v13, %v2158_v21  ;;  %v14006_v21 = vld [vmem:[#allocation2 + $0x24] sm:$0xff]  }
 0x116   : > { %12933 = vmatmul.mubr.msk.bf16.gmra.mrb[8].mxu0 %vm1532_vm12, %v11811_v39  ;;  %v2051_v39 = vld [vmem:[#allocation2 + $0x9c] sm:$0xe] }
 0x117   : > { %12936 = vmatprep.mubr.msk.bf16.mxu0 %vm1532_vm12, %v11812_v47  ;;  %v2052_v47 = vld [vmem:[#allocation2 + $0xa8] sm:$0xe]  ;;  %v11802_v19 = vrot.slane %v2051_v39, 9  ;;  %v2926_v39 = vshrl.u32 %v2856_v45, 16 }
 0x118   : > { %v11803_v30 = vrot.slane %v2052_v47, 9  ;;  %v15029_v47 = vld [vmem:[#allocation2 + $0x14] sm:$0x1] }
 0x119   : > { %v2183_v42 = vsel %vm14878_vm1, %v11802_v19, %v2182_v35  ;;  %v15025_v35 = vld [vmem:[#allocation2 + $0x1c] sm:$0xf]  ;;  %v2921_v1 = vshll.u32 %v15029_v47, 16 }
 0x11a   : > { %v2190_v18 = vsel %vm14878_vm1, %v11803_v30, %v2189_v6  ;;  %v11819_v56 = vcombine.low %v2183_v42, %v2186_v62  ;;  %v2929_v6 = vshll.u32 %v2856_v45, 16  ;;  %v2935_v19 = vshll.u32 %v15025_v35, 16  ;;  %v15035_v30 = vld [vmem:[#allocation2 + $0x28] sm:$0xf] }
 0x11b   : > { %v11820_v40 = vcombine.low %v2190_v18, %v2193_v37  ;;  %v2939_v51 = vshrl.u32 %v15025_v35, 16  ;;  %v2928_v42 = vrot.slane %v2926_v39, 4  ;;  %v2959_v12 = vshll.u32 %v15035_v30, 16  ;;  %v2868_v39 = vld [vmem:[#allocation2 + $0x48] sm:$0xf] }
 0x11c   : > { %v2931_v62 = vrot.slane %v2929_v6, 5 }
 0x11e   : > { %12937 = vmatmul.mubr.msk.bf16.gmra.mrb[12].mxu0 %vm1532_vm12, %v11813_v32  ;;  %v574_v32 = vrot.slane %v14867_v9, 4  ;;  %v11722_v9 = vrot.slane %v917_v29, 11  ;;  %v2923_v29 = vrot.slane %v2921_v1, 5 }
 0x11f   : > { %12940 = vmatprep.mubr.msk.bf16.mxu0 %vm1532_vm12, %v11814_v48  ;;  %v739_v48 = vld [vmem:[#allocation2 + $0xc8] sm:$0x1] }
 0x120   : > { %v740_v63 = vsel %vm14231_vm8, %v574_v32, %v739_v48  ;;  %v2963_v32 = vshrl.u32 %v15035_v30, 16  ;;  %v2932_v48 = vor.u32 %v2931_v62, %v2928_v42 }
 0x121   : > { %741 = vst [vmem:[#allocation2 + $0xc8] sm:$0x1] %v740_v63  ;;  %v15047_v63 = vld [vmem:[#allocation2 + $0x34] sm:$0xf] }
 0x126   : > { %12941 = vmatmul.mubr.msk.bf16.gmra.mrb[16].mxu0 %vm1532_vm12, %v11815_v53  ;;  %v14012_v53 = vld [vmem:[#allocation2 + $0x6c] sm:$0xff]  }
 0x127   : > { %12944 = vmatprep.mubr.msk.bf16.mxu0 %vm1532_vm12, %v11816_v4  ;;  %v2853_v4 = vld [vmem:[#allocation2 + $0xc] sm:$0xf] }
 0x128   : > { %v1040_v55 = vld [vmem:[#allocation2 + $0xc8] sm:$0x1]  ;;  %v2902_v38 = vshrl.u32 %v2853_v4, 16  ;;  %v2905_v8 = vshll.u32 %v2853_v4, 16 }
 0x129   : > { %v1041_v13 = vsel %vm14270_vm9, %v11722_v9, %v1040_v55  ;;  %v2865_v55 = vld [vmem:[#allocation2 + $0x3c] sm:$0xf]  ;;  %v14017_v4 = vld [vmem:[#allocation2 + $0xa8] sm:$0xff]  }
 0x12a   : > { %1042 = vst [vmem:[#allocation2 + $0xc8] sm:$0x1] %v1041_v13  ;;  %v2904_v33 = vrot.slane %v2902_v38, 4  ;;  %v2907_v15 = vrot.slane %v2905_v8, 5  ;;  %v2955_v13 = vrot.slane %v2953_v2, 5  ;;  %v2947_v38 = vrot.slane %v2945_v34, 5 }
 0x12b   : > { %v2998_v8 = vshrl.u32 %v2865_v55, 16  ;;  %v15077_v2 = vld [vmem:[#allocation2 + $0x44] sm:$0x1] }
 0x12c   : > { %v2908_v18 = vor.u32 %v2907_v15, %v2904_v33 }
 0x12d   : > { %v3000_v62 = vrot.slane %v2998_v8, 4 }
 0x12e   : > { %12945 = vmatmul.mubr.msk.bf16.gmra.mrb[20].mxu0 %vm1532_vm12, %v11817_v49  ;;  %v15031_v49 = vrot.slane %v2911_v3, 5  ;;  %v14018_v3 = vld [vmem:[#allocation2 + $0xb4] sm:$0xff]  }
 0x12f   : > { %12948 = vmatprep.mubr.msk.bf16.mxu0 %vm1532_vm12, %v11818_v44  ;;  %v2917_v44 = vrot.slane %v2915_v22, 4 }
 0x131   : > { %v2918_v37 = vor.u32 %v2917_v44, %v15031_v49 }
 0x136   : > { %12949 = vmatmul.mubr.msk.bf16.gmra.mrb[24].mxu0 %vm1532_vm12, %v11819_v56  ;;  %v15041_v56 = vrot.slane %v2935_v19, 5 }
 0x137   : > { %12952 = vmatprep.mubr.msk.bf16.mxu0 %vm1532_vm12, %v11820_v40  ;;  %v2941_v40 = vrot.slane %v2939_v51, 4 }
 0x139   : > { %v2942_v9 = vor.u32 %v2941_v40, %v15041_v56 }
 0x13b   : > { %v2943_v6 = vrot.slane %v2942_v9, 4 }
 0x13e   : > { %12953 = vmatmul.mubr.msk.bf16.gmra.mrb[28].mxu0 %vm1532_vm12, %v11821_v10  ;;  %v2909_v10 = vrot.slane %v2908_v18, 4  ;;  %v3022_v18 = vshrl.u32 %v2868_v39, 16 }
 0x13f   : > { %12958 = vmatprep.mubr.msk.bf16.mxu0 %vm1532_vm12, %v14004_v41  ;;  %v2919_v41 = vrot.slane %v2918_v37, 4  ;;  %v3025_v37 = vshll.u32 %v2868_v39, 16 }
 0x140   : > { %v2914_v22 = vsel %vm14338_vm13, %v2909_v10, %v15031_v49  ;;  %v15071_v49 = vld [vmem:[#allocation2 + $0x38] sm:$0x1] }
 0x141   : > { %v2924_v45 = vsel %vm14338_vm13, %v2919_v41, %v2923_v29  ;;  %v15083_v41 = vld [vmem:[#allocation2 + $0x4c] sm:$0xf]  ;;  %v15087_v29 = vsel %vm1581_vm0, %v15009_v0, 0 }
 0x142   : > { %v11872_v40 = vcombine.low %v2914_v22, %v2924_v45 }
 0x146   : > { %12959 = vmatmul.mubr.msk.bf16.vlgmr.msra.gmra.mrb[0].mxu0 %vm1532_vm12, %v14005_v25  ;;  %v2952_v25 = vrot.slane %v2950_v57, 4 }
 0x147   : > { %12991 = vmatpush3.bf16.msra.mxu0 %v3384_v50  ;;  %12962 = vmatprep.mubr.msk.bf16.mxu0 %vm1532_vm12, %v14006_v21  ;;  %v15051_v21 = vrot.slane %v2959_v12, 5  ;;  %v2965_v50 = vrot.slane %v2963_v32, 4 }
 0x148   : > { %13983 = vmatprep.subr.msk.bf16.mxu0 %vm1581_vm0, %v15009_v0  ;;  %v2956_v44 = vor.u32 %v2955_v13, %v2952_v25  ;;  %v2871_v25 = vld [vmem:[#allocation2 + $0x54] sm:$0xf]  ;;  %v14019_v13 = vld [vmem:[#allocation2 + $0xc0] sm:$0xff]   ;;  %v3031_v0 = vshll.u32 %v15083_v41, 16 }
 0x149   : > { %v2966_v19 = vor.u32 %v2965_v50, %v15051_v21  ;;  %v3046_v22 = vshrl.u32 %v2871_v25, 16  ;;  %v3049_v45 = vshll.u32 %v2871_v25, 16 }
 0x14a   : > { %v2957_v34 = vrot.slane %v2956_v44, 4  ;;  %v2874_v44 = vld [vmem:[#allocation2 + $0x60] sm:$0xf] }
 0x14c   : > { %v2962_v8 = vsel %vm14338_vm13, %v2957_v34, %v15051_v21  ;;  %v15113_v34 = vld [vmem:[#allocation2 + $0x5c] sm:$0x1] }
 0x14e   : > { %12963 = vmatmul.mubr.msk.bf16.gmra.mrb[4].mxu0 %vm1532_vm12, %v14007_v36  ;;  %v15053_v36 = vld [vmem:[#allocation2 + $0x40] sm:$0xf] }
 0x14f   : > { %12966 = vmatprep.mubr.msk.bf16.mxu0 %vm1532_vm12, %v14008_v7  ;;  %v15055_v7 = vld [vmem:[#allocation2 + $0x2c] sm:$0x1]  ;;  %v3007_v33 = vshll.u32 %v15053_v36, 16  ;;  %v3011_v15 = vshrl.u32 %v15053_v36, 16 }
 0x150   : > { %v2969_v51 = vshll.u32 %v15055_v7, 16 }
 0x151   : > { %v15079_v12 = vrot.slane %v3007_v33, 5  ;;  %v3013_v32 = vrot.slane %v3011_v15, 4 }
 0x152   : > { %v2971_v10 = vrot.slane %v2969_v51, 5 }
 0x156   : > { %12967 = vmatmul.mubr.msk.bf16.gmra.mrb[8].mxu0 %vm1532_vm12, %v14009_v46  ;;  %v2974_v46 = vshrl.u32 %v2862_v28, 16 }
 0x157   : > { %12970 = vmatprep.mubr.msk.bf16.mxu0 %vm1532_vm12, %v14010_v11  ;;  %v2977_v11 = vshll.u32 %v2862_v28, 16  ;;  %v2967_v28 = vrot.slane %v2966_v19, 4 }
 0x158   : > { %v2976_v23 = vrot.slane %v2974_v46, 4  ;;  %v3017_v46 = vshll.u32 %v15077_v2, 16 }
 0x15e   : > { %12971 = vmatmul.mubr.msk.bf16.gmra.mrb[12].mxu0 %vm1532_vm12, %v14011_v24  ;;  %v2983_v24 = vshll.u32 %v15047_v63, 16 }
 0x15f   : > { %12974 = vmatprep.mubr.msk.bf16.mxu0 %vm1532_vm12, %v14012_v53  ;;  %v2987_v53 = vshrl.u32 %v15047_v63, 16 }
 0x160   : > { %v15068_v1 = vrot.slane %v2983_v24, 5  ;;  %v3027_v24 = vrot.slane %v3025_v37, 5  ;;  %v3048_v37 = vrot.slane %v3046_v22, 4  ;;  %v2880_v22 = vld [vmem:[#allocation2 + $0x78] sm:$0xf] }
 0x161   : > { %v2989_v42 = vrot.slane %v2987_v53, 4  ;;  %v15092_v53 = vld [vmem:[#allocation2 + $0x58] sm:$0xf] }
 0x162   : > { %v3055_v39 = vshll.u32 %v15092_v53, 16 }
 0x166   : > { %12975 = vmatmul.mubr.msk.bf16.gmra.mrb[16].mxu0 %vm1532_vm12, %v14013_v43  ;;  %v2933_v43 = vrot.slane %v2932_v48, 4  ;;  %v2948_v48 = vsel %vm14338_vm13, %v2943_v6, %v2947_v38  ;;  %v3035_v38 = vshrl.u32 %v15083_v41, 16  ;;  %v3059_v6 = vshrl.u32 %v15092_v53, 16 }
 0x167   : > { %12978 = vmatprep.mubr.msk.bf16.mxu0 %vm1532_vm12, %v14014_v61  ;;  %v3001_v61 = vshll.u32 %v2865_v55, 16  ;;  %v2993_v55 = vshll.u32 %v15071_v49, 16 }
 0x168   : > { %v2938_v57 = vsel %vm14338_vm13, %v2933_v43, %v15041_v56  ;;  %v2990_v56 = vor.u32 %v2989_v42, %v15068_v1  ;;  %v3014_v43 = vor.u32 %v3013_v32, %v15079_v12  ;;  %v3070_v32 = vshrl.u32 %v2874_v44, 16 }
 0x169   : > { %v2995_v15 = vrot.slane %v2993_v55, 5 }
 0x16a   : > { %v2991_v19 = vrot.slane %v2990_v56, 4  ;;  %v3015_v42 = vrot.slane %v3014_v43, 4  ;;  %v2877_v43 = vld [vmem:[#allocation2 + $0x6c] sm:$0xf] }
 0x16c   : > { %v2996_v25 = vsel %vm14338_vm13, %v2991_v19, %v2995_v15  ;;  %v3094_v19 = vshrl.u32 %v2877_v43, 16 }
 0x16e   : > { %12979 = vmatmul.mubr.msk.bf16.gmra.mrb[20].mxu0 %vm1532_vm12, %v14015_v54  ;;  %v2979_v54 = vrot.slane %v2977_v11, 5  ;;  %v3024_v11 = vrot.slane %v3022_v18, 4 }
 0x16f   : > { %12982 = vmatprep.mubr.msk.bf16.mxu0 %vm1532_vm12, %v14016_v14  ;;  %v3003_v14 = vrot.slane %v3001_v61, 5  ;;  %v2972_v61 = vsel %vm14338_vm13, %v2967_v28, %v2971_v10  ;;  %v15115_v28 = vrot.slane %v3055_v39, 5  ;;  %v3061_v10 = vrot.slane %v3059_v6, 4  ;;  %v15140_v39 = vld [vmem:[#allocation2 + $0x7c] sm:$0xf] }
 0x170   : > { %v2980_v9 = vor.u32 %v2979_v54, %v2976_v23  ;;  %v3019_v23 = vrot.slane %v3017_v46, 5  ;;  %v3028_v21 = vor.u32 %v3027_v24, %v3024_v11  ;;  %v15107_v54 = vld [vmem:[#allocation2 + $0x64] sm:$0xf]  ;;  %v15145_v6 = vld [vmem:[%s18837_s1 + $0xc] sm:$0x3] }
 0x171   : > { %v3004_v50 = vor.u32 %v3003_v14, %v3000_v62  ;;  %v15110_v62 = vrot.slane %v3031_v0, 5  ;;  %v3037_v14 = vrot.slane %v3035_v38, 4  ;;  %v3083_v56 = vshrl.u32 %v15107_v54, 16  ;;  %v15134_v0 = vld [vmem:[#allocation2 + $0x70] sm:$0xf] }
 0x172   : > { %v2981_v33 = vrot.slane %v2980_v9, 4  ;;  %v3079_v9 = vshll.u32 %v15107_v54, 16  ;;  %v15129_v46 = vrot.slane %v3028_v21, 4  ;;  %v3065_v38 = vshll.u32 %v15113_v34, 16 }
 0x173   : > { %v3005_v51 = vrot.slane %v3004_v50, 4  ;;  %v3020_v50 = vsel %vm14338_vm13, %v3015_v42, %v3019_v23  ;;  %v3038_v11 = vor.u32 %v3037_v14, %v15110_v62  ;;  %v3085_v15 = vrot.slane %v3083_v56, 4 }
 0x174   : > { %v2986_v55 = vsel %vm14338_vm13, %v2981_v33, %v15068_v1  ;;  %v15138_v33 = vrot.slane %v3079_v9, 5  ;;  %v3103_v23 = vshll.u32 %v15134_v0, 16  ;;  %v3107_v21 = vshrl.u32 %v15134_v0, 16 }
 0x175   : > { %v3039_v14 = vrot.slane %v3038_v11, 4 }
 0x176   : > { %12983 = vmatmul.mubr.msk.bf16.gmra.mrb[24].mxu0 %vm1532_vm12, %v14017_v4  ;;  %v11873_v4 = vcombine.low %v2938_v57, %v2948_v48  ;;  %v3051_v57 = vrot.slane %v3049_v45, 5  ;;  %v3073_v48 = vshll.u32 %v2874_v44, 16  ;;  %v11875_v45 = vcombine.low %v2986_v55, %v2996_v25  ;;  %v15148_v44 = vld [vmem:[#allocation2 + $0x68] sm:$0x1]  ;;  %v15160_v55 = vld [vmem:[#allocation2 + $0x74] sm:$0x1] }
 0x177   : > { %12986 = vmatprep.mubr.msk.bf16.mxu0 %vm1532_vm12, %v14018_v3  ;;  %v15102_v3 = vld [vmem:[#allocation2 + $0x50] sm:$0x1]  ;;  %v3086_v56 = vor.u32 %v3085_v15, %v15138_v33  ;;  %v3096_v25 = vrot.slane %v3094_v19, 4  ;;  %v3109_v11 = vrot.slane %v3107_v21, 4  ;;  %v15175_v15 = vld [vmem:[#allocation2 + $0x88] sm:$0xf] }
 0x178   : > { %v3041_v18 = vshll.u32 %v15102_v3, 16  ;;  %v3052_v1 = vor.u32 %v3051_v57, %v3048_v37  ;;  %v3121_v37 = vshll.u32 %v2880_v22, 16 }
 0x17a   : > { %v15132_v24 = vrot.slane %v3041_v18, 5  ;;  %v3118_v18 = vshrl.u32 %v2880_v22, 16  ;;  %v3053_v57 = vrot.slane %v3052_v1, 4 }
 0x17c   : > { %v3044_v1 = vsel %vm14338_vm13, %v3039_v14, %v15132_v24  ;;  %v3113_v24 = vshll.u32 %v15160_v55, 16  ;;  %v3087_v14 = vrot.slane %v3086_v56, 4 }
 0x17e   : > { %12987 = vmatmul.mubr.msk.bf16.gmra.mrb[28].mxu0 %vm1532_vm12, %v14019_v13  ;;  %v3010_v13 = vsel %vm14338_vm13, %v3005_v51, %v15079_v12  ;;  %v3062_v12 = vor.u32 %v3061_v10, %v15115_v28  ;;  %v3097_v51 = vshll.u32 %v2877_v43, 16  ;;  %v3034_v43 = vsel %vm14338_vm13, %v15129_v46, %v15110_v62 }
 0x17f   : > { %12992 = vmatprep.mubr.msk.bf16.mxu0 %vm1532_vm12, %v11872_v40  ;;  %v11874_v40 = vcombine.low %v2962_v8, %v2972_v61  ;;  %v3072_v8 = vrot.slane %v3070_v32, 4  ;;  %v3075_v61 = vrot.slane %v3073_v48, 5  ;;  %v11876_v42 = vcombine.low %v3010_v13, %v3020_v50 }
 0x180   : > { %v3067_v32 = vrot.slane %v3065_v38, 5  ;;  %v3131_v48 = vshrl.u32 %v15140_v39, 16  ;;  %v3063_v10 = vrot.slane %v3062_v12, 4  ;;  %v3099_v13 = vrot.slane %v3097_v51, 5  ;;  %v15171_v38 = vld [vmem:[#allocation2 + $0x80] sm:$0x1] }
 0x181   : > { %v3076_v9 = vor.u32 %v3075_v61, %v3072_v8  ;;  %v15162_v50 = vrot.slane %v3103_v23, 5  ;;  %v3120_v8 = vrot.slane %v3118_v18, 4  ;;  %v3123_v61 = vrot.slane %v3121_v37, 5 }
 0x182   : > { %v3133_v12 = vrot.slane %v3131_v48, 4  ;;  %v3058_v23 = vsel %vm14338_vm13, %v3053_v57, %v15115_v28  ;;  %v3068_v62 = vsel %vm14338_vm13, %v3063_v10, %v3067_v32  ;;  %v3100_v18 = vor.u32 %v3099_v13, %v3096_v25 }
 0x183   : > { %v3077_v21 = vrot.slane %v3076_v9, 4  ;;  %v3110_v37 = vor.u32 %v3109_v11, %v15162_v50  ;;  %v3151_v48 = vshll.u32 %v15175_v15, 16  ;;  %v3155_v28 = vshrl.u32 %v15175_v15, 16 }
 0x184   : > { %v3124_v57 = vor.u32 %v3123_v61, %v3120_v8  ;;  %v11878_v9 = vcombine.low %v3058_v23, %v3068_v62  ;;  %v3115_v56 = vrot.slane %v3113_v24, 5  ;;  %v3101_v13 = vrot.slane %v3100_v18, 4  ;;  %v2889_v8 = vld [vmem:[#allocation2 + $0x9c] sm:$0xf]  ;;  %v15201_v24 = vld [vmem:[#allocation2 + $0x8c] sm:$0x1] }
 0x185   : > { %v3082_v25 = vsel %vm14338_vm13, %v3077_v21, %v15138_v33  ;;  %v3111_v11 = vrot.slane %v3110_v37, 4  ;;  %v15197_v61 = vrot.slane %v3151_v48, 5  ;;  %v3179_v21 = vshrl.u32 %v15195_v58, 16 }
 0x186   : > { %12993 = vmatmul.mubr.msk.bf16.vlgmr.msra.gmra.mrb[0].mxu0 %vm1532_vm12, %v11873_v4  ;;  %v3127_v4 = vshll.u32 %v15140_v39, 16  ;;  %v3193_v18 = vshll.u32 %v2889_v8, 16  ;;  %v3106_v37 = vsel %vm14338_vm13, %v3101_v13, %v15162_v50 }
 0x187   : > { %13025 = vmatpush3.bf16.msra.mxu0 %v15087_v29  ;;  %12996 = vmatprep.mubr.msk.bf16.mxu0 %vm1532_vm12, %v11874_v40  ;;  %v3089_v29 = vshll.u32 %v15148_v44, 16  ;;  %v2883_v40 = vld [vmem:[#allocation2 + $0x84] sm:$0xf]  ;;  %v3116_v48 = vsel %vm14338_vm13, %v3111_v11, %v3115_v56  ;;  %v15221_v56 = vld [vmem:[#allocation2 + $0x98] sm:$0x1]  ;;  %v3181_v11 = vrot.slane %v3179_v21, 4 }
 0x188   : > { %13984 = vmatprep.subr.msk.bf16.mxu0 %vm1581_vm0, %v15145_v6  ;;  %v15173_v22 = vrot.slane %v3127_v4, 5  ;;  %v3142_v19 = vshrl.u32 %v2883_v40, 16  ;;  %v3145_v51 = vshll.u32 %v2883_v40, 16  ;;  %v3137_v4 = vshll.u32 %v15171_v38, 16  ;;  %v2886_v40 = vld [vmem:[#allocation2 + $0x90] sm:$0xf] }
 0x189   : > { %v3091_v46 = vrot.slane %v3089_v29, 5  ;;  %18971 = vst [vmem:[#allocation12_spill] sm:$0xff] %v15221_v56  ;;  %v11880_v17 = vcombine.low %v3106_v37, %v3116_v48  ;;  %v3217_v48 = vshll.u32 %v2892_v5, 16 }
 0x18a   : > { %v3134_v32 = vor.u32 %v3133_v12, %v15173_v22  ;;  %v3144_v10 = vrot.slane %v3142_v19, 4  ;;  %v3147_v29 = vrot.slane %v3145_v51, 5  ;;  %v3157_v12 = vrot.slane %v3155_v28, 4 }
 0x18b   : > { %v3166_v19 = vshrl.u32 %v2886_v40, 16  ;;  %v3169_v51 = vshll.u32 %v2886_v40, 16  ;;  %v3139_v62 = vrot.slane %v3137_v4, 5 }
 0x18c   : > { %v3135_v23 = vrot.slane %v3134_v32, 4  ;;  %v3148_v33 = vor.u32 %v3147_v29, %v3144_v10  ;;  %v3161_v32 = vshll.u32 %v15201_v24, 16 }
 0x18d   : > { %v3168_v10 = vrot.slane %v3166_v19, 4  ;;  %v3171_v29 = vrot.slane %v3169_v51, 5 }
 0x18e   : > { %12997 = vmatmul.mubr.msk.bf16.gmra.mrb[4].mxu0 %vm1532_vm12, %v11875_v45  ;;  %v11877_v45 = vcombine.low %v3034_v43, %v3044_v1  ;;  %v15199_v43 = vld [vmem:[#allocation2 + $0xa0] sm:$0xf]  ;;  %v3125_v1 = vrot.slane %v3124_v57, 4  ;;  %v3158_v57 = vor.u32 %v3157_v12, %v15197_v61  ;;  %v3140_v50 = vsel %vm14338_vm13, %v3135_v23, %v3139_v62  ;;  %v15230_v62 = vld [vmem:[#allocation2 + $0xac] sm:$0xf] }
 0x18f   : > { %13000 = vmatprep.mubr.msk.bf16.mxu0 %vm1532_vm12, %v11876_v42  ;;  %v3092_v42 = vsel %vm14338_vm13, %v3087_v14, %v3091_v46  ;;  %18970 = vst [vmem:[#allocation11_spill] sm:$0xff] %v15199_v43  ;;  %v3175_v46 = vshll.u32 %v15195_v58, 16  ;;  %v3190_v14 = vshrl.u32 %v2889_v8, 16  ;;  %v3199_v4 = vshll.u32 %v15199_v43, 16  ;;  %18973 = vst [vmem:[#allocation14_spill] sm:$0xff] %v15230_v62 }
 0x190   : > { %v3203_v28 = vshrl.u32 %v15199_v43, 16  ;;  %v3130_v40 = vsel %vm14338_vm13, %v3125_v1, %v15173_v22  ;;  %v3195_v8 = vrot.slane %v3193_v18, 5  ;;  %v11879_v12 = vcombine.low %v3082_v25, %v3092_v42  ;;  %v15234_v18 = vld [vmem:[#allocation2 + $0xb8] sm:$0xf]  ;;  %v15250_v58 = vld [vmem:[#allocation2 + $0xc4] sm:$0xf] }
 0x191   : > { %v15223_v13 = vrot.slane %v3175_v46, 5  ;;  %v15227_v19 = vrot.slane %v3199_v4, 5  ;;  %v3159_v22 = vrot.slane %v3158_v57, 4  ;;  %v3163_v1 = vrot.slane %v3161_v32, 5 }
 0x192   : > { %v3205_v51 = vrot.slane %v3203_v28, 4  ;;  %v3172_v43 = vor.u32 %v3171_v29, %v3168_v10  ;;  %v3185_v23 = vshll.u32 %v15221_v56, 16  ;;  %v3209_v25 = vshll.u32 %v15225_v20, 16 }
 0x193   : > { %v3182_v46 = vor.u32 %v3181_v11, %v15223_v13  ;;  %v3214_v42 = vshrl.u32 %v2892_v5, 16  ;;  %v3223_v4 = vshll.u32 %v15230_v62, 16  ;;  %v3227_v28 = vshrl.u32 %v15230_v62, 16  ;;  %v15248_v62 = vld [vmem:[#allocation2 + $0xb0] sm:$0x1] }
 0x194   : > { %v3206_v37 = vor.u32 %v3205_v51, %v15227_v19  ;;  %v3164_v32 = vsel %vm14338_vm13, %v3159_v22, %v3163_v1  ;;  %v3173_v10 = vrot.slane %v3172_v43, 4  ;;  %v3187_v29 = vrot.slane %v3185_v23, 5  ;;  %v2898_v22 = vld [vmem:[#allocation2 + $0xc0] sm:$0xf] }
 0x195   : > { %v3247_v11 = vshll.u32 %v15234_v18, 16  ;;  %v3251_v5 = vshrl.u32 %v15234_v18, 16  ;;  %v3216_v51 = vrot.slane %v3214_v42, 4  ;;  %v3219_v20 = vrot.slane %v3217_v48, 5  ;;  %v15258_v42 = vld [vmem:[#allocation2 + $0xbc] sm:$0x1] }
 0x196   : > { %13001 = vmatmul.mubr.msk.bf16.gmra.mrb[8].mxu0 %vm1532_vm12, %v11877_v45  ;;  %v3149_v45 = vrot.slane %v3148_v33, 4  ;;  %v11881_v33 = vcombine.low %v3130_v40, %v3140_v50 }
 0x197   : > { %13004 = vmatprep.mubr.msk.bf16.mxu0 %vm1532_vm12, %v11878_v9  ;;  %v3192_v9 = vrot.slane %v3190_v14, 4  ;;  %v2895_v14 = vld [vmem:[#allocation2 + $0xb4] sm:$0xf]  ;;  %v3249_v23 = vrot.slane %v3247_v11, 5 }
 0x198   : > { %v3154_v57 = vsel %vm14338_vm13, %v3149_v45, %v15197_v61  ;;  %v3238_v40 = vshrl.u32 %v2895_v14, 16  ;;  %v3241_v50 = vshll.u32 %v2895_v14, 16  ;;  %v3225_v61 = vrot.slane %v3223_v4, 5 }
 0x199   : > { %v3196_v21 = vor.u32 %v3195_v8, %v3192_v9  ;;  %v3183_v9 = vrot.slane %v3182_v46, 4  ;;  %v3229_v45 = vrot.slane %v3227_v28, 4  ;;  %v11882_v56 = vcombine.low %v3154_v57, %v3164_v32 }
 0x19a   : > { %v3240_v43 = vrot.slane %v3238_v40, 4  ;;  %v3243_v1 = vrot.slane %v3241_v50, 5  ;;  %v3253_v14 = vrot.slane %v3251_v5, 4  ;;  %v3178_v46 = vsel %vm14338_vm13, %v3173_v10, %v15223_v13  ;;  %v750_v50 = vld [vmem:[#allocation2 + $0xcc] sm:$0xf] }
 0x19b   : > { %v3197_v8 = vrot.slane %v3196_v21, 4  ;;  %v3188_v21 = vsel %vm14338_vm13, %v3183_v9, %v3187_v29  ;;  %v3220_v4 = vor.u32 %v3219_v20, %v3216_v51  ;;  %v3230_v28 = vor.u32 %v3229_v45, %v3225_v61 }
 0x19c   : > { %v3262_v13 = vshrl.u32 %v2898_v22, 16  ;;  %v3265_v57 = vshll.u32 %v2898_v22, 16  ;;  %v3271_v32 = vshll.u32 %v15250_v58, 16  ;;  %v3275_v10 = vshrl.u32 %v15250_v58, 16 }
 0x19d   : > { %v3244_v29 = vor.u32 %v3243_v1, %v3240_v43  ;;  %v3254_v40 = vor.u32 %v3253_v14, %v3249_v23  ;;  %v11883_v11 = vcombine.low %v3178_v46, %v3188_v21  ;;  %v3221_v5 = vrot.slane %v3220_v4, 4  ;;  %v15273_v1 = vld [vmem:[#allocation2 + $0xc8] sm:$0x1] }
 0x19e   : > { %13005 = vmatmul.mubr.msk.bf16.gmra.mrb[12].mxu0 %vm1532_vm12, %v11879_v12  ;;  %v3211_v12 = vrot.slane %v3209_v25, 5  ;;  %v3233_v25 = vshll.u32 %v15248_v62, 16  ;;  %v3231_v9 = vrot.slane %v3230_v28, 4  ;;  %v3273_v51 = vrot.slane %v3271_v32, 5  ;;  %v3579_v28 = vld [vmem:[#allocation2 + $0xc] sm:$0xe] }
 0x19f   : > { %13008 = vmatprep.mubr.msk.bf16.mxu0 %vm1532_vm12, %v11880_v17  ;;  %v3207_v17 = vrot.slane %v3206_v37, 4  ;;  %v3202_v37 = vsel %vm14338_vm13, %v3197_v8, %v15227_v19  ;;  %v751_v19 = vsel %vm14225_vm7, %v14738_v16, %v750_v50  ;;  %v3264_v8 = vrot.slane %v3262_v13, 4 }
 0x1a0   : > { %752 = vst [vmem:[#allocation2 + $0xcc] sm:$0xf] %v751_v19  ;;  %v3245_v45 = vrot.slane %v3244_v29, 4  ;;  %v3255_v22 = vrot.slane %v3254_v40, 4  ;;  %v3226_v14 = vsel %vm14338_vm13, %v3221_v5, %v3225_v61  ;;  %v3645_v4 = vrot.slane %v15021_v59, 5 }
 0x1a1   : > { %v3212_v48 = vsel %vm14338_vm13, %v3207_v17, %v3211_v12  ;;  %v3267_v12 = vrot.slane %v3265_v57, 5  ;;  %v3277_v17 = vrot.slane %v3275_v10, 4  ;;  %v11904_v50 = vrot.slane %v3579_v28, 9 }
 0x1a2   : > { %v11884_v20 = vcombine.low %v3202_v37, %v3212_v48  ;;  %v3250_v37 = vsel %vm14338_vm13, %v3245_v45, %v3249_v23  ;;  %v3648_v19 = vrot.slane %v15029_v47, 5  ;;  %v3652_v5 = vrot.slane %v15025_v35, 5 }
 0x1a3   : > { %v3268_v46 = vor.u32 %v3267_v12, %v3264_v8  ;;  %v3278_v21 = vor.u32 %v3277_v17, %v3273_v51  ;;  %v3659_v8 = vrot.slane %v15035_v30, 5  ;;  %v3581_v12 = vld [vmem:[#allocation2 + $0x24] sm:$0xe]  ;;  %v3662_v35 = vrot.slane %v15055_v7, 5 }
 0x1a4   : > { %v3673_v7 = vrot.slane %v15053_v36, 5 }
 0x1a5   : > { %v3269_v10 = vrot.slane %v3268_v46, 4  ;;  %v3279_v29 = vrot.slane %v3278_v21, 4  ;;  %v3666_v21 = vrot.slane %v15047_v63, 5 }
 0x1a6   : > { %13009 = vmatmul.mubr.msk.bf16.gmra.mrb[16].mxu0 %vm1532_vm12, %v11881_v33  ;;  %v3257_v33 = vshll.u32 %v15258_v42, 16 }
 0x1a7   : > { %13012 = vmatprep.mubr.msk.bf16.mxu0 %vm1532_vm12, %v11882_v56  ;;  %v3235_v56 = vrot.slane %v3233_v25, 5  ;;  %v3281_v25 = vshll.u32 %v15273_v1, 16  ;;  %v774_v13 = vld [vmem:[#allocation2 + $0xcc] sm:$0x2]  ;;  %v3274_v59 = vsel %vm14338_vm13, %v3269_v10, %v3273_v51  ;;  %v3655_v51 = vrot.slane %v15039_v60, 5 }
 0x1a8   : > { %v3259_v43 = vrot.slane %v3257_v33, 5  ;;  %v11705_v57 = vrot.slane %v774_v13, 9  ;;  %v898_v33 = vld [vmem:[#allocation2 + $0xcc] sm:$0x1]  ;;  %v3675_v10 = vrot.slane %v3673_v7, 4 }
 0x1a9   : > { %v3236_v16 = vsel %vm14338_vm13, %v3231_v9, %v3235_v56  ;;  %v3283_v40 = vrot.slane %v3281_v25, 5  ;;  %v3646_v9 = vsel %vm14878_vm1, %v11904_v50, %v3645_v4  ;;  %v3580_v56 = vld [vmem:[#allocation2 + $0x18] sm:$0xe]  ;;  %v3584_v50 = vld [vmem:[#allocation2 + $0x48] sm:$0xe] }
 0x1aa   : > { %v3260_v48 = vsel %vm14338_vm13, %v3255_v22, %v3259_v43  ;;  %v11885_v61 = vcombine.low %v3226_v14, %v3236_v16  ;;  %v899_v23 = vsel %vm14231_vm8, %v11705_v57, %v898_v33  ;;  %v11905_v22 = vrot.slane %v3580_v56, 9 }
 0x1ab   : > { %v11886_v32 = vcombine.low %v3250_v37, %v3260_v48  ;;  %900 = vst [vmem:[#allocation2 + $0xcc] sm:$0x1] %v899_v23  ;;  %v3654_v43 = vrot.slane %v3652_v5, 4  ;;  %v11906_v14 = vrot.slane %v3581_v12, 9  ;;  %v3661_v16 = vrot.slane %v3659_v8, 4 }
 0x1ac   : > { %v3653_v46 = vsel %vm14878_vm1, %v11905_v22, %v3652_v5  ;;  %v3582_v37 = vld [vmem:[#allocation2 + $0x30] sm:$0xe]  ;;  %v3583_v48 = vld [vmem:[#allocation2 + $0x3c] sm:$0xe]  ;;  %v3669_v57 = vrot.slane %v15071_v49, 5  ;;  %v3690_v56 = vrot.slane %v15113_v34, 5 }
 0x1ad   : > { %v3656_v30 = vsel %vm14878_vm1, %v3654_v43, %v3655_v51  ;;  %v3660_v25 = vsel %vm14878_vm1, %v11906_v14, %v3659_v8  ;;  %v3663_v60 = vsel %vm14878_vm1, %v3661_v16, %v3662_v35  ;;  %v11907_v13 = vrot.slane %v3582_v37, 9  ;;  %v3587_v22 = vld [vmem:[#allocation2 + $0x6c] sm:$0xe]  ;;  %v3588_v37 = vld [vmem:[#allocation2 + $0x78] sm:$0xe] }
 0x1ae   : > { %13013 = vmatmul.mubr.msk.bf16.gmra.mrb[20].mxu0 %vm1532_vm12, %v11883_v11  ;;  %v3647_v11 = vrot.slane %v3645_v4, 4  ;;  %v11922_v4 = vcombine.low %v3653_v46, %v3656_v30  ;;  %v11923_v28 = vcombine.low %v3660_v25, %v3663_v60  ;;  %v11908_v63 = vrot.slane %v3583_v48, 9 }
 0x1af   : > { %13016 = vmatprep.mubr.msk.bf16.mxu0 %vm1532_vm12, %v11884_v20  ;;  %v3284_v20 = vsel %vm14338_vm13, %v3279_v29, %v3283_v40  ;;  %v3676_v29 = vrot.slane %v15077_v2, 5  ;;  %v15323_v40 = vld [vmem:[%s18837_s1 + $0xe] sm:$0x3]  ;;  %v3667_v36 = vsel %vm14878_vm1, %v11907_v13, %v3666_v21  ;;  %v3694_v12 = vrot.slane %v15107_v54, 5 }
 0x1b0   : > { %v3649_v47 = vsel %vm14878_vm1, %v3647_v11, %v3648_v19  ;;  %v11887_v17 = vcombine.low %v3274_v59, %v3284_v20  ;;  %v3674_v2 = vsel %vm14878_vm1, %v11908_v63, %v3673_v7  ;;  %v3687_v11 = vrot.slane %v15092_v53, 5  ;;  %v3585_v19 = vld [vmem:[#allocation2 + $0x54] sm:$0xe]  ;;  %v3589_v7 = vld [vmem:[#allocation2 + $0x84] sm:$0xe] }
 0x1b1   : > { %v11921_v45 = vcombine.low %v3646_v9, %v3649_v47  ;;  %v3677_v33 = vsel %vm14878_vm1, %v3675_v10, %v3676_v29  ;;  %v11909_v20 = vrot.slane %v3584_v50, 9  ;;  %v3683_v9 = vrot.slane %v15102_v3, 5  ;;  %v18974_v10 = vld [vmem:[#allocation10_spill] sm:$0xff] }
 0x1b2   : > { %v11925_v59 = vcombine.low %v3674_v2, %v3677_v33  ;;  %v3689_v47 = vrot.slane %v3687_v11, 4  ;;  %v3701_v34 = vrot.slane %v15134_v0, 5  ;;  %v3696_v16 = vrot.slane %v3694_v12, 4  ;;  %v3591_v2 = vld [vmem:[#allocation2 + $0x9c] sm:$0xe] }
 0x1b3   : > { %v3697_v35 = vrot.slane %v15148_v44, 5  ;;  %v11912_v46 = vrot.slane %v3587_v22, 9  ;;  %v3704_v54 = vrot.slane %v15160_v55, 5  ;;  %v3708_v25 = vrot.slane %v15140_v39, 5 }
 0x1b4   : > { %v3691_v3 = vsel %vm14878_vm1, %v3689_v47, %v3690_v56  ;;  %v3703_v30 = vrot.slane %v3701_v34, 4  ;;  %v3715_v55 = vrot.slane %v15175_v15, 5  ;;  %v3718_v39 = vrot.slane %v15201_v24, 5  ;;  %v18975_v24 = vld [vmem:[#allocation11_spill] sm:$0xff] }
 0x1b5   : > { %v3698_v0 = vsel %vm14878_vm1, %v3696_v16, %v3697_v35  ;;  %v3702_v60 = vsel %vm14878_vm1, %v11912_v46, %v3701_v34  ;;  %v3710_v13 = vrot.slane %v3708_v25, 4  ;;  %v3722_v29 = vrot.slane %v18974_v10, 5  ;;  %v3593_v34 = vld [vmem:[#allocation2 + $0xb4] sm:$0xe] }
 0x1b6   : > { %13017 = vmatmul.mubr.msk.bf16.gmra.mrb[24].mxu0 %vm1532_vm12, %v11885_v61  ;;  %v3668_v61 = vrot.slane %v3666_v21, 4  ;;  %v3705_v44 = vsel %vm14878_vm1, %v3703_v30, %v3704_v54  ;;  %v3739_v16 = vrot.slane %v15248_v62, 5  ;;  %v11918_v35 = vrot.slane %v3593_v34, 9 }
 0x1b7   : > { %13020 = vmatprep.mubr.msk.bf16.mxu0 %vm1532_vm12, %v11886_v32  ;;  %v4213_v32 = vsel %vm1581_vm0, %v15145_v6, 0  ;;  %v3680_v6 = vrot.slane %v15083_v41, 5  ;;  %v11910_v41 = vrot.slane %v3585_v19, 9  ;;  %v3724_v19 = vrot.slane %v3722_v29, 4 }
 0x1b8   : > { %v3670_v49 = vsel %vm14878_vm1, %v3668_v61, %v3669_v57  ;;  %v3711_v61 = vrot.slane %v15171_v38, 5  ;;  %v11914_v57 = vrot.slane %v3589_v7, 9  ;;  %v3746_v30 = vrot.slane %v15258_v42, 5  ;;  %v754_v7 = vld [vmem:[#allocation2 + $0xd4] sm:$0x1] }
 0x1b9   : > { %v11924_v23 = vcombine.low %v3667_v36, %v3670_v49  ;;  %v3682_v5 = vrot.slane %v3680_v6, 4  ;;  %v3681_v53 = vsel %vm14878_vm1, %v11909_v20, %v3680_v6  ;;  %v3590_v49 = vld [vmem:[#allocation2 + $0x90] sm:$0xe]  ;;  %v3729_v6 = vrot.slane %v18975_v24, 5  ;;  %v14024_v24 = vld [vmem:[#allocation2 + $0x48] sm:$0xff]  }
 0x1ba   : > { %v3712_v15 = vsel %vm14878_vm1, %v3710_v13, %v3711_v61  ;;  %v3716_v36 = vsel %vm14878_vm1, %v11914_v57, %v3715_v55  ;;  %v11916_v20 = vrot.slane %v3591_v2, 9  ;;  %v14020_v57 = vld [vmem:[#allocation2 + $0x18] sm:$0xff]   ;;  %v14027_v2 = vld [vmem:[#allocation2 + $0x6c] sm:$0xff]  }
 0x1bb   : > { %v3684_v8 = vsel %vm14878_vm1, %v3682_v5, %v3683_v9  ;;  %v3731_v5 = vrot.slane %v3729_v6, 4  ;;  %v18977_v9 = vld [vmem:[#allocation13_spill] sm:$0xff] }
 0x1bc   : > { %v11926_v43 = vcombine.low %v3681_v53, %v3684_v8  ;;  %v18978_v53 = vld [vmem:[#allocation14_spill] sm:$0xff] }
 0x1bd   : > { %v3736_v8 = vrot.slane %v18978_v53, 5 }
 0x1be   : > { %13021 = vmatmul.mubr.msk.bf16.gmra.mrb[28].mxu0 %vm1532_vm12, %v11887_v17  ;;  %v3688_v17 = vsel %vm14878_vm1, %v11910_v41, %v3687_v11  ;;  %v11915_v11 = vrot.slane %v3590_v49, 9  ;;  %v3732_v41 = vrot.slane %v18977_v9, 5  ;;  %v14023_v49 = vld [vmem:[#allocation2 + $0x3c] sm:$0xff]  }
 0x1bf   : > { %13026 = vmatprep.mubr.msk.bf16.mxu0 %vm1532_vm12, %v11921_v45  ;;  %v3586_v45 = vld [vmem:[#allocation2 + $0x60] sm:$0xe]  ;;  %v11927_v51 = vcombine.low %v3688_v17, %v3691_v3  ;;  %v3592_v3 = vld [vmem:[#allocation2 + $0xa8] sm:$0xe] }
 0x1c0   : > { %v11911_v14 = vrot.slane %v3586_v45, 9  ;;  %v3723_v47 = vsel %vm14878_vm1, %v11915_v11, %v3722_v29  ;;  %v3733_v17 = vsel %vm14878_vm1, %v3731_v5, %v3732_v41  ;;  %v3743_v45 = vrot.slane %v15234_v18, 5  ;;  %v14022_v29 = vld [vmem:[#allocation2 + $0x30] sm:$0xff]   ;;  %v15440_v11 = vld [vmem:[#allocation2 + $0x1c] sm:$0xf] }
 0x1c1   : > { %v4466_v5 = vshll.u32 %v15440_v11, 16  ;;  %v4470_v9 = vshrl.u32 %v15440_v11, 16  ;;  %v4411_v41 = vld [vmem:[#allocation2 + $0x24] sm:$0xf] }
 0x1c2   : > { %v3695_v21 = vsel %vm14878_vm1, %v11911_v14, %v3694_v12  ;;  %v3730_v12 = vsel %vm14878_vm1, %v11916_v20, %v3729_v6  ;;  %v3738_v14 = vrot.slane %v3736_v8, 4  ;;  %v3745_v46 = vrot.slane %v3743_v45, 4  ;;  %v14026_v6 = vld [vmem:[#allocation2 + $0x60] sm:$0xff]  }
 0x1c3   : > { %v11928_v48 = vcombine.low %v3695_v21, %v3698_v0  ;;  %v3750_v21 = vrot.slane %v15250_v58, 5  ;;  %v3744_v0 = vsel %vm14878_vm1, %v11918_v35, %v3743_v45  ;;  %v4481_v53 = vshrl.u32 %v4411_v41, 16  ;;  %v14031_v35 = vld [vmem:[#allocation2 + $0x9c] sm:$0xff]  }
 0x1c4   : > { %v3740_v18 = vsel %vm14878_vm1, %v3738_v14, %v3739_v16  ;;  %v3747_v62 = vsel %vm14878_vm1, %v3745_v46, %v3746_v30  ;;  %v15450_v45 = vrot.slane %v4466_v5, 5  ;;  %v4472_v34 = vrot.slane %v4470_v9, 4 }
 0x1c6   : > { %13027 = vmatmul.mubr.msk.bf16.vlgmr.msra.gmra.mrb[0].mxu0 %vm1532_vm12, %v11922_v4  ;;  %v11929_v4 = vcombine.low %v3702_v60, %v3705_v44  ;;  %v11935_v60 = vcombine.low %v3744_v0, %v3747_v62  ;;  %v4473_v62 = vor.u32 %v4472_v34, %v15450_v45 }
 0x1c7   : > { %13059 = vmatpush3.bf16.msra.mxu0 %v4213_v32  ;;  %13030 = vmatprep.mubr.msk.bf16.mxu0 %vm1532_vm12, %v11923_v28  ;;  %v11913_v28 = vrot.slane %v3588_v37, 9  ;;  %v3717_v32 = vrot.slane %v3715_v55, 4  ;;  %v3752_v37 = vrot.slane %v3750_v21, 4  ;;  %v3753_v55 = vrot.slane %v15273_v1, 5  ;;  %v918_v1 = vld [vmem:[#allocation2 + $0xd0] sm:$0x8] }
 0x1c8   : > { %13985 = vmatprep.subr.msk.bf16.mxu0 %vm1581_vm0, %v15323_v40 }
 0x1c9   : > { %v3709_v63 = vsel %vm14878_vm1, %v11913_v28, %v3708_v25  ;;  %v3719_v38 = vsel %vm14878_vm1, %v3717_v32, %v3718_v39  ;;  %v3594_v25 = vld [vmem:[#allocation2 + $0xc0] sm:$0xe]  ;;  %v11723_v32 = vrot.slane %v918_v1, 11 }
 0x1ca   : > { %v11930_v33 = vcombine.low %v3709_v63, %v3712_v15  ;;  %v11931_v50 = vcombine.low %v3716_v36, %v3719_v38  ;;  %v11919_v44 = vrot.slane %v3594_v25, 9  ;;  %v14021_v63 = vld [vmem:[#allocation2 + $0x24] sm:$0xff]   ;;  %v4939_v36 = vsel %vm1581_vm0, %v15323_v40, 0  ;;  %v15428_v38 = vld [vmem:[%s18837_s1 + $0x10] sm:$0x3]  ;;  %v14025_v40 = vld [vmem:[#allocation2 + $0x54] sm:$0xff]  }
 0x1cc   : > { %v3751_v58 = vsel %vm14878_vm1, %v11919_v44, %v3750_v21  ;;  %v4417_v21 = vld [vmem:[#allocation2 + $0x3c] sm:$0xf]  ;;  %v15462_v44 = vld [vmem:[#allocation2 + $0x2c] sm:$0x1] }
 0x1ce   : > { %13031 = vmatmul.mubr.msk.bf16.gmra.mrb[4].mxu0 %vm1532_vm12, %v11924_v23  ;;  %v18976_v23 = vld [vmem:[#allocation12_spill] sm:$0xff] }
 0x1cf   : > { %13034 = vmatprep.mubr.msk.bf16.mxu0 %vm1532_vm12, %v11925_v59  ;;  %v3725_v59 = vrot.slane %v18976_v23, 5  ;;  %v14030_v23 = vld [vmem:[#allocation2 + $0x90] sm:$0xff]  }
 0x1d1   : > { %v3726_v56 = vsel %vm14878_vm1, %v3724_v19, %v3725_v59  ;;  %v14029_v19 = vld [vmem:[#allocation2 + $0x84] sm:$0xff]  }
 0x1d2   : > { %v11932_v22 = vcombine.low %v3723_v47, %v3726_v56  ;;  %v15445_v47 = vld [vmem:[#allocation2 + $0x28] sm:$0xf]  ;;  %v4414_v56 = vld [vmem:[#allocation2 + $0x30] sm:$0xf] }
 0x1d3   : > { %v4505_v14 = vshrl.u32 %v4414_v56, 16  ;;  %v4508_v16 = vshll.u32 %v4414_v56, 16  ;;  %v15482_v56 = vld [vmem:[#allocation2 + $0x44] sm:$0x1] }
 0x1d6   : > { %13035 = vmatmul.mubr.msk.bf16.gmra.mrb[8].mxu0 %vm1532_vm12, %v11926_v43  ;;  %v11933_v43 = vcombine.low %v3730_v12, %v3733_v17  ;;  %v15448_v12 = vld [vmem:[#allocation2 + $0x34] sm:$0xf] }
 0x1d7   : > { %13038 = vmatprep.mubr.msk.bf16.mxu0 %vm1532_vm12, %v11927_v51  ;;  %v11917_v51 = vrot.slane %v3592_v3, 9  ;;  %v4514_v46 = vshll.u32 %v15448_v12, 16  ;;  %v4518_v30 = vshrl.u32 %v15448_v12, 16 }
 0x1d9   : > { %v3737_v54 = vsel %vm14878_vm1, %v11917_v51, %v3736_v8  ;;  %v4484_v8 = vshll.u32 %v4411_v41, 16  ;;  %v4494_v51 = vshrl.u32 %v15445_v47, 16 }
 0x1da   : > { %v11934_v42 = vcombine.low %v3737_v54, %v3740_v18  ;;  %v14032_v54 = vld [vmem:[#allocation2 + $0xa8] sm:$0xff]   ;;  %v4483_v18 = vrot.slane %v4481_v53, 4 }
 0x1de   : > { %13039 = vmatmul.mubr.msk.bf16.gmra.mrb[12].mxu0 %vm1532_vm12, %v11928_v48  ;;  %v3754_v48 = vsel %vm14878_vm1, %v3752_v37, %v3753_v55  ;;  %v4496_v55 = vrot.slane %v4494_v51, 4  ;;  %v4423_v51 = vld [vmem:[#allocation2 + $0x54] sm:$0xf] }
 0x1df   : > { %13042 = vmatprep.mubr.msk.bf16.mxu0 %vm1532_vm12, %v11929_v4  ;;  %v18979_v4 = vld [vmem:[#allocation8_spill] sm:$0xff]  ;;  %v11936_v61 = vcombine.low %v3751_v58, %v3754_v48  ;;  %v4510_v58 = vrot.slane %v4508_v16, 5  ;;  %v15467_v48 = vrot.slane %v4514_v46, 5 }
 0x1e0   : > { %v18980_v28 = vrot.slane %v18979_v4, 4  ;;  %v4520_v4 = vrot.slane %v4518_v30, 4 }
 0x1e2   : > { %v755_v13 = vsel %vm14231_vm8, %v18980_v28, %v754_v7  ;;  %v4507_v7 = vrot.slane %v4505_v14, 4  ;;  %v4529_v28 = vshrl.u32 %v4417_v21, 16 }
 0x1e3   : > { %756 = vst [vmem:[#allocation2 + $0xd4] sm:$0x1] %v755_v13  ;;  %v4532_v13 = vshll.u32 %v4417_v21, 16  ;;  %v15495_v21 = vld [vmem:[#allocation2 + $0x58] sm:$0xf] }
 0x1e6   : > { %13043 = vmatmul.mubr.msk.bf16.gmra.mrb[16].mxu0 %vm1532_vm12, %v11930_v33  ;;  %v14028_v33 = vld [vmem:[#allocation2 + $0x78] sm:$0xff]  }
 0x1e7   : > { %13046 = vmatprep.mubr.msk.bf16.mxu0 %vm1532_vm12, %v11931_v50  ;;  %v4408_v50 = vld [vmem:[#allocation2 + $0x18] sm:$0xf] }
 0x1e8   : > { %v4457_v59 = vshrl.u32 %v4408_v50, 16  ;;  %v4460_v20 = vshll.u32 %v4408_v50, 16  ;;  %v4531_v50 = vrot.slane %v4529_v28, 4 }
 0x1ea   : > { %v1043_v39 = vld [vmem:[#allocation2 + $0xd4] sm:$0x1]  ;;  %v4459_v17 = vrot.slane %v4457_v59, 4  ;;  %v4462_v3 = vrot.slane %v4460_v20, 5 }
 0x1eb   : > { %v1044_v10 = vsel %vm14270_vm9, %v11723_v32, %v1043_v39 }
 0x1ec   : > { %1045 = vst [vmem:[#allocation2 + $0xd4] sm:$0x1] %v1044_v10  ;;  %v4463_v0 = vor.u32 %v4462_v3, %v4459_v17  ;;  %v4420_v10 = vld [vmem:[#allocation2 + $0x48] sm:$0xf] }
 0x1ed   : > { %v4553_v5 = vshrl.u32 %v4420_v10, 16  ;;  %v4556_v9 = vshll.u32 %v4420_v10, 16 }
 0x1ee   : > { %13047 = vmatmul.mubr.msk.bf16.gmra.mrb[20].mxu0 %vm1532_vm12, %v11932_v22  ;;  %v15452_v22 = vld [vmem:[#allocation2 + $0x20] sm:$0x1]  ;;  %v4464_v32 = vrot.slane %v4463_v0, 4  ;;  %v15497_v0 = vld [vmem:[#allocation2 + $0x50] sm:$0x1] }
 0x1ef   : > { %13050 = vmatprep.mubr.msk.bf16.mxu0 %vm1532_vm12, %v11933_v43  ;;  %v4490_v43 = vshll.u32 %v15445_v47, 16  ;;  %v4476_v25 = vshll.u32 %v15452_v22, 16 }
 0x1f0   : > { %v4469_v17 = vsel %vm14338_vm13, %v4464_v32, %v15450_v45  ;;  %v4558_v45 = vrot.slane %v4556_v9, 5  ;;  %v4590_v32 = vshrl.u32 %v15495_v21, 16 }
 0x1f1   : > { %v15464_v37 = vrot.slane %v4490_v43, 5 }
 0x1f6   : > { %13051 = vmatmul.mubr.msk.bf16.gmra.mrb[24].mxu0 %vm1532_vm12, %v11934_v42  ;;  %v4486_v42 = vrot.slane %v4484_v8, 5 }
 0x1f7   : > { %13054 = vmatprep.mubr.msk.bf16.mxu0 %vm1532_vm12, %v11935_v60  ;;  %v15460_v60 = vld [vmem:[#allocation2 + $0x40] sm:$0xf] }
 0x1f8   : > { %v4542_v1 = vshrl.u32 %v15460_v60, 16  ;;  %v4487_v39 = vor.u32 %v4486_v42, %v4483_v18  ;;  %v4555_v18 = vrot.slane %v4553_v5, 4  ;;  %v4577_v42 = vshrl.u32 %v4423_v51, 16 }
 0x1f9   : > { %v5409_v5 = vsel %vm1581_vm0, %v15428_v38, 0 }
 0x1fa   : > { %v4544_v20 = vrot.slane %v4542_v1, 4  ;;  %v4488_v41 = vrot.slane %v4487_v39, 4  ;;  %v4586_v1 = vshll.u32 %v15495_v21, 16  ;;  %v4426_v39 = vld [vmem:[#allocation2 + $0x60] sm:$0xf] }
 0x1fc   : > { %v15530_v9 = vrot.slane %v4586_v1, 5 }
 0x1fe   : > { %13055 = vmatmul.mubr.msk.bf16.gmra.mrb[28].mxu0 %vm1532_vm12, %v11936_v61  ;;  %v15470_v61 = vld [vmem:[#allocation2 + $0x38] sm:$0x1] }
 0x1ff   : > { %13060 = vmatprep.mubr.msk.bf16.mxu0 %vm1532_vm12, %v14020_v57  ;;  %v4538_v57 = vshll.u32 %v15460_v60, 16 }
 0x201   : > { %v15480_v59 = vrot.slane %v4538_v57, 5 }
 0x203   : > { %v4545_v30 = vor.u32 %v4544_v20, %v15480_v59 }
 0x206   : > { %13061 = vmatmul.mubr.msk.bf16.vlgmr.msra.gmra.mrb[0].mxu0 %vm1532_vm12, %v14021_v63  ;;  %v4500_v63 = vshll.u32 %v15462_v44, 16 }
 0x207   : > { %13093 = vmatpush3.bf16.msra.mxu0 %v4939_v36  ;;  %13064 = vmatprep.mubr.msk.bf16.mxu0 %vm1532_vm12, %v14022_v29  ;;  %v4474_v29 = vrot.slane %v4473_v62, 4  ;;  %v4478_v36 = vrot.slane %v4476_v25, 5 }
 0x208   : > { %13986 = vmatprep.subr.msk.bf16.mxu0 %vm1581_vm0, %v15428_v38  ;;  %v4502_v43 = vrot.slane %v4500_v63, 5  ;;  %v15513_v63 = vld [vmem:[#allocation2 + $0x64] sm:$0xf] }
 0x209   : > { %v4479_v3 = vsel %vm14338_vm13, %v4474_v29, %v4478_v36  ;;  %v4559_v29 = vor.u32 %v4558_v45, %v4555_v18  ;;  %v4572_v36 = vshll.u32 %v15497_v0, 16  ;;  %v15548_v45 = vld [vmem:[#allocation2 + $0x7c] sm:$0xf] }
 0x20e   : > { %13065 = vmatmul.mubr.msk.bf16.gmra.mrb[4].mxu0 %vm1532_vm12, %v14023_v49  ;;  %v4497_v49 = vor.u32 %v4496_v55, %v15464_v37  ;;  %v4580_v55 = vshll.u32 %v4423_v51, 16 }
 0x20f   : > { %13068 = vmatprep.mubr.msk.bf16.mxu0 %vm1532_vm12, %v14024_v24  ;;  %v4511_v24 = vor.u32 %v4510_v58, %v4507_v7  ;;  %v14035_v7 = vld [vmem:[#allocation2 + $0xcc] sm:$0xff]   ;;  %v11987_v58 = vcombine.low %v4469_v17, %v4479_v3  ;;  %v4560_v17 = vrot.slane %v4559_v29, 4  ;;  %v4574_v3 = vrot.slane %v4572_v36, 5 }
 0x210   : > { %v4498_v34 = vrot.slane %v4497_v49, 4  ;;  %v15520_v49 = vrot.slane %v4545_v30, 4 }
 0x211   : > { %v4512_v14 = vrot.slane %v4511_v24, 4  ;;  %v4579_v24 = vrot.slane %v4577_v42, 4 }
 0x212   : > { %v4503_v28 = vsel %vm14338_vm13, %v4498_v34, %v4502_v43  ;;  %v15537_v34 = vld [vmem:[#allocation2 + $0x68] sm:$0x1]  ;;  %v4429_v43 = vld [vmem:[#allocation2 + $0x6c] sm:$0xf] }
 0x213   : > { %v4620_v42 = vshll.u32 %v15537_v34, 16 }
 0x216   : > { %13069 = vmatmul.mubr.msk.bf16.gmra.mrb[8].mxu0 %vm1532_vm12, %v14025_v40  ;;  %v15476_v40 = vld [vmem:[#allocation2 + $0x4c] sm:$0xf] }
 0x217   : > { %13072 = vmatprep.mubr.msk.bf16.mxu0 %vm1532_vm12, %v14026_v6  ;;  %v14033_v6 = vld [vmem:[#allocation2 + $0xb4] sm:$0xff]   ;;  %v4562_v53 = vshll.u32 %v15476_v40, 16  ;;  %v4566_v8 = vshrl.u32 %v15476_v40, 16 }
 0x219   : > { %v15499_v62 = vrot.slane %v4562_v53, 5  ;;  %v4568_v25 = vrot.slane %v4566_v8, 4 }
 0x21e   : > { %13073 = vmatmul.mubr.msk.bf16.gmra.mrb[12].mxu0 %vm1532_vm12, %v14027_v2  ;;  %v4521_v2 = vor.u32 %v4520_v4, %v15467_v48  ;;  %v4493_v4 = vsel %vm14338_vm13, %v4488_v41, %v15464_v37  ;;  %v4592_v41 = vrot.slane %v4590_v32, 4  ;;  %v4658_v32 = vshll.u32 %v15548_v45, 16 }
 0x21f   : > { %13076 = vmatprep.mubr.msk.bf16.mxu0 %vm1532_vm12, %v14028_v33  ;;  %v4524_v33 = vshll.u32 %v15470_v61, 16  ;;  %v11988_v20 = vcombine.low %v4493_v4, %v4503_v28 }
 0x220   : > { %v4522_v16 = vrot.slane %v4521_v2, 4  ;;  %v15523_v2 = vld [vmem:[#allocation2 + $0x5c] sm:$0x1] }
 0x226   : > { %13077 = vmatmul.mubr.msk.bf16.gmra.mrb[16].mxu0 %vm1532_vm12, %v14029_v19  ;;  %v4534_v19 = vrot.slane %v4532_v13, 5  ;;  %v4517_v13 = vsel %vm14338_vm13, %v4512_v14, %v15467_v48  ;;  %v4569_v48 = vor.u32 %v4568_v25, %v15499_v62  ;;  %v4593_v25 = vor.u32 %v4592_v41, %v15530_v9 }
 0x227   : > { %13080 = vmatprep.mubr.msk.bf16.mxu0 %vm1532_vm12, %v14030_v23  ;;  %v14034_v23 = vld [vmem:[#allocation2 + $0xc0] sm:$0xff]  }
 0x228   : > { %v4535_v46 = vor.u32 %v4534_v19, %v4531_v50  ;;  %v4604_v50 = vshll.u32 %v4426_v39, 16  ;;  %v4610_v19 = vshll.u32 %v15513_v63, 16  ;;  %v4570_v51 = vrot.slane %v4569_v48, 4 }
 0x229   : > { %v4594_v48 = vrot.slane %v4593_v25, 4 }
 0x22a   : > { %v15515_v10 = vrot.slane %v4535_v46, 4  ;;  %v4432_v46 = vld [vmem:[#allocation2 + $0x78] sm:$0xf] }
 0x22b   : > { %v4649_v28 = vshrl.u32 %v4432_v46, 16 }
 0x22c   : > { %v4541_v8 = vsel %vm14338_vm13, %v15515_v10, %v15480_v59  ;;  %v15546_v59 = vrot.slane %v4610_v19, 5  ;;  %v4575_v10 = vsel %vm14338_vm13, %v4570_v51, %v4574_v3  ;;  %v15572_v3 = vrot.slane %v4658_v32, 5  ;;  %v15595_v32 = vld [vmem:[#allocation2 + $0x8c] sm:$0x1] }
 0x22e   : > { %13081 = vmatmul.mubr.msk.bf16.gmra.mrb[20].mxu0 %vm1532_vm12, %v14031_v35  ;;  %v4526_v35 = vrot.slane %v4524_v33, 5  ;;  %v4601_v33 = vshrl.u32 %v4426_v39, 16  ;;  %v4662_v39 = vshrl.u32 %v15548_v45, 16 }
 0x22f   : > { %13084 = vmatprep.mubr.msk.bf16.mxu0 %vm1532_vm12, %v14032_v54  ;;  %v4548_v54 = vshll.u32 %v15482_v56, 16 }
 0x230   : > { %v4527_v57 = vsel %vm14338_vm13, %v4522_v16, %v4526_v35  ;;  %v4596_v16 = vshll.u32 %v15523_v2, 16  ;;  %v15544_v35 = vld [vmem:[#allocation2 + $0x70] sm:$0xf]  ;;  %v4603_v30 = vrot.slane %v4601_v33, 4  ;;  %v15565_v33 = vld [vmem:[#allocation2 + $0x88] sm:$0xf] }
 0x231   : > { %v15517_v37 = vrot.slane %v4548_v54, 5  ;;  %v11989_v53 = vcombine.low %v4517_v13, %v4527_v57  ;;  %v4606_v54 = vrot.slane %v4604_v50, 5  ;;  %v4638_v4 = vshrl.u32 %v15544_v35, 16 }
 0x232   : > { %v4652_v13 = vshll.u32 %v4432_v46, 16  ;;  %v4565_v57 = vsel %vm14338_vm13, %v4560_v17, %v15499_v62  ;;  %v15570_v17 = vld [vmem:[#allocation2 + $0x74] sm:$0x1]  ;;  %v15574_v46 = vld [vmem:[#allocation2 + $0x80] sm:$0x1] }
 0x233   : > { %v4551_v38 = vsel %vm14338_vm13, %v15520_v49, %v15517_v37  ;;  %v4598_v37 = vrot.slane %v4596_v16, 5  ;;  %v4607_v29 = vor.u32 %v4606_v54, %v4603_v30  ;;  %v4435_v49 = vld [vmem:[#allocation2 + $0x84] sm:$0xf]  ;;  %v4640_v19 = vrot.slane %v4638_v4, 4  ;;  %v4438_v4 = vld [vmem:[#allocation2 + $0x90] sm:$0xf] }
 0x234   : > { %v4654_v41 = vrot.slane %v4652_v13, 5  ;;  %v4676_v51 = vshll.u32 %v4435_v49, 16  ;;  %v11990_v30 = vcombine.low %v4541_v8, %v4551_v38  ;;  %v11991_v54 = vcombine.low %v4565_v57, %v4575_v10 }
 0x235   : > { %v4599_v25 = vsel %vm14338_vm13, %v4594_v48, %v4598_v37  ;;  %v4668_v38 = vshll.u32 %v15574_v46, 16  ;;  %v4697_v37 = vshrl.u32 %v4438_v4, 16 }
 0x236   : > { %13085 = vmatmul.mubr.msk.bf16.gmra.mrb[24].mxu0 %vm1532_vm12, %v14033_v6  ;;  %v4582_v6 = vrot.slane %v4580_v55, 5  ;;  %v4625_v55 = vshrl.u32 %v4429_v43, 16  ;;  %v4678_v57 = vrot.slane %v4676_v51, 5 }
 0x237   : > { %13088 = vmatprep.mubr.msk.bf16.mxu0 %vm1532_vm12, %v14034_v23  ;;  %v4614_v23 = vshrl.u32 %v15513_v63, 16 }
 0x238   : > { %v4583_v14 = vor.u32 %v4582_v6, %v4579_v24  ;;  %v4622_v24 = vrot.slane %v4620_v42, 5  ;;  %v4627_v6 = vrot.slane %v4625_v55, 4 }
 0x239   : > { %v4616_v18 = vrot.slane %v4614_v23, 4  ;;  %v4651_v23 = vrot.slane %v4649_v28, 4  ;;  %v15586_v28 = vld [vmem:[#allocation2 + $0x94] sm:$0xf] }
 0x23a   : > { %v15557_v1 = vrot.slane %v4583_v14, 4  ;;  %v4608_v14 = vrot.slane %v4607_v29, 4  ;;  %v4700_v29 = vshll.u32 %v4438_v4, 16  ;;  %v15616_v4 = vld [vmem:[#allocation2 + $0xac] sm:$0xf] }
 0x23b   : > { %v4617_v36 = vor.u32 %v4616_v18, %v15546_v59 }
 0x23c   : > { %v4589_v18 = vsel %vm14338_vm13, %v15557_v1, %v15530_v9  ;;  %v4613_v9 = vsel %vm14338_vm13, %v4608_v14, %v15546_v59 }
 0x23d   : > { %v4618_v16 = vrot.slane %v4617_v36, 4  ;;  %v4706_v36 = vshll.u32 %v15586_v28, 16 }
 0x23e   : > { %13089 = vmatmul.mubr.msk.bf16.gmra.mrb[28].mxu0 %vm1532_vm12, %v14035_v7  ;;  %v4628_v7 = vshll.u32 %v4429_v43, 16  ;;  %v4664_v43 = vrot.slane %v4662_v39, 4 }
 0x23f   : > { %13094 = vmatprep.mubr.msk.bf16.mxu0 %vm1532_vm12, %v11987_v58  ;;  %v4634_v58 = vshll.u32 %v15544_v35, 16  ;;  %v4623_v1 = vsel %vm14338_vm13, %v4618_v16, %v4622_v24  ;;  %v15605_v16 = vld [vmem:[#allocation2 + $0xa0] sm:$0xf] }
 0x240   : > { %v4630_v62 = vrot.slane %v4628_v7, 5  ;;  %v4644_v7 = vshll.u32 %v15570_v17, 16  ;;  %v4665_v8 = vor.u32 %v4664_v43, %v15572_v3  ;;  %v4441_v43 = vld [vmem:[#allocation2 + $0x9c] sm:$0xf]  ;;  %v11993_v51 = vcombine.low %v4613_v9, %v4623_v1 }
 0x241   : > { %v15568_v50 = vrot.slane %v4634_v58, 5  ;;  %v4655_v58 = vor.u32 %v4654_v41, %v4651_v23  ;;  %v4692_v41 = vshll.u32 %v15595_v32, 16  ;;  %v4730_v1 = vshll.u32 %v15605_v16, 16 }
 0x242   : > { %v4631_v42 = vor.u32 %v4630_v62, %v4627_v6  ;;  %v4646_v6 = vrot.slane %v4644_v7, 5  ;;  %v4666_v24 = vrot.slane %v4665_v8, 4 }
 0x243   : > { %v4641_v55 = vor.u32 %v4640_v19, %v15568_v50  ;;  %v4656_v62 = vrot.slane %v4655_v58, 4  ;;  %v4670_v19 = vrot.slane %v4668_v38, 5  ;;  %v4444_v58 = vld [vmem:[#allocation2 + $0xa8] sm:$0xf] }
 0x244   : > { %v4632_v48 = vrot.slane %v4631_v42, 4 }
 0x245   : > { %v4642_v59 = vrot.slane %v4641_v55, 4  ;;  %v4661_v8 = vsel %vm14338_vm13, %v4656_v62, %v15572_v3  ;;  %v4671_v38 = vsel %vm14338_vm13, %v4666_v24, %v4670_v19  ;;  %v4758_v3 = vshrl.u32 %v15616_v4, 16 }
 0x246   : > { %13095 = vmatmul.mubr.msk.bf16.vlgmr.msra.gmra.mrb[0].mxu0 %vm1532_vm12, %v11988_v20  ;;  %v4673_v20 = vshrl.u32 %v4435_v49, 16  ;;  %v4710_v49 = vshrl.u32 %v15586_v28, 16  ;;  %v4637_v55 = vsel %vm14338_vm13, %v4632_v48, %v15568_v50  ;;  %v11995_v24 = vcombine.low %v4661_v8, %v4671_v38  ;;  %v15645_v8 = vld [vmem:[#allocation2 + $0xb8] sm:$0xf] }
 0x247   : > { %13127 = vmatpush3.bf16.msra.mxu0 %v5409_v5  ;;  %13098 = vmatprep.mubr.msk.bf16.mxu0 %vm1532_vm12, %v11989_v53  ;;  %v4682_v5 = vshll.u32 %v15565_v33, 16  ;;  %v4686_v53 = vshrl.u32 %v15565_v33, 16  ;;  %v4647_v7 = vsel %vm14338_vm13, %v4642_v59, %v4646_v6  ;;  %18982 = vst [vmem:[#allocation10_spill] sm:$0xff] %v15645_v8 }
 0x248   : > { %v4675_v13 = vrot.slane %v4673_v20, 4  ;;  %v11992_v20 = vcombine.low %v4589_v18, %v4599_v25  ;;  %v4712_v42 = vrot.slane %v4710_v49, 4  ;;  %v4721_v18 = vshrl.u32 %v4441_v43, 16 }
 0x249   : > { %v15597_v39 = vrot.slane %v4682_v5, 5  ;;  %v4688_v10 = vrot.slane %v4686_v53, 4  ;;  %v15607_v5 = vld [vmem:[#allocation2 + $0x98] sm:$0x1]  ;;  %v4699_v53 = vrot.slane %v4697_v37, 4  ;;  %v4724_v25 = vshll.u32 %v4441_v43, 16 }
 0x24a   : > { %v4679_v23 = vor.u32 %v4678_v57, %v4675_v13  ;;  %v4694_v57 = vrot.slane %v4692_v41, 5  ;;  %v4716_v50 = vshll.u32 %v15607_v5, 16  ;;  %v4745_v37 = vshrl.u32 %v4444_v58, 16 }
 0x24b   : > { %v4689_v14 = vor.u32 %v4688_v10, %v15597_v39  ;;  %v4734_v10 = vshrl.u32 %v15605_v16, 16  ;;  %v4723_v59 = vrot.slane %v4721_v18, 4  ;;  %v4726_v6 = vrot.slane %v4724_v25, 5 }
 0x24c   : > { %v4680_v13 = vrot.slane %v4679_v23, 4  ;;  %v11994_v62 = vcombine.low %v4637_v55, %v4647_v7  ;;  %v15634_v23 = vld [vmem:[#allocation2 + $0xa4] sm:$0x1]  ;;  %v4718_v43 = vrot.slane %v4716_v50, 5  ;;  %v4760_v55 = vrot.slane %v4758_v3, 4 }
 0x24d   : > { %v4690_v9 = vrot.slane %v4689_v14, 4  ;;  %v15640_v14 = vld [vmem:[#allocation2 + $0xb0] sm:$0x1]  ;;  %v4447_v7 = vld [vmem:[#allocation2 + $0xb4] sm:$0xf]  ;;  %v4782_v3 = vshrl.u32 %v15645_v8, 16 }
 0x24e   : > { %13099 = vmatmul.mubr.msk.bf16.gmra.mrb[4].mxu0 %vm1532_vm12, %v11990_v30  ;;  %v4702_v30 = vrot.slane %v4700_v29, 5  ;;  %v4748_v29 = vshll.u32 %v4444_v58, 16  ;;  %v4685_v19 = vsel %vm14338_vm13, %v4680_v13, %v15597_v39  ;;  %v4727_v39 = vor.u32 %v4726_v6, %v4723_v59 }
 0x24f   : > { %13102 = vmatprep.mubr.msk.bf16.mxu0 %vm1532_vm12, %v11991_v54  ;;  %v15609_v54 = vrot.slane %v4706_v36, 5  ;;  %v4754_v36 = vshll.u32 %v15616_v4, 16  ;;  %v4695_v41 = vsel %vm14338_vm13, %v4690_v9, %v4694_v57  ;;  %v4740_v58 = vshll.u32 %v15634_v23, 16 }
 0x250   : > { %v4703_v49 = vor.u32 %v4702_v30, %v4699_v53  ;;  %v4747_v53 = vrot.slane %v4745_v37, 4  ;;  %v4750_v30 = vrot.slane %v4748_v29, 5  ;;  %v4764_v38 = vshll.u32 %v15640_v14, 16 }
 0x251   : > { %v4713_v48 = vor.u32 %v4712_v42, %v15609_v54  ;;  %v15642_v42 = vrot.slane %v4754_v36, 5  ;;  %v11996_v13 = vcombine.low %v4685_v19, %v4695_v41  ;;  %v4769_v9 = vshrl.u32 %v4447_v7, 16 }
 0x252   : > { %v4704_v18 = vrot.slane %v4703_v49, 4  ;;  %v4772_v50 = vshll.u32 %v4447_v7, 16  ;;  %v4751_v37 = vor.u32 %v4750_v30, %v4747_v53  ;;  %v4778_v36 = vshll.u32 %v15645_v8, 16  ;;  %v15665_v8 = vld [vmem:[#allocation2 + $0xd0] sm:$0xf] }
 0x253   : > { %v4714_v25 = vrot.slane %v4713_v48, 4  ;;  %v4761_v29 = vor.u32 %v4760_v55, %v15642_v42  ;;  %v4728_v59 = vrot.slane %v4727_v39, 4  ;;  %v4742_v6 = vrot.slane %v4740_v58, 5 }
 0x254   : > { %v4709_v49 = vsel %vm14338_vm13, %v4704_v18, %v15609_v54  ;;  %v4766_v30 = vrot.slane %v4764_v38, 5  ;;  %v4771_v55 = vrot.slane %v4769_v9, 4  ;;  %v4774_v7 = vrot.slane %v4772_v50, 5  ;;  %v15663_v18 = vld [vmem:[#allocation2 + $0xbc] sm:$0x1] }
 0x255   : > { %v4719_v48 = vsel %vm14338_vm13, %v4714_v25, %v4718_v43  ;;  %v4762_v26 = vrot.slane %v4761_v29, 4  ;;  %v4780_v15 = vrot.slane %v4778_v36, 5  ;;  %v4784_v31 = vrot.slane %v4782_v3, 4  ;;  %v4453_v43 = vld [vmem:[#allocation2 + $0xcc] sm:$0xf] }
 0x256   : > { %13103 = vmatmul.mubr.msk.bf16.gmra.mrb[8].mxu0 %vm1532_vm12, %v11992_v20  ;;  %v15638_v20 = vrot.slane %v4730_v1, 5  ;;  %v4450_v1 = vld [vmem:[#allocation2 + $0xc0] sm:$0xf]  ;;  %v11997_v54 = vcombine.low %v4709_v49, %v4719_v48  ;;  %v4775_v9 = vor.u32 %v4774_v7, %v4771_v55  ;;  %v15672_v50 = vld [vmem:[#allocation2 + $0xc8] sm:$0x1]  ;;  %v4788_v3 = vshll.u32 %v15663_v18, 16 }
 0x257   : > { %13106 = vmatprep.mubr.msk.bf16.mxu0 %vm1532_vm12, %v11993_v51  ;;  %v4736_v51 = vrot.slane %v4734_v10, 4  ;;  %v15649_v10 = vld [vmem:[#allocation2 + $0xc4] sm:$0xf]  ;;  %v4793_v19 = vshrl.u32 %v4450_v1, 16  ;;  %v4767_v29 = vsel %vm14338_vm13, %v4762_v26, %v4766_v30  ;;  %v4785_v36 = vor.u32 %v4784_v31, %v4780_v15 }
 0x258   : > { %v4802_v41 = vshll.u32 %v15649_v10, 16  ;;  %v4733_v38 = vsel %vm14338_vm13, %v4728_v59, %v15638_v20  ;;  %v4820_v49 = vshll.u32 %v4453_v43, 16  ;;  %v4826_v48 = vshll.u32 %v15665_v8, 16 }
 0x259   : > { %v4737_v57 = vor.u32 %v4736_v51, %v15638_v20  ;;  %v4806_v51 = vshrl.u32 %v15649_v10, 16  ;;  %v4795_v25 = vrot.slane %v4793_v19, 4  ;;  %v4817_v20 = vshrl.u32 %v4453_v43, 16  ;;  %v15685_v43 = vld [vmem:[#allocation2 + $0xd4] sm:$0x1] }
 0x25a   : > { %v4804_v58 = vrot.slane %v4802_v41, 5  ;;  %v4830_v59 = vshrl.u32 %v15665_v8, 16  ;;  %v4812_v19 = vshll.u32 %v15672_v50, 16  ;;  %v4776_v41 = vrot.slane %v4775_v9, 4 }
 0x25b   : > { %v4738_v53 = vrot.slane %v4737_v57, 4  ;;  %v4790_v26 = vrot.slane %v4788_v3, 5  ;;  %v4819_v31 = vrot.slane %v4817_v20, 4  ;;  %v4828_v30 = vrot.slane %v4826_v48, 5 }
 0x25c   : > { %v4832_v55 = vrot.slane %v4830_v59, 4 }
 0x25d   : > { %v4743_v57 = vsel %vm14338_vm13, %v4738_v53, %v4742_v6  ;;  %v4822_v53 = vrot.slane %v4820_v49, 5 }
 0x25e   : > { %13107 = vmatmul.mubr.msk.bf16.gmra.mrb[12].mxu0 %vm1532_vm12, %v11994_v62  ;;  %v4796_v62 = vshll.u32 %v4450_v1, 16  ;;  %v4808_v1 = vrot.slane %v4806_v51, 4  ;;  %v4786_v51 = vrot.slane %v4785_v36, 4  ;;  %v5134_v36 = vld [vmem:[#allocation2 + $0x18] sm:$0xe] }
 0x25f   : > { %13110 = vmatprep.mubr.msk.bf16.mxu0 %vm1532_vm12, %v11995_v24  ;;  %v4752_v24 = vrot.slane %v4751_v37, 4  ;;  %v12019_v59 = vrot.slane %v5134_v36, 9  ;;  %v5224_v36 = vrot.slane %v15482_v56, 5 }
 0x260   : > { %v4798_v39 = vrot.slane %v4796_v62, 5  ;;  %v11998_v62 = vcombine.low %v4733_v38, %v4743_v57  ;;  %v4833_v38 = vor.u32 %v4832_v55, %v4828_v30  ;;  %v4836_v57 = vshll.u32 %v15685_v43, 16 }
 0x261   : > { %v4757_v37 = vsel %vm14338_vm13, %v4752_v24, %v15642_v42 }
 0x262   : > { %v4799_v6 = vor.u32 %v4798_v39, %v4795_v25  ;;  %v11999_v42 = vcombine.low %v4757_v37, %v4767_v29  ;;  %v4781_v25 = vsel %vm14338_vm13, %v4776_v41, %v4780_v15  ;;  %v4791_v39 = vsel %vm14338_vm13, %v4786_v51, %v4790_v26  ;;  %v5135_v41 = vld [vmem:[#allocation2 + $0x24] sm:$0xe]  ;;  %v5136_v51 = vld [vmem:[#allocation2 + $0x30] sm:$0xe] }
 0x263   : > { %v5200_v29 = vrot.slane %v15440_v11, 5  ;;  %v12000_v3 = vcombine.low %v4781_v25, %v4791_v39  ;;  %v4834_v49 = vrot.slane %v4833_v38, 4  ;;  %v4838_v48 = vrot.slane %v4836_v57, 5  ;;  %v5138_v38 = vld [vmem:[#allocation2 + $0x48] sm:$0xe] }
 0x264   : > { %v4800_v7 = vrot.slane %v4799_v6, 4  ;;  %v5221_v25 = vrot.slane %v15460_v60, 5  ;;  %v5231_v60 = vrot.slane %v15497_v0, 5  ;;  %v5242_v0 = vrot.slane %v15513_v63, 5 }
 0x265   : > { %v5202_v6 = vrot.slane %v5200_v29, 4  ;;  %v4839_v11 = vsel %vm14338_vm13, %v4834_v49, %v4838_v48  ;;  %v5235_v49 = vrot.slane %v15495_v21, 5  ;;  %v5245_v21 = vrot.slane %v15537_v34, 5 }
 0x266   : > { %13111 = vmatmul.mubr.msk.bf16.gmra.mrb[16].mxu0 %vm1532_vm12, %v11996_v13  ;;  %v4809_v13 = vor.u32 %v4808_v1, %v4804_v58  ;;  %v4823_v1 = vor.u32 %v4822_v53, %v4819_v31  ;;  %v4805_v9 = vsel %vm14338_vm13, %v4800_v7, %v4804_v58  ;;  %v12020_v53 = vrot.slane %v5135_v41, 9 }
 0x267   : > { %13114 = vmatprep.mubr.msk.bf16.mxu0 %vm1532_vm12, %v11997_v54  ;;  %v4814_v54 = vrot.slane %v4812_v19, 5  ;;  %v5207_v19 = vrot.slane %v15445_v47, 5  ;;  %v12021_v7 = vrot.slane %v5136_v51, 9  ;;  %v5217_v47 = vrot.slane %v15470_v61, 5 }
 0x268   : > { %v4810_v24 = vrot.slane %v4809_v13, 4  ;;  %v4824_v20 = vrot.slane %v4823_v1, 4  ;;  %v5203_v13 = vrot.slane %v15452_v22, 5  ;;  %v5214_v22 = vrot.slane %v15448_v12, 5  ;;  %v5137_v1 = vld [vmem:[#allocation2 + $0x3c] sm:$0xe] }
 0x269   : > { %v5209_v55 = vrot.slane %v5207_v19, 4  ;;  %v5228_v61 = vrot.slane %v15476_v40, 5  ;;  %v5244_v41 = vrot.slane %v5242_v0, 4  ;;  %v5249_v51 = vrot.slane %v15544_v35, 5 }
 0x26a   : > { %v4815_v37 = vsel %vm14338_vm13, %v4810_v24, %v4814_v54  ;;  %v4829_v58 = vsel %vm14338_vm13, %v4824_v20, %v4828_v30  ;;  %v5210_v30 = vrot.slane %v15462_v44, 5  ;;  %v5216_v24 = vrot.slane %v5214_v22, 4 }
 0x26b   : > { %v12001_v15 = vcombine.low %v4805_v9, %v4815_v37  ;;  %v12002_v26 = vcombine.low %v4829_v58, %v4839_v11  ;;  %v5208_v54 = vsel %vm14878_vm1, %v12020_v53, %v5207_v19  ;;  %v5215_v39 = vsel %vm14878_vm1, %v12021_v7, %v5214_v22  ;;  %v5142_v53 = vld [vmem:[#allocation2 + $0x78] sm:$0xe] }
 0x26c   : > { %v5211_v12 = vsel %vm14878_vm1, %v5209_v55, %v5210_v30  ;;  %v5218_v44 = vsel %vm14878_vm1, %v5216_v24, %v5217_v47  ;;  %v12022_v37 = vrot.slane %v5137_v1, 9  ;;  %v5237_v19 = vrot.slane %v5235_v49, 4  ;;  %v5143_v1 = vld [vmem:[#allocation2 + $0x84] sm:$0xe] }
 0x26d   : > { %v12037_v57 = vcombine.low %v5208_v54, %v5211_v12  ;;  %v12038_v9 = vcombine.low %v5215_v39, %v5218_v44  ;;  %v5256_v34 = vrot.slane %v15548_v45, 5  ;;  %v5251_v24 = vrot.slane %v5249_v51, 4 }
 0x26e   : > { %13115 = vmatmul.mubr.msk.bf16.gmra.mrb[20].mxu0 %vm1532_vm12, %v11998_v62  ;;  %v5201_v62 = vsel %vm14878_vm1, %v12019_v59, %v5200_v29  ;;  %v5223_v29 = vrot.slane %v5221_v25, 4  ;;  %v5222_v20 = vsel %vm14878_vm1, %v12022_v37, %v5221_v25  ;;  %v5139_v59 = vld [vmem:[#allocation2 + $0x54] sm:$0xe]  ;;  %v5252_v47 = vrot.slane %v15570_v17, 5 }
 0x26f   : > { %13118 = vmatprep.mubr.msk.bf16.mxu0 %vm1532_vm12, %v11999_v42  ;;  %v5204_v42 = vsel %vm14878_vm1, %v5202_v6, %v5203_v13  ;;  %v5140_v6 = vld [vmem:[#allocation2 + $0x60] sm:$0xe]  ;;  %v12024_v11 = vrot.slane %v5139_v59, 9  ;;  %v12027_v54 = vrot.slane %v5142_v53, 9  ;;  %v5258_v12 = vrot.slane %v5256_v34, 4 }
 0x270   : > { %v12036_v31 = vcombine.low %v5201_v62, %v5204_v42  ;;  %v5225_v40 = vsel %vm14878_vm1, %v5223_v29, %v5224_v36  ;;  %v5238_v62 = vrot.slane %v15523_v2, 5  ;;  %v12025_v42 = vrot.slane %v5140_v6, 9 }
 0x271   : > { %v12039_v13 = vcombine.low %v5222_v20, %v5225_v40  ;;  %v5236_v22 = vsel %vm14878_vm1, %v12024_v11, %v5235_v49  ;;  %v5246_v2 = vsel %vm14878_vm1, %v5244_v41, %v5245_v21  ;;  %v5259_v35 = vrot.slane %v15574_v46, 5  ;;  %v5145_v40 = vld [vmem:[#allocation2 + $0x9c] sm:$0xe]  ;;  %v5146_v49 = vld [vmem:[#allocation2 + $0xa8] sm:$0xe] }
 0x272   : > { %v5239_v63 = vsel %vm14878_vm1, %v5237_v19, %v5238_v62  ;;  %v5253_v45 = vsel %vm14878_vm1, %v5251_v24, %v5252_v47  ;;  %v5263_v39 = vrot.slane %v15565_v33, 5  ;;  %v5257_v44 = vsel %vm14878_vm1, %v12027_v54, %v5256_v34  ;;  %v18983_v19 = vld [vmem:[#allocation10_spill] sm:$0xff]  ;;  %v5148_v21 = vld [vmem:[#allocation2 + $0xc0] sm:$0xe]  ;;  %v5149_v24 = vld [vmem:[#allocation2 + $0xcc] sm:$0xe] }
 0x273   : > { %v12041_v55 = vcombine.low %v5236_v22, %v5239_v63  ;;  %v5260_v17 = vsel %vm14878_vm1, %v5258_v12, %v5259_v35  ;;  %v5270_v46 = vrot.slane %v15586_v28, 5  ;;  %v5266_v29 = vrot.slane %v15595_v32, 5  ;;  %v5147_v41 = vld [vmem:[#allocation2 + $0xb4] sm:$0xe] }
 0x274   : > { %v5265_v37 = vrot.slane %v5263_v39, 4  ;;  %v5273_v33 = vrot.slane %v15607_v5, 5  ;;  %v5284_v5 = vrot.slane %v15616_v4, 5  ;;  %v12030_v59 = vrot.slane %v5145_v40, 9 }
 0x275   : > { %v5280_v6 = vrot.slane %v15634_v23, 5  ;;  %v5291_v62 = vrot.slane %v18983_v19, 5  ;;  %v5301_v53 = vrot.slane %v15672_v50, 5  ;;  %v12034_v54 = vrot.slane %v5149_v24, 9 }
 0x276   : > { %13119 = vmatmul.mubr.msk.bf16.gmra.mrb[24].mxu0 %vm1532_vm12, %v12000_v3  ;;  %v12023_v3 = vrot.slane %v5138_v38, 9  ;;  %v5267_v28 = vsel %vm14878_vm1, %v5265_v37, %v5266_v29  ;;  %v5308_v35 = vrot.slane %v15685_v43, 5 }
 0x277   : > { %13122 = vmatprep.mubr.msk.bf16.mxu0 %vm1532_vm12, %v12001_v15  ;;  %v5230_v15 = vrot.slane %v5228_v61, 4 }
 0x278   : > { %v5229_v48 = vsel %vm14878_vm1, %v12023_v3, %v5228_v61  ;;  %v5144_v61 = vld [vmem:[#allocation2 + $0x90] sm:$0xe]  ;;  %v5272_v3 = vrot.slane %v5270_v46, 4 }
 0x279   : > { %v5232_v56 = vsel %vm14878_vm1, %v5230_v15, %v5231_v60  ;;  %v12029_v36 = vrot.slane %v5144_v61, 9  ;;  %v5277_v60 = vrot.slane %v15605_v16, 5  ;;  %v5287_v16 = vrot.slane %v15640_v14, 5 }
 0x27a   : > { %v12040_v58 = vcombine.low %v5229_v48, %v5232_v56  ;;  %v5274_v32 = vsel %vm14878_vm1, %v5272_v3, %v5273_v33  ;;  %v5298_v14 = vrot.slane %v15649_v10, 5 }
 0x27b   : > { %v5271_v20 = vsel %vm14878_vm1, %v12029_v36, %v5270_v46  ;;  %v5278_v11 = vsel %vm14878_vm1, %v12030_v59, %v5277_v60 }
 0x27c   : > { %v12046_v56 = vcombine.low %v5271_v20, %v5274_v32  ;;  %v5300_v34 = vrot.slane %v5298_v14, 4 }
 0x27e   : > { %13123 = vmatmul.mubr.msk.bf16.gmra.mrb[28].mxu0 %vm1532_vm12, %v12002_v26  ;;  %v5243_v26 = vsel %vm14878_vm1, %v12025_v42, %v5242_v0  ;;  %v5279_v0 = vrot.slane %v5277_v60, 4 }
 0x27f   : > { %13128 = vmatprep.mubr.msk.bf16.mxu0 %vm1532_vm12, %v12036_v31  ;;  %v5141_v31 = vld [vmem:[#allocation2 + $0x6c] sm:$0xe]  ;;  %v12042_v30 = vcombine.low %v5243_v26, %v5246_v2  ;;  %v5293_v26 = vrot.slane %v5291_v62, 4  ;;  %v5294_v2 = vrot.slane %v15663_v18, 5  ;;  %v5302_v18 = vsel %vm14878_vm1, %v5300_v34, %v5301_v53 }
 0x280   : > { %v12026_v7 = vrot.slane %v5141_v31, 9  ;;  %v5281_v4 = vsel %vm14878_vm1, %v5279_v0, %v5280_v6  ;;  %v12033_v31 = vrot.slane %v5148_v21, 9 }
 0x281   : > { %v12047_v22 = vcombine.low %v5278_v11, %v5281_v4  ;;  %v5295_v10 = vsel %vm14878_vm1, %v5293_v26, %v5294_v2 }
 0x282   : > { %v5250_v25 = vsel %vm14878_vm1, %v12026_v7, %v5249_v51  ;;  %v12032_v51 = vrot.slane %v5147_v41, 9  ;;  %v5299_v7 = vsel %vm14878_vm1, %v12033_v31, %v5298_v14 }
 0x283   : > { %v12043_v38 = vcombine.low %v5250_v25, %v5253_v45  ;;  %v12050_v47 = vcombine.low %v5299_v7, %v5302_v18 }
 0x286   : > { %13129 = vmatmul.mubr.msk.bf16.vlgmr.msra.gmra.mrb[0].mxu0 %vm1532_vm12, %v12037_v57  ;;  %v12044_v57 = vcombine.low %v5257_v44, %v5260_v17 }
 0x287   : > { %13132 = vmatprep.mubr.msk.bf16.mxu0 %vm1532_vm12, %v12038_v9  ;;  %v12028_v9 = vrot.slane %v5143_v1, 9 }
 0x289   : > { %v5264_v15 = vsel %vm14878_vm1, %v12028_v9, %v5263_v39 }
 0x28a   : > { %v12045_v48 = vcombine.low %v5264_v15, %v5267_v28 }
 0x28e   : > { %13133 = vmatmul.mubr.msk.bf16.gmra.mrb[4].mxu0 %vm1532_vm12, %v12039_v13  ;;  %v12031_v13 = vrot.slane %v5146_v49, 9 }
 0x28f   : > { %13136 = vmatprep.mubr.msk.bf16.mxu0 %vm1532_vm12, %v12040_v58  ;;  %v5286_v58 = vrot.slane %v5284_v5, 4 }
 0x290   : > { %v5285_v42 = vsel %vm14878_vm1, %v12031_v13, %v5284_v5 }
 0x291   : > { %v5288_v23 = vsel %vm14878_vm1, %v5286_v58, %v5287_v16 }
 0x292   : > { %v12048_v63 = vcombine.low %v5285_v42, %v5288_v23 }
 0x296   : > { %13137 = vmatmul.mubr.msk.bf16.gmra.mrb[8].mxu0 %vm1532_vm12, %v12041_v55  ;;  %v5292_v55 = vsel %vm14878_vm1, %v12032_v51, %v5291_v62 }
 0x297   : > { %13140 = vmatprep.mubr.msk.bf16.mxu0 %vm1532_vm12, %v12042_v30  ;;  %v5305_v30 = vrot.slane %v15665_v8, 5  ;;  %v12049_v50 = vcombine.low %v5292_v55, %v5295_v10 }
 0x299   : > { %v5307_v12 = vrot.slane %v5305_v30, 4  ;;  %v5306_v8 = vsel %vm14878_vm1, %v12034_v54, %v5305_v30 }
 0x29b   : > { %v5309_v25 = vsel %vm14878_vm1, %v5307_v12, %v5308_v35 }
 0x29c   : > { %v12051_v45 = vcombine.low %v5306_v8, %v5309_v25 }
 0x29e   : > { %13141 = vmatmul.mubr.msk.bf16.gmra.mrb[12].mxu0 %vm1532_vm12, %v12043_v38 }
 0x29f   : > { %13144 = vmatprep.mubr.msk.bf16.mxu0 %vm1532_vm12, %v12044_v57 }
 0x2a6   : > { %13145 = vmatmul.mubr.msk.bf16.gmra.mrb[16].mxu0 %vm1532_vm12, %v12045_v48 }
 0x2a7   : > { %13148 = vmatprep.mubr.msk.bf16.mxu0 %vm1532_vm12, %v12046_v56 }
 0x2ae   : > { %13149 = vmatmul.mubr.msk.bf16.gmra.mrb[20].mxu0 %vm1532_vm12, %v12047_v22 }
 0x2af   : > { %13152 = vmatprep.mubr.msk.bf16.mxu0 %vm1532_vm12, %v12048_v63 }
 0x2b6   : > { %13153 = vmatmul.mubr.msk.bf16.gmra.mrb[24].mxu0 %vm1532_vm12, %v12049_v50 }
 0x2b7   : > { %13156 = vmatprep.mubr.msk.bf16.mxu0 %vm1532_vm12, %v12050_v47 }
 0x2be   : > { %13157 = vmatmul.mubr.msk.bf16.gmra.mrb[28].mxu0 %vm1532_vm12, %v12051_v45 }
 0x359   : > { %v15817_v39 = vpop.f32.mrb[0].mxu0 }
 0x35a   : > { %v15819_v44 = vpop.f32.mrb[1].mxu0  ;;  %v5676_v46 = vmul.f32 %v15817_v39, %v15817_v39  ;;  %v5607_v37 = vsel %vm1532_vm12, %v15817_v39, 0.0 }
 0x35b   : > { %v5674_v43 = vmul.f32 %v15819_v44, %v15819_v44  ;;  %v15823_v17 = vpop.f32.mrb[2].mxu0  ;;  %v5604_v61 = vsel %vm1532_vm12, %v15819_v44, 0.0 }
 0x35c   : > { %v15825_v1 = vpop.f32.mrb[3].mxu0  ;;  %v5677_v36 = vmul.f32 %v15823_v17, %v15823_v17  ;;  %v5709_v28 = vsel %vm1532_vm12, %v5676_v46, 0.0  ;;  %v5609_v60 = vsel %vm1532_vm12, %v15823_v17, 0.0 }
 0x35d   : > { %v5605_v38 = vsel %vm1532_vm12, %v15825_v1, 0.0  ;;  %v5675_v57 = vmul.f32 %v15825_v1, %v15825_v1  ;;  %v5706_v29 = vsel %vm1532_vm12, %v5674_v43, 0.0 }
 0x35e   : > { %v5606_v9 = vadd.f32 %v5605_v38, %v5604_v61  ;;  %v5711_v49 = vsel %vm1532_vm12, %v5677_v36, 0.0 }
 0x35f   : > { %v5707_v3 = vsel %vm1532_vm12, %v5675_v57, 0.0 }
 0x360   : > { %v5608_v33 = vadd.f32 %v5607_v37, %v5606_v9  ;;  %v5708_v15 = vadd.f32 %v5707_v3, %v5706_v29 }
 0x361   : > { %v15844_v20 = vpop.f32.mrb[4].mxu0 }
 0x362   : > { %v5710_v32 = vadd.f32 %v5709_v28, %v5708_v15  ;;  %v15846_v40 = vpop.f32.mrb[5].mxu0  ;;  %v5610_v5 = vadd.f32 %v5609_v60, %v5608_v33  ;;  %v5680_v58 = vmul.f32 %v15844_v20, %v15844_v20  ;;  %v5615_v42 = vsel %vm1532_vm12, %v15844_v20, 0.0 }
 0x363   : > { %v5611_v48 = vsel %vm1532_vm12, %v15846_v40, 0.0  ;;  %v5678_v56 = vmul.f32 %v15846_v40, %v15846_v40  ;;  %v15853_v59 = vpop.f32.mrb[6].mxu0 }
 0x364   : > { %v5612_v0 = vadd.f32 %v5611_v48, %v5610_v5  ;;  %v5712_v6 = vadd.f32 %v5711_v49, %v5710_v32  ;;  %v15855_v13 = vpop.f32.mrb[7].mxu0  ;;  %v5681_v23 = vmul.f32 %v15853_v59, %v15853_v59  ;;  %v5717_v22 = vsel %vm1532_vm12, %v5680_v58, 0.0 }
 0x365   : > { %v5713_v16 = vsel %vm1532_vm12, %v5678_v56, 0.0  ;;  %v5613_v11 = vsel %vm1532_vm12, %v15855_v13, 0.0  ;;  %v5679_v4 = vmul.f32 %v15855_v13, %v15855_v13  ;;  %v5617_v63 = vsel %vm1532_vm12, %v15853_v59, 0.0 }
 0x366   : > { %v5714_v19 = vadd.f32 %v5713_v16, %v5712_v6  ;;  %v5614_v62 = vadd.f32 %v5613_v11, %v5612_v0  ;;  %v5719_v34 = vsel %vm1532_vm12, %v5681_v23, 0.0 }
 0x367   : > { %v5715_v41 = vsel %vm1532_vm12, %v5679_v4, 0.0 }
 0x368   : > { %v5616_v14 = vadd.f32 %v5615_v42, %v5614_v62  ;;  %v5716_v21 = vadd.f32 %v5715_v41, %v5714_v19 }
 0x369   : > { %v15872_v51 = vpop.f32.mrb[8].mxu0 }
 0x36a   : > { %v5718_v26 = vadd.f32 %v5717_v22, %v5716_v21  ;;  %v15874_v2 = vpop.f32.mrb[9].mxu0  ;;  %v5618_v31 = vadd.f32 %v5617_v63, %v5616_v14  ;;  %v5684_v24 = vmul.f32 %v15872_v51, %v15872_v51  ;;  %v5623_v8 = vsel %vm1532_vm12, %v15872_v51, 0.0 }
 0x36b   : > { %v5619_v53 = vsel %vm1532_vm12, %v15874_v2, 0.0  ;;  %v5682_v55 = vmul.f32 %v15874_v2, %v15874_v2  ;;  %v15881_v10 = vpop.f32.mrb[10].mxu0 }
 0x36c   : > { %v5620_v30 = vadd.f32 %v5619_v53, %v5618_v31  ;;  %v5720_v7 = vadd.f32 %v5719_v34, %v5718_v26  ;;  %v15883_v18 = vpop.f32.mrb[11].mxu0  ;;  %v5685_v25 = vmul.f32 %v15881_v10, %v15881_v10  ;;  %v5725_v61 = vsel %vm1532_vm12, %v5684_v24, 0.0 }
 0x36d   : > { %v5721_v50 = vsel %vm1532_vm12, %v5682_v55, 0.0  ;;  %v5621_v47 = vsel %vm1532_vm12, %v15883_v18, 0.0  ;;  %v5683_v54 = vmul.f32 %v15883_v18, %v15883_v18  ;;  %v5625_v38 = vsel %vm1532_vm12, %v15881_v10, 0.0 }
 0x36e   : > { %v5722_v12 = vadd.f32 %v5721_v50, %v5720_v7  ;;  %v5622_v35 = vadd.f32 %v5621_v47, %v5620_v30  ;;  %v5727_v36 = vsel %vm1532_vm12, %v5685_v25, 0.0 }
 0x36f   : > { %v5723_v45 = vsel %vm1532_vm12, %v5683_v54, 0.0 }
 0x370   : > { %v5624_v43 = vadd.f32 %v5623_v8, %v5622_v35  ;;  %v5724_v46 = vadd.f32 %v5723_v45, %v5722_v12 }
 0x371   : > { %v15900_v57 = vpop.f32.mrb[12].mxu0 }
 0x372   : > { %v5726_v9 = vadd.f32 %v5725_v61, %v5724_v46  ;;  %v15902_v37 = vpop.f32.mrb[13].mxu0  ;;  %v5626_v29 = vadd.f32 %v5625_v38, %v5624_v43  ;;  %v5688_v5 = vmul.f32 %v15900_v57, %v15900_v57  ;;  %v5631_v58 = vsel %vm1532_vm12, %v15900_v57, 0.0 }
 0x373   : > { %v5627_v3 = vsel %vm1532_vm12, %v15902_v37, 0.0  ;;  %v5686_v33 = vmul.f32 %v15902_v37, %v15902_v37  ;;  %v15909_v15 = vpop.f32.mrb[14].mxu0 }
 0x374   : > { %v5628_v28 = vadd.f32 %v5627_v3, %v5626_v29  ;;  %v5728_v60 = vadd.f32 %v5727_v36, %v5726_v9  ;;  %v15911_v32 = vpop.f32.mrb[15].mxu0  ;;  %v5689_v16 = vmul.f32 %v15909_v15, %v15909_v15  ;;  %v5733_v62 = vsel %vm1532_vm12, %v5688_v5, 0.0 }
 0x375   : > { %v5729_v49 = vsel %vm1532_vm12, %v5686_v33, 0.0  ;;  %v5629_v48 = vsel %vm1532_vm12, %v15911_v32, 0.0  ;;  %v5687_v56 = vmul.f32 %v15911_v32, %v15911_v32  ;;  %v5633_v42 = vsel %vm1532_vm12, %v15909_v15, 0.0 }
 0x376   : > { %v5730_v0 = vadd.f32 %v5729_v49, %v5728_v60  ;;  %v5630_v6 = vadd.f32 %v5629_v48, %v5628_v28  ;;  %v5735_v22 = vsel %vm1532_vm12, %v5689_v16, 0.0 }
 0x377   : > { %v5731_v11 = vsel %vm1532_vm12, %v5687_v56, 0.0 }
 0x378   : > { %v5632_v4 = vadd.f32 %v5631_v58, %v5630_v6  ;;  %v5732_v19 = vadd.f32 %v5731_v11, %v5730_v0 }
 0x379   : > { %v15928_v23 = vpop.f32.mrb[16].mxu0 }
 0x37a   : > { %v5734_v41 = vadd.f32 %v5733_v62, %v5732_v19  ;;  %v15930_v14 = vpop.f32.mrb[17].mxu0  ;;  %v5634_v21 = vadd.f32 %v5633_v42, %v5632_v4  ;;  %v5692_v30 = vmul.f32 %v15928_v23, %v15928_v23  ;;  %v5639_v12 = vsel %vm1532_vm12, %v15928_v23, 0.0 }
 0x37b   : > { %v5635_v63 = vsel %vm1532_vm12, %v15930_v14, 0.0  ;;  %v5690_v26 = vmul.f32 %v15930_v14, %v15930_v14  ;;  %v15937_v31 = vpop.f32.mrb[18].mxu0 }
 0x37c   : > { %v5636_v34 = vadd.f32 %v5635_v63, %v5634_v21  ;;  %v5736_v53 = vadd.f32 %v5735_v22, %v5734_v41  ;;  %v15939_v55 = vpop.f32.mrb[19].mxu0  ;;  %v5693_v35 = vmul.f32 %v15937_v31, %v15937_v31  ;;  %v5741_v43 = vsel %vm1532_vm12, %v5692_v30, 0.0 }
 0x37d   : > { %v5737_v7 = vsel %vm1532_vm12, %v5690_v26, 0.0  ;;  %v5637_v24 = vsel %vm1532_vm12, %v15939_v55, 0.0  ;;  %v5691_v50 = vmul.f32 %v15939_v55, %v15939_v55  ;;  %v5641_v46 = vsel %vm1532_vm12, %v15937_v31, 0.0 }
 0x37e   : > { %v5738_v47 = vadd.f32 %v5737_v7, %v5736_v53  ;;  %v5638_v54 = vadd.f32 %v5637_v24, %v5636_v34  ;;  %v5743_v36 = vsel %vm1532_vm12, %v5693_v35, 0.0 }
 0x37f   : > { %v5739_v8 = vsel %vm1532_vm12, %v5691_v50, 0.0 }
 0x380   : > { %v5640_v25 = vadd.f32 %v5639_v12, %v5638_v54  ;;  %v5740_v45 = vadd.f32 %v5739_v8, %v5738_v47 }
 0x381   : > { %v15956_v61 = vpop.f32.mrb[20].mxu0 }
 0x382   : > { %v5742_v38 = vadd.f32 %v5741_v43, %v5740_v45  ;;  %v15958_v9 = vpop.f32.mrb[21].mxu0  ;;  %v5642_v29 = vadd.f32 %v5641_v46, %v5640_v25  ;;  %v5696_v48 = vmul.f32 %v15956_v61, %v15956_v61  ;;  %v5647_v11 = vsel %vm1532_vm12, %v15956_v61, 0.0 }
 0x383   : > { %v5643_v3 = vsel %vm1532_vm12, %v15958_v9, 0.0  ;;  %v5694_v33 = vmul.f32 %v15958_v9, %v15958_v9  ;;  %v15965_v28 = vpop.f32.mrb[22].mxu0 }
 0x384   : > { %v5644_v60 = vadd.f32 %v5643_v3, %v5642_v29  ;;  %v5744_v5 = vadd.f32 %v5743_v36, %v5742_v38  ;;  %v15967_v49 = vpop.f32.mrb[23].mxu0  ;;  %v5697_v4 = vmul.f32 %v15965_v28, %v15965_v28  ;;  %v5749_v41 = vsel %vm1532_vm12, %v5696_v48, 0.0 }
 0x385   : > { %v5745_v56 = vsel %vm1532_vm12, %v5694_v33, 0.0  ;;  %v5645_v0 = vsel %vm1532_vm12, %v15967_v49, 0.0  ;;  %v5695_v6 = vmul.f32 %v15967_v49, %v15967_v49  ;;  %v5649_v21 = vsel %vm1532_vm12, %v15965_v28, 0.0 }
 0x386   : > { %v5746_v58 = vadd.f32 %v5745_v56, %v5744_v5  ;;  %v5646_v16 = vadd.f32 %v5645_v0, %v5644_v60  ;;  %v5751_v53 = vsel %vm1532_vm12, %v5697_v4, 0.0 }
 0x387   : > { %v5747_v19 = vsel %vm1532_vm12, %v5695_v6, 0.0 }
 0x388   : > { %v5648_v62 = vadd.f32 %v5647_v11, %v5646_v16  ;;  %v5748_v42 = vadd.f32 %v5747_v19, %v5746_v58 }
 0x389   : > { %v15984_v22 = vpop.f32.mrb[24].mxu0 }
 0x38a   : > { %v5750_v63 = vadd.f32 %v5749_v41, %v5748_v42  ;;  %v15986_v26 = vpop.f32.mrb[25].mxu0  ;;  %v5650_v34 = vadd.f32 %v5649_v21, %v5648_v62  ;;  %v5700_v12 = vmul.f32 %v15984_v22, %v15984_v22  ;;  %v5655_v46 = vsel %vm1532_vm12, %v15984_v22, 0.0 }
 0x38b   : > { %v5651_v30 = vsel %vm1532_vm12, %v15986_v26, 0.0  ;;  %v5698_v7 = vmul.f32 %v15986_v26, %v15986_v26  ;;  %v15993_v24 = vpop.f32.mrb[26].mxu0 }
 0x38c   : > { %v5652_v50 = vadd.f32 %v5651_v30, %v5650_v34  ;;  %v5752_v47 = vadd.f32 %v5751_v53, %v5750_v63  ;;  %v15995_v54 = vpop.f32.mrb[27].mxu0  ;;  %v5701_v38 = vmul.f32 %v15993_v24, %v15993_v24  ;;  %v5757_v33 = vsel %vm1532_vm12, %v5700_v12, 0.0 }
 0x38d   : > { %v5753_v35 = vsel %vm1532_vm12, %v5698_v7, 0.0  ;;  %v5653_v8 = vsel %vm1532_vm12, %v15995_v54, 0.0  ;;  %v5699_v25 = vmul.f32 %v15995_v54, %v15995_v54  ;;  %v5657_v60 = vsel %vm1532_vm12, %v15993_v24, 0.0 }
 0x38e   : > { %v5754_v45 = vadd.f32 %v5753_v35, %v5752_v47  ;;  %v5654_v43 = vadd.f32 %v5653_v8, %v5652_v50  ;;  %v5759_v6 = vsel %vm1532_vm12, %v5701_v38, 0.0 }
 0x38f   : > { %v5755_v29 = vsel %vm1532_vm12, %v5699_v25, 0.0 }
 0x390   : > { %v5656_v36 = vadd.f32 %v5655_v46, %v5654_v43  ;;  %v5756_v3 = vadd.f32 %v5755_v29, %v5754_v45 }
 0x391   : > { %v16012_v5 = vpop.f32.mrb[28].mxu0 }
 0x392   : > { %v5758_v48 = vadd.f32 %v5757_v33, %v5756_v3  ;;  %v16014_v56 = vpop.f32.mrb[29].mxu0  ;;  %v5658_v0 = vadd.f32 %v5657_v60, %v5656_v36  ;;  %v5704_v42 = vmul.f32 %v16012_v5, %v16012_v5  ;;  %v5663_v30 = vsel %vm1532_vm12, %v16012_v5, 0.0  ;;  %v12136_v60 = vld [vmem:[%s18838_s2 + $0x2] sm:$0x3] }
 0x393   : > { %v5659_v58 = vsel %vm1532_vm12, %v16014_v56, 0.0  ;;  %v5702_v16 = vmul.f32 %v16014_v56, %v16014_v56  ;;  %v16021_v11 = vpop.f32.mrb[30].mxu0  ;;  %13987 = vmatprep.subr.msk.bf16.mxu1 %vm1581_vm0, %v12136_v60 }
 0x394   : > { %v5660_v4 = vadd.f32 %v5659_v58, %v5658_v0  ;;  %v5760_v19 = vadd.f32 %v5759_v6, %v5758_v48  ;;  %v16023_v62 = vpop.f32.mrb[31].mxu0  ;;  %v5705_v7 = vmul.f32 %v16021_v11, %v16021_v11  ;;  %v5765_v35 = vsel %vm1532_vm12, %v5704_v42, 0.0 }
 0x395   : > { %v5761_v41 = vsel %vm1532_vm12, %v5702_v16, 0.0  ;;  %v5661_v21 = vsel %vm1532_vm12, %v16023_v62, 0.0  ;;  %v5703_v63 = vmul.f32 %v16023_v62, %v16023_v62  ;;  %v5665_v8 = vsel %vm1532_vm12, %v16021_v11, 0.0 }
 0x396   : > { %v5762_v34 = vadd.f32 %v5761_v41, %v5760_v19  ;;  %v5662_v53 = vadd.f32 %v5661_v21, %v5660_v4  ;;  %v5767_v43 = vsel %vm1532_vm12, %v5705_v7, 0.0  ;;  %v7238_v6 = vsel %vm1581_vm0, %v12136_v60, 0 }
 0x397   : > { %v5763_v50 = vsel %vm1532_vm12, %v5703_v63, 0.0  ;;  %13161 = vmatpush3.bf16.msra.mxu1 %v7238_v6 }
 0x398   : > { %v5664_v47 = vadd.f32 %v5663_v30, %v5662_v53  ;;  %v5764_v12 = vadd.f32 %v5763_v50, %v5762_v34 }
 0x39a   : > { %v5666_v25 = vadd.f32 %v5665_v8, %v5664_v47  ;;  %v5766_v45 = vadd.f32 %v5765_v35, %v5764_v12 }
 0x39c   : > { %v5667_v46 = vrot.slane %v5666_v25, 4  ;;  %v5768_v38 = vadd.f32 %v5767_v43, %v5766_v45 }
 0x39e   : > { %v5668_v29 = vadd.f32 %v5667_v46, %v5666_v25  ;;  %v5769_v36 = vrot.slane %v5768_v38, 4 }
 0x3a0   : > { %v5669_v3 = vrot.slane %v5668_v29, 2  ;;  %v5770_v33 = vadd.f32 %v5769_v36, %v5768_v38 }
 0x3a2   : > { %v5670_v48 = vadd.f32 %v5669_v3, %v5668_v29  ;;  %v5771_v0 = vrot.slane %v5770_v33, 2 }
 0x3a4   : > { %v5671_v58 = vrot.slane %v5670_v48, 1  ;;  %v5772_v16 = vadd.f32 %v5771_v0, %v5770_v33 }
 0x3a6   : > { %v5672_v4 = vadd.f32 %v5671_v58, %v5670_v48  ;;  %v5773_v19 = vrot.slane %v5772_v16, 1 }
 0x3a8   : > { %v16046_v42 = vmul.f32 0.00390625, %v5672_v4  ;;  %v5774_v41 = vadd.f32 %v5773_v19, %v5772_v16 }
 0x3aa   : > { %v5775_v21 = vmul.f32 0.00390625, %v5774_v41  ;;  %v5776_v63 = vmul.f32 %v16046_v42, %v16046_v42  ;;  %v5807_v34 = vsub.f32 %v16014_v56, %v16046_v42  ;;  %v5808_v53 = vsub.f32 %v16023_v62, %v16046_v42 }
 0x3ab   : > { %v5779_v30 = vsub.f32 %v15819_v44, %v16046_v42  ;;  %v5780_v7 = vsub.f32 %v15825_v1, %v16046_v42  ;;  %v5781_v50 = vsub.f32 %v15817_v39, %v16046_v42  ;;  %v5782_v47 = vsub.f32 %v15823_v17, %v16046_v42  ;;  %v6738_v44 = vld [vmem:[%s18838_s2] sm:$0x3] }
 0x3ac   : > { %v5777_v12 = vsub.f32 %v5775_v21, %v5776_v63  ;;  %v5783_v35 = vsub.f32 %v15846_v40, %v16046_v42  ;;  %v5784_v56 = vsub.f32 %v15855_v13, %v16046_v42  ;;  %v5785_v62 = vsub.f32 %v15844_v20, %v16046_v42  ;;  %13988 = vmatprep.subr.msk.bf16.mxu1 %vm1581_vm0, %v6738_v44 }
 0x3ad   : > { %v5786_v39 = vsub.f32 %v15853_v59, %v16046_v42  ;;  %v5787_v17 = vsub.f32 %v15874_v2, %v16046_v42  ;;  %v5788_v1 = vsub.f32 %v15883_v18, %v16046_v42  ;;  %v5789_v40 = vsub.f32 %v15872_v51, %v16046_v42 }
 0x3ae   : > { %v5778_v13 = vmax.f32 %v5777_v12, 0.0  ;;  %v5790_v20 = vsub.f32 %v15881_v10, %v16046_v42  ;;  %v5791_v8 = vsub.f32 %v15902_v37, %v16046_v42  ;;  %v5792_v59 = vsub.f32 %v15911_v32, %v16046_v42 }
 0x3af   : > { %v5793_v2 = vsub.f32 %v15900_v57, %v16046_v42  ;;  %v5794_v18 = vsub.f32 %v15909_v15, %v16046_v42  ;;  %v5795_v51 = vsub.f32 %v15930_v14, %v16046_v42  ;;  %v5796_v25 = vsub.f32 %v15939_v55, %v16046_v42 }
 0x3b0   : > { %v5811_v45 = vadd.f32 1e-05, %v5778_v13  ;;  %v5797_v10 = vsub.f32 %v15928_v23, %v16046_v42  ;;  %v5798_v37 = vsub.f32 %v15937_v31, %v16046_v42  ;;  %v5799_v32 = vsub.f32 %v15958_v9, %v16046_v42 }
 0x3b1   : > { %v5800_v57 = vsub.f32 %v15967_v49, %v16046_v42  ;;  %v5801_v15 = vsub.f32 %v15956_v61, %v16046_v42  ;;  %v5802_v14 = vsub.f32 %v15965_v28, %v16046_v42  ;;  %v5803_v55 = vsub.f32 %v15986_v26, %v16046_v42 }
 0x3b2   : > { %14084 = vrsqrt.f32 %v5811_v45  ;;  %v5804_v23 = vsub.f32 %v15995_v54, %v16046_v42  ;;  %v5805_v31 = vsub.f32 %v15984_v22, %v16046_v42  ;;  %v5806_v9 = vsub.f32 %v15993_v24, %v16046_v42 }
 0x3b3   : > { %v5809_v49 = vsub.f32 %v16012_v5, %v16046_v42  ;;  %v5810_v61 = vsub.f32 %v16021_v11, %v16046_v42 }
 0x3bc   : > { %v14085_v28 = vpop.eup %14084 }
 0x3bd   : > { %v5841_v43 = vmul.f32 %v14085_v28, %v5807_v34  ;;  %v5842_v46 = vmul.f32 %v14085_v28, %v5808_v53  ;;  %v16118_v26 = vmul.f32 %v14085_v28, %v5779_v30  ;;  %v16120_v38 = vmul.f32 %v14085_v28, %v5780_v7 }
 0x3be   : > { %v16122_v54 = vmul.f32 %v14085_v28, %v5781_v50  ;;  %v16124_v29 = vmul.f32 %v14085_v28, %v5782_v47  ;;  %v16126_v22 = vmul.f32 %v14085_v28, %v5783_v35  ;;  %v16128_v24 = vmul.f32 %v14085_v28, %v5784_v56 }
 0x3bf   : > { %v5873_v36 = vmax.f32 %v5841_v43, 0.0  ;;  %v5874_v5 = vmax.f32 %v5842_v46, 0.0  ;;  %v16130_v3 = vmul.f32 %v14085_v28, %v5785_v62  ;;  %v16132_v11 = vmul.f32 %v14085_v28, %v5786_v39  ;;  %v6394_v39 = vld [vmem:[#allocation2 + $0xbc] sm:$0x1] }
 0x3c0   : > { %v16134_v33 = vmul.f32 %v14085_v28, %v5787_v17  ;;  %v16136_v60 = vmul.f32 %v14085_v28, %v5788_v1  ;;  %v16138_v48 = vmul.f32 %v14085_v28, %v5789_v40  ;;  %v16140_v0 = vmul.f32 %v14085_v28, %v5790_v20  ;;  %v6415_v17 = vld [vmem:[#allocation2 + $0xd4] sm:$0x1] }
 0x3c1   : > { %v16142_v6 = vpack.c.bf16 %v5873_v36, %v5873_v36  ;;  %v12545_v58 = vpack.c.bf16 %v5874_v5, %v5874_v5  ;;  %v16144_v16 = vmul.f32 %v14085_v28, %v5791_v8  ;;  %v16146_v4 = vmul.f32 %v14085_v28, %v5792_v59 }
 0x3c2   : > { %v16148_v19 = vmul.f32 %v14085_v28, %v5793_v2  ;;  %v16150_v42 = vmul.f32 %v14085_v28, %v5794_v18  ;;  %v16152_v41 = vmul.f32 %v14085_v28, %v5795_v51  ;;  %v16154_v21 = vmul.f32 %v14085_v28, %v5796_v25 }
 0x3c3   : > { %v6212_v63 = vshrl.u32 %v16142_v6, 16  ;;  %v6220_v34 = vshrl.u32 %v12545_v58, 16  ;;  %v6223_v53 = vshll.u32 %v12545_v58, 16  ;;  %v6215_v30 = vshll.u32 %v16142_v6, 16  ;;  %v6327_v6 = vld [vmem:[#allocation2 + $0x48] sm:$0xf] }
 0x3c4   : > { %v16158_v7 = vmul.f32 %v14085_v28, %v5797_v10  ;;  %v16160_v50 = vmul.f32 %v14085_v28, %v5798_v37  ;;  %v16162_v47 = vmul.f32 %v14085_v28, %v5799_v32  ;;  %v16164_v12 = vmul.f32 %v14085_v28, %v5800_v57  ;;  %v6404_v37 = vld [vmem:[#allocation2] sm:$0xf] }
 0x3c5   : > { %v16166_v35 = vrot.slane %v6212_v63, 7  ;;  %v6222_v56 = vrot.slane %v6220_v34, 7  ;;  %v16168_v62 = vmul.f32 %v14085_v28, %v5801_v15  ;;  %v16170_v44 = vmul.f32 %v14085_v28, %v5802_v14 }
 0x3c6   : > { %v16172_v1 = vmul.f32 %v14085_v28, %v5803_v55  ;;  %v16174_v40 = vmul.f32 %v14085_v28, %v5804_v23  ;;  %v16176_v13 = vmul.f32 %v14085_v28, %v5805_v31  ;;  %v16178_v20 = vmul.f32 %v14085_v28, %v5806_v9 }
 0x3c7   : > { %v6218_v8 = vrot.slane %v16166_v35, 4  ;;  %v6225_v59 = vor.u32 %v6223_v53, %v6222_v56  ;;  %v6227_v2 = vrot.slane %v6222_v56, 4  ;;  %v16181_v18 = vmul.f32 %v14085_v28, %v5809_v49 }
 0x3c8   : > { %v16183_v51 = vmul.f32 %v14085_v28, %v5810_v61  ;;  %v5845_v25 = vmax.f32 %v16118_v26, 0.0  ;;  %v5846_v45 = vmax.f32 %v16120_v38, 0.0  ;;  %v5847_v10 = vmax.f32 %v16122_v54, 0.0 }
 0x3c9   : > { %v6226_v32 = vsel %vm14217_vm6, %v6218_v8, %v6225_v59  ;;  %v6395_v15 = vsel %vm14231_vm8, %v6227_v2, %v6394_v39  ;;  %v6416_v14 = vsel %vm14231_vm8, %v6227_v2, %v6415_v17  ;;  %v5848_v55 = vmax.f32 %v16124_v29, 0.0 }
 0x3ca   : > { %6393 = vst.msk [vmem:[#allocation2 + $0xb8] sm:$0xf] %vm624_vm3, %v6226_v32  ;;  %6396 = vst [vmem:[#allocation2 + $0xbc] sm:$0x1] %v6395_v15  ;;  %v5849_v23 = vmax.f32 %v16126_v22, 0.0  ;;  %v5850_v31 = vmax.f32 %v16128_v24, 0.0  ;;  %v12518_v34 = vpack.c.bf16 %v5847_v10, %v5847_v10 }
 0x3cb   : > { %6414 = vst.msk [vmem:[#allocation2 + $0xd0] sm:$0xf] %vm624_vm3, %v6226_v32  ;;  %6417 = vst [vmem:[#allocation2 + $0xd4] sm:$0x1] %v6416_v14  ;;  %v5851_v9 = vmax.f32 %v16130_v3, 0.0  ;;  %v5852_v49 = vmax.f32 %v16132_v11, 0.0  ;;  %v12519_v53 = vpack.c.bf16 %v5848_v55, %v5848_v55 }
 0x3cc   : > { %v5853_v61 = vmax.f32 %v16134_v33, 0.0  ;;  %v5854_v28 = vmax.f32 %v16136_v60, 0.0  ;;  %v5855_v43 = vmax.f32 %v16138_v48, 0.0  ;;  %v5856_v46 = vmax.f32 %v16140_v0, 0.0 }
 0x3cd   : > { %v5857_v26 = vmax.f32 %v16144_v16, 0.0  ;;  %v5858_v38 = vmax.f32 %v16146_v4, 0.0  ;;  %v5859_v54 = vmax.f32 %v16148_v19, 0.0  ;;  %v5860_v29 = vmax.f32 %v16150_v42, 0.0 }
 0x3ce   : > { %v5861_v22 = vmax.f32 %v16152_v41, 0.0  ;;  %v5862_v24 = vmax.f32 %v16154_v21, 0.0  ;;  %v5863_v36 = vmax.f32 %v16158_v7, 0.0  ;;  %v5864_v5 = vmax.f32 %v16160_v50, 0.0 }
 0x3cf   : > { %v5865_v3 = vmax.f32 %v16162_v47, 0.0  ;;  %v5866_v11 = vmax.f32 %v16164_v12, 0.0  ;;  %v5867_v33 = vmax.f32 %v16168_v62, 0.0  ;;  %v5868_v60 = vmax.f32 %v16170_v44, 0.0 }
 0x3d0   : > { %v5869_v48 = vmax.f32 %v16172_v1, 0.0  ;;  %v5870_v0 = vmax.f32 %v16174_v40, 0.0  ;;  %v5871_v58 = vmax.f32 %v16176_v13, 0.0  ;;  %v5872_v16 = vmax.f32 %v16178_v20, 0.0  ;;  %v6362_v20 = vld [vmem:[#allocation2 + $0x84] sm:$0xf] }
 0x3d1   : > { %v5875_v4 = vmax.f32 %v16181_v18, 0.0  ;;  %v5876_v19 = vmax.f32 %v16183_v51, 0.0  ;;  %v12516_v42 = vpack.c.bf16 %v5845_v25, %v5845_v25  ;;  %v12517_v41 = vpack.c.bf16 %v5846_v45, %v5846_v45  ;;  %v6577_v21 = vld [vmem:[#allocation2 + $0xb8] sm:$0x8]  ;;  %v6697_v56 = vld [vmem:[#allocation2 + $0xbc] sm:$0x1] }
 0x3d2   : > { %v6579_v63 = vld [vmem:[#allocation2 + $0xd0] sm:$0x8]  ;;  %v16223_v7 = vpack.c.bf16 %v5849_v23, %v5849_v23  ;;  %v16225_v50 = vpack.c.bf16 %v5850_v31, %v5850_v31  ;;  %v12133_v47 = vrot.slane %v6577_v21, 11  ;;  %v16227_v62 = vpack.c.bf16 %v5851_v9, %v5851_v9  ;;  %v6703_v39 = vld [vmem:[#allocation2 + $0xd4] sm:$0x1] }
 0x3d3   : > { %v12135_v12 = vrot.slane %v6579_v63, 11  ;;  %v16229_v44 = vpack.c.bf16 %v5852_v49, %v5852_v49  ;;  %v16231_v17 = vpack.c.bf16 %v5853_v61, %v5853_v61  ;;  %v16233_v1 = vpack.c.bf16 %v5854_v28, %v5854_v28 }
 0x3d4   : > { %v16235_v40 = vpack.c.bf16 %v5855_v43, %v5855_v43  ;;  %v16237_v13 = vpack.c.bf16 %v5856_v46, %v5856_v46  ;;  %v6698_v8 = vsel %vm14270_vm9, %v12133_v47, %v6697_v56  ;;  %v16243_v2 = vpack.c.bf16 %v5857_v26, %v5857_v26 }
 0x3d5   : > { %v6704_v59 = vsel %vm14270_vm9, %v12135_v12, %v6703_v39  ;;  %v16245_v18 = vpack.c.bf16 %v5858_v38, %v5858_v38  ;;  %6699 = vst [vmem:[#allocation2 + $0xbc] sm:$0x1] %v6698_v8  ;;  %v16247_v51 = vpack.c.bf16 %v5859_v54, %v5859_v54  ;;  %v16249_v25 = vpack.c.bf16 %v5860_v29, %v5860_v29 }
 0x3d6   : > { %6705 = vst [vmem:[#allocation2 + $0xd4] sm:$0x1] %v6704_v59  ;;  %v16251_v45 = vpack.c.bf16 %v5861_v22, %v5861_v22  ;;  %v16253_v10 = vpack.c.bf16 %v5862_v24, %v5862_v24  ;;  %v16255_v32 = vpack.c.bf16 %v5863_v36, %v5863_v36  ;;  %v16257_v15 = vpack.c.bf16 %v5864_v5, %v5864_v5 }
 0x3d7   : > { %v16259_v14 = vpack.c.bf16 %v5865_v3, %v5865_v3  ;;  %v16261_v55 = vpack.c.bf16 %v5866_v11, %v5866_v11  ;;  %v16263_v23 = vpack.c.bf16 %v5867_v33, %v5867_v33  ;;  %v16265_v31 = vpack.c.bf16 %v5868_v60, %v5868_v60 }
 0x3d8   : > { %v16267_v9 = vpack.c.bf16 %v5869_v48, %v5869_v48  ;;  %v16269_v49 = vpack.c.bf16 %v5870_v0, %v5870_v0  ;;  %v16271_v61 = vpack.c.bf16 %v5871_v58, %v5871_v58  ;;  %v16273_v28 = vpack.c.bf16 %v5872_v16, %v5872_v16 }
 0x3d9   : > { %v16275_v43 = vpack.c.bf16 %v5875_v4, %v5875_v4  ;;  %v16277_v46 = vpack.c.bf16 %v5876_v19, %v5876_v19  ;;  %v5974_v26 = vshrl.u32 %v12516_v42, 16  ;;  %v5977_v38 = vshll.u32 %v12516_v42, 16 }
 0x3da   : > { %v5982_v54 = vshrl.u32 %v12517_v41, 16  ;;  %v5985_v29 = vshll.u32 %v12517_v41, 16  ;;  %v5991_v22 = vshrl.u32 %v12518_v34, 16  ;;  %v5994_v24 = vshll.u32 %v12518_v34, 16  ;;  %v6341_v41 = vld [vmem:[#allocation2 + $0x60] sm:$0xf] }
 0x3db   : > { %v5999_v36 = vshrl.u32 %v12519_v53, 16  ;;  %v6002_v5 = vshll.u32 %v12519_v53, 16  ;;  %v5976_v3 = vrot.slane %v5974_v26, 7  ;;  %v6008_v33 = vshrl.u32 %v16223_v7, 16 }
 0x3dc   : > { %v16279_v11 = vrot.slane %v5982_v54, 7  ;;  %v6011_v60 = vshll.u32 %v16223_v7, 16  ;;  %v5993_v48 = vrot.slane %v5991_v22, 7  ;;  %v6016_v58 = vshrl.u32 %v16225_v50, 16 }
 0x3dd   : > { %v16283_v0 = vrot.slane %v5999_v36, 7  ;;  %v6019_v16 = vshll.u32 %v16225_v50, 16  ;;  %v16287_v4 = vor.u32 %v5977_v38, %v5976_v3  ;;  %v5980_v19 = vrot.slane %v5976_v3, 4 }
 0x3de   : > { %v5987_v42 = vor.u32 %v5985_v29, %v16279_v11  ;;  %v16291_v21 = vor.u32 %v5994_v24, %v5993_v48  ;;  %v5997_v63 = vrot.slane %v5993_v48, 4  ;;  %v6010_v47 = vrot.slane %v6008_v33, 7 }
 0x3df   : > { %18987 = vst [vmem:[#allocation11_spill] sm:$0xff] %v16283_v0  ;;  %v6004_v34 = vor.u32 %v6002_v5, %v16283_v0  ;;  %v16297_v12 = vrot.slane %v6016_v58, 7  ;;  %v6025_v50 = vshrl.u32 %v16227_v62, 16  ;;  %v6028_v39 = vshll.u32 %v16227_v62, 16 }
 0x3e0   : > { %v5988_v7 = vsel %vm14217_vm6, %v5980_v19, %v5987_v42  ;;  %v6033_v8 = vshrl.u32 %v16229_v44, 16  ;;  %v6036_v59 = vshll.u32 %v16229_v44, 16  ;;  %v16306_v26 = vor.u32 %v6011_v60, %v6010_v47 }
 0x3e1   : > { %v6005_v56 = vsel %vm14217_vm6, %v5997_v63, %v6004_v34  ;;  %6295 = vst.msk [vmem:[#allocation2 + $0x10] sm:$0xf] %vm624_vm3, %v5988_v7  ;;  %v6014_v38 = vrot.slane %v6010_v47, 4  ;;  %v6021_v54 = vor.u32 %v6019_v16, %v16297_v12  ;;  %v6027_v22 = vrot.slane %v6025_v50, 7  ;;  %v6359_v16 = vld [vmem:[#allocation2 + $0x80] sm:$0x1] }
 0x3e2   : > { %6302 = vst.msk [vmem:[#allocation2 + $0x1c] sm:$0xf] %vm624_vm3, %v6005_v56  ;;  %6407 = vst.msk [vmem:[#allocation2 + $0x4] sm:$0xf] %vm624_vm3, %v6005_v56  ;;  %v16312_v24 = vrot.slane %v6033_v8, 7  ;;  %v6042_v62 = vshrl.u32 %v16231_v17, 16 }
 0x3e3   : > { %v6045_v44 = vshll.u32 %v16231_v17, 16  ;;  %v6022_v36 = vsel %vm14217_vm6, %v6014_v38, %v6021_v54  ;;  %v6050_v5 = vshrl.u32 %v16233_v1, 16  ;;  %v6053_v3 = vshll.u32 %v16233_v1, 16  ;;  %v6338_v8 = vld [vmem:[#allocation2 + $0x5c] sm:$0x1] }
 0x3e4   : > { %v6059_v33 = vshrl.u32 %v16235_v40, 16  ;;  %v16321_v60 = vor.u32 %v6028_v39, %v6027_v22  ;;  %v6031_v48 = vrot.slane %v6027_v22, 4  ;;  %v6038_v58 = vor.u32 %v6036_v59, %v16312_v24  ;;  %6309 = vst.msk [vmem:[#allocation2 + $0x28] sm:$0xf] %vm624_vm3, %v6022_v36 }
 0x3e5   : > { %v6044_v19 = vrot.slane %v6042_v62, 7  ;;  %v16326_v17 = vrot.slane %v6050_v5, 7  ;;  %v6062_v63 = vshll.u32 %v16235_v40, 16  ;;  %v6067_v34 = vshrl.u32 %v16237_v13, 16 }
 0x3e6   : > { %v6061_v42 = vrot.slane %v6059_v33, 7  ;;  %v6039_v1 = vsel %vm14217_vm6, %v6031_v48, %v6038_v58  ;;  %v6070_v7 = vshll.u32 %v16237_v13, 16  ;;  %v6076_v47 = vshrl.u32 %v16243_v2, 16 }
 0x3e7   : > { %v16334_v50 = vor.u32 %v6045_v44, %v6044_v19  ;;  %v6048_v56 = vrot.slane %v6044_v19, 4  ;;  %v6055_v39 = vor.u32 %v6053_v3, %v16326_v17  ;;  %6316 = vst.msk [vmem:[#allocation2 + $0x34] sm:$0xf] %vm624_vm3, %v6039_v1  ;;  %v16341_v38 = vrot.slane %v6067_v34, 7 }
 0x3e8   : > { %v16339_v59 = vor.u32 %v6062_v63, %v6061_v42  ;;  %v6065_v40 = vrot.slane %v6061_v42, 4  ;;  %v6078_v54 = vrot.slane %v6076_v47, 7  ;;  %v6079_v22 = vshll.u32 %v16243_v2, 16 }
 0x3e9   : > { %v6056_v13 = vsel %vm14217_vm6, %v6048_v56, %v6055_v39  ;;  %v6084_v62 = vshrl.u32 %v16245_v18, 16  ;;  %v6087_v44 = vshll.u32 %v16245_v18, 16  ;;  %v6072_v36 = vor.u32 %v6070_v7, %v16341_v38  ;;  %v6310_v7 = vld [vmem:[#allocation2 + $0x2c] sm:$0x1] }
 0x3ea   : > { %v6082_v3 = vrot.slane %v6078_v54, 4  ;;  %v6093_v33 = vshrl.u32 %v16247_v51, 16  ;;  %6323 = vst.msk [vmem:[#allocation2 + $0x40] sm:$0xf] %vm624_vm3, %v6056_v13  ;;  %v16352_v48 = vor.u32 %v6079_v22, %v6078_v54  ;;  %v6096_v19 = vshll.u32 %v16247_v51, 16 }
 0x3eb   : > { %v16354_v58 = vrot.slane %v6084_v62, 7  ;;  %v6101_v2 = vshrl.u32 %v16249_v25, 16  ;;  %v6073_v18 = vsel %vm14217_vm6, %v6065_v40, %v6072_v36  ;;  %v6104_v63 = vshll.u32 %v16249_v25, 16  ;;  %v6306_v22 = vld [vmem:[#allocation2 + $0x24] sm:$0xf] }
 0x3ec   : > { %v6095_v42 = vrot.slane %v6093_v33, 7  ;;  %v6110_v1 = vshrl.u32 %v16251_v45, 16  ;;  %v6113_v56 = vshll.u32 %v16251_v45, 16  ;;  %6330 = vst.msk [vmem:[#allocation2 + $0x4c] sm:$0xf] %vm624_vm3, %v6073_v18  ;;  %v6118_v40 = vshrl.u32 %v16253_v10, 16 }
 0x3ed   : > { %v6089_v34 = vor.u32 %v6087_v44, %v16354_v58  ;;  %v16364_v47 = vrot.slane %v6101_v2, 7  ;;  %v6121_v62 = vshll.u32 %v16253_v10, 16  ;;  %v6127_v33 = vshrl.u32 %v16255_v32, 16 }
 0x3ee   : > { %v16368_v51 = vor.u32 %v6096_v19, %v6095_v42  ;;  %v6099_v39 = vrot.slane %v6095_v42, 4  ;;  %v6112_v54 = vrot.slane %v6110_v1, 7  ;;  %v16378_v36 = vrot.slane %v6118_v40, 7  ;;  %v6313_v42 = vld [vmem:[#allocation2 + $0x30] sm:$0xf] }
 0x3ef   : > { %v6090_v25 = vsel %vm14217_vm6, %v6082_v3, %v6089_v34  ;;  %v6106_v13 = vor.u32 %v6104_v63, %v16364_v47  ;;  %v6130_v3 = vshll.u32 %v16255_v32, 16  ;;  %v6135_v2 = vshrl.u32 %v16257_v15, 16 }
 0x3f0   : > { %v16376_v44 = vor.u32 %v6113_v56, %v6112_v54  ;;  %v6116_v45 = vrot.slane %v6112_v54, 4  ;;  %6337 = vst.msk [vmem:[#allocation2 + $0x58] sm:$0xf] %vm624_vm3, %v6090_v25  ;;  %v6138_v18 = vshll.u32 %v16257_v15, 16  ;;  %v6123_v10 = vor.u32 %v6121_v62, %v16378_v36 }
 0x3f1   : > { %v6107_v19 = vsel %vm14217_vm6, %v6099_v39, %v6106_v13  ;;  %v6129_v63 = vrot.slane %v6127_v33, 7  ;;  %v6144_v1 = vshrl.u32 %v16259_v14, 16  ;;  %v16391_v34 = vrot.slane %v6135_v2, 7 }
 0x3f2   : > { %6344 = vst.msk [vmem:[#allocation2 + $0x64] sm:$0xf] %vm624_vm3, %v6107_v19  ;;  %v6147_v56 = vshll.u32 %v16259_v14, 16  ;;  %v6152_v39 = vshrl.u32 %v16261_v55, 16  ;;  %v6155_v32 = vshll.u32 %v16261_v55, 16  ;;  %v6124_v15 = vsel %vm14217_vm6, %v6116_v45, %v6123_v10 }
 0x3f3   : > { %v16398_v54 = vor.u32 %v6130_v3, %v6129_v63  ;;  %v6133_v40 = vrot.slane %v6129_v63, 4  ;;  %v6146_v25 = vrot.slane %v6144_v1, 7  ;;  %v6140_v13 = vor.u32 %v6138_v18, %v16391_v34  ;;  %6351 = vst.msk [vmem:[#allocation2 + $0x70] sm:$0xf] %vm624_vm3, %v6124_v15 }
 0x3f4   : > { %v16402_v33 = vrot.slane %v6152_v39, 7  ;;  %v6161_v19 = vshrl.u32 %v16263_v23, 16  ;;  %v6164_v2 = vshll.u32 %v16263_v23, 16  ;;  %v6169_v45 = vshrl.u32 %v16265_v31, 16 }
 0x3f5   : > { %v16406_v14 = vor.u32 %v6147_v56, %v6146_v25  ;;  %v6150_v55 = vrot.slane %v6146_v25, 4  ;;  %v6141_v3 = vsel %vm14217_vm6, %v6133_v40, %v6140_v13  ;;  %v6172_v39 = vshll.u32 %v16265_v31, 16 }
 0x3f6   : > { %v6157_v18 = vor.u32 %v6155_v32, %v16402_v33  ;;  %v6163_v63 = vrot.slane %v6161_v19, 7  ;;  %v16414_v1 = vrot.slane %v6169_v45, 7  ;;  %v6178_v56 = vshrl.u32 %v16267_v9, 16  ;;  %6358 = vst.msk [vmem:[#allocation2 + $0x7c] sm:$0xf] %vm624_vm3, %v6141_v3 }
 0x3f7   : > { %v6181_v15 = vshll.u32 %v16267_v9, 16  ;;  %v6186_v32 = vshrl.u32 %v16269_v49, 16  ;;  %v6189_v31 = vshll.u32 %v16269_v49, 16  ;;  %v6195_v3 = vshrl.u32 %v16271_v61, 16 }
 0x3f8   : > { %v6158_v23 = vsel %vm14217_vm6, %v6150_v55, %v6157_v18  ;;  %v16422_v25 = vor.u32 %v6164_v2, %v6163_v63  ;;  %v6167_v40 = vrot.slane %v6163_v63, 4  ;;  %v6174_v13 = vor.u32 %v6172_v39, %v16414_v1  ;;  %v6299_v18 = vld [vmem:[#allocation2 + $0x18] sm:$0xf]  ;;  %v6296_v63 = vld [vmem:[#allocation2 + $0x14] sm:$0x1] }
 0x3f9   : > { %v6180_v45 = vrot.slane %v6178_v56, 7  ;;  %6365 = vst.msk [vmem:[#allocation2 + $0x88] sm:$0xf] %vm624_vm3, %v6158_v23  ;;  %v16429_v9 = vrot.slane %v6186_v32, 7  ;;  %v6198_v55 = vshll.u32 %v16271_v61, 16  ;;  %v6203_v2 = vshrl.u32 %v16273_v28, 16 }
 0x3fa   : > { %v6175_v39 = vsel %vm14217_vm6, %v6167_v40, %v6174_v13  ;;  %v6206_v49 = vshll.u32 %v16273_v28, 16  ;;  %v6197_v19 = vrot.slane %v6195_v3, 7  ;;  %v6303_v61 = vld [vmem:[#allocation2 + $0x20] sm:$0x1]  ;;  %v6229_v28 = vshrl.u32 %v16275_v43, 16 }
 0x3fb   : > { %v16436_v10 = vor.u32 %v6181_v15, %v6180_v45  ;;  %v6184_v56 = vrot.slane %v6180_v45, 4  ;;  %v6191_v23 = vor.u32 %v6189_v31, %v16429_v9  ;;  %v16441_v62 = vrot.slane %v6203_v2, 7  ;;  %6372 = vst.msk [vmem:[#allocation2 + $0x94] sm:$0xf] %vm624_vm3, %v6175_v39  ;;  %v6317_v45 = vld [vmem:[#allocation2 + $0x38] sm:$0x1] }
 0x3fc   : > { %v16447_v15 = vor.u32 %v6215_v30, %v16166_v35  ;;  %v6232_v40 = vshll.u32 %v16275_v43, 16  ;;  %v6237_v13 = vshrl.u32 %v16277_v46, 16  ;;  %v6320_v31 = vld [vmem:[#allocation2 + $0x3c] sm:$0xf]  ;;  %v6324_v3 = vld [vmem:[#allocation2 + $0x44] sm:$0x1]  ;;  %v16454_v39 = vor.u32 %v6198_v55, %v6197_v19 }
 0x3fd   : > { %18988 = vst [vmem:[#allocation12_spill] sm:$0xff] %v16441_v62  ;;  %v6192_v2 = vsel %vm14217_vm6, %v6184_v56, %v6191_v23  ;;  %v6201_v32 = vrot.slane %v6197_v19, 4  ;;  %v6208_v5 = vor.u32 %v6206_v49, %v16441_v62  ;;  %v6331_v30 = vld [vmem:[#allocation2 + $0x50] sm:$0x1]  ;;  %v6334_v35 = vld [vmem:[#allocation2 + $0x54] sm:$0xf] }
 0x3fe   : > { %18989 = vst [vmem:[#allocation13_spill] sm:$0xff] %v16447_v15  ;;  %v6231_v43 = vrot.slane %v6229_v28, 7  ;;  %v16458_v29 = vrot.slane %v6237_v13, 7  ;;  %v6240_v53 = vshll.u32 %v16277_v46, 16  ;;  %6379 = vst.msk [vmem:[#allocation2 + $0xa0] sm:$0xf] %vm624_vm3, %v6192_v2  ;;  %v6300_v46 = vsel %vm14225_vm7, %v16291_v21, %v6299_v18 }
 0x3ff   : > { %v6345_v56 = vld [vmem:[#allocation2 + $0x68] sm:$0x1]  ;;  %v6348_v55 = vld [vmem:[#allocation2 + $0x6c] sm:$0xf]  ;;  %v6352_v23 = vld [vmem:[#allocation2 + $0x74] sm:$0x1]  ;;  %v6209_v19 = vsel %vm14217_vm6, %v6201_v32, %v6208_v5 }
 0x400   : > { %v14112_v49 = vld [vmem:[#allocation2 + $0xc] sm:$0xf]  ;;  %v18991_v28 = vrot.slane %v16279_v11, 4  ;;  %v6355_v2 = vld [vmem:[#allocation2 + $0x78] sm:$0xf]  ;;  %v16474_v62 = vor.u32 %v6232_v40, %v6231_v43  ;;  %v6235_v5 = vrot.slane %v6231_v43, 4  ;;  %v6242_v32 = vor.u32 %v6240_v53, %v16458_v29 }
 0x401   : > { %v6293_v52 = vsel %vm14225_vm7, %v16287_v4, %v14112_v49  ;;  %v6366_v15 = vld [vmem:[#allocation2 + $0x8c] sm:$0x1]  ;;  %6301 = vst [vmem:[#allocation2 + $0x18] sm:$0xf] %v6300_v46  ;;  %6386 = vst.msk [vmem:[#allocation2 + $0xac] sm:$0xf] %vm624_vm3, %v6209_v19  ;;  %v6307_v53 = vsel %vm14225_vm7, %v16306_v26, %v6306_v22  ;;  %v6314_v19 = vsel %vm14225_vm7, %v16321_v60, %v6313_v42 }
 0x402   : > { %v6297_v13 = vsel %vm14231_vm8, %v18991_v28, %v6296_v63  ;;  %6294 = vst [vmem:[#allocation2 + $0xc] sm:$0xf] %v6293_v52  ;;  %v6369_v11 = vld [vmem:[#allocation2 + $0x90] sm:$0xf]  ;;  %v6373_v63 = vld [vmem:[#allocation2 + $0x98] sm:$0x1]  ;;  %v6321_v60 = vsel %vm14225_vm7, %v16334_v50, %v6320_v31 }
 0x403   : > { %6298 = vst [vmem:[#allocation2 + $0x14] sm:$0x1] %v6297_v13  ;;  %v6376_v49 = vld [vmem:[#allocation2 + $0x9c] sm:$0xf]  ;;  %v6380_v18 = vld [vmem:[#allocation2 + $0xa4] sm:$0x1] }
 0x404   : > { %v18992_v28 = vrot.slane %v16283_v0, 4  ;;  %v18993_v43 = vrot.slane %v16297_v12, 4  ;;  %v6383_v13 = vld [vmem:[#allocation2 + $0xa8] sm:$0xf]  ;;  %v6387_v46 = vld [vmem:[#allocation2 + $0xb0] sm:$0x1] }
 0x405   : > { %v16493_v4 = vld [vmem:[#allocation2 + $0xc0] sm:$0xf]  ;;  %v6390_v0 = vld [vmem:[#allocation2 + $0xb4] sm:$0xf]  ;;  %6308 = vst [vmem:[#allocation2 + $0x24] sm:$0xf] %v6307_v53 }
 0x406   : > { %v6304_v40 = vsel %vm14231_vm8, %v18992_v28, %v6303_v61  ;;  %v6311_v52 = vsel %vm14231_vm8, %v18993_v43, %v6310_v7  ;;  %v6243_v61 = vsel %vm14217_vm6, %v6235_v5, %v6242_v32  ;;  %6315 = vst [vmem:[#allocation2 + $0x30] sm:$0xf] %v6314_v19  ;;  %v18994_v12 = vrot.slane %v16312_v24, 4  ;;  %v6408_v42 = vld [vmem:[#allocation2 + $0x8] sm:$0x1] }
 0x407   : > { %6305 = vst [vmem:[#allocation2 + $0x20] sm:$0x1] %v6304_v40  ;;  %6312 = vst [vmem:[#allocation2 + $0x2c] sm:$0x1] %v6311_v52  ;;  %v18995_v7 = vrot.slane %v16326_v17, 4  ;;  %v6328_v24 = vsel %vm14225_vm7, %v16339_v59, %v6327_v6  ;;  %v6335_v17 = vsel %vm14225_vm7, %v16352_v48, %v6334_v35  ;;  %v18997_v31 = vrot.slane %v16354_v58, 4 }
 0x408   : > { %v6318_v26 = vsel %vm14231_vm8, %v18994_v12, %v6317_v45  ;;  %v6411_v5 = vld [vmem:[#allocation2 + $0xcc] sm:$0xf]  ;;  %6322 = vst [vmem:[#allocation2 + $0x3c] sm:$0xf] %v6321_v60  ;;  %v18996_v45 = vrot.slane %v16341_v38, 4  ;;  %v6342_v59 = vsel %vm14225_vm7, %v16368_v51, %v6341_v41  ;;  %v18998_v38 = vrot.slane %v16364_v47, 4 }
 0x409   : > { %v6325_v22 = vsel %vm14231_vm8, %v18995_v7, %v6324_v3  ;;  %6319 = vst [vmem:[#allocation2 + $0x38] sm:$0x1] %v6318_v26  ;;  %v6339_v3 = vsel %vm14231_vm8, %v18997_v31, %v6338_v8  ;;  %6400 = vst.msk [vmem:[#allocation2 + $0xc4] sm:$0xf] %vm624_vm3, %v6243_v61  ;;  %v6349_v58 = vsel %vm14225_vm7, %v16376_v44, %v6348_v55  ;;  %v18999_v8 = vrot.slane %v16378_v36, 4 }
 0x40a   : > { %6326 = vst [vmem:[#allocation2 + $0x44] sm:$0x1] %v6325_v22  ;;  %v6332_v50 = vsel %vm14231_vm8, %v18996_v45, %v6331_v30  ;;  %6329 = vst [vmem:[#allocation2 + $0x48] sm:$0xf] %v6328_v24  ;;  %v6346_v48 = vsel %vm14231_vm8, %v18998_v38, %v6345_v56  ;;  %v6401_v30 = vld [vmem:[#allocation2 + $0xc8] sm:$0x1]  ;;  %v6356_v41 = vsel %vm14225_vm7, %v16398_v54, %v6355_v2 }
 0x40b   : > { %6333 = vst [vmem:[#allocation2 + $0x50] sm:$0x1] %v6332_v50  ;;  %6336 = vst [vmem:[#allocation2 + $0x54] sm:$0xf] %v6335_v17  ;;  %v6353_v6 = vsel %vm14231_vm8, %v18999_v8, %v6352_v23  ;;  %v19000_v47 = vrot.slane %v16391_v34, 4  ;;  %v6363_v44 = vsel %vm14225_vm7, %v16406_v14, %v6362_v20  ;;  %v19001_v36 = vrot.slane %v16402_v33, 4 }
 0x40c   : > { %6340 = vst [vmem:[#allocation2 + $0x5c] sm:$0x1] %v6339_v3  ;;  %6343 = vst [vmem:[#allocation2 + $0x60] sm:$0xf] %v6342_v59  ;;  %v16551_v56 = vld [vmem:[#allocation2 + $0x4] sm:$0x8]  ;;  %v6370_v34 = vsel %vm14225_vm7, %v16422_v25, %v6369_v11  ;;  %v6377_v54 = vsel %vm14225_vm7, %v16436_v10, %v6376_v49  ;;  %v6405_v11 = vsel %vm14225_vm7, %v16291_v21, %v6404_v37 }
 0x40d   : > { %6347 = vst [vmem:[#allocation2 + $0x68] sm:$0x1] %v6346_v48  ;;  %6350 = vst [vmem:[#allocation2 + $0x6c] sm:$0xf] %v6349_v58  ;;  %v6360_v51 = vsel %vm14231_vm8, %v19000_v47, %v6359_v16  ;;  %v6367_v35 = vsel %vm14231_vm8, %v19001_v36, %v6366_v15  ;;  %v19002_v16 = vrot.slane %v16414_v1, 4  ;;  %v19003_v33 = vrot.slane %v16429_v9, 4 }
 0x40e   : > { %6354 = vst [vmem:[#allocation2 + $0x74] sm:$0x1] %v6353_v6  ;;  %6357 = vst [vmem:[#allocation2 + $0x78] sm:$0xf] %v6356_v41  ;;  %v6384_v1 = vsel %vm14225_vm7, %v16454_v39, %v6383_v13  ;;  %v19004_v25 = vld [vmem:[#allocation12_spill] sm:$0xff]  ;;  %v19006_v23 = vld [vmem:[#allocation13_spill] sm:$0xff]  ;;  %v6398_v9 = vsel %vm14225_vm7, %v16474_v62, %v16493_v4 }
 0x40f   : > { %6361 = vst [vmem:[#allocation2 + $0x80] sm:$0x1] %v6360_v51  ;;  %6364 = vst [vmem:[#allocation2 + $0x84] sm:$0xf] %v6363_v44  ;;  %v6374_v20 = vsel %vm14231_vm8, %v19002_v16, %v6373_v63  ;;  %v6381_v14 = vsel %vm14231_vm8, %v19003_v33, %v6380_v18  ;;  %v19005_v15 = vrot.slane %v19004_v25, 4  ;;  %v6391_v10 = vsel %vm14225_vm7, %v19006_v23, %v6390_v0 }
 0x410   : > { %6368 = vst [vmem:[#allocation2 + $0x8c] sm:$0x1] %v6367_v35  ;;  %6371 = vst [vmem:[#allocation2 + $0x90] sm:$0xf] %v6370_v34  ;;  %v6420_v2 = vld [vmem:[#allocation2 + $0x18] sm:$0x2]  ;;  %v19009_v0 = vmov %v18992_v28  ;;  %v6412_v62 = vsel %vm14225_vm7, %v19006_v23, %v6411_v5 }
 0x411   : > { %6375 = vst [vmem:[#allocation2 + $0x98] sm:$0x1] %v6374_v20  ;;  %6378 = vst [vmem:[#allocation2 + $0x9c] sm:$0xf] %v6377_v54  ;;  %v6388_v55 = vsel %vm14231_vm8, %v19005_v15, %v6387_v46  ;;  %v19007_v39 = vrot.slane %v16458_v29, 4  ;;  %v6409_v49 = vsel %vm14231_vm8, %v19009_v0, %v6408_v42  ;;  %v12102_v40 = vrot.slane %v6420_v2, 9 }
 0x412   : > { %6382 = vst [vmem:[#allocation2 + $0xa4] sm:$0x1] %v6381_v14  ;;  %6385 = vst [vmem:[#allocation2 + $0xa8] sm:$0xf] %v6384_v1  ;;  %v6514_v4 = vld [vmem:[#allocation2 + $0x18] sm:$0x1] }
 0x413   : > { %6389 = vst [vmem:[#allocation2 + $0xb0] sm:$0x1] %v6388_v55  ;;  %6392 = vst [vmem:[#allocation2 + $0xb4] sm:$0xf] %v6391_v10  ;;  %v6402_v32 = vsel %vm14231_vm8, %v19007_v39, %v6401_v30  ;;  %v6563_v18 = vld [vmem:[#allocation2 + $0x10] sm:$0x8]  ;;  %v6515_v12 = vsel %vm14231_vm8, %v12102_v40, %v6514_v4 }
 0x414   : > { %6399 = vst [vmem:[#allocation2 + $0xc0] sm:$0xf] %v6398_v9  ;;  %6403 = vst [vmem:[#allocation2 + $0xc8] sm:$0x1] %v6402_v32  ;;  %v6421_v29 = vld [vmem:[#allocation2 + $0x24] sm:$0x2] }
 0x415   : > { %6406 = vst [vmem:[#allocation2] sm:$0xf] %v6405_v11  ;;  %6410 = vst [vmem:[#allocation2 + $0x8] sm:$0x1] %v6409_v49  ;;  %v6422_v28 = vld [vmem:[#allocation2 + $0x30] sm:$0x2] }
 0x416   : > { %6413 = vst [vmem:[#allocation2 + $0xcc] sm:$0xf] %v6412_v62  ;;  %v12118_v21 = vrot.slane %v16551_v56, 11  ;;  %v6423_v53 = vld [vmem:[#allocation2 + $0x3c] sm:$0x2]  ;;  %v12103_v43 = vrot.slane %v6421_v29, 9 }
 0x417   : > { %v12104_v52 = vrot.slane %v6422_v28, 9  ;;  %v6517_v19 = vld [vmem:[#allocation2 + $0x24] sm:$0x1]  ;;  %v6655_v13 = vld [vmem:[#allocation2 + $0x14] sm:$0x1]  ;;  %v12105_v61 = vrot.slane %v6423_v53, 9 }
 0x418   : > { %v6424_v46 = vld [vmem:[#allocation2 + $0x48] sm:$0x2]  ;;  %v6425_v27 = vld [vmem:[#allocation2 + $0x54] sm:$0x2]  ;;  %v12119_v26 = vrot.slane %v6563_v18, 11  ;;  %v6518_v42 = vsel %vm14231_vm8, %v12103_v43, %v6517_v19 }
 0x419   : > { %v6426_v60 = vld [vmem:[#allocation2 + $0x60] sm:$0x2]  ;;  %v6427_v7 = vld [vmem:[#allocation2 + $0x6c] sm:$0x2]  ;;  %v12106_v22 = vrot.slane %v6424_v46, 9  ;;  %v12107_v37 = vrot.slane %v6425_v27, 9 }
 0x41a   : > { %6516 = vst [vmem:[#allocation2 + $0x18] sm:$0x1] %v6515_v12  ;;  %v6428_v5 = vld [vmem:[#allocation2 + $0x78] sm:$0x2]  ;;  %v6429_v24 = vld [vmem:[#allocation2 + $0x84] sm:$0x2]  ;;  %v6656_v31 = vsel %vm14270_vm9, %v12119_v26, %v6655_v13 }
 0x41b   : > { %v12108_v45 = vrot.slane %v6426_v60, 9  ;;  %v12109_v50 = vrot.slane %v6427_v7, 9  ;;  %6519 = vst [vmem:[#allocation2 + $0x24] sm:$0x1] %v6518_v42  ;;  %v6430_v3 = vld [vmem:[#allocation2 + $0x90] sm:$0x2] }
 0x41c   : > { %v6431_v59 = vld [vmem:[#allocation2 + $0x9c] sm:$0x2]  ;;  %v12110_v38 = vrot.slane %v6428_v5, 9  ;;  %v12111_v48 = vrot.slane %v6429_v24, 9  ;;  %6657 = vst [vmem:[#allocation2 + $0x14] sm:$0x1] %v6656_v31 }
 0x41d   : > { %v6432_v58 = vld [vmem:[#allocation2 + $0xa8] sm:$0x2]  ;;  %v6433_v8 = vld [vmem:[#allocation2 + $0xb4] sm:$0x2]  ;;  %v12112_v6 = vrot.slane %v6430_v3, 9  ;;  %v12113_v30 = vrot.slane %v6431_v59, 9 }
 0x41e   : > { %v6418_v41 = vld [vmem:[#allocation2] sm:$0x2]  ;;  %v6435_v47 = vld [vmem:[#allocation2 + $0xcc] sm:$0x2]  ;;  %v12114_v51 = vrot.slane %v6432_v58, 9  ;;  %v12115_v44 = vrot.slane %v6433_v8, 9 }
 0x41f   : > { %v12100_v36 = vrot.slane %v6418_v41, 9  ;;  %v12117_v35 = vrot.slane %v6435_v47, 9  ;;  %v6508_v34 = vld [vmem:[#allocation2] sm:$0x1]  ;;  %v6520_v16 = vld [vmem:[#allocation2 + $0x30] sm:$0x1] }
 0x420   : > { %v16602_v20 = vld [vmem:[#allocation2 + $0x1c] sm:$0x8]  ;;  %v6521_v54 = vsel %vm14231_vm8, %v12104_v52, %v6520_v16  ;;  %v6523_v33 = vld [vmem:[#allocation2 + $0x3c] sm:$0x1]  ;;  %v6526_v14 = vld [vmem:[#allocation2 + $0x48] sm:$0x1] }
 0x421   : > { %v6529_v1 = vld [vmem:[#allocation2 + $0x54] sm:$0x1]  ;;  %v16606_v25 = vld [vmem:[#allocation2 + $0x28] sm:$0x8]  ;;  %v16608_v15 = vld [vmem:[#allocation2 + $0x34] sm:$0x8]  ;;  %v6509_v10 = vsel %vm14231_vm8, %v12100_v36, %v6508_v34  ;;  %v6524_v9 = vsel %vm14231_vm8, %v12105_v61, %v6523_v33  ;;  %v6527_v2 = vsel %vm14231_vm8, %v12106_v22, %v6526_v14 }
 0x422   : > { %v16610_v55 = vld [vmem:[#allocation2 + $0x40] sm:$0x8]  ;;  %v16612_v23 = vld [vmem:[#allocation2 + $0x4c] sm:$0x8]  ;;  %6522 = vst [vmem:[#allocation2 + $0x30] sm:$0x1] %v6521_v54  ;;  %v6530_v39 = vsel %vm14231_vm8, %v12107_v37, %v6529_v1 }
 0x423   : > { %v6532_v32 = vld [vmem:[#allocation2 + $0x60] sm:$0x1]  ;;  %v6535_v11 = vld [vmem:[#allocation2 + $0x6c] sm:$0x1]  ;;  %v6538_v63 = vld [vmem:[#allocation2 + $0x78] sm:$0x1] }
 0x424   : > { %v16622_v0 = vld [vmem:[#allocation2 + $0x58] sm:$0x8]  ;;  %v16624_v49 = vld [vmem:[#allocation2 + $0x64] sm:$0x8]  ;;  %v16626_v62 = vld [vmem:[#allocation2 + $0x70] sm:$0x8]  ;;  %v6533_v18 = vsel %vm14231_vm8, %v12108_v45, %v6532_v32  ;;  %v6536_v29 = vsel %vm14231_vm8, %v12109_v50, %v6535_v11  ;;  %v6539_v28 = vsel %vm14231_vm8, %v12110_v38, %v6538_v63 }
 0x425   : > { %v16628_v4 = vld [vmem:[#allocation2 + $0x7c] sm:$0x8]  ;;  %6510 = vst [vmem:[#allocation2] sm:$0x1] %v6509_v10  ;;  %6525 = vst [vmem:[#allocation2 + $0x3c] sm:$0x1] %v6524_v9 }
 0x426   : > { %6528 = vst [vmem:[#allocation2 + $0x48] sm:$0x1] %v6527_v2  ;;  %6531 = vst [vmem:[#allocation2 + $0x54] sm:$0x1] %v6530_v39  ;;  %v6541_v40 = vld [vmem:[#allocation2 + $0x84] sm:$0x1] }
 0x427   : > { %v6544_v53 = vld [vmem:[#allocation2 + $0x90] sm:$0x1]  ;;  %v6547_v43 = vld [vmem:[#allocation2 + $0x9c] sm:$0x1]  ;;  %v16636_v52 = vld [vmem:[#allocation2 + $0x88] sm:$0x8]  ;;  %v6542_v46 = vsel %vm14231_vm8, %v12111_v48, %v6541_v40 }
 0x428   : > { %v16638_v19 = vld [vmem:[#allocation2 + $0x94] sm:$0x8]  ;;  %v16640_v13 = vld [vmem:[#allocation2 + $0xa0] sm:$0x8]  ;;  %6534 = vst [vmem:[#allocation2 + $0x60] sm:$0x1] %v6533_v18  ;;  %v6545_v27 = vsel %vm14231_vm8, %v12112_v6, %v6544_v53  ;;  %v6548_v61 = vsel %vm14231_vm8, %v12113_v30, %v6547_v43 }
 0x429   : > { %6537 = vst [vmem:[#allocation2 + $0x6c] sm:$0x1] %v6536_v29  ;;  %6540 = vst [vmem:[#allocation2 + $0x78] sm:$0x1] %v6539_v28  ;;  %v6550_v12 = vld [vmem:[#allocation2 + $0xa8] sm:$0x1] }
 0x42a   : > { %v6553_v26 = vld [vmem:[#allocation2 + $0xb4] sm:$0x1]  ;;  %v6559_v60 = vld [vmem:[#allocation2 + $0xcc] sm:$0x1]  ;;  %6543 = vst [vmem:[#allocation2 + $0x84] sm:$0x1] %v6542_v46  ;;  %v6551_v7 = vsel %vm14231_vm8, %v12114_v51, %v6550_v12 }
 0x42b   : > { %6546 = vst [vmem:[#allocation2 + $0x90] sm:$0x1] %v6545_v27  ;;  %6549 = vst [vmem:[#allocation2 + $0x9c] sm:$0x1] %v6548_v61  ;;  %v6554_v22 = vsel %vm14231_vm8, %v12115_v44, %v6553_v26  ;;  %v6560_v37 = vsel %vm14231_vm8, %v12117_v35, %v6559_v60  ;;  %v16654_v42 = vld [vmem:[#allocation2 + $0xac] sm:$0x8] }
 0x42c   : > { %v16656_v5 = vld [vmem:[#allocation2 + $0xc4] sm:$0x8]  ;;  %v12120_v24 = vrot.slane %v16602_v20, 11  ;;  %6552 = vst [vmem:[#allocation2 + $0xa8] sm:$0x1] %v6551_v7  ;;  %v12121_v45 = vrot.slane %v16606_v25, 11 }
 0x42d   : > { %6555 = vst [vmem:[#allocation2 + $0xb4] sm:$0x1] %v6554_v22  ;;  %6561 = vst [vmem:[#allocation2 + $0xcc] sm:$0x1] %v6560_v37  ;;  %v12122_v50 = vrot.slane %v16608_v15, 11  ;;  %v12123_v31 = vrot.slane %v16610_v55, 11 }
 0x42e   : > { %v12124_v3 = vrot.slane %v16612_v23, 11  ;;  %v6652_v59 = vld [vmem:[#allocation2 + $0x8] sm:$0x1]  ;;  %v6658_v38 = vld [vmem:[#allocation2 + $0x20] sm:$0x1]  ;;  %v12125_v48 = vrot.slane %v16622_v0, 11 }
 0x42f   : > { %v12126_v58 = vrot.slane %v16624_v49, 11  ;;  %v12127_v8 = vrot.slane %v16626_v62, 11  ;;  %v12128_v6 = vrot.slane %v16628_v4, 11  ;;  %v6661_v30 = vld [vmem:[#allocation2 + $0x2c] sm:$0x1]  ;;  %v12129_v41 = vrot.slane %v16636_v52, 11 }
 0x430   : > { %v12130_v47 = vrot.slane %v16638_v19, 11  ;;  %v12131_v51 = vrot.slane %v16640_v13, 11  ;;  %v12132_v44 = vrot.slane %v16654_v42, 11  ;;  %v6664_v36 = vld [vmem:[#allocation2 + $0x38] sm:$0x1]  ;;  %v12134_v34 = vrot.slane %v16656_v5, 11 }
 0x431   : > { %v16671_v35 = vld [vmem:[#allocation2 + $0x4] sm:$0xf]  ;;  %v6653_v16 = vsel %vm14270_vm9, %v12118_v21, %v6652_v59  ;;  %v6659_v20 = vsel %vm14270_vm9, %v12120_v24, %v6658_v38  ;;  %v6662_v54 = vsel %vm14270_vm9, %v12121_v45, %v6661_v30  ;;  %v6670_v14 = vld [vmem:[#allocation2 + $0x50] sm:$0x1]  ;;  %v6419_v1 = vld [vmem:[#allocation2 + $0xc] sm:$0x2]  ;;  %v6665_v25 = vsel %vm14270_vm9, %v12122_v50, %v6664_v36 }
 0x432   : > { %v6667_v33 = vld [vmem:[#allocation2 + $0x44] sm:$0x1]  ;;  %6654 = vst [vmem:[#allocation2 + $0x8] sm:$0x1] %v6653_v16  ;;  %6660 = vst [vmem:[#allocation2 + $0x20] sm:$0x1] %v6659_v20  ;;  %v6671_v21 = vsel %vm14270_vm9, %v12124_v3, %v6670_v14 }
 0x433   : > { %6663 = vst [vmem:[#allocation2 + $0x2c] sm:$0x1] %v6662_v54  ;;  %v6668_v56 = vsel %vm14270_vm9, %v12123_v31, %v6667_v33  ;;  %v6673_v15 = vld [vmem:[#allocation2 + $0x5c] sm:$0x1]  ;;  %v6676_v55 = vld [vmem:[#allocation2 + $0x68] sm:$0x1] }
 0x434   : > { %v6679_v23 = vld [vmem:[#allocation2 + $0x74] sm:$0x1]  ;;  %v16688_v10 = vld [vmem:[#allocation2 + $0x10] sm:$0xf]  ;;  %6666 = vst [vmem:[#allocation2 + $0x38] sm:$0x1] %v6665_v25  ;;  %v6674_v9 = vsel %vm14270_vm9, %v12125_v48, %v6673_v15  ;;  %v6677_v2 = vsel %vm14270_vm9, %v12126_v58, %v6676_v55 }
 0x435   : > { %6669 = vst [vmem:[#allocation2 + $0x44] sm:$0x1] %v6668_v56  ;;  %6672 = vst [vmem:[#allocation2 + $0x50] sm:$0x1] %v6671_v21  ;;  %v6680_v39 = vsel %vm14270_vm9, %v12127_v8, %v6679_v23  ;;  %v6682_v32 = vld [vmem:[#allocation2 + $0x80] sm:$0x1] }
 0x436   : > { %v6685_v11 = vld [vmem:[#allocation2 + $0x8c] sm:$0x1]  ;;  %v6688_v63 = vld [vmem:[#allocation2 + $0x98] sm:$0x1]  ;;  %6675 = vst [vmem:[#allocation2 + $0x5c] sm:$0x1] %v6674_v9  ;;  %v6683_v0 = vsel %vm14270_vm9, %v12128_v6, %v6682_v32 }
 0x437   : > { %6678 = vst [vmem:[#allocation2 + $0x68] sm:$0x1] %v6677_v2  ;;  %6681 = vst [vmem:[#allocation2 + $0x74] sm:$0x1] %v6680_v39  ;;  %v6686_v49 = vsel %vm14270_vm9, %v12129_v41, %v6685_v11  ;;  %v6689_v62 = vsel %vm14270_vm9, %v12130_v47, %v6688_v63  ;;  %v6691_v4 = vld [vmem:[#allocation2 + $0xa4] sm:$0x1] }
 0x438   : > { %v6694_v18 = vld [vmem:[#allocation2 + $0xb0] sm:$0x1]  ;;  %v6700_v29 = vld [vmem:[#allocation2 + $0xc8] sm:$0x1]  ;;  %6684 = vst [vmem:[#allocation2 + $0x80] sm:$0x1] %v6683_v0  ;;  %v6692_v28 = vsel %vm14270_vm9, %v12131_v51, %v6691_v4 }
 0x439   : > { %6687 = vst [vmem:[#allocation2 + $0x8c] sm:$0x1] %v6686_v49  ;;  %6690 = vst [vmem:[#allocation2 + $0x98] sm:$0x1] %v6689_v62  ;;  %v6695_v40 = vsel %vm14270_vm9, %v12132_v44, %v6694_v18  ;;  %v6701_v53 = vsel %vm14270_vm9, %v12134_v34, %v6700_v29  ;;  %v16708_v43 = vld [vmem:[#allocation2] sm:$0xf] }
 0x43a   : > { %v6765_v52 = vshll.u32 %v16671_v35, 16  ;;  %v6740_v19 = vld [vmem:[#allocation2 + $0x14] sm:$0x1]  ;;  %6693 = vst [vmem:[#allocation2 + $0xa4] sm:$0x1] %v6692_v28  ;;  %v6756_v13 = vshrl.u32 %v16708_v43, 16 }
 0x43b   : > { %6696 = vst [vmem:[#allocation2 + $0xb0] sm:$0x1] %v6695_v40  ;;  %6702 = vst [vmem:[#allocation2 + $0xc8] sm:$0x1] %v6701_v53  ;;  %v6759_v46 = vshll.u32 %v16708_v43, 16  ;;  %v6769_v27 = vshrl.u32 %v16671_v35, 16 }
 0x43c   : > { %v12101_v61 = vrot.slane %v6419_v1, 9  ;;  %v6767_v12 = vrot.slane %v6765_v52, 5  ;;  %v6511_v26 = vld [vmem:[#allocation2 + $0xc] sm:$0x1]  ;;  %v6789_v17 = vshll.u32 %v16688_v10, 16  ;;  %v6793_v60 = vshrl.u32 %v16688_v10, 16 }
 0x43d   : > { %v6799_v7 = vshll.u32 %v6740_v19, 16  ;;  %v6758_v22 = vrot.slane %v6756_v13, 4  ;;  %v6761_v37 = vrot.slane %v6759_v46, 5  ;;  %v6771_v42 = vrot.slane %v6769_v27, 4  ;;  %v16718_v24 = vld [vmem:[#allocation2 + $0x18] sm:$0xf] }
 0x43e   : > { %v6512_v5 = vsel %vm14231_vm8, %v12101_v61, %v6511_v26  ;;  %v16720_v45 = vld [vmem:[#allocation2 + $0x8] sm:$0x1]  ;;  %v16722_v50 = vrot.slane %v6789_v17, 5  ;;  %v6795_v31 = vrot.slane %v6793_v60, 4  ;;  %v16724_v3 = vld [vmem:[#allocation2 + $0x1c] sm:$0xf] }
 0x43f   : > { %19011 = vst [vmem:[#allocation14_spill] sm:$0xff] %v16720_v45  ;;  %6513 = vst [vmem:[#allocation2 + $0xc] sm:$0x1] %v6512_v5  ;;  %v6762_v59 = vor.u32 %v6761_v37, %v6758_v22  ;;  %v6772_v38 = vor.u32 %v6771_v42, %v6767_v12  ;;  %v6775_v48 = vshll.u32 %v16720_v45, 16  ;;  %v14113_v58 = vld [vmem:[%s18838_s2] sm:$0x3] }
 0x440   : > { %v16731_v8 = vsel %vm1581_vm0, %v14113_v58, 0  ;;  %v6796_v6 = vor.u32 %v6795_v31, %v16722_v50  ;;  %v16734_v30 = vrot.slane %v6799_v7, 5  ;;  %v16736_v41 = vld [vmem:[#allocation2 + $0x20] sm:$0x1]  ;;  %v6804_v47 = vshrl.u32 %v16718_v24, 16 }
 0x441   : > { %19012 = vst [vmem:[#allocation8_spill] sm:$0xff] %v16736_v41  ;;  %v6807_v51 = vshll.u32 %v16718_v24, 16  ;;  %v6763_v44 = vrot.slane %v6762_v59, 4  ;;  %v6773_v36 = vrot.slane %v6772_v38, 4  ;;  %v6777_v34 = vrot.slane %v6775_v48, 5 }
 0x442   : > { %v6813_v16 = vshll.u32 %v16724_v3, 16  ;;  %v16741_v20 = vld [vmem:[#allocation2 + $0x28] sm:$0xf]  ;;  %v16743_v54 = vrot.slane %v6796_v6, 4  ;;  %v6806_v33 = vrot.slane %v6804_v47, 4  ;;  %v6817_v1 = vshrl.u32 %v16724_v3, 16 }
 0x443   : > { %v6809_v14 = vrot.slane %v6807_v51, 5  ;;  %v16746_v25 = vld [vmem:[#allocation2 + $0x24] sm:$0xf]  ;;  %v6768_v21 = vsel %vm14338_vm13, %v6763_v44, %v6767_v12  ;;  %v6778_v15 = vsel %vm14338_vm13, %v6773_v36, %v6777_v34  ;;  %v6823_v23 = vshll.u32 %v16736_v41, 16  ;;  %v16757_v11 = vld [vmem:[#allocation2 + $0x30] sm:$0xf] }
 0x444   : > { %v6815_v55 = vrot.slane %v6813_v16, 5  ;;  %v12137_v9 = vcombine.low %v6768_v21, %v6778_v15  ;;  %v6802_v2 = vsel %vm14338_vm13, %v16743_v54, %v16734_v30  ;;  %v6819_v32 = vrot.slane %v6817_v1, 4  ;;  %v16767_v53 = vld [vmem:[#allocation2 + $0x2c] sm:$0x1]  ;;  %v16770_v27 = vld [vmem:[#allocation2 + $0x34] sm:$0xf] }
 0x445   : > { %v6810_v39 = vor.u32 %v6809_v14, %v6806_v33  ;;  %v6825_v0 = vrot.slane %v6823_v23, 5  ;;  %v6828_v49 = vshrl.u32 %v16746_v25, 16  ;;  %v6831_v62 = vshll.u32 %v16746_v25, 16  ;;  %19014 = vst [vmem:[#allocation10_spill] sm:$0xff] %v16767_v53  ;;  %v16778_v31 = vld [vmem:[#allocation2 + $0x38] sm:$0x1] }
 0x446   : > { %v16759_v63 = vld [vmem:[#allocation2 + $0xc] sm:$0xf]  ;;  %v6837_v4 = vshll.u32 %v16741_v20, 16  ;;  %13162 = vmatprep.mubr.msk.bf16.mxu1 %vm1532_vm12, %v12137_v9  ;;  %v6820_v40 = vor.u32 %v6819_v32, %v6815_v55  ;;  %v6841_v46 = vshrl.u32 %v16741_v20, 16  ;;  %v6847_v22 = vshll.u32 %v16767_v53, 16 }
 0x447   : > { %v6780_v18 = vshrl.u32 %v16759_v63, 16  ;;  %v6783_v29 = vshll.u32 %v16759_v63, 16  ;;  %v6811_v28 = vrot.slane %v6810_v39, 4  ;;  %v6830_v52 = vrot.slane %v6828_v49, 4  ;;  %v16782_v47 = vld [vmem:[#allocation2 + $0x3c] sm:$0xf] }
 0x448   : > { %v6833_v19 = vrot.slane %v6831_v62, 5  ;;  %v6839_v13 = vrot.slane %v6837_v4, 5  ;;  %v6821_v17 = vrot.slane %v6820_v40, 4  ;;  %v6843_v7 = vrot.slane %v6841_v46, 4  ;;  %v16791_v15 = vld [vmem:[#allocation2 + $0x40] sm:$0xf] }
 0x449   : > { %v6782_v61 = vrot.slane %v6780_v18, 4  ;;  %v6785_v12 = vrot.slane %v6783_v29, 5  ;;  %v6816_v26 = vsel %vm14338_vm13, %v6811_v28, %v6815_v55  ;;  %v6852_v37 = vshrl.u32 %v16757_v11, 16  ;;  %v16793_v55 = vld [vmem:[#allocation2 + $0x44] sm:$0x1] }
 0x44a   : > { %v6834_v60 = vor.u32 %v6833_v19, %v6830_v52  ;;  %v6826_v5 = vsel %vm14338_vm13, %v6821_v17, %v6825_v0  ;;  %v6855_v59 = vshll.u32 %v16757_v11, 16  ;;  %v6861_v38 = vshll.u32 %v16770_v27, 16  ;;  %v16799_v62 = vld [vmem:[#allocation2 + $0x48] sm:$0xf]  ;;  %v16804_v28 = vld [vmem:[%s18838_s2 + $0x4] sm:$0x3] }
 0x44b   : > { %v6786_v42 = vor.u32 %v6785_v12, %v6782_v61  ;;  %v12139_v48 = vcombine.low %v6816_v26, %v6826_v5  ;;  %v6844_v6 = vor.u32 %v6843_v7, %v6839_v13  ;;  %v6849_v30 = vrot.slane %v6847_v22, 5  ;;  %v16816_v12 = vld [vmem:[#allocation2 + $0x50] sm:$0x1] }
 0x44c   : > { %v6835_v58 = vrot.slane %v6834_v60, 4  ;;  %v6854_v44 = vrot.slane %v6852_v37, 4  ;;  %v6857_v36 = vrot.slane %v6855_v59, 5  ;;  %v6863_v34 = vrot.slane %v6861_v38, 5  ;;  %v16823_v38 = vld [vmem:[#allocation2 + $0x54] sm:$0xf] }
 0x44d   : > { %v6787_v51 = vrot.slane %v6786_v42, 4  ;;  %v6845_v54 = vrot.slane %v6844_v6, 4  ;;  %v6865_v33 = vshrl.u32 %v16770_v27, 16  ;;  %v6871_v14 = vshll.u32 %v16778_v31, 16 }
 0x44e   : > { %v6840_v16 = vsel %vm14338_vm13, %v6835_v58, %v6839_v13  ;;  %v6858_v21 = vor.u32 %v6857_v36, %v6854_v44  ;;  %v6876_v23 = vshrl.u32 %v16782_v47, 16  ;;  %v6879_v9 = vshll.u32 %v16782_v47, 16  ;;  %v16810_v13 = vld [vmem:[#allocation2 + $0x4c] sm:$0xf] }
 0x44f   : > { %v6792_v1 = vsel %vm14338_vm13, %v6787_v51, %v16722_v50  ;;  %v6850_v32 = vsel %vm14338_vm13, %v6845_v54, %v6849_v30  ;;  %v6867_v0 = vrot.slane %v6865_v33, 4  ;;  %v6873_v49 = vrot.slane %v6871_v14, 5  ;;  %v16829_v51 = vld [vmem:[#allocation2 + $0x58] sm:$0xf]  ;;  %v16833_v54 = vld [vmem:[#allocation2 + $0x5c] sm:$0x1] }
 0x450   : > { %v12138_v39 = vcombine.low %v6792_v1, %v6802_v2  ;;  %v12140_v4 = vcombine.low %v6840_v16, %v6850_v32  ;;  %v6859_v18 = vrot.slane %v6858_v21, 4  ;;  %v6878_v50 = vrot.slane %v6876_v23, 4 }
 0x451   : > { %v6881_v29 = vrot.slane %v6879_v9, 5  ;;  %v6868_v40 = vor.u32 %v6867_v0, %v6863_v34  ;;  %v6885_v2 = vshll.u32 %v16791_v15, 16  ;;  %v6889_v52 = vshrl.u32 %v16791_v15, 16  ;;  %v16839_v0 = vld [vmem:[#allocation2 + $0x60] sm:$0xf] }
 0x452   : > { %13163 = vmatmul.mubr.msk.bf16.vlgmr.msra.gmra.mrb[0].mxu1 %vm1532_vm12, %v12138_v39  ;;  %v6895_v19 = vshll.u32 %v16793_v55, 16  ;;  %v6864_v46 = vsel %vm14338_vm13, %v6859_v18, %v6863_v34  ;;  %v6900_v26 = vshrl.u32 %v16799_v62, 16  ;;  %v6903_v17 = vshll.u32 %v16799_v62, 16 }
 0x453   : > { %13195 = vmatpush3.bf16.msra.mxu1 %v16731_v8  ;;  %13166 = vmatprep.mubr.msk.bf16.mxu1 %vm1532_vm12, %v12139_v48  ;;  %v6882_v61 = vor.u32 %v6881_v29, %v6878_v50  ;;  %v6869_v60 = vrot.slane %v6868_v40, 4  ;;  %v6887_v7 = vrot.slane %v6885_v2, 5  ;;  %v6891_v22 = vrot.slane %v6889_v52, 4  ;;  %v16845_v40 = vld [vmem:[#allocation2 + $0x64] sm:$0xf] }
 0x454   : > { %v6897_v37 = vrot.slane %v6895_v19, 5  ;;  %13989 = vmatprep.subr.msk.bf16.mxu1 %vm1581_vm0, %v16804_v28  ;;  %v6902_v42 = vrot.slane %v6900_v26, 4  ;;  %v6905_v5 = vrot.slane %v6903_v17, 5  ;;  %v6909_v59 = vshll.u32 %v16810_v13, 16 }
 0x455   : > { %v6883_v8 = vrot.slane %v6882_v61, 4  ;;  %v6874_v48 = vsel %vm14338_vm13, %v6869_v60, %v6873_v49  ;;  %v6892_v58 = vor.u32 %v6891_v22, %v6887_v7  ;;  %v6913_v6 = vshrl.u32 %v16810_v13, 16  ;;  %v16850_v61 = vld [vmem:[#allocation2 + $0x68] sm:$0x1] }
 0x456   : > { %v6919_v30 = vshll.u32 %v16816_v12, 16  ;;  %v12141_v44 = vcombine.low %v6864_v46, %v6874_v48  ;;  %v6906_v34 = vor.u32 %v6905_v5, %v6902_v42  ;;  %v6911_v16 = vrot.slane %v6909_v59, 5  ;;  %19015 = vst [vmem:[#allocation3_spill] sm:$0xff] %v16850_v61  ;;  %v16856_v42 = vld [vmem:[#allocation2 + $0x6c] sm:$0xf] }
 0x457   : > { %v6888_v36 = vsel %vm14338_vm13, %v6883_v8, %v6887_v7  ;;  %v6893_v33 = vrot.slane %v6892_v58, 4  ;;  %v6915_v14 = vrot.slane %v6913_v6, 4  ;;  %v6924_v21 = vshrl.u32 %v16823_v38, 16  ;;  %v16861_v6 = vld [vmem:[#allocation2 + $0x70] sm:$0xf] }
 0x458   : > { %v6921_v1 = vrot.slane %v6919_v30, 5  ;;  %v6907_v23 = vrot.slane %v6906_v34, 4  ;;  %v6927_v9 = vshll.u32 %v16823_v38, 16  ;;  %v6933_v39 = vshll.u32 %v16829_v51, 16 }
 0x459   : > { %v6937_v32 = vshrl.u32 %v16829_v51, 16  ;;  %v6898_v49 = vsel %vm14338_vm13, %v6893_v33, %v6897_v37  ;;  %v6916_v18 = vor.u32 %v6915_v14, %v6911_v16  ;;  %v6926_v50 = vrot.slane %v6924_v21, 4  ;;  %v16865_v33 = vld [vmem:[#allocation2 + $0x78] sm:$0xf] }
 0x45a   : > { %13167 = vmatmul.mubr.msk.bf16.gmra.mrb[4].mxu1 %vm1532_vm12, %v12140_v4  ;;  %v6943_v29 = vshll.u32 %v16833_v54, 16  ;;  %v12142_v2 = vcombine.low %v6888_v36, %v6898_v49  ;;  %v6912_v52 = vsel %vm14338_vm13, %v6907_v23, %v6911_v16  ;;  %v6929_v19 = vrot.slane %v6927_v9, 5  ;;  %v16863_v16 = vld [vmem:[#allocation2 + $0x74] sm:$0x1] }
 0x45b   : > { %13170 = vmatprep.mubr.msk.bf16.mxu1 %vm1532_vm12, %v12141_v44  ;;  %v6935_v46 = vrot.slane %v6933_v39, 5  ;;  %v6917_v4 = vrot.slane %v6916_v18, 4  ;;  %v6939_v26 = vrot.slane %v6937_v32, 4  ;;  %v6948_v60 = vshrl.u32 %v16839_v0, 16  ;;  %19016 = vst [vmem:[#allocation4_spill] sm:$0xff] %v16863_v16 }
 0x45c   : > { %v6945_v17 = vrot.slane %v6943_v29, 5  ;;  %v6930_v7 = vor.u32 %v6929_v19, %v6926_v50  ;;  %v6951_v22 = vshll.u32 %v16839_v0, 16  ;;  %v6957_v37 = vshll.u32 %v16845_v40, 16 }
 0x45d   : > { %v6961_v8 = vshrl.u32 %v16845_v40, 16  ;;  %v6922_v5 = vsel %vm14338_vm13, %v6917_v4, %v6921_v1  ;;  %v6940_v59 = vor.u32 %v6939_v26, %v6935_v46  ;;  %v6950_v48 = vrot.slane %v6948_v60, 4  ;;  %v16868_v1 = vld [vmem:[#allocation2 + $0x7c] sm:$0xf] }
 0x45e   : > { %v6967_v58 = vshll.u32 %v16850_v61, 16  ;;  %v12143_v30 = vcombine.low %v6912_v52, %v6922_v5  ;;  %v6931_v44 = vrot.slane %v6930_v7, 4  ;;  %v6953_v36 = vrot.slane %v6951_v22, 5  ;;  %v16879_v7 = vld [vmem:[#allocation2 + $0x80] sm:$0x1] }
 0x45f   : > { %v6959_v34 = vrot.slane %v6957_v37, 5  ;;  %v6941_v14 = vrot.slane %v6940_v59, 4  ;;  %v6963_v21 = vrot.slane %v6961_v8, 4  ;;  %v6972_v9 = vshrl.u32 %v16856_v42, 16  ;;  %19017 = vst [vmem:[#allocation12_spill] sm:$0xff] %v16879_v7 }
 0x460   : > { %v6969_v23 = vrot.slane %v6967_v58, 5  ;;  %v6936_v39 = vsel %vm14338_vm13, %v6931_v44, %v6935_v46  ;;  %v6954_v32 = vor.u32 %v6953_v36, %v6950_v48  ;;  %v6975_v49 = vshll.u32 %v16856_v42, 16  ;;  %v16881_v22 = vld [vmem:[#allocation2 + $0x84] sm:$0xf]  ;;  %v16885_v5 = vld [vmem:[#allocation2 + $0x88] sm:$0xf] }
 0x461   : > { %v6981_v18 = vshll.u32 %v16861_v6, 16  ;;  %v6946_v50 = vsel %vm14338_vm13, %v6941_v14, %v6945_v17  ;;  %v6964_v29 = vor.u32 %v6963_v21, %v6959_v34  ;;  %v6974_v52 = vrot.slane %v6972_v9, 4 }
 0x462   : > { %13171 = vmatmul.mubr.msk.bf16.gmra.mrb[8].mxu1 %vm1532_vm12, %v12142_v2  ;;  %v6985_v19 = vshrl.u32 %v16861_v6, 16  ;;  %v12144_v4 = vcombine.low %v6936_v39, %v6946_v50  ;;  %v6955_v26 = vrot.slane %v6954_v32, 4  ;;  %v6977_v60 = vrot.slane %v6975_v49, 5 }
 0x463   : > { %13174 = vmatprep.mubr.msk.bf16.mxu1 %vm1532_vm12, %v12143_v30  ;;  %v6983_v46 = vrot.slane %v6981_v18, 5  ;;  %v6965_v37 = vrot.slane %v6964_v29, 4  ;;  %v6991_v2 = vshll.u32 %v16863_v16, 16  ;;  %v6996_v17 = vshrl.u32 %v16865_v33, 16  ;;  %v16893_v18 = vld [vmem:[#allocation2 + $0x8c] sm:$0x1] }
 0x464   : > { %v6987_v8 = vrot.slane %v6985_v19, 4  ;;  %v6960_v59 = vsel %vm14338_vm13, %v6955_v26, %v6959_v34  ;;  %v6978_v48 = vor.u32 %v6977_v60, %v6974_v52  ;;  %v6999_v58 = vshll.u32 %v16865_v33, 16  ;;  %19018 = vst [vmem:[#allocation13_spill] sm:$0xff] %v16893_v18 }
 0x465   : > { %v7005_v30 = vshll.u32 %v16868_v1, 16  ;;  %v6970_v44 = vsel %vm14338_vm13, %v6965_v37, %v6969_v23  ;;  %v6993_v14 = vrot.slane %v6991_v2, 5  ;;  %v6998_v21 = vrot.slane %v6996_v17, 4  ;;  %v16902_v37 = vld [vmem:[#allocation2 + $0x90] sm:$0xf] }
 0x466   : > { %v6988_v36 = vor.u32 %v6987_v8, %v6983_v46  ;;  %v12145_v9 = vcombine.low %v6960_v59, %v6970_v44  ;;  %v6979_v39 = vrot.slane %v6978_v48, 4  ;;  %v7001_v32 = vrot.slane %v6999_v58, 5  ;;  %v16907_v48 = vld [vmem:[#allocation2 + $0x94] sm:$0xf] }
 0x467   : > { %v7007_v49 = vrot.slane %v7005_v30, 5  ;;  %v7009_v34 = vshrl.u32 %v16868_v1, 16  ;;  %v7015_v29 = vshll.u32 %v16879_v7, 16  ;;  %v7020_v52 = vshrl.u32 %v16881_v22, 16 }
 0x468   : > { %v6989_v50 = vrot.slane %v6988_v36, 4  ;;  %v6984_v19 = vsel %vm14338_vm13, %v6979_v39, %v6983_v46  ;;  %v7002_v23 = vor.u32 %v7001_v32, %v6998_v21  ;;  %v7023_v26 = vshll.u32 %v16881_v22, 16 }
 0x469   : > { %v7029_v60 = vshll.u32 %v16885_v5, 16  ;;  %v7011_v2 = vrot.slane %v7009_v34, 4  ;;  %v7017_v17 = vrot.slane %v7015_v29, 5  ;;  %v7022_v59 = vrot.slane %v7020_v52, 4  ;;  %v16919_v29 = vld [vmem:[#allocation2 + $0x9c] sm:$0xf] }
 0x46a   : > { %13175 = vmatmul.mubr.msk.bf16.gmra.mrb[12].mxu1 %vm1532_vm12, %v12144_v4  ;;  %v6994_v8 = vsel %vm14338_vm13, %v6989_v50, %v6993_v14  ;;  %v7003_v58 = vrot.slane %v7002_v23, 4  ;;  %v7025_v30 = vrot.slane %v7023_v26, 5  ;;  %v7033_v21 = vshrl.u32 %v16885_v5, 16  ;;  %v16915_v50 = vld [vmem:[#allocation2 + $0x98] sm:$0x1] }
 0x46b   : > { %13178 = vmatprep.mubr.msk.bf16.mxu1 %vm1532_vm12, %v12145_v9  ;;  %v12146_v46 = vcombine.low %v6984_v19, %v6994_v8  ;;  %v7031_v44 = vrot.slane %v7029_v60, 5  ;;  %v7012_v36 = vor.u32 %v7011_v2, %v7007_v49  ;;  %v7039_v39 = vshll.u32 %v16893_v18, 16  ;;  %19019 = vst [vmem:[#allocation11_spill] sm:$0xff] %v16915_v50  ;;  %v16949_v18 = vld [vmem:[#allocation2 + $0xb4] sm:$0xf] }
 0x46c   : > { %v7044_v4 = vshrl.u32 %v16902_v37, 16  ;;  %v7008_v14 = vsel %vm14338_vm13, %v7003_v58, %v7007_v49  ;;  %v7026_v32 = vor.u32 %v7025_v30, %v7022_v59  ;;  %v7047_v34 = vshll.u32 %v16902_v37, 16  ;;  %v16925_v30 = vld [vmem:[#allocation2 + $0xa0] sm:$0xf] }
 0x46d   : > { %v7053_v9 = vshll.u32 %v16907_v48, 16  ;;  %v7013_v52 = vrot.slane %v7012_v36, 4  ;;  %v7035_v19 = vrot.slane %v7033_v21, 4  ;;  %v7041_v23 = vrot.slane %v7039_v39, 5 }
 0x46e   : > { %v7046_v26 = vrot.slane %v7044_v4, 4  ;;  %v7027_v60 = vrot.slane %v7026_v32, 4  ;;  %v7049_v8 = vrot.slane %v7047_v34, 5  ;;  %v7057_v53 = vshrl.u32 %v16907_v48, 16  ;;  %v16930_v4 = vld [vmem:[#allocation2 + $0xa8] sm:$0xf] }
 0x46f   : > { %v7055_v2 = vrot.slane %v7053_v9, 5  ;;  %v7018_v49 = vsel %vm14338_vm13, %v7013_v52, %v7017_v17  ;;  %v7036_v59 = vor.u32 %v7035_v19, %v7031_v44  ;;  %v7063_v58 = vshll.u32 %v16915_v50, 16  ;;  %v16933_v17 = vld [vmem:[#allocation2 + $0xa4] sm:$0x1] }
 0x470   : > { %v7068_v41 = vshrl.u32 %v16919_v29, 16  ;;  %v12147_v45 = vcombine.low %v7008_v14, %v7018_v49  ;;  %v7032_v36 = vsel %vm14338_vm13, %v7027_v60, %v7031_v44  ;;  %v7050_v21 = vor.u32 %v7049_v8, %v7046_v26  ;;  %19020 = vst [vmem:[#allocation6_spill] sm:$0xff] %v16933_v17 }
 0x471   : > { %v7059_v39 = vrot.slane %v7057_v53, 4  ;;  %v7037_v32 = vrot.slane %v7036_v59, 4  ;;  %v7065_v34 = vrot.slane %v7063_v58, 5  ;;  %v7071_v52 = vshll.u32 %v16919_v29, 16  ;;  %v16947_v58 = vld [vmem:[#allocation2 + $0xb0] sm:$0x1] }
 0x472   : > { %13179 = vmatmul.mubr.msk.bf16.gmra.mrb[16].mxu1 %vm1532_vm12, %v12146_v46  ;;  %v7070_v9 = vrot.slane %v7068_v41, 4  ;;  %v7051_v19 = vrot.slane %v7050_v21, 4  ;;  %v7077_v49 = vshll.u32 %v16925_v30, 16  ;;  %v7081_v44 = vshrl.u32 %v16925_v30, 16  ;;  %v16941_v46 = vld [vmem:[#allocation2 + $0xac] sm:$0xf] }
 0x473   : > { %13182 = vmatprep.mubr.msk.bf16.mxu1 %vm1532_vm12, %v12147_v45  ;;  %v7060_v14 = vor.u32 %v7059_v39, %v7055_v2  ;;  %v7042_v53 = vsel %vm14338_vm13, %v7037_v32, %v7041_v23  ;;  %v7073_v26 = vrot.slane %v7071_v52, 5  ;;  %v7092_v60 = vshrl.u32 %v16930_v4, 16  ;;  %19021 = vst [vmem:[#allocation7_spill] sm:$0xff] %v16947_v58 }
 0x474   : > { %v7056_v41 = vsel %vm14338_vm13, %v7051_v19, %v7055_v2  ;;  %v7079_v59 = vrot.slane %v7077_v49, 5  ;;  %v7087_v45 = vshll.u32 %v16933_v17, 16  ;;  %v12148_v21 = vcombine.low %v7032_v36, %v7042_v53  ;;  %v16957_v36 = vld [vmem:[#allocation2 + $0xb8] sm:$0xf] }
 0x475   : > { %v7061_v8 = vrot.slane %v7060_v14, 4  ;;  %v7074_v39 = vor.u32 %v7073_v26, %v7070_v9  ;;  %v7083_v57 = vrot.slane %v7081_v44, 4  ;;  %v7094_v50 = vrot.slane %v7092_v60, 4 }
 0x476   : > { %v7095_v32 = vshll.u32 %v16930_v4, 16  ;;  %v7101_v52 = vshll.u32 %v16941_v46, 16  ;;  %v7105_v2 = vshrl.u32 %v16941_v46, 16  ;;  %v7111_v17 = vshll.u32 %v16947_v58, 16 }
 0x477   : > { %v7066_v23 = vsel %vm14338_vm13, %v7061_v8, %v7065_v34  ;;  %v7075_v14 = vrot.slane %v7074_v39, 4  ;;  %v7084_v49 = vor.u32 %v7083_v57, %v7079_v59  ;;  %v7116_v26 = vshrl.u32 %v16949_v18, 16  ;;  %v16963_v57 = vld [vmem:[#allocation2 + $0xbc] sm:$0x1] }
 0x478   : > { %v12149_v19 = vcombine.low %v7056_v41, %v7066_v23  ;;  %v7097_v9 = vrot.slane %v7095_v32, 5  ;;  %v7103_v44 = vrot.slane %v7101_v52, 5  ;;  %v7107_v53 = vrot.slane %v7105_v2, 4 }
 0x479   : > { %v7089_v34 = vrot.slane %v7087_v45, 5  ;;  %v7113_v60 = vrot.slane %v7111_v17, 5  ;;  %v7119_v8 = vshll.u32 %v16949_v18, 16  ;;  %v7118_v23 = vrot.slane %v7116_v26, 4 }
 0x47a   : > { %13183 = vmatmul.mubr.msk.bf16.gmra.mrb[20].mxu1 %vm1532_vm12, %v12148_v21  ;;  %v7098_v41 = vor.u32 %v7097_v9, %v7094_v50  ;;  %v7108_v39 = vor.u32 %v7107_v53, %v7103_v44  ;;  %v7125_v58 = vshll.u32 %v16957_v36, 16  ;;  %v7080_v32 = vsel %vm14338_vm13, %v7075_v14, %v7079_v59 }
 0x47b   : > { %13186 = vmatprep.mubr.msk.bf16.mxu1 %vm1532_vm12, %v12149_v19  ;;  %v7121_v52 = vrot.slane %v7119_v8, 5  ;;  %v7129_v2 = vshrl.u32 %v16957_v36, 16  ;;  %v7085_v21 = vrot.slane %v7084_v49, 4  ;;  %v7135_v50 = vshll.u32 %v16963_v57, 16  ;;  %v7708_v8 = vld [vmem:[#allocation2 + $0xb4] sm:$0xe] }
 0x47c   : > { %v7099_v45 = vrot.slane %v7098_v41, 4  ;;  %v7109_v17 = vrot.slane %v7108_v39, 4  ;;  %v7127_v7 = vrot.slane %v7125_v58, 5  ;;  %v12173_v58 = vcombine.low %v16757_v11, %v16770_v27  ;;  %v7704_v39 = vld [vmem:[#allocation2 + $0x84] sm:$0xe] }
 0x47d   : > { %v7122_v16 = vor.u32 %v7121_v52, %v7118_v23  ;;  %v7131_v61 = vrot.slane %v7129_v2, 4  ;;  %v7090_v19 = vsel %vm14338_vm13, %v7085_v21, %v7089_v34  ;;  %v7137_v34 = vrot.slane %v7135_v50, 5  ;;  %v7697_v50 = vld [vmem:[#allocation2 + $0x30] sm:$0xe]  ;;  %v7699_v52 = vld [vmem:[#allocation2 + $0x48] sm:$0xe] }
 0x47e   : > { %v7104_v9 = vsel %vm14338_vm13, %v7099_v45, %v7103_v44  ;;  %v7114_v59 = vsel %vm14338_vm13, %v7109_v17, %v7113_v60  ;;  %v12150_v14 = vcombine.low %v7080_v32, %v7090_v19  ;;  %v19023_v23 = vld [vmem:[#allocation3_spill] sm:$0xff]  ;;  %v19026_v60 = vld [vmem:[#allocation13_spill] sm:$0xff]  ;;  %v6434_v44 = vld [vmem:[#allocation2 + $0xc0] sm:$0x2] }
 0x47f   : > { %v12151_v53 = vcombine.low %v7104_v9, %v7114_v59  ;;  %v7123_v26 = vrot.slane %v7122_v16, 4  ;;  %v7132_v49 = vor.u32 %v7131_v61, %v7127_v7  ;;  %v12169_v9 = vcombine.low %v16708_v43, %v16671_v35  ;;  %v7698_v59 = vld [vmem:[#allocation2 + $0x3c] sm:$0xe] }
 0x480   : > { %v12171_v35 = vcombine.low %v16718_v24, %v16724_v3  ;;  %v7706_v61 = vld [vmem:[#allocation2 + $0x9c] sm:$0xe] }
 0x481   : > { %v7128_v21 = vsel %vm14338_vm13, %v7123_v26, %v7127_v7  ;;  %v7133_v45 = vrot.slane %v7132_v49, 4  ;;  %v12170_v7 = vcombine.low %v16759_v63, %v16688_v10  ;;  %v7952_v26 = vsel %vm1581_vm0, %v16804_v28, 0  ;;  %v7700_v63 = vld [vmem:[#allocation2 + $0x54] sm:$0xe] }
 0x482   : > { %13187 = vmatmul.mubr.msk.bf16.gmra.mrb[24].mxu1 %vm1532_vm12, %v12150_v14  ;;  %v12205_v14 = vrot.slane %v7697_v50, 9  ;;  %v7774_v49 = vrot.slane %v16778_v31, 5  ;;  %v12207_v50 = vrot.slane %v7699_v52, 9  ;;  %v7785_v10 = vrot.slane %v16810_v13, 5 }
 0x483   : > { %13190 = vmatprep.mubr.msk.bf16.mxu1 %vm1532_vm12, %v12151_v53  ;;  %v7138_v17 = vsel %vm14338_vm13, %v7133_v45, %v7137_v34  ;;  %v7771_v53 = vrot.slane %v16770_v27, 5  ;;  %v12206_v34 = vrot.slane %v7698_v59, 9  ;;  %v12172_v45 = vcombine.low %v16746_v25, %v16741_v20  ;;  %v7701_v59 = vld [vmem:[#allocation2 + $0x60] sm:$0xe]  ;;  %v19028_v25 = vld [vmem:[#allocation6_spill] sm:$0xff] }
 0x484   : > { %v12152_v19 = vcombine.low %v7128_v21, %v7138_v17  ;;  %v7778_v21 = vrot.slane %v16791_v15, 5  ;;  %v7781_v17 = vrot.slane %v16793_v55, 5  ;;  %v17039_v52 = vsel %vm14878_vm1, %v12207_v50, %v7785_v10  ;;  %v17051_v55 = vld [vmem:[%s18838_s2 + $0x6] sm:$0x3] }
 0x485   : > { %v7773_v43 = vrot.slane %v7771_v53, 4  ;;  %v17025_v28 = vsel %vm14878_vm1, %v12205_v14, %v7771_v53  ;;  %v7787_v2 = vrot.slane %v7785_v10, 4  ;;  %v7788_v14 = vrot.slane %v16816_v12, 5 }
 0x486   : > { %v17033_v31 = vsel %vm14878_vm1, %v12206_v34, %v7778_v21  ;;  %v7795_v34 = vrot.slane %v16833_v54, 5  ;;  %v7799_v10 = vrot.slane %v16845_v40, 5  ;;  %v7802_v50 = vrot.slane %v19023_v23, 5  ;;  %v7705_v54 = vld [vmem:[#allocation2 + $0x90] sm:$0xe]  ;;  %v19024_v23 = vld [vmem:[#allocation4_spill] sm:$0xff] }
 0x487   : > { %v17029_v24 = vsel %vm14878_vm1, %v7773_v43, %v7774_v49  ;;  %v12208_v49 = vrot.slane %v7700_v63, 9  ;;  %v7792_v43 = vrot.slane %v16829_v51, 5  ;;  %v17057_v12 = vsel %vm14878_vm1, %v7787_v2, %v7788_v14  ;;  %v7703_v63 = vld [vmem:[#allocation2 + $0x78] sm:$0xe] }
 0x488   : > { %v7806_v14 = vrot.slane %v16861_v6, 5 }
 0x489   : > { %v7794_v32 = vrot.slane %v7792_v43, 4 }
 0x48a   : > { %13191 = vmatmul.mubr.msk.bf16.gmra.mrb[28].mxu1 %vm1532_vm12, %v12152_v19  ;;  %v7808_v16 = vrot.slane %v7806_v14, 4 }
 0x48b   : > { %13196 = vmatprep.mubr.msk.bf16.mxu1 %vm1532_vm12, %v12169_v9  ;;  %v7780_v9 = vrot.slane %v7778_v21, 4  ;;  %v7702_v21 = vld [vmem:[#allocation2 + $0x6c] sm:$0xe] }
 0x48d   : > { %v17044_v53 = vsel %vm14878_vm1, %v7780_v9, %v7781_v17  ;;  %v12209_v17 = vrot.slane %v7701_v59, 9  ;;  %v17065_v9 = vsel %vm14878_vm1, %v12208_v49, %v7792_v43  ;;  %v7801_v59 = vrot.slane %v7799_v10, 4 }
 0x48e   : > { %v17078_v49 = vsel %vm14878_vm1, %v7794_v32, %v7795_v34  ;;  %v12211_v43 = vrot.slane %v7703_v63, 9 }
 0x48f   : > { %v17071_v2 = vsel %vm14878_vm1, %v12209_v17, %v7799_v10 }
 0x492   : > { %13197 = vmatmul.mubr.msk.bf16.vlgmr.msra.gmra.mrb[0].mxu1 %vm1532_vm12, %v12170_v7  ;;  %v12210_v7 = vrot.slane %v7702_v21, 9  ;;  %v17086_v21 = vsel %vm14878_vm1, %v7801_v59, %v7802_v50  ;;  %v12212_v59 = vrot.slane %v7704_v39, 9  ;;  %v19027_v39 = vld [vmem:[#allocation11_spill] sm:$0xff] }
 0x493   : > { %13229 = vmatpush3.bf16.msra.mxu1 %v7952_v26  ;;  %13200 = vmatprep.mubr.msk.bf16.mxu1 %vm1532_vm12, %v12171_v35  ;;  %v7809_v26 = vrot.slane %v19024_v23, 5  ;;  %v7813_v35 = vrot.slane %v16868_v1, 5  ;;  %v19025_v23 = vld [vmem:[#allocation12_spill] sm:$0xff]  ;;  %v7830_v41 = vrot.slane %v19027_v39, 5 }
 0x494   : > { %13990 = vmatprep.subr.msk.bf16.mxu1 %vm1581_vm0, %v17051_v55  ;;  %v17090_v10 = vsel %vm14878_vm1, %v12210_v7, %v7806_v14  ;;  %v7816_v17 = vrot.slane %v19025_v23, 5  ;;  %v7820_v7 = vrot.slane %v16885_v5, 5  ;;  %v7823_v14 = vrot.slane %v19026_v60, 5  ;;  %v7707_v23 = vld [vmem:[#allocation2 + $0xa8] sm:$0xe] }
 0x495   : > { %v17096_v34 = vsel %vm14878_vm1, %v12211_v43, %v7813_v35  ;;  %v7815_v63 = vrot.slane %v7813_v35, 4  ;;  %v17101_v50 = vsel %vm14878_vm1, %v7808_v16, %v7809_v26  ;;  %v12213_v43 = vrot.slane %v7705_v54, 9 }
 0x496   : > { %v7827_v35 = vrot.slane %v16907_v48, 5  ;;  %v7822_v26 = vrot.slane %v7820_v7, 4  ;;  %v17121_v60 = vsel %vm14878_vm1, %v12212_v59, %v7820_v7  ;;  %v12215_v16 = vrot.slane %v7707_v23, 9 }
 0x497   : > { %v17109_v32 = vsel %vm14878_vm1, %v7815_v63, %v7816_v17  ;;  %v12214_v17 = vrot.slane %v7706_v61, 9  ;;  %v7834_v63 = vrot.slane %v16925_v30, 5  ;;  %v7841_v59 = vrot.slane %v16941_v46, 5 }
 0x498   : > { %v7829_v54 = vrot.slane %v7827_v35, 4  ;;  %v17130_v39 = vsel %vm14878_vm1, %v7822_v26, %v7823_v14  ;;  %v17138_v7 = vsel %vm14878_vm1, %v12213_v43, %v7827_v35  ;;  %v19029_v26 = vld [vmem:[#allocation7_spill] sm:$0xff]  ;;  %v12216_v43 = vrot.slane %v7708_v8, 9 }
 0x499   : > { %v7836_v27 = vrot.slane %v7834_v63, 4  ;;  %v17148_v14 = vsel %vm14878_vm1, %v12214_v17, %v7834_v63  ;;  %v7843_v23 = vrot.slane %v7841_v59, 4  ;;  %v7848_v35 = vrot.slane %v16957_v36, 5 }
 0x49a   : > { %13201 = vmatmul.mubr.msk.bf16.gmra.mrb[4].mxu1 %vm1532_vm12, %v12172_v45  ;;  %v7837_v45 = vrot.slane %v19028_v25, 5  ;;  %v17142_v11 = vsel %vm14878_vm1, %v7829_v54, %v7830_v41  ;;  %v7844_v25 = vrot.slane %v19029_v26, 5  ;;  %v7851_v41 = vrot.slane %v16963_v57, 5 }
 0x49b   : > { %13204 = vmatprep.mubr.msk.bf16.mxu1 %vm1532_vm12, %v12173_v58  ;;  %v17161_v58 = vsel %vm14878_vm1, %v12215_v16, %v7841_v59  ;;  %v12116_v63 = vrot.slane %v6434_v44, 9  ;;  %v7850_v8 = vrot.slane %v7848_v35, 4  ;;  %v19031_v54 = vcombine.low %v16782_v47, %v16791_v15 }
 0x49c   : > { %v17153_v61 = vsel %vm14878_vm1, %v7836_v27, %v7837_v45  ;;  %v17165_v17 = vsel %vm14878_vm1, %v7843_v23, %v7844_v25  ;;  %v6556_v27 = vld [vmem:[#allocation2 + $0xc0] sm:$0x1]  ;;  %v17177_v16 = vsel %vm14878_vm1, %v12216_v43, %v7848_v35  ;;  %v19032_v59 = vcombine.low %v16799_v62, %v16810_v13  ;;  %v17420_v23 = vld [vmem:[#allocation2 + $0xac] sm:$0xf] }
 0x49d   : > { %v6557_v57 = vsel %vm14231_vm8, %v12116_v63, %v6556_v27  ;;  %v17181_v44 = vsel %vm14878_vm1, %v7850_v8, %v7851_v41  ;;  %v19033_v47 = vcombine.low %v16823_v38, %v16829_v51  ;;  %v19034_v15 = vcombine.low %v16839_v0, %v16845_v40  ;;  %v14114_v51 = vld [vmem:[#allocation2 + $0x4] sm:$0xf]  ;;  %v7693_v40 = vld [vmem:[#allocation2] sm:$0xe]  ;;  %v7694_v41 = vld [vmem:[#allocation2 + $0xc] sm:$0xe] }
 0x49e   : > { %6558 = vst [vmem:[#allocation2 + $0xc0] sm:$0x1] %v6557_v57  ;;  %v19035_v25 = vcombine.low %v16856_v42, %v16861_v6  ;;  %v19036_v62 = vcombine.low %v16865_v33, %v16868_v1  ;;  %v19037_v13 = vcombine.low %v16881_v22, %v16885_v5  ;;  %v19038_v38 = vcombine.low %v16902_v37, %v16907_v48  ;;  %v19039_v42 = vld [vmem:[#allocation14_spill] sm:$0xff]  ;;  %v7695_v8 = vld [vmem:[#allocation2 + $0x18] sm:$0xe] }
 0x49f   : > { %v7743_v0 = vrot.slane %v14114_v51, 5  ;;  %v7746_v6 = vrot.slane %v19039_v42, 5  ;;  %v19040_v33 = vcombine.low %v16919_v29, %v16925_v30  ;;  %v19041_v1 = vcombine.low %v16930_v4, %v16941_v46  ;;  %v14115_v48 = vld [vmem:[#allocation2 + $0x10] sm:$0xf]  ;;  %v14116_v30 = vld [vmem:[#allocation2 + $0x14] sm:$0x1] }
 0x4a0   : > { %v12201_v22 = vrot.slane %v7693_v40, 9  ;;  %v7750_v43 = vrot.slane %v14115_v48, 5  ;;  %v7757_v29 = vrot.slane %v16724_v3, 5  ;;  %v19042_v4 = vcombine.low %v16949_v18, %v16957_v36  ;;  %v19043_v46 = vld [vmem:[#allocation8_spill] sm:$0xff]  ;;  %v17248_v42 = vld [vmem:[%s18838_s2 + $0x8] sm:$0x3] }
 0x4a1   : > { %v7745_v5 = vrot.slane %v7743_v0, 4  ;;  %v7760_v27 = vrot.slane %v19043_v46, 5  ;;  %v12202_v26 = vrot.slane %v7694_v41, 9  ;;  %v7764_v18 = vrot.slane %v16741_v20, 5  ;;  %v17271_v48 = vld [vmem:[#allocation2 + $0x28] sm:$0xf] }
 0x4a2   : > { %13205 = vmatmul.mubr.msk.bf16.gmra.mrb[8].mxu1 %vm1532_vm12, %v19031_v54  ;;  %v7744_v35 = vsel %vm14878_vm1, %v12201_v22, %v7743_v0  ;;  %v7753_v54 = vrot.slane %v14116_v30, 5  ;;  %v7752_v57 = vrot.slane %v7750_v43, 4  ;;  %v19044_v0 = vld [vmem:[#allocation10_spill] sm:$0xff]  ;;  %v19045_v22 = vcombine.low %v17025_v28, %v17029_v24  ;;  %v17277_v28 = vld [vmem:[#allocation2 + $0x38] sm:$0x1] }
 0x4a3   : > { %13208 = vmatprep.mubr.msk.bf16.mxu1 %vm1532_vm12, %v19032_v59  ;;  %v7747_v37 = vsel %vm14878_vm1, %v7745_v5, %v7746_v6  ;;  %v12203_v59 = vrot.slane %v7695_v8, 9  ;;  %v7767_v40 = vrot.slane %v19044_v0, 5  ;;  %v7766_v6 = vrot.slane %v7764_v18, 4  ;;  %v17275_v41 = vld [vmem:[#allocation2 + $0x34] sm:$0xf] }
 0x4a4   : > { %v12218_v63 = vcombine.low %v7744_v35, %v7747_v37  ;;  %v7754_v3 = vsel %vm14878_vm1, %v7752_v57, %v7753_v54  ;;  %v19046_v5 = vcombine.low %v17033_v31, %v17044_v53  ;;  %v19047_v37 = vcombine.low %v17039_v52, %v17057_v12  ;;  %v17273_v35 = vld [vmem:[#allocation2 + $0x2c] sm:$0x1]  ;;  %v17279_v24 = vld [vmem:[#allocation2 + $0x40] sm:$0xf]  ;;  %v9234_v53 = vld [vmem:[#allocation2 + $0x30] sm:$0xe] }
 0x4a5   : > { %v9311_v31 = vrot.slane %v17271_v48, 5  ;;  %v17282_v30 = vld [vmem:[#allocation2 + $0x44] sm:$0x1]  ;;  %v17284_v52 = vld [vmem:[#allocation2 + $0x4c] sm:$0xf]  ;;  %v19048_v46 = vcombine.low %v17065_v9, %v17078_v49  ;;  %v9321_v57 = vrot.slane %v17277_v28, 5 }
 0x4a6   : > { %v9235_v12 = vld [vmem:[#allocation2 + $0x3c] sm:$0xe]  ;;  %v17286_v54 = vld [vmem:[#allocation2 + $0x50] sm:$0x1] }
 0x4a7   : > { %v9313_v8 = vrot.slane %v9311_v31, 4  ;;  %v12320_v49 = vrot.slane %v9235_v12, 9 }
 0x4aa   : > { %13209 = vmatmul.mubr.msk.bf16.gmra.mrb[12].mxu1 %vm1532_vm12, %v19033_v47  ;;  %v7759_v47 = vrot.slane %v7757_v29, 4 }
 0x4ab   : > { %13212 = vmatprep.mubr.msk.bf16.mxu1 %vm1532_vm12, %v19034_v15 }
 0x4ac   : > { %v7761_v15 = vsel %vm14878_vm1, %v7759_v47, %v7760_v27  ;;  %v12319_v27 = vrot.slane %v9234_v53, 9  ;;  %v19049_v47 = vcombine.low %v17071_v2, %v17086_v21  ;;  %v17408_v2 = vld [vmem:[#allocation2 + $0xa4] sm:$0x1] }
 0x4b2   : > { %13213 = vmatmul.mubr.msk.bf16.gmra.mrb[16].mxu1 %vm1532_vm12, %v19035_v25  ;;  %v7751_v25 = vsel %vm14878_vm1, %v12202_v26, %v7750_v43  ;;  %v9233_v43 = vld [vmem:[#allocation2 + $0x24] sm:$0xe]  ;;  %v9318_v26 = vrot.slane %v17275_v41, 5 }
 0x4b3   : > { %13216 = vmatprep.mubr.msk.bf16.mxu1 %vm1532_vm12, %v19036_v62  ;;  %v12219_v36 = vcombine.low %v7751_v25, %v7754_v3  ;;  %v8310_v62 = vsel %vm1581_vm0, %v17051_v55, 0  ;;  %v7768_v55 = vsel %vm14878_vm1, %v7766_v6, %v7767_v40  ;;  %v17301_v3 = vld [vmem:[#allocation2 + $0x5c] sm:$0x1]  ;;  %v9325_v25 = vrot.slane %v17279_v24, 5 }
 0x4b4   : > { %v17320_v21 = vsel %vm14878_vm1, %v12319_v27, %v9318_v26  ;;  %v9332_v6 = vrot.slane %v17284_v52, 5 }
 0x4b5   : > { %19052 = vst [vmem:[#allocation4_spill] sm:$0xff] %v17320_v21  ;;  %v17327_v0 = vsel %vm14878_vm1, %v12320_v49, %v9325_v25  ;;  %v9327_v40 = vrot.slane %v9325_v25, 4 }
 0x4b6   : > { %19053 = vst [vmem:[#allocation12_spill] sm:$0xff] %v17327_v0  ;;  %v9334_v12 = vrot.slane %v9332_v6, 4 }
 0x4ba   : > { %13217 = vmatmul.mubr.msk.bf16.gmra.mrb[20].mxu1 %vm1532_vm12, %v19037_v13  ;;  %v7758_v13 = vsel %vm14878_vm1, %v12203_v59, %v7757_v29  ;;  %v12318_v29 = vrot.slane %v9233_v43, 9  ;;  %v9236_v59 = vld [vmem:[#allocation2 + $0x48] sm:$0xe]  ;;  %v17338_v43 = vld [vmem:[#allocation2 + $0x7c] sm:$0xf] }
 0x4bb   : > { %13220 = vmatprep.mubr.msk.bf16.mxu1 %vm1532_vm12, %v19038_v38  ;;  %v7696_v38 = vld [vmem:[#allocation2 + $0x24] sm:$0xe]  ;;  %v12220_v51 = vcombine.low %v7758_v13, %v7761_v15  ;;  %v9320_v13 = vrot.slane %v9318_v26, 4 }
 0x4bc   : > { %v12204_v20 = vrot.slane %v7696_v38, 9  ;;  %v17305_v15 = vsel %vm14878_vm1, %v12318_v29, %v9311_v31  ;;  %v9328_v38 = vrot.slane %v17282_v30, 5  ;;  %v9242_v29 = vld [vmem:[#allocation2 + $0x90] sm:$0xe] }
 0x4bd   : > { %19050 = vst [vmem:[#allocation9_spill] sm:$0xff] %v17305_v15 }
 0x4be   : > { %v17344_v31 = vsel %vm14878_vm1, %v9327_v40, %v9328_v38  ;;  %v19059_v38 = vcombine.low %v17090_v10, %v17101_v50  ;;  %v17371_v40 = vld [vmem:[#allocation2 + $0x8c] sm:$0x1]  ;;  %v17384_v10 = vld [vmem:[#allocation2 + $0x94] sm:$0xf]  ;;  %v17386_v50 = vld [vmem:[#allocation2 + $0x98] sm:$0x1] }
 0x4bf   : > { %19055 = vst [vmem:[#allocation11_spill] sm:$0xff] %v17344_v31 }
 0x4c2   : > { %13221 = vmatmul.mubr.msk.bf16.gmra.mrb[24].mxu1 %vm1532_vm12, %v19040_v33  ;;  %v7765_v33 = vsel %vm14878_vm1, %v12204_v20, %v7764_v18  ;;  %v9237_v18 = vld [vmem:[#allocation2 + $0x54] sm:$0xe]  ;;  %v12321_v20 = vrot.slane %v9236_v59, 9  ;;  %v9342_v59 = vrot.slane %v17301_v3, 5 }
 0x4c3   : > { %13224 = vmatprep.mubr.msk.bf16.mxu1 %vm1532_vm12, %v19041_v1  ;;  %v12221_v1 = vcombine.low %v7765_v33, %v7768_v55  ;;  %v17330_v55 = vld [vmem:[#allocation2 + $0x74] sm:$0x1]  ;;  %v17334_v33 = vsel %vm14878_vm1, %v9320_v13, %v9321_v57  ;;  %v9240_v13 = vld [vmem:[#allocation2 + $0x78] sm:$0xe] }
 0x4c4   : > { %19054 = vst [vmem:[#allocation13_spill] sm:$0xff] %v17334_v33  ;;  %v17348_v53 = vsel %vm14878_vm1, %v12321_v20, %v9332_v6  ;;  %v9360_v20 = vrot.slane %v17338_v43, 5 }
 0x4c5   : > { %19056 = vst [vmem:[#allocation6_spill] sm:$0xff] %v17348_v53  ;;  %v8514_v53 = vld [vmem:[#allocation2 + $0x30] sm:$0xf] }
 0x4c6   : > { %v8626_v21 = vshrl.u32 %v8514_v53, 16 }
 0x4ca   : > { %13225 = vmatmul.mubr.msk.bf16.gmra.mrb[28].mxu1 %vm1532_vm12, %v19042_v4  ;;  %v9314_v4 = vrot.slane %v17273_v35, 5 }
 0x4cb   : > { %13230 = vmatprep.mubr.msk.bf16.mxu1 %vm1532_vm12, %v12218_v63  ;;  %v17288_v63 = vld [vmem:[#allocation2 + $0x58] sm:$0xf] }
 0x4cc   : > { %v17309_v9 = vsel %vm14878_vm1, %v9313_v8, %v9314_v4  ;;  %v9239_v8 = vld [vmem:[#allocation2 + $0x6c] sm:$0xe]  ;;  %v17350_v4 = vld [vmem:[#allocation2 + $0x80] sm:$0x1] }
 0x4cd   : > { %19051 = vst [vmem:[#allocation3_spill] sm:$0xff] %v17309_v9  ;;  %v8629_v9 = vshll.u32 %v8514_v53, 16 }
 0x4d2   : > { %13231 = vmatmul.mubr.msk.bf16.vlgmr.msra.gmra.mrb[0].mxu1 %vm1532_vm12, %v12219_v36  ;;  %v17312_v36 = vld [vmem:[#allocation2 + $0x64] sm:$0xf] }
 0x4d3   : > { %13263 = vmatpush3.bf16.msra.mxu1 %v8310_v62  ;;  %13234 = vmatprep.mubr.msk.bf16.mxu1 %vm1532_vm12, %v12220_v51  ;;  %v17314_v62 = vld [vmem:[#allocation2 + $0x68] sm:$0x1]  ;;  %v17323_v51 = vld [vmem:[#allocation2 + $0x70] sm:$0xf]  ;;  %v9346_v25 = vrot.slane %v17312_v36, 5 }
 0x4d4   : > { %13991 = vmatprep.subr.msk.bf16.mxu1 %vm1581_vm0, %v17248_v42  ;;  %v8755_v15 = vshll.u32 %v17323_v51, 16 }
 0x4da   : > { %13235 = vmatmul.mubr.msk.bf16.gmra.mrb[4].mxu1 %vm1532_vm12, %v12221_v1  ;;  %v9335_v1 = vrot.slane %v17286_v54, 5 }
 0x4db   : > { %13238 = vmatprep.mubr.msk.bf16.mxu1 %vm1532_vm12, %v19045_v22  ;;  %v12322_v22 = vrot.slane %v9237_v18, 9  ;;  %v9349_v18 = vrot.slane %v17314_v62, 5 }
 0x4e2   : > { %13239 = vmatmul.mubr.msk.bf16.gmra.mrb[8].mxu1 %vm1532_vm12, %v19046_v5  ;;  %v9339_v5 = vrot.slane %v17288_v63, 5 }
 0x4e3   : > { %13242 = vmatprep.mubr.msk.bf16.mxu1 %vm1532_vm12, %v19047_v37  ;;  %v9238_v37 = vld [vmem:[#allocation2 + $0x60] sm:$0xe] }
 0x4e4   : > { %v17358_v26 = vsel %vm14878_vm1, %v12322_v22, %v9339_v5  ;;  %v9341_v57 = vrot.slane %v9339_v5, 4  ;;  %v12323_v49 = vrot.slane %v9238_v37, 9  ;;  %v9353_v22 = vrot.slane %v17323_v51, 5  ;;  %v9241_v5 = vld [vmem:[#allocation2 + $0x84] sm:$0xe] }
 0x4e5   : > { %19057 = vst [vmem:[#allocation7_spill] sm:$0xff] %v17358_v26  ;;  %v19061_v37 = vcombine.low %v17096_v34, %v17109_v32  ;;  %v12326_v27 = vrot.slane %v9241_v5, 9  ;;  %v17422_v5 = vld [vmem:[#allocation2 + $0xb0] sm:$0x1]  ;;  %v17437_v26 = vld [vmem:[#allocation2 + $0xb8] sm:$0xf] }
 0x4e6   : > { %v17377_v6 = vsel %vm14878_vm1, %v9341_v57, %v9342_v59  ;;  %v17392_v57 = vsel %vm14878_vm1, %v12323_v49, %v9346_v25  ;;  %v9356_v59 = vrot.slane %v17330_v55, 5  ;;  %v9355_v34 = vrot.slane %v9353_v22, 4 }
 0x4e7   : > { %19060 = vst [vmem:[#allocation14_spill] sm:$0xff] %v17377_v6  ;;  %19062 = vst [vmem:[#allocation8_spill] sm:$0xff] %v17392_v57  ;;  %v9363_v49 = vrot.slane %v17350_v4, 5  ;;  %v9377_v57 = vrot.slane %v17386_v50, 5  ;;  %v9244_v6 = vld [vmem:[#allocation2 + $0xa8] sm:$0xe] }
 0x4ea   : > { %13243 = vmatmul.mubr.msk.bf16.gmra.mrb[12].mxu1 %vm1532_vm12, %v19048_v46  ;;  %v17352_v46 = vld [vmem:[#allocation2 + $0x88] sm:$0xf] }
 0x4eb   : > { %13246 = vmatprep.mubr.msk.bf16.mxu1 %vm1532_vm12, %v19049_v47  ;;  %v17363_v47 = vsel %vm14878_vm1, %v9334_v12, %v9335_v1  ;;  %v12324_v1 = vrot.slane %v9239_v8, 9  ;;  %v9348_v8 = vrot.slane %v9346_v25, 4  ;;  %v9367_v25 = vrot.slane %v17352_v46, 5 }
 0x4ec   : > { %19058 = vst [vmem:[#allocation5_spill] sm:$0xff] %v17363_v47 }
 0x4ed   : > { %v17399_v32 = vsel %vm14878_vm1, %v12324_v1, %v9353_v22  ;;  %v17404_v12 = vsel %vm14878_vm1, %v9348_v8, %v9349_v18  ;;  %v9362_v18 = vrot.slane %v9360_v20, 4  ;;  %v9243_v8 = vld [vmem:[#allocation2 + $0x9c] sm:$0xe]  ;;  %v17428_v1 = vsel %vm14878_vm1, %v12326_v27, %v9367_v25 }
 0x4ee   : > { %19063 = vst [vmem:[#allocation10_spill] sm:$0xff] %v17399_v32  ;;  %19064 = vst [vmem:[#allocation15_spill] sm:$0xff] %v17404_v12  ;;  %v9369_v12 = vrot.slane %v9367_v25, 4  ;;  %v12328_v25 = vrot.slane %v9243_v8, 9  ;;  %v17452_v32 = vld [vmem:[#allocation2 + $0xc4] sm:$0xf]  ;;  %v19071_v8 = vcombine.low %v17138_v7, %v17142_v11 }
 0x4ef   : > { %19067 = vst [vmem:[#allocation18_spill] sm:$0xff] %v17428_v1  ;;  %v9395_v7 = vrot.slane %v17437_v26, 5  ;;  %v9246_v11 = vld [vmem:[#allocation2 + $0xc0] sm:$0xe] }
 0x4f2   : > { %13247 = vmatmul.mubr.msk.bf16.gmra.mrb[16].mxu1 %vm1532_vm12, %v19059_v38  ;;  %v17395_v38 = vld [vmem:[#allocation2 + $0xa0] sm:$0xf] }
 0x4f3   : > { %13250 = vmatprep.mubr.msk.bf16.mxu1 %vm1532_vm12, %v19061_v37  ;;  %v12325_v37 = vrot.slane %v9240_v13, 9  ;;  %v17414_v13 = vsel %vm14878_vm1, %v9355_v34, %v9356_v59  ;;  %v9370_v59 = vrot.slane %v17371_v40, 5  ;;  %v17433_v34 = vsel %vm14878_vm1, %v9362_v18, %v9363_v49  ;;  %v9245_v49 = vld [vmem:[#allocation2 + $0xb4] sm:$0xe]  ;;  %v17450_v18 = vld [vmem:[#allocation2 + $0xbc] sm:$0x1] }
 0x4f4   : > { %19065 = vst [vmem:[#allocation16_spill] sm:$0xff] %v17414_v13  ;;  %19068 = vst [vmem:[#allocation19_spill] sm:$0xff] %v17433_v34  ;;  %v9381_v13 = vrot.slane %v17395_v38, 5  ;;  %v12330_v1 = vrot.slane %v9245_v49, 9  ;;  %v9397_v49 = vrot.slane %v9395_v7, 4  ;;  %v9398_v47 = vrot.slane %v17450_v18, 5 }
 0x4f5   : > { %v17418_v22 = vsel %vm14878_vm1, %v12325_v37, %v9360_v20  ;;  %v12327_v20 = vrot.slane %v9242_v29, 9  ;;  %v9374_v37 = vrot.slane %v17384_v10, 5  ;;  %v17443_v27 = vsel %vm14878_vm1, %v9369_v12, %v9370_v59  ;;  %v17461_v59 = vld [vmem:[#allocation2 + $0xc8] sm:$0x1] }
 0x4f6   : > { %19066 = vst [vmem:[#allocation17_spill] sm:$0xff] %v17418_v22  ;;  %19069 = vst [vmem:[#allocation20_spill] sm:$0xff] %v17443_v27  ;;  %v19070_v29 = vcombine.low %v17121_v60, %v17130_v39  ;;  %v9384_v12 = vrot.slane %v17408_v2, 5  ;;  %v9383_v39 = vrot.slane %v9381_v13, 4  ;;  %v9388_v22 = vrot.slane %v17420_v23, 5 }
 0x4f7   : > { %v9376_v34 = vrot.slane %v9374_v37, 4  ;;  %v17465_v60 = vsel %vm14878_vm1, %v12327_v20, %v9374_v37  ;;  %v9391_v27 = vrot.slane %v17422_v5, 5  ;;  %v17478_v20 = vsel %vm14878_vm1, %v12328_v25, %v9381_v13 }
 0x4f8   : > { %19072 = vst [vmem:[#allocation21_spill] sm:$0xff] %v17465_v60  ;;  %19074 = vst [vmem:[#allocation23_spill] sm:$0xff] %v17478_v20  ;;  %v9390_v37 = vrot.slane %v9388_v22, 4  ;;  %v12331_v13 = vrot.slane %v9246_v11, 9  ;;  %v9402_v25 = vrot.slane %v17452_v32, 5  ;;  %v19080_v11 = vcombine.low %v17148_v14, %v17153_v61 }
 0x4f9   : > { %v17470_v45 = vsel %vm14878_vm1, %v9376_v34, %v9377_v57  ;;  %v17501_v57 = vsel %vm14878_vm1, %v12330_v1, %v9395_v7  ;;  %v19084_v61 = vcombine.low %v17177_v16, %v17181_v44  ;;  %v9036_v14 = vsel %vm1581_vm0, %v17248_v42, 0  ;;  %v14055_v16 = vld [vmem:[#allocation2 + $0x30] sm:$0xff]   ;;  %v8505_v44 = vld [vmem:[#allocation2 + $0xc] sm:$0xf] }
 0x4fa   : > { %13251 = vmatmul.mubr.msk.bf16.gmra.mrb[20].mxu1 %vm1532_vm12, %v19070_v29  ;;  %v12329_v29 = vrot.slane %v9244_v6, 9  ;;  %19073 = vst [vmem:[#allocation22_spill] sm:$0xff] %v17470_v45  ;;  %v17482_v6 = vsel %vm14878_vm1, %v9383_v39, %v9384_v12  ;;  %v9405_v12 = vrot.slane %v17461_v59, 5  ;;  %19078 = vst [vmem:[#allocation27_spill] sm:$0xff] %v17501_v57  ;;  %v17519_v1 = vsel %vm14878_vm1, %v12331_v13, %v9402_v25  ;;  %v17537_v13 = vld [vmem:[%s18838_s2 + $0xa] sm:$0x3] }
 0x4fb   : > { %13254 = vmatprep.mubr.msk.bf16.mxu1 %vm1532_vm12, %v19071_v8  ;;  %19075 = vst [vmem:[#allocation24_spill] sm:$0xff] %v17482_v6  ;;  %v17493_v8 = vsel %vm14878_vm1, %v9390_v37, %v9391_v27  ;;  %v19081_v37 = vcombine.low %v17161_v58, %v17165_v17  ;;  %19082 = vst [vmem:[#allocation29_spill] sm:$0xff] %v17519_v1  ;;  %v14053_v58 = vld [vmem:[#allocation2 + $0x18] sm:$0xff]   ;;  %v14054_v17 = vld [vmem:[#allocation2 + $0x24] sm:$0xff]  }
 0x4fc   : > { %v17488_v34 = vsel %vm14878_vm1, %v12329_v29, %v9388_v22  ;;  %19077 = vst [vmem:[#allocation26_spill] sm:$0xff] %v17493_v8  ;;  %v17505_v22 = vsel %vm14878_vm1, %v9397_v49, %v9398_v47  ;;  %v9404_v29 = vrot.slane %v9402_v25, 4  ;;  %v14052_v49 = vld [vmem:[#allocation2 + $0xc] sm:$0xff]   ;;  %v14056_v25 = vld [vmem:[#allocation2 + $0x3c] sm:$0xff]  }
 0x4fd   : > { %19076 = vst [vmem:[#allocation25_spill] sm:$0xff] %v17488_v34  ;;  %19079 = vst [vmem:[#allocation28_spill] sm:$0xff] %v17505_v22  ;;  %v17545_v42 = vld [vmem:[#allocation2 + $0x10] sm:$0xf]  ;;  %v14057_v39 = vld [vmem:[#allocation2 + $0x48] sm:$0xff]  }
 0x4fe   : > { %v17523_v47 = vsel %vm14878_vm1, %v9404_v29, %v9405_v12  ;;  %v8508_v12 = vld [vmem:[#allocation2 + $0x18] sm:$0xf]  ;;  %v8554_v29 = vshrl.u32 %v8505_v44, 16  ;;  %v8567_v27 = vshrl.u32 %v17545_v42, 16  ;;  %v17557_v34 = vld [vmem:[#allocation2 + $0x20] sm:$0x1] }
 0x4ff   : > { %19083 = vst [vmem:[#allocation30_spill] sm:$0xff] %v17523_v47  ;;  %v14058_v22 = vld [vmem:[#allocation2 + $0x54] sm:$0xff]   ;;  %19087 = vst [vmem:[#allocation33_spill] sm:$0xff] %v17557_v34 }
 0x502   : > { %13255 = vmatmul.mubr.msk.bf16.gmra.mrb[24].mxu1 %vm1532_vm12, %v19080_v11  ;;  %v8557_v11 = vshll.u32 %v8505_v44, 16 }
 0x503   : > { %13258 = vmatprep.mubr.msk.bf16.mxu1 %vm1532_vm12, %v19081_v37  ;;  %v8578_v37 = vshrl.u32 %v8508_v12, 16 }
 0x504   : > { %v8559_v7 = vrot.slane %v8557_v11, 5  ;;  %v8569_v11 = vrot.slane %v8567_v27, 4 }
 0x505   : > { %v8580_v47 = vrot.slane %v8578_v37, 4  ;;  %v8611_v37 = vshll.u32 %v17271_v48, 16 }
 0x50a   : > { %13259 = vmatmul.mubr.msk.bf16.gmra.mrb[28].mxu1 %vm1532_vm12, %v19084_v61  ;;  %v17547_v61 = vld [vmem:[#allocation2 + $0x1c] sm:$0xf] }
 0x50b   : > { %13264 = vmatprep.mubr.msk.bf16.mxu1 %vm1532_vm12, %v14052_v49  ;;  %v8581_v49 = vshll.u32 %v8508_v12, 16  ;;  %19085 = vst [vmem:[#allocation31_spill] sm:$0xff] %v17547_v61  ;;  %v8591_v1 = vshrl.u32 %v17547_v61, 16  ;;  %v17554_v12 = vld [vmem:[#allocation2 + $0x14] sm:$0x1] }
 0x50c   : > { %19086 = vst [vmem:[#allocation32_spill] sm:$0xff] %v17554_v12 }
 0x50d   : > { %v8593_v45 = vrot.slane %v8591_v1, 4  ;;  %v8621_v1 = vshll.u32 %v17273_v35, 16 }
 0x50f   : > { %v8623_v35 = vrot.slane %v8621_v1, 5 }
 0x512   : > { %13265 = vmatmul.mubr.msk.bf16.vlgmr.msra.gmra.mrb[0].mxu1 %vm1532_vm12, %v14053_v58  ;;  %v8563_v58 = vshll.u32 %v17545_v42, 16 }
 0x513   : > { %13297 = vmatpush3.bf16.msra.mxu1 %v9036_v14  ;;  %13268 = vmatprep.mubr.msk.bf16.mxu1 %vm1532_vm12, %v14054_v17  ;;  %v8511_v14 = vld [vmem:[#allocation2 + $0x24] sm:$0xf]  ;;  %v8556_v17 = vrot.slane %v8554_v29, 4 }
 0x514   : > { %13992 = vmatprep.subr.msk.bf16.mxu1 %vm1581_vm0, %v17537_v13  ;;  %v8602_v44 = vshrl.u32 %v8511_v14, 16  ;;  %v8605_v57 = vshll.u32 %v8511_v14, 16  ;;  %v8565_v8 = vrot.slane %v8563_v58, 5  ;;  %v8597_v58 = vshll.u32 %v17557_v34, 16  ;;  %v17739_v34 = vld [vmem:[#allocation2 + $0x7c] sm:$0xf] }
 0x515   : > { %v8560_v29 = vor.u32 %v8559_v7, %v8556_v17  ;;  %v8613_v7 = vrot.slane %v8611_v37, 5  ;;  %v14059_v17 = vld [vmem:[#allocation2 + $0x60] sm:$0xff]   ;;  %19099 = vst [vmem:[#allocation45_spill] sm:$0xff] %v17739_v34 }
 0x516   : > { %v8604_v60 = vrot.slane %v8602_v44, 4  ;;  %v8607_v14 = vrot.slane %v8605_v57, 5 }
 0x517   : > { %v8561_v31 = vrot.slane %v8560_v29, 4 }
 0x51a   : > { %13269 = vmatmul.mubr.msk.bf16.gmra.mrb[4].mxu1 %vm1532_vm12, %v14055_v16  ;;  %v8583_v16 = vrot.slane %v8581_v49, 5  ;;  %v8615_v49 = vshrl.u32 %v17271_v48, 16  ;;  %v14060_v48 = vld [vmem:[#allocation2 + $0x6c] sm:$0xff]  }
 0x51b   : > { %13272 = vmatprep.mubr.msk.bf16.mxu1 %vm1532_vm12, %v14056_v25  ;;  %v8587_v25 = vshll.u32 %v17547_v61, 16 }
 0x51c   : > { %v8584_v6 = vor.u32 %v8583_v16, %v8580_v47  ;;  %v8617_v27 = vrot.slane %v8615_v49, 4  ;;  %v8608_v47 = vor.u32 %v8607_v14, %v8604_v60  ;;  %v8599_v16 = vrot.slane %v8597_v58, 5 }
 0x51d   : > { %v8589_v20 = vrot.slane %v8587_v25, 5  ;;  %v8566_v25 = vsel %vm14338_vm13, %v8561_v31, %v8565_v8  ;;  %v8631_v60 = vrot.slane %v8629_v9, 5  ;;  %v8635_v49 = vshll.u32 %v17275_v41, 16 }
 0x51e   : > { %v8585_v0 = vrot.slane %v8584_v6, 4  ;;  %v8618_v29 = vor.u32 %v8617_v27, %v8613_v7  ;;  %v8628_v6 = vrot.slane %v8626_v21, 4  ;;  %v8609_v37 = vrot.slane %v8608_v47, 4  ;;  %v8520_v21 = vld [vmem:[#allocation2 + $0x48] sm:$0xf] }
 0x51f   : > { %v8594_v33 = vor.u32 %v8593_v45, %v8589_v20  ;;  %v8639_v14 = vshrl.u32 %v17275_v41, 16  ;;  %v8659_v41 = vshll.u32 %v17279_v24, 16  ;;  %v14062_v47 = vld [vmem:[#allocation2 + $0x84] sm:$0xff]  }
 0x520   : > { %v8590_v45 = vsel %vm14338_vm13, %v8585_v0, %v8589_v20  ;;  %v8619_v9 = vrot.slane %v8618_v29, 4  ;;  %v8632_v20 = vor.u32 %v8631_v60, %v8628_v6  ;;  %v8614_v1 = vsel %vm14338_vm13, %v8609_v37, %v8613_v7  ;;  %v8526_v6 = vld [vmem:[#allocation2 + $0x60] sm:$0xf] }
 0x521   : > { %v8595_v53 = vrot.slane %v8594_v33, 4  ;;  %v14061_v33 = vld [vmem:[#allocation2 + $0x78] sm:$0xff]   ;;  %v8674_v29 = vshrl.u32 %v8520_v21, 16 }
 0x522   : > { %13273 = vmatmul.mubr.msk.bf16.gmra.mrb[8].mxu1 %vm1532_vm12, %v14057_v39  ;;  %v8573_v39 = vshll.u32 %v17554_v12, 16  ;;  %v8633_v60 = vrot.slane %v8632_v20, 4  ;;  %v10793_v12 = vld [vmem:[#allocation2 + $0x78] sm:$0xe] }
 0x523   : > { %13276 = vmatprep.mubr.msk.bf16.mxu1 %vm1532_vm12, %v14058_v22  ;;  %v8570_v22 = vor.u32 %v8569_v11, %v8565_v8  ;;  %v8517_v11 = vld [vmem:[#allocation2 + $0x3c] sm:$0xf]  ;;  %v8600_v31 = vsel %vm14338_vm13, %v8595_v53, %v8599_v16  ;;  %v8645_v8 = vshll.u32 %v17277_v28, 16  ;;  %v8624_v28 = vsel %vm14338_vm13, %v8619_v9, %v8623_v35 }
 0x524   : > { %v8575_v57 = vrot.slane %v8573_v39, 5  ;;  %v8650_v58 = vshrl.u32 %v8517_v11, 16  ;;  %v17579_v0 = vcombine.low %v8590_v45, %v8600_v31  ;;  %v8653_v27 = vshll.u32 %v8517_v11, 16 }
 0x525   : > { %v8571_v44 = vrot.slane %v8570_v22, 4  ;;  %v8641_v16 = vrot.slane %v8639_v14, 4  ;;  %v8677_v11 = vshll.u32 %v8520_v21, 16  ;;  %v8687_v45 = vshrl.u32 %v17284_v52, 16 }
 0x526   : > { %v8655_v37 = vrot.slane %v8653_v27, 5  ;;  %v17595_v35 = vrot.slane %v8659_v41, 5  ;;  %v17597_v14 = vcombine.low %v8614_v1, %v8624_v28  ;;  %v8707_v31 = vshll.u32 %v17288_v63, 16  ;;  %v14063_v41 = vld [vmem:[#allocation2 + $0x90] sm:$0xff]  }
 0x527   : > { %v8576_v39 = vsel %vm14338_vm13, %v8571_v44, %v8575_v57  ;;  %v17587_v57 = vrot.slane %v8635_v49, 5  ;;  %v8652_v44 = vrot.slane %v8650_v58, 4  ;;  %v8676_v58 = vrot.slane %v8674_v29, 4 }
 0x528   : > { %v17577_v22 = vcombine.low %v8566_v25, %v8576_v39  ;;  %v17590_v25 = vrot.slane %v8645_v8, 5  ;;  %v8711_v8 = vshrl.u32 %v17288_v63, 16  ;;  %v8679_v9 = vrot.slane %v8677_v11, 5 }
 0x529   : > { %v8642_v39 = vor.u32 %v8641_v16, %v17587_v57  ;;  %v8722_v21 = vshrl.u32 %v8526_v6, 16  ;;  %v8656_v1 = vor.u32 %v8655_v37, %v8652_v44  ;;  %v8669_v63 = vshll.u32 %v17282_v30, 16 }
 0x52a   : > { %13277 = vmatmul.mubr.msk.bf16.gmra.mrb[12].mxu1 %vm1532_vm12, %v14059_v17  ;;  %v8663_v17 = vshrl.u32 %v17279_v24, 16  ;;  %v8683_v24 = vshll.u32 %v17284_v52, 16  ;;  %v8725_v52 = vshll.u32 %v8526_v6, 16  ;;  %v17609_v16 = vrot.slane %v8707_v31, 5 }
 0x52b   : > { %13280 = vmatprep.mubr.msk.bf16.mxu1 %vm1532_vm12, %v14060_v48  ;;  %v8523_v48 = vld [vmem:[#allocation2 + $0x54] sm:$0xf]  ;;  %v8713_v29 = vrot.slane %v8711_v8, 4  ;;  %v8731_v11 = vshll.u32 %v17312_v36, 16  ;;  %v8724_v6 = vrot.slane %v8722_v21, 4  ;;  %v8643_v44 = vrot.slane %v8642_v39, 4 }
 0x52c   : > { %v8698_v7 = vshrl.u32 %v8523_v48, 16  ;;  %v8701_v53 = vshll.u32 %v8523_v48, 16  ;;  %v8665_v49 = vrot.slane %v8663_v17, 4  ;;  %v8689_v48 = vrot.slane %v8687_v45, 4  ;;  %v8529_v45 = vld [vmem:[#allocation2 + $0x6c] sm:$0xf] }
 0x52d   : > { %v8638_v17 = vsel %vm14338_vm13, %v8633_v60, %v17587_v57  ;;  %v8727_v57 = vrot.slane %v8725_v52, 5  ;;  %v8717_v37 = vshll.u32 %v17301_v3, 16  ;;  %v8671_v31 = vrot.slane %v8669_v63, 5 }
 0x52e   : > { %v8700_v20 = vrot.slane %v8698_v7, 4  ;;  %v8703_v27 = vrot.slane %v8701_v53, 5  ;;  %v8666_v28 = vor.u32 %v8665_v49, %v17595_v35  ;;  %v8680_v7 = vor.u32 %v8679_v9, %v8676_v58 }
 0x52f   : > { %v8693_v53 = vshll.u32 %v17286_v54, 16  ;;  %v8657_v49 = vrot.slane %v8656_v1, 4  ;;  %v8746_v8 = vshrl.u32 %v8529_v45, 16  ;;  %v8648_v58 = vsel %vm14338_vm13, %v8643_v44, %v17590_v25  ;;  %v14065_v1 = vld [vmem:[#allocation2 + $0xa8] sm:$0xff]  }
 0x530   : > { %v8704_v60 = vor.u32 %v8703_v27, %v8700_v20  ;;  %v8714_v54 = vor.u32 %v8713_v29, %v17609_v16  ;;  %v17622_v9 = vrot.slane %v8731_v11, 5  ;;  %v8667_v52 = vrot.slane %v8666_v28, 4  ;;  %v14066_v29 = vld [vmem:[#allocation2 + $0xb4] sm:$0xff]  }
 0x531   : > { %v8681_v39 = vrot.slane %v8680_v7, 4  ;;  %v8719_v3 = vrot.slane %v8717_v37, 5  ;;  %v8748_v63 = vrot.slane %v8746_v8, 4  ;;  %v8759_v25 = vshrl.u32 %v17323_v51, 16  ;;  %v10787_v8 = vld [vmem:[#allocation2 + $0x30] sm:$0xe] }
 0x532   : > { %13281 = vmatmul.mubr.msk.bf16.gmra.mrb[16].mxu1 %vm1532_vm12, %v14061_v33  ;;  %v17602_v33 = vrot.slane %v8683_v24, 5  ;;  %v8735_v24 = vshrl.u32 %v17312_v36, 16  ;;  %v8749_v36 = vshll.u32 %v8529_v45, 16  ;;  %v8705_v27 = vrot.slane %v8704_v60, 4  ;;  %v17652_v60 = vld [vmem:[#allocation2 + $0x34] sm:$0xf] }
 0x533   : > { %13284 = vmatprep.mubr.msk.bf16.mxu1 %vm1532_vm12, %v14062_v47  ;;  %v14064_v47 = vld [vmem:[#allocation2 + $0x9c] sm:$0xff]   ;;  %v17627_v11 = vcombine.low %v8638_v17, %v8648_v58  ;;  %v8662_v28 = vsel %vm14338_vm13, %v8657_v49, %v17595_v35  ;;  %19088 = vst [vmem:[#allocation34_spill] sm:$0xff] %v17652_v60  ;;  %v17654_v37 = vrot.slane %v8755_v15, 5  ;;  %v17656_v49 = vrot.slane %v8759_v25, 4 }
 0x534   : > { %v8690_v30 = vor.u32 %v8689_v48, %v17602_v33  ;;  %v8737_v21 = vrot.slane %v8735_v24, 4  ;;  %v8728_v48 = vor.u32 %v8727_v57, %v8724_v6  ;;  %v8751_v45 = vrot.slane %v8749_v36, 5 }
 0x535   : > { %v8715_v24 = vrot.slane %v8714_v54, 4  ;;  %v8686_v51 = vsel %vm14338_vm13, %v8681_v39, %v17602_v33  ;;  %v8710_v35 = vsel %vm14338_vm13, %v8705_v27, %v17609_v16  ;;  %v8779_v16 = vshll.u32 %v17338_v43, 16 }
 0x536   : > { %v8691_v20 = vrot.slane %v8690_v30, 4  ;;  %v8738_v7 = vor.u32 %v8737_v21, %v17622_v9  ;;  %v17641_v6 = vrot.slane %v8728_v48, 4  ;;  %v8765_v30 = vshll.u32 %v17330_v55, 16  ;;  %v17662_v21 = vld [vmem:[#allocation2 + $0x38] sm:$0x1] }
 0x537   : > { %v8720_v57 = vsel %vm14338_vm13, %v8715_v24, %v8719_v3  ;;  %v8752_v33 = vor.u32 %v8751_v45, %v8748_v63  ;;  %v8783_v54 = vshrl.u32 %v17338_v43, 16  ;;  %19089 = vst [vmem:[#allocation35_spill] sm:$0xff] %v17662_v21  ;;  %v17676_v48 = vld [vmem:[#allocation2 + $0x40] sm:$0xf]  ;;  %v17686_v3 = vld [vmem:[#allocation2 + $0x4c] sm:$0xf] }
 0x538   : > { %v17658_v36 = vrot.slane %v8738_v7, 4  ;;  %v17668_v39 = vcombine.low %v8710_v35, %v8720_v57  ;;  %19090 = vst [vmem:[#allocation36_spill] sm:$0xff] %v17676_v48  ;;  %v17684_v27 = vrot.slane %v8765_v30, 5  ;;  %19092 = vst [vmem:[#allocation38_spill] sm:$0xff] %v17686_v3  ;;  %v10788_v63 = vld [vmem:[#allocation2 + $0x3c] sm:$0xe] }
 0x539   : > { %v14067_v45 = vld [vmem:[#allocation2 + $0xc0] sm:$0xff]   ;;  %v17689_v25 = vrot.slane %v8752_v33, 4  ;;  %v17695_v24 = vld [vmem:[#allocation2 + $0x50] sm:$0x1]  ;;  %v17697_v7 = vld [vmem:[#allocation2 + $0x58] sm:$0xf] }
 0x53a   : > { %13285 = vmatmul.mubr.msk.bf16.gmra.mrb[20].mxu1 %vm1532_vm12, %v14063_v41  ;;  %v8695_v41 = vrot.slane %v8693_v53, 5  ;;  %v8532_v53 = vld [vmem:[#allocation2 + $0x78] sm:$0xf]  ;;  %19093 = vst [vmem:[#allocation39_spill] sm:$0xff] %v17695_v24  ;;  %19094 = vst [vmem:[#allocation40_spill] sm:$0xff] %v17697_v7  ;;  %v17704_v35 = vrot.slane %v8783_v54, 4 }
 0x53b   : > { %13288 = vmatprep.mubr.msk.bf16.mxu1 %vm1532_vm12, %v14064_v47  ;;  %v8741_v47 = vshll.u32 %v17314_v62, 16  ;;  %v8672_v62 = vsel %vm14338_vm13, %v8667_v52, %v8671_v31  ;;  %v8770_v31 = vshrl.u32 %v8532_v53, 16  ;;  %v8773_v58 = vshll.u32 %v8532_v53, 16  ;;  %v17706_v57 = vld [vmem:[#allocation2 + $0x5c] sm:$0x1] }
 0x53c   : > { %v8696_v17 = vsel %vm14338_vm13, %v8691_v20, %v8695_v41  ;;  %v17664_v52 = vcombine.low %v8662_v28, %v8672_v62  ;;  %v17674_v41 = vld [vmem:[#allocation2 + $0x84] sm:$0xf]  ;;  %v10868_v53 = vrot.slane %v17662_v21, 5  ;;  %v10789_v62 = vld [vmem:[#allocation2 + $0x48] sm:$0xe]  ;;  %19095 = vst [vmem:[#allocation41_spill] sm:$0xff] %v17706_v57 }
 0x53d   : > { %v17649_v44 = vrot.slane %v8741_v47, 5  ;;  %v17666_v55 = vcombine.low %v8686_v51, %v8696_v17  ;;  %v17678_v20 = vld [vmem:[#allocation2 + $0x44] sm:$0x1]  ;;  %v12433_v47 = vrot.slane %v10787_v8, 9  ;;  %v17693_v28 = vrot.slane %v8770_v31, 4 }
 0x53e   : > { %19091 = vst [vmem:[#allocation37_spill] sm:$0xff] %v17678_v20  ;;  %v17700_v51 = vrot.slane %v8773_v58, 5  ;;  %v17702_v17 = vrot.slane %v8779_v16, 5  ;;  %v17711_v8 = vld [vmem:[#allocation2 + $0x64] sm:$0xf]  ;;  %v12434_v15 = vrot.slane %v10788_v63, 9 }
 0x53f   : > { %v10872_v43 = vrot.slane %v17676_v48, 5  ;;  %v10790_v58 = vld [vmem:[#allocation2 + $0x54] sm:$0xe]  ;;  %v17716_v16 = vld [vmem:[#allocation2 + $0x68] sm:$0x1]  ;;  %v12435_v31 = vrot.slane %v10789_v62, 9 }
 0x540   : > { %v10791_v63 = vld [vmem:[#allocation2 + $0x60] sm:$0xe]  ;;  %v9506_v33 = vsel %vm1581_vm0, %v17537_v13, 0  ;;  %v17729_v21 = vld [vmem:[#allocation2 + $0x70] sm:$0xf] }
 0x541   : > { %v10874_v48 = vrot.slane %v10872_v43, 4  ;;  %v10792_v62 = vld [vmem:[#allocation2 + $0x6c] sm:$0xe]  ;;  %v17743_v13 = vsel %vm14878_vm1, %v12434_v15, %v10872_v43  ;;  %v10893_v15 = vrot.slane %v17711_v8, 5  ;;  %v17760_v43 = vld [vmem:[#allocation2 + $0x8c] sm:$0x1] }
 0x542   : > { %13289 = vmatmul.mubr.msk.bf16.gmra.mrb[24].mxu1 %vm1532_vm12, %v14065_v1  ;;  %v10865_v1 = vrot.slane %v17652_v60, 5  ;;  %v12436_v60 = vrot.slane %v10790_v58, 9  ;;  %19100 = vst [vmem:[#allocation46_spill] sm:$0xff] %v17743_v13  ;;  %v17749_v58 = vld [vmem:[#allocation2 + $0x80] sm:$0x1]  ;;  %19105 = vst [vmem:[#allocation51_spill] sm:$0xff] %v17760_v43 }
 0x543   : > { %13292 = vmatprep.mubr.msk.bf16.mxu1 %vm1532_vm12, %v14066_v29  ;;  %v10875_v29 = vrot.slane %v17678_v20, 5  ;;  %v17737_v20 = vld [vmem:[#allocation2 + $0x74] sm:$0x1]  ;;  %19102 = vst [vmem:[#allocation48_spill] sm:$0xff] %v17749_v58  ;;  %v10900_v61 = vrot.slane %v17729_v21, 5 }
 0x544   : > { %v10867_v30 = vrot.slane %v10865_v1, 4  ;;  %v17720_v54 = vsel %vm14878_vm1, %v12433_v47, %v10865_v1  ;;  %v10879_v47 = vrot.slane %v17686_v3, 5  ;;  %v10882_v1 = vrot.slane %v17695_v24, 5  ;;  %19098 = vst [vmem:[#allocation44_spill] sm:$0xff] %v17737_v20  ;;  %v17787_v13 = vld [vmem:[#allocation2 + $0x98] sm:$0x1] }
 0x545   : > { %19096 = vst [vmem:[#allocation42_spill] sm:$0xff] %v17720_v54  ;;  %v12437_v54 = vrot.slane %v10791_v63, 9  ;;  %v12438_v63 = vrot.slane %v10792_v62, 9  ;;  %v10794_v62 = vld [vmem:[#allocation2 + $0x84] sm:$0xe] }
 0x546   : > { %v17757_v24 = vsel %vm14878_vm1, %v12435_v31, %v10879_v47  ;;  %v17771_v31 = vld [vmem:[%s18838_s2 + $0xc] sm:$0x3] }
 0x547   : > { %19104 = vst [vmem:[#allocation50_spill] sm:$0xff] %v17757_v24 }
 0x54a   : > { %13293 = vmatmul.mubr.msk.bf16.gmra.mrb[28].mxu1 %vm1532_vm12, %v14067_v45  ;;  %v17724_v45 = vsel %vm14878_vm1, %v10867_v30, %v10868_v53  ;;  %v10886_v53 = vrot.slane %v17697_v7, 5  ;;  %v10889_v30 = vrot.slane %v17706_v57, 5  ;;  %v17751_v7 = vld [vmem:[#allocation2 + $0x88] sm:$0xf] }
 0x54b   : > { %13298 = vmatprep.mubr.msk.bf16.mxu1 %vm1532_vm12, %v17577_v22  ;;  %19097 = vst [vmem:[#allocation43_spill] sm:$0xff] %v17724_v45  ;;  %v17747_v22 = vsel %vm14878_vm1, %v10874_v48, %v10875_v29  ;;  %v10881_v45 = vrot.slane %v10879_v47, 4  ;;  %19103 = vst [vmem:[#allocation49_spill] sm:$0xff] %v17751_v7  ;;  %v10896_v29 = vrot.slane %v17716_v16, 5  ;;  %v10903_v47 = vrot.slane %v17737_v20, 5 }
 0x54c   : > { %19101 = vst [vmem:[#allocation47_spill] sm:$0xff] %v17747_v22  ;;  %v10888_v3 = vrot.slane %v10886_v53, 4  ;;  %v17777_v57 = vsel %vm14878_vm1, %v12436_v60, %v10886_v53  ;;  %v17785_v22 = vld [vmem:[#allocation2 + $0x94] sm:$0xf]  ;;  %v17793_v60 = vsel %vm14878_vm1, %v12437_v54, %v10893_v15  ;;  %v10902_v53 = vrot.slane %v10900_v61, 4 }
 0x54d   : > { %v17764_v48 = vsel %vm14878_vm1, %v10881_v45, %v10882_v1  ;;  %19107 = vst [vmem:[#allocation53_spill] sm:$0xff] %v17777_v57  ;;  %v10895_v1 = vrot.slane %v10893_v15, 4  ;;  %19109 = vst [vmem:[#allocation55_spill] sm:$0xff] %v17793_v60  ;;  %v10907_v54 = vrot.slane %v17739_v34, 5  ;;  %v10795_v15 = vld [vmem:[#allocation2 + $0x90] sm:$0xe] }
 0x54e   : > { %19106 = vst [vmem:[#allocation52_spill] sm:$0xff] %v17764_v48  ;;  %v17781_v45 = vsel %vm14878_vm1, %v10888_v3, %v10889_v30  ;;  %v17797_v3 = vsel %vm14878_vm1, %v12438_v63, %v10900_v61  ;;  %v10914_v63 = vrot.slane %v17751_v7, 5  ;;  %v10796_v57 = vld [vmem:[#allocation2 + $0x9c] sm:$0xe]  ;;  %v10917_v61 = vrot.slane %v17760_v43, 5 }
 0x54f   : > { %19108 = vst [vmem:[#allocation54_spill] sm:$0xff] %v17781_v45  ;;  %19110 = vst [vmem:[#allocation56_spill] sm:$0xff] %v17797_v3  ;;  %v17805_v30 = vsel %vm14878_vm1, %v10895_v1, %v10896_v29  ;;  %v12439_v45 = vrot.slane %v10793_v12, 9  ;;  %v17815_v29 = vld [vmem:[#allocation2 + $0xa4] sm:$0x1]  ;;  %v17821_v12 = vsel %vm14878_vm1, %v10902_v53, %v10903_v47  ;;  %v10909_v24 = vrot.slane %v10907_v54, 4 }
 0x550   : > { %19112 = vst [vmem:[#allocation58_spill] sm:$0xff] %v17805_v30  ;;  %19113 = vst [vmem:[#allocation59_spill] sm:$0xff] %v17815_v29  ;;  %v17817_v1 = vld [vmem:[#allocation2 + $0xac] sm:$0xf]  ;;  %v17828_v30 = vld [vmem:[#allocation2 + $0xb0] sm:$0x1] }
 0x551   : > { %19114 = vst [vmem:[#allocation60_spill] sm:$0xff] %v17821_v12  ;;  %v17825_v48 = vsel %vm14878_vm1, %v12439_v45, %v10907_v54  ;;  %v10916_v7 = vrot.slane %v10914_v63, 4  ;;  %v10797_v47 = vld [vmem:[#allocation2 + $0xa8] sm:$0xe]  ;;  %v17836_v53 = vld [vmem:[#allocation2 + $0xb8] sm:$0xf] }
 0x552   : > { %13299 = vmatmul.mubr.msk.bf16.vlgmr.msra.gmra.mrb[0].mxu1 %vm1532_vm12, %v17579_v0  ;;  %v17801_v0 = vld [vmem:[#allocation2 + $0xa0] sm:$0xf]  ;;  %19115 = vst [vmem:[#allocation61_spill] sm:$0xff] %v17825_v48  ;;  %19117 = vst [vmem:[#allocation63_spill] sm:$0xff] %v17836_v53  ;;  %v10921_v54 = vrot.slane %v17785_v22, 5  ;;  %v10924_v43 = vrot.slane %v17787_v13, 5 }
 0x553   : > { %13331 = vmatpush3.bf16.msra.mxu1 %v9506_v33  ;;  %13302 = vmatprep.mubr.msk.bf16.mxu1 %vm1532_vm12, %v17597_v14  ;;  %19111 = vst [vmem:[#allocation57_spill] sm:$0xff] %v17801_v0  ;;  %v10910_v14 = vrot.slane %v17749_v58, 5  ;;  %v12440_v33 = vrot.slane %v10794_v62, 9  ;;  %v12441_v58 = vrot.slane %v10795_v15, 9  ;;  %v12442_v20 = vrot.slane %v10796_v57, 9 }
 0x554   : > { %13993 = vmatprep.subr.msk.bf16.mxu1 %vm1581_vm0, %v17771_v31  ;;  %v10100_v34 = vld [vmem:[#allocation2 + $0xbc] sm:$0x1]  ;;  %v10928_v15 = vrot.slane %v17801_v0, 5  ;;  %v10798_v12 = vld [vmem:[#allocation2 + $0xb4] sm:$0xe]  ;;  %v10923_v62 = vrot.slane %v10921_v54, 4 }
 0x555   : > { %v17834_v60 = vsel %vm14878_vm1, %v12440_v33, %v10914_v63  ;;  %v17840_v45 = vsel %vm14878_vm1, %v10909_v24, %v10910_v14  ;;  %v17848_v33 = vsel %vm14878_vm1, %v10916_v7, %v10917_v61  ;;  %v10931_v63 = vrot.slane %v17815_v29, 5  ;;  %v17852_v24 = vld [vmem:[#allocation2 + $0xc4] sm:$0xf]  ;;  %v10103_v14 = vld [vmem:[#allocation2 + $0xc8] sm:$0x1] }
 0x556   : > { %19116 = vst [vmem:[#allocation62_spill] sm:$0xff] %v17834_v60  ;;  %19118 = vst [vmem:[#allocation64_spill] sm:$0xff] %v17840_v45  ;;  %v17858_v57 = vsel %vm14878_vm1, %v12441_v58, %v10921_v54  ;;  %v12443_v45 = vrot.slane %v10797_v47, 9  ;;  %v17864_v7 = vsel %vm14878_vm1, %v12442_v20, %v10928_v15  ;;  %v10930_v61 = vrot.slane %v10928_v15, 4  ;;  %v10799_v0 = vld [vmem:[#allocation2 + $0xc0] sm:$0xe] }
 0x557   : > { %19119 = vst [vmem:[#allocation65_spill] sm:$0xff] %v17848_v33  ;;  %v10935_v48 = vrot.slane %v17817_v1, 5  ;;  %v10938_v29 = vrot.slane %v17828_v30, 5  ;;  %v17872_v58 = vsel %vm14878_vm1, %v10923_v62, %v10924_v43  ;;  %v12444_v47 = vrot.slane %v10798_v12, 9  ;;  %v10800_v3 = vld [vmem:[#allocation2 + $0xcc] sm:$0xe] }
 0x558   : > { %19120 = vst [vmem:[#allocation66_spill] sm:$0xff] %v17872_v58  ;;  %v10945_v54 = vrot.slane %v10100_v34, 5  ;;  %v17875_v20 = vld [vmem:[#allocation2 + $0xd0] sm:$0xf]  ;;  %v10106_v15 = vld [vmem:[#allocation2 + $0xd4] sm:$0x1]  ;;  %v17881_v60 = vsel %vm14878_vm1, %v10930_v61, %v10931_v63 }
 0x559   : > { %19121 = vst [vmem:[#allocation67_spill] sm:$0xff] %v17881_v60  ;;  %v10937_v43 = vrot.slane %v10935_v48, 4  ;;  %v10949_v63 = vrot.slane %v17852_v24, 5  ;;  %v10952_v61 = vrot.slane %v10103_v14, 5  ;;  %v12446_v58 = vrot.slane %v10800_v3, 9  ;;  %v19199_v19 = vld [vmem:[#allocation53_spill] sm:$0xff] }
 0x55a   : > { %13303 = vmatmul.mubr.msk.bf16.gmra.mrb[4].mxu1 %vm1532_vm12, %v17627_v11  ;;  %v10942_v11 = vrot.slane %v17836_v53, 5  ;;  %v12445_v53 = vrot.slane %v10799_v0, 9  ;;  %v8803_v0 = vshll.u32 %v17352_v46, 16  ;;  %v8776_v3 = vor.u32 %v17700_v51, %v17693_v28  ;;  %v8541_v60 = vld [vmem:[#allocation2 + $0x9c] sm:$0xf] }
 0x55b   : > { %13306 = vmatprep.mubr.msk.bf16.mxu1 %vm1532_vm12, %v17664_v52  ;;  %v17885_v52 = vsel %vm14878_vm1, %v12443_v45, %v10935_v48  ;;  %v17895_v33 = vsel %vm14878_vm1, %v10937_v43, %v10938_v29  ;;  %v8538_v45 = vld [vmem:[#allocation2 + $0x90] sm:$0xf]  ;;  %v8807_v29 = vshrl.u32 %v17352_v46, 16  ;;  %v10951_v14 = vrot.slane %v10949_v63, 4 }
 0x55c   : > { %19122 = vst [vmem:[#allocation68_spill] sm:$0xff] %v17885_v52  ;;  %v17891_v34 = vsel %vm14878_vm1, %v12444_v47, %v10942_v11  ;;  %v10944_v62 = vrot.slane %v10942_v11, 4  ;;  %19123 = vst [vmem:[#allocation69_spill] sm:$0xff] %v17895_v33  ;;  %v10956_v47 = vrot.slane %v17875_v20, 5  ;;  %v10959_v11 = vrot.slane %v10106_v15, 5 }
 0x55d   : > { %v8789_v48 = vshll.u32 %v17350_v4, 16  ;;  %v19124_v33 = vshrl.u32 %v17674_v41, 16  ;;  %v19125_v15 = vshll.u32 %v17674_v41, 16  ;;  %v8818_v46 = vshrl.u32 %v8538_v45, 16 }
 0x55e   : > { %v17902_v12 = vsel %vm14878_vm1, %v10944_v62, %v10945_v54  ;;  %v10958_v62 = vrot.slane %v10956_v47, 4  ;;  %v17920_v43 = vsel %vm14878_vm1, %v12445_v53, %v10949_v63  ;;  %v17924_v28 = vsel %vm14878_vm1, %v10951_v14, %v10952_v61 }
 0x55f   : > { %v8796_v54 = vrot.slane %v19124_v33, 4  ;;  %v8799_v52 = vrot.slane %v19125_v15, 5  ;;  %v8821_v4 = vshll.u32 %v8538_v45, 16  ;;  %v17932_v41 = vsel %vm14878_vm1, %v12446_v58, %v10956_v47 }
 0x560   : > { %v17936_v51 = vsel %vm14878_vm1, %v10958_v62, %v10959_v11  ;;  %v19126_v53 = vor.u32 %v17656_v49, %v17654_v37  ;;  %v8805_v63 = vrot.slane %v8803_v0, 5  ;;  %v8809_v61 = vrot.slane %v8807_v29, 4 }
 0x561   : > { %v8758_v45 = vsel %vm14338_vm13, %v17689_v25, %v17654_v37  ;;  %v8786_v58 = vor.u32 %v17704_v35, %v17702_v17  ;;  %v8842_v47 = vshrl.u32 %v8541_v60, 16  ;;  %v8845_v11 = vshll.u32 %v8541_v60, 16 }
 0x562   : > { %13307 = vmatmul.mubr.msk.bf16.gmra.mrb[8].mxu1 %vm1532_vm12, %v17666_v55  ;;  %v12462_v55 = vcombine.low %v17920_v43, %v17924_v28  ;;  %v8763_v33 = vrot.slane %v19126_v53, 4  ;;  %v8777_v14 = vrot.slane %v8776_v3, 4  ;;  %v8800_v0 = vor.u32 %v8799_v52, %v8796_v54 }
 0x563   : > { %13310 = vmatprep.mubr.msk.bf16.mxu1 %vm1532_vm12, %v17668_v39  ;;  %v8813_v29 = vshll.u32 %v17371_v40, 16  ;;  %v8820_v62 = vrot.slane %v8818_v46, 4  ;;  %v8823_v15 = vrot.slane %v8821_v4, 5  ;;  %v8827_v53 = vshll.u32 %v17384_v10, 16  ;;  %v8544_v46 = vld [vmem:[#allocation2 + $0xa8] sm:$0xf] }
 0x564   : > { %v8768_v49 = vsel %vm14338_vm13, %v8763_v33, %v17684_v27  ;;  %v8831_v39 = vshrl.u32 %v17384_v10, 16  ;;  %v19127_v37 = vsel %vm14338_vm13, %v17658_v36, %v17649_v44  ;;  %v19128_v27 = vsel %vm14338_vm13, %v17641_v6, %v17622_v9 }
 0x565   : > { %v12291_v25 = vcombine.low %v19128_v27, %v19127_v37  ;;  %v12292_v35 = vcombine.low %v8758_v45, %v8768_v49  ;;  %v8791_v60 = vrot.slane %v8789_v48, 5  ;;  %v8810_v40 = vor.u32 %v8809_v61, %v8805_v63  ;;  %v8547_v61 = vld [vmem:[#allocation2 + $0xb4] sm:$0xf] }
 0x566   : > { %v8844_v52 = vrot.slane %v8842_v47, 4  ;;  %v8847_v3 = vrot.slane %v8845_v11, 5  ;;  %v8851_v54 = vshll.u32 %v17395_v38, 16  ;;  %v8855_v10 = vshrl.u32 %v17395_v38, 16 }
 0x567   : > { %v8782_v44 = vsel %vm14338_vm13, %v8777_v14, %v17702_v17  ;;  %v8787_v36 = vrot.slane %v8786_v58, 4  ;;  %v8801_v4 = vrot.slane %v8800_v0, 4  ;;  %v8815_v9 = vrot.slane %v8813_v29, 5 }
 0x568   : > { %v8824_v6 = vor.u32 %v8823_v15, %v8820_v62  ;;  %v8829_v48 = vrot.slane %v8827_v53, 5  ;;  %v8833_v33 = vrot.slane %v8831_v39, 4  ;;  %v8811_v38 = vrot.slane %v8810_v40, 4 }
 0x569   : > { %v8792_v45 = vsel %vm14338_vm13, %v8787_v36, %v8791_v60  ;;  %v8866_v47 = vshrl.u32 %v8544_v46, 16  ;;  %v8869_v11 = vshll.u32 %v8544_v46, 16  ;;  %v8837_v49 = vshll.u32 %v17386_v50, 16  ;;  %v8550_v36 = vld [vmem:[#allocation2 + $0xc0] sm:$0xf] }
 0x56a   : > { %13311 = vmatmul.mubr.msk.bf16.gmra.mrb[12].mxu1 %vm1532_vm12, %v12291_v25  ;;  %v8848_v37 = vor.u32 %v8847_v3, %v8844_v52  ;;  %v8853_v27 = vrot.slane %v8851_v54, 5  ;;  %v8857_v17 = vrot.slane %v8855_v10, 4  ;;  %v12293_v58 = vcombine.low %v8782_v44, %v8792_v45 }
 0x56b   : > { %13314 = vmatprep.mubr.msk.bf16.mxu1 %vm1532_vm12, %v12292_v35  ;;  %v8806_v14 = vsel %vm14338_vm13, %v8801_v4, %v8805_v63  ;;  %v8890_v0 = vshrl.u32 %v8547_v61, 16  ;;  %v8893_v29 = vshll.u32 %v8547_v61, 16  ;;  %v8816_v39 = vsel %vm14338_vm13, %v8811_v38, %v8815_v9 }
 0x56c   : > { %v8825_v62 = vrot.slane %v8824_v6, 4  ;;  %v8834_v15 = vor.u32 %v8833_v33, %v8829_v48  ;;  %v8861_v53 = vshll.u32 %v17408_v2, 16  ;;  %v8868_v25 = vrot.slane %v8866_v47, 4 }
 0x56d   : > { %v8871_v35 = vrot.slane %v8869_v11, 5  ;;  %v8875_v50 = vshll.u32 %v17420_v23, 16  ;;  %v8879_v60 = vshrl.u32 %v17420_v23, 16  ;;  %v12294_v40 = vcombine.low %v8806_v14, %v8816_v39 }
 0x56e   : > { %v8839_v52 = vrot.slane %v8837_v49, 5  ;;  %v8849_v3 = vrot.slane %v8848_v37, 4  ;;  %v8858_v54 = vor.u32 %v8857_v17, %v8853_v27  ;;  %v8892_v63 = vrot.slane %v8890_v0, 4 }
 0x56f   : > { %v8895_v10 = vrot.slane %v8893_v29, 5  ;;  %v8899_v46 = vshll.u32 %v17437_v26, 16  ;;  %v8903_v44 = vshrl.u32 %v17437_v26, 16  ;;  %v8830_v2 = vsel %vm14338_vm13, %v8825_v62, %v8829_v48 }
 0x570   : > { %v8863_v4 = vrot.slane %v8861_v53, 5  ;;  %v8835_v23 = vrot.slane %v8834_v15, 4  ;;  %v8872_v9 = vor.u32 %v8871_v35, %v8868_v25  ;;  %v8877_v6 = vrot.slane %v8875_v50, 5 }
 0x571   : > { %v8881_v33 = vrot.slane %v8879_v60, 4  ;;  %v8854_v61 = vsel %vm14338_vm13, %v8849_v3, %v8853_v27  ;;  %v8859_v45 = vrot.slane %v8858_v54, 4  ;;  %v8914_v38 = vshrl.u32 %v8550_v36, 16 }
 0x572   : > { %13315 = vmatmul.mubr.msk.bf16.gmra.mrb[16].mxu1 %vm1532_vm12, %v12293_v58  ;;  %v8917_v47 = vshll.u32 %v8550_v36, 16  ;;  %v8840_v26 = vsel %vm14338_vm13, %v8835_v23, %v8839_v52  ;;  %v8896_v11 = vor.u32 %v8895_v10, %v8892_v63  ;;  %v8901_v49 = vrot.slane %v8899_v46, 5 }
 0x573   : > { %13318 = vmatprep.mubr.msk.bf16.mxu1 %vm1532_vm12, %v12294_v40  ;;  %v8905_v37 = vrot.slane %v8903_v44, 4  ;;  %v12295_v17 = vcombine.low %v8830_v2, %v8840_v26  ;;  %v8864_v48 = vsel %vm14338_vm13, %v8859_v45, %v8863_v4  ;;  %v8885_v58 = vshll.u32 %v17422_v5, 16 }
 0x574   : > { %v12296_v14 = vcombine.low %v8854_v61, %v8864_v48  ;;  %v8873_v0 = vrot.slane %v8872_v9, 4  ;;  %v8882_v29 = vor.u32 %v8881_v33, %v8877_v6  ;;  %v8909_v27 = vshll.u32 %v17450_v18, 16  ;;  %v9231_v9 = vld [vmem:[#allocation2 + $0xc] sm:$0xe]  ;;  %v9232_v48 = vld [vmem:[#allocation2 + $0x18] sm:$0xe] }
 0x575   : > { %v8916_v39 = vrot.slane %v8914_v38, 4  ;;  %v8919_v62 = vrot.slane %v8917_v47, 5  ;;  %v8923_v15 = vshll.u32 %v17452_v32, 16  ;;  %v8927_v53 = vshrl.u32 %v17452_v32, 16 }
 0x576   : > { %v8897_v25 = vrot.slane %v8896_v11, 4  ;;  %v8906_v35 = vor.u32 %v8905_v37, %v8901_v49  ;;  %v8887_v50 = vrot.slane %v8885_v58, 5  ;;  %v8878_v5 = vsel %vm14338_vm13, %v8873_v0, %v8877_v6  ;;  %v19129_v6 = vld [vmem:[#allocation32_spill] sm:$0xff]  ;;  %v19130_v11 = vld [vmem:[#allocation31_spill] sm:$0xff] }
 0x577   : > { %v8911_v60 = vrot.slane %v8909_v27, 5  ;;  %v8883_v40 = vrot.slane %v8882_v29, 4  ;;  %v8920_v52 = vor.u32 %v8919_v62, %v8916_v39  ;;  %v8925_v18 = vrot.slane %v8923_v15, 5 }
 0x578   : > { %v8929_v3 = vrot.slane %v8927_v53, 4  ;;  %v8902_v54 = vsel %vm14338_vm13, %v8897_v25, %v8901_v49  ;;  %v8907_v63 = vrot.slane %v8906_v35, 4  ;;  %v8933_v10 = vshll.u32 %v17461_v59, 16  ;;  %v12398_v25 = vld [vmem:[%s18838_s2 + $0xe] sm:$0x3] }
 0x579   : > { %v8888_v32 = vsel %vm14338_vm13, %v8883_v40, %v8887_v50  ;;  %v9297_v36 = vrot.slane %v17545_v42, 5  ;;  %v8921_v4 = vrot.slane %v8920_v52, 4  ;;  %v9300_v33 = vrot.slane %v19129_v6, 5  ;;  %v19132_v35 = vld [vmem:[#allocation9_spill] sm:$0xff]  ;;  %v19133_v50 = vld [vmem:[#allocation3_spill] sm:$0xff] }
 0x57a   : > { %13319 = vmatmul.mubr.msk.bf16.gmra.mrb[20].mxu1 %vm1532_vm12, %v12295_v17  ;;  %v12297_v46 = vcombine.low %v8878_v5, %v8888_v32  ;;  %v8912_v44 = vsel %vm14338_vm13, %v8907_v63, %v8911_v60  ;;  %v8930_v23 = vor.u32 %v8929_v3, %v8925_v18  ;;  %v8935_v61 = vrot.slane %v8933_v10, 5  ;;  %v19135_v60 = vld [vmem:[#allocation4_spill] sm:$0xff]  ;;  %v19136_v40 = vld [vmem:[#allocation13_spill] sm:$0xff]  ;;  %v19144_v10 = vld [vmem:[#allocation7_spill] sm:$0xff] }
 0x57b   : > { %13322 = vmatprep.mubr.msk.bf16.mxu1 %vm1532_vm12, %v12296_v14  ;;  %v12298_v2 = vcombine.low %v8902_v54, %v8912_v44  ;;  %v12316_v45 = vrot.slane %v9231_v9, 9  ;;  %v9299_v38 = vrot.slane %v9297_v36, 4  ;;  %v8926_v59 = vsel %vm14338_vm13, %v8921_v4, %v8925_v18  ;;  %v19131_v14 = vld [vmem:[#allocation33_spill] sm:$0xff]  ;;  %v19139_v18 = vld [vmem:[#allocation11_spill] sm:$0xff]  ;;  %v19141_v54 = vld [vmem:[#allocation6_spill] sm:$0xff] }
 0x57c   : > { %v8931_v47 = vrot.slane %v8930_v23, 4  ;;  %v9304_v49 = vrot.slane %v19130_v11, 5  ;;  %v9307_v0 = vrot.slane %v19131_v14, 5  ;;  %v12317_v29 = vrot.slane %v9232_v48, 9  ;;  %v19142_v63 = vld [vmem:[#allocation5_spill] sm:$0xff]  ;;  %v19150_v23 = vld [vmem:[#allocation10_spill] sm:$0xff] }
 0x57d   : > { %v9301_v42 = vsel %vm14878_vm1, %v9299_v38, %v9300_v33  ;;  %v9298_v17 = vsel %vm14878_vm1, %v12316_v45, %v9297_v36  ;;  %v9864_v53 = vsel %vm1581_vm0, %v17771_v31, 0  ;;  %v19134_v5 = vcombine.low %v19132_v35, %v19133_v50  ;;  %v19138_v31 = vld [vmem:[#allocation12_spill] sm:$0xff]  ;;  %v19153_v33 = vld [vmem:[#allocation17_spill] sm:$0xff]  ;;  %v19156_v38 = vld [vmem:[#allocation18_spill] sm:$0xff] }
 0x57e   : > { %v8936_v26 = vsel %vm14338_vm13, %v8931_v47, %v8935_v61  ;;  %v12333_v58 = vcombine.low %v9298_v17, %v9301_v42  ;;  %v9306_v27 = vrot.slane %v9304_v49, 4  ;;  %v9305_v62 = vsel %vm14878_vm1, %v12317_v29, %v9304_v49  ;;  %v19147_v36 = vld [vmem:[#allocation8_spill] sm:$0xff]  ;;  %v19154_v61 = vld [vmem:[#allocation19_spill] sm:$0xff]  ;;  %v19159_v42 = vld [vmem:[#allocation21_spill] sm:$0xff] }
 0x57f   : > { %v12299_v37 = vcombine.low %v8926_v59, %v8936_v26  ;;  %v19137_v52 = vcombine.low %v19135_v60, %v19136_v40  ;;  %v19140_v3 = vcombine.low %v19138_v31, %v19139_v18  ;;  %v19143_v32 = vcombine.low %v19141_v54, %v19142_v63  ;;  %v19151_v9 = vld [vmem:[#allocation16_spill] sm:$0xff]  ;;  %v19160_v26 = vld [vmem:[#allocation22_spill] sm:$0xff]  ;;  %v19162_v49 = vld [vmem:[#allocation23_spill] sm:$0xff] }
 0x580   : > { %v9308_v39 = vsel %vm14878_vm1, %v9306_v27, %v9307_v0  ;;  %v19152_v6 = vcombine.low %v19150_v23, %v19151_v9  ;;  %v19155_v45 = vcombine.low %v19153_v33, %v19154_v61  ;;  %v19157_v59 = vld [vmem:[#allocation20_spill] sm:$0xff]  ;;  %v19161_v11 = vcombine.low %v19159_v42, %v19160_v26  ;;  %v19165_v48 = vld [vmem:[#allocation25_spill] sm:$0xff]  ;;  %v19168_v0 = vld [vmem:[#allocation27_spill] sm:$0xff] }
 0x581   : > { %v12334_v15 = vcombine.low %v9305_v62, %v9308_v39  ;;  %v19158_v47 = vcombine.low %v19156_v38, %v19157_v59  ;;  %v19169_v29 = vld [vmem:[#allocation28_spill] sm:$0xff]  ;;  %v14068_v39 = vld [vmem:[#allocation2 + $0x18] sm:$0xff]   ;;  %v19171_v62 = vld [vmem:[#allocation29_spill] sm:$0xff]  ;;  %v10590_v50 = vsel %vm1581_vm0, %v12398_v25, 0 }
 0x582   : > { %13323 = vmatmul.mubr.msk.bf16.gmra.mrb[24].mxu1 %vm1532_vm12, %v12297_v46  ;;  %v19145_v46 = vld [vmem:[#allocation14_spill] sm:$0xff]  ;;  %v19170_v27 = vcombine.low %v19168_v0, %v19169_v29  ;;  %v14069_v35 = vld [vmem:[#allocation2 + $0x24] sm:$0xff]   ;;  %v14071_v40 = vld [vmem:[#allocation2 + $0x3c] sm:$0xff]  }
 0x583   : > { %13326 = vmatprep.mubr.msk.bf16.mxu1 %vm1532_vm12, %v12298_v2  ;;  %v19146_v44 = vcombine.low %v19144_v10, %v19145_v46  ;;  %v19148_v2 = vld [vmem:[#allocation15_spill] sm:$0xff]  ;;  %v18097_v60 = vld [vmem:[%s18838_s2 + $0x10] sm:$0x3]  ;;  %v14074_v31 = vld [vmem:[#allocation2 + $0x60] sm:$0xff]  }
 0x584   : > { %v19149_v4 = vcombine.low %v19147_v36, %v19148_v2  ;;  %v14075_v18 = vld [vmem:[#allocation2 + $0x6c] sm:$0xff]   ;;  %v14077_v54 = vld [vmem:[#allocation2 + $0x84] sm:$0xff]   ;;  %v10059_v63 = vld [vmem:[#allocation2 + $0x18] sm:$0xf] }
 0x585   : > { %v18109_v10 = vld [vmem:[#allocation2 + $0x1c] sm:$0xf]  ;;  %v10108_v46 = vshrl.u32 %v10059_v63, 16  ;;  %v18115_v23 = vld [vmem:[#allocation2 + $0x28] sm:$0xf] }
 0x586   : > { %v10117_v36 = vshll.u32 %v18109_v10, 16  ;;  %v10121_v2 = vshrl.u32 %v18109_v10, 16  ;;  %v10065_v9 = vld [vmem:[#allocation2 + $0x30] sm:$0xf]  ;;  %v14080_v26 = vld [vmem:[#allocation2 + $0xa8] sm:$0xff]  }
 0x587   : > { %v10110_v33 = vrot.slane %v10108_v46, 4 }
 0x588   : > { %v18119_v38 = vrot.slane %v10117_v36, 5  ;;  %v10123_v59 = vrot.slane %v10121_v2, 4 }
 0x58a   : > { %13327 = vmatmul.mubr.msk.bf16.gmra.mrb[28].mxu1 %vm1532_vm12, %v12299_v37  ;;  %v19163_v37 = vld [vmem:[#allocation24_spill] sm:$0xff]  ;;  %v10124_v0 = vor.u32 %v10123_v59, %v18119_v38 }
 0x58b   : > { %13332 = vmatprep.mubr.msk.bf16.mxu1 %vm1532_vm12, %v12333_v58  ;;  %v19164_v17 = vcombine.low %v19162_v49, %v19163_v37  ;;  %v19166_v58 = vld [vmem:[#allocation26_spill] sm:$0xff]  ;;  %v10145_v49 = vshrl.u32 %v18115_v23, 16  ;;  %v10156_v37 = vshrl.u32 %v10065_v9, 16 }
 0x58c   : > { %v19167_v14 = vcombine.low %v19165_v48, %v19166_v58  ;;  %v10068_v58 = vld [vmem:[#allocation2 + $0x3c] sm:$0xf]  ;;  %v10125_v46 = vrot.slane %v10124_v0, 4 }
 0x592   : > { %13333 = vmatmul.mubr.msk.bf16.vlgmr.msra.gmra.mrb[0].mxu1 %vm1532_vm12, %v12334_v15  ;;  %v19172_v15 = vld [vmem:[#allocation30_spill] sm:$0xff] }
 0x593   : > { %13365 = vmatpush3.bf16.msra.mxu1 %v9864_v53  ;;  %13336 = vmatprep.mubr.msk.bf16.mxu1 %vm1532_vm12, %v19134_v5  ;;  %v19173_v53 = vcombine.low %v19171_v62, %v19172_v15  ;;  %v14070_v5 = vld [vmem:[#allocation2 + $0x30] sm:$0xff]   ;;  %v10147_v15 = vrot.slane %v10145_v49, 4 }
 0x594   : > { %13994 = vmatprep.subr.msk.bf16.mxu1 %vm1581_vm0, %v12398_v25  ;;  %v14073_v25 = vld [vmem:[#allocation2 + $0x54] sm:$0xff]  }
 0x59a   : > { %13337 = vmatmul.mubr.msk.bf16.gmra.mrb[4].mxu1 %vm1532_vm12, %v19137_v52  ;;  %v14072_v52 = vld [vmem:[#allocation2 + $0x48] sm:$0xff]  }
 0x59b   : > { %13340 = vmatprep.mubr.msk.bf16.mxu1 %vm1532_vm12, %v19140_v3  ;;  %v14076_v3 = vld [vmem:[#allocation2 + $0x78] sm:$0xff]  }
 0x5a2   : > { %13341 = vmatmul.mubr.msk.bf16.gmra.mrb[8].mxu1 %vm1532_vm12, %v19143_v32  ;;  %v14078_v32 = vld [vmem:[#allocation2 + $0x90] sm:$0xff]  }
 0x5a3   : > { %13344 = vmatprep.mubr.msk.bf16.mxu1 %vm1532_vm12, %v19146_v44  ;;  %v10111_v44 = vshll.u32 %v10059_v63, 16  ;;  %v10071_v63 = vld [vmem:[#allocation2 + $0x48] sm:$0xf] }
 0x5a5   : > { %v10113_v61 = vrot.slane %v10111_v44, 5 }
 0x5aa   : > { %13345 = vmatmul.mubr.msk.bf16.gmra.mrb[12].mxu1 %vm1532_vm12, %v19149_v4  ;;  %v10062_v4 = vld [vmem:[#allocation2 + $0x24] sm:$0xf] }
 0x5ab   : > { %13348 = vmatprep.mubr.msk.bf16.mxu1 %vm1532_vm12, %v19152_v6  ;;  %v14079_v6 = vld [vmem:[#allocation2 + $0x9c] sm:$0xff]   ;;  %v10135_v42 = vshll.u32 %v10062_v4, 16 }
 0x5b2   : > { %13349 = vmatmul.mubr.msk.bf16.gmra.mrb[16].mxu1 %vm1532_vm12, %v19155_v45  ;;  %v18117_v45 = vld [vmem:[#allocation2 + $0x20] sm:$0x1] }
 0x5b3   : > { %13352 = vmatprep.mubr.msk.bf16.mxu1 %vm1532_vm12, %v19158_v47  ;;  %v10132_v47 = vshrl.u32 %v10062_v4, 16  ;;  %v10127_v48 = vshll.u32 %v18117_v45, 16 }
 0x5b5   : > { %v10134_v29 = vrot.slane %v10132_v47, 4  ;;  %v10129_v44 = vrot.slane %v10127_v48, 5 }
 0x5ba   : > { %13353 = vmatmul.mubr.msk.bf16.gmra.mrb[20].mxu1 %vm1532_vm12, %v19161_v11  ;;  %v10141_v11 = vshll.u32 %v18115_v23, 16 }
 0x5bb   : > { %13356 = vmatprep.mubr.msk.bf16.mxu1 %vm1532_vm12, %v19164_v17  ;;  %v10159_v17 = vshll.u32 %v10065_v9, 16 }
 0x5bc   : > { %v18129_v62 = vrot.slane %v10141_v11, 5 }
 0x5be   : > { %v10148_v36 = vor.u32 %v10147_v15, %v18129_v62  ;;  %v19177_v15 = vld [vmem:[#allocation38_spill] sm:$0xff] }
 0x5c0   : > { %v10149_v48 = vrot.slane %v10148_v36, 4 }
 0x5c2   : > { %13357 = vmatmul.mubr.msk.bf16.gmra.mrb[24].mxu1 %vm1532_vm12, %v19167_v14  ;;  %v10114_v14 = vor.u32 %v10113_v61, %v10110_v33  ;;  %v19175_v33 = vld [vmem:[#allocation36_spill] sm:$0xff] }
 0x5c3   : > { %13360 = vmatprep.mubr.msk.bf16.mxu1 %vm1532_vm12, %v19170_v27  ;;  %v10137_v27 = vrot.slane %v10135_v42, 5  ;;  %v10189_v61 = vshll.u32 %v19175_v33, 16  ;;  %v10193_v47 = vshrl.u32 %v19175_v33, 16  ;;  %v10204_v42 = vshrl.u32 %v10071_v63, 16 }
 0x5ca   : > { %13361 = vmatmul.mubr.msk.bf16.gmra.mrb[28].mxu1 %vm1532_vm12, %v19173_v53  ;;  %v10158_v53 = vrot.slane %v10156_v37, 4 }
 0x5cb   : > { %13366 = vmatprep.mubr.msk.bf16.mxu1 %vm1532_vm12, %v14068_v39  ;;  %v18127_v39 = vld [vmem:[#allocation2 + $0x2c] sm:$0x1] }
 0x5d2   : > { %13367 = vmatmul.mubr.msk.bf16.vlgmr.msra.gmra.mrb[0].mxu1 %vm1532_vm12, %v14069_v35  ;;  %v10161_v35 = vrot.slane %v10159_v17, 5  ;;  %v10130_v17 = vsel %vm14338_vm13, %v10125_v46, %v10129_v44  ;;  %v10077_v44 = vld [vmem:[#allocation2 + $0x60] sm:$0xf] }
 0x5d3   : > { %13399 = vmatpush3.bf16.msra.mxu1 %v10590_v50  ;;  %13370 = vmatprep.mubr.msk.bf16.mxu1 %vm1532_vm12, %v14070_v5  ;;  %v19174_v50 = vld [vmem:[#allocation34_spill] sm:$0xff] }
 0x5d4   : > { %13995 = vmatprep.subr.msk.bf16.mxu1 %vm1581_vm0, %v18097_v60  ;;  %v10165_v5 = vshll.u32 %v19174_v50, 16  ;;  %v10162_v2 = vor.u32 %v10161_v35, %v10158_v53  ;;  %v10213_v53 = vshll.u32 %v19177_v15, 16  ;;  %v10217_v35 = vshrl.u32 %v19177_v15, 16 }
 0x5d6   : > { %v10167_v4 = vrot.slane %v10165_v5, 5  ;;  %v10195_v5 = vrot.slane %v10193_v47, 4  ;;  %v10215_v36 = vrot.slane %v10213_v53, 5 }
 0x5da   : > { %13371 = vmatmul.mubr.msk.bf16.gmra.mrb[4].mxu1 %vm1532_vm12, %v14071_v40  ;;  %v10169_v40 = vshrl.u32 %v19174_v50, 16 }
 0x5db   : > { %13374 = vmatprep.mubr.msk.bf16.mxu1 %vm1532_vm12, %v14072_v52  ;;  %v10180_v52 = vshrl.u32 %v10068_v58, 16 }
 0x5dc   : > { %v10171_v9 = vrot.slane %v10169_v40, 4  ;;  %v10206_v40 = vrot.slane %v10204_v42, 4 }
 0x5e2   : > { %13375 = vmatmul.mubr.msk.bf16.gmra.mrb[8].mxu1 %vm1532_vm12, %v14073_v25  ;;  %v10183_v25 = vshll.u32 %v10068_v58, 16  ;;  %v10163_v58 = vrot.slane %v10162_v2, 4  ;;  %v10219_v2 = vrot.slane %v10217_v35, 4 }
 0x5e3   : > { %13378 = vmatprep.mubr.msk.bf16.mxu1 %vm1532_vm12, %v14074_v31  ;;  %v14081_v31 = vld [vmem:[#allocation2 + $0xb4] sm:$0xff]  }
 0x5e4   : > { %v10185_v59 = vrot.slane %v10183_v25, 5  ;;  %v14083_v25 = vld [vmem:[#allocation2 + $0xcc] sm:$0xff]  }
 0x5ea   : > { %13379 = vmatmul.mubr.msk.bf16.gmra.mrb[12].mxu1 %vm1532_vm12, %v14075_v18  ;;  %v10115_v18 = vrot.slane %v10114_v14, 4  ;;  %v19176_v14 = vld [vmem:[#allocation35_spill] sm:$0xff] }
 0x5eb   : > { %13382 = vmatprep.mubr.msk.bf16.mxu1 %vm1532_vm12, %v14076_v3  ;;  %v10138_v3 = vor.u32 %v10137_v27, %v10134_v29  ;;  %v10175_v0 = vshll.u32 %v19176_v14, 16  ;;  %v10172_v29 = vor.u32 %v10171_v9, %v10167_v4  ;;  %v10191_v27 = vrot.slane %v10189_v61, 5 }
 0x5ec   : > { %v10120_v11 = vsel %vm14338_vm13, %v10115_v18, %v18119_v38  ;;  %v10074_v38 = vld [vmem:[#allocation2 + $0x54] sm:$0xf]  ;;  %v19178_v18 = vld [vmem:[#allocation37_spill] sm:$0xff] }
 0x5ed   : > { %v10139_v49 = vrot.slane %v10138_v3, 4  ;;  %v10199_v3 = vshll.u32 %v19178_v18, 16  ;;  %v10177_v46 = vrot.slane %v10175_v0, 5  ;;  %v10228_v9 = vshrl.u32 %v10074_v38, 16 }
 0x5ee   : > { %v10173_v33 = vrot.slane %v10172_v29, 4  ;;  %v10220_v0 = vor.u32 %v10219_v2, %v10215_v36 }
 0x5ef   : > { %v10201_v42 = vrot.slane %v10199_v3, 5  ;;  %v10230_v15 = vrot.slane %v10228_v9, 4  ;;  %v10083_v9 = vld [vmem:[#allocation2 + $0x78] sm:$0xf] }
 0x5f2   : > { %13383 = vmatmul.mubr.msk.bf16.gmra.mrb[16].mxu1 %vm1532_vm12, %v14077_v54  ;;  %v10151_v54 = vshll.u32 %v18127_v39, 16 }
 0x5f3   : > { %13386 = vmatprep.mubr.msk.bf16.mxu1 %vm1532_vm12, %v14078_v32  ;;  %v14082_v32 = vld [vmem:[#allocation2 + $0xc0] sm:$0xff]  }
 0x5f4   : > { %v10153_v37 = vrot.slane %v10151_v54, 5  ;;  %v10144_v54 = vsel %vm14338_vm13, %v10139_v49, %v18129_v62  ;;  %v19179_v49 = vld [vmem:[#allocation39_spill] sm:$0xff] }
 0x5fa   : > { %13387 = vmatmul.mubr.msk.bf16.gmra.mrb[20].mxu1 %vm1532_vm12, %v14079_v6  ;;  %v10182_v6 = vrot.slane %v10180_v52, 4 }
 0x5fb   : > { %13390 = vmatprep.mubr.msk.bf16.mxu1 %vm1532_vm12, %v14080_v26  ;;  %v10207_v26 = vshll.u32 %v10071_v63, 16  ;;  %v10154_v63 = vsel %vm14338_vm13, %v10149_v48, %v10153_v37  ;;  %v10223_v37 = vshll.u32 %v19179_v49, 16 }
 0x5fc   : > { %v10186_v50 = vor.u32 %v10185_v59, %v10182_v6  ;;  %v10231_v6 = vshll.u32 %v10074_v38, 16  ;;  %v10196_v59 = vor.u32 %v10195_v5, %v10191_v27  ;;  %v12400_v47 = vcombine.low %v10144_v54, %v10154_v63 }
 0x5fd   : > { %v10209_v52 = vrot.slane %v10207_v26, 5  ;;  %v10252_v26 = vshrl.u32 %v10077_v44, 16  ;;  %v10261_v5 = vshll.u32 %v17711_v8, 16  ;;  %v10225_v3 = vrot.slane %v10223_v37, 5 }
 0x5fe   : > { %v10187_v61 = vrot.slane %v10186_v50, 4  ;;  %v10233_v29 = vrot.slane %v10231_v6, 5  ;;  %v10197_v35 = vrot.slane %v10196_v59, 4 }
 0x5ff   : > { %v10210_v62 = vor.u32 %v10209_v52, %v10206_v40  ;;  %v11060_v40 = vsel %vm1581_vm0, %v18097_v60, 0  ;;  %v10254_v52 = vrot.slane %v10252_v26, 4  ;;  %v10263_v60 = vrot.slane %v10261_v5, 5 }
 0x600   : > { %v10192_v53 = vsel %vm14338_vm13, %v10187_v61, %v10191_v27  ;;  %v10202_v18 = vsel %vm14338_vm13, %v10197_v35, %v10201_v42 }
 0x601   : > { %v10211_v50 = vrot.slane %v10210_v62, 4  ;;  %v12402_v27 = vcombine.low %v10192_v53, %v10202_v18  ;;  %v10285_v62 = vshll.u32 %v17729_v21, 16 }
 0x602   : > { %13391 = vmatmul.mubr.msk.bf16.gmra.mrb[24].mxu1 %vm1532_vm12, %v14081_v31  ;;  %v12399_v31 = vcombine.low %v10120_v11, %v10130_v17  ;;  %v10255_v11 = vshll.u32 %v10077_v44, 16  ;;  %v19180_v17 = vld [vmem:[#allocation40_spill] sm:$0xff]  ;;  %v19181_v44 = vld [vmem:[#allocation41_spill] sm:$0xff] }
 0x603   : > { %13394 = vmatprep.mubr.msk.bf16.mxu1 %vm1532_vm12, %v14082_v32  ;;  %v10168_v32 = vsel %vm14338_vm13, %v10163_v58, %v10167_v4  ;;  %v10178_v4 = vsel %vm14338_vm13, %v10173_v33, %v10177_v46  ;;  %v10237_v48 = vshll.u32 %v19180_v17, 16  ;;  %v10241_v58 = vshrl.u32 %v19180_v17, 16 }
 0x604   : > { %v12401_v14 = vcombine.low %v10168_v32, %v10178_v4  ;;  %v10257_v38 = vrot.slane %v10255_v11, 5  ;;  %v10221_v32 = vrot.slane %v10220_v0, 4  ;;  %v10234_v46 = vor.u32 %v10233_v29, %v10230_v15  ;;  %v19182_v0 = vld [vmem:[#allocation45_spill] sm:$0xff] }
 0x605   : > { %v10239_v54 = vrot.slane %v10237_v48, 5  ;;  %v10243_v63 = vrot.slane %v10241_v58, 4  ;;  %v10247_v2 = vshll.u32 %v19181_v44, 16  ;;  %v10300_v11 = vshrl.u32 %v10083_v9, 16  ;;  %v10086_v48 = vld [vmem:[#allocation2 + $0x84] sm:$0xf] }
 0x606   : > { %v10258_v61 = vor.u32 %v10257_v38, %v10254_v52  ;;  %v10226_v42 = vsel %vm14338_vm13, %v10221_v32, %v10225_v3  ;;  %v10303_v4 = vshll.u32 %v10083_v9, 16  ;;  %v10235_v37 = vrot.slane %v10234_v46, 4  ;;  %v10089_v46 = vld [vmem:[#allocation2 + $0x90] sm:$0xf]  ;;  %v19183_v9 = vld [vmem:[#allocation44_spill] sm:$0xff] }
 0x607   : > { %v10244_v26 = vor.u32 %v10243_v63, %v10239_v54  ;;  %v10249_v17 = vrot.slane %v10247_v2, 5  ;;  %v10309_v15 = vshll.u32 %v19182_v0, 16  ;;  %v10313_v29 = vshrl.u32 %v19182_v0, 16 }
 0x608   : > { %v10259_v53 = vrot.slane %v10258_v61, 4  ;;  %v18182_v35 = vrot.slane %v10285_v62, 5  ;;  %v10305_v52 = vrot.slane %v10303_v4, 5  ;;  %v10324_v38 = vshrl.u32 %v10086_v48, 16 }
 0x609   : > { %v10245_v5 = vrot.slane %v10244_v26, 4  ;;  %v10311_v63 = vrot.slane %v10309_v15, 5  ;;  %v10315_v32 = vrot.slane %v10313_v29, 4  ;;  %v10348_v26 = vshrl.u32 %v10089_v46, 16 }
 0x60a   : > { %13395 = vmatmul.mubr.msk.bf16.gmra.mrb[28].mxu1 %vm1532_vm12, %v14083_v25  ;;  %v10265_v25 = vshrl.u32 %v17711_v8, 16  ;;  %v10216_v8 = vsel %vm14338_vm13, %v10211_v50, %v10215_v36  ;;  %v10271_v36 = vshll.u32 %v17716_v16, 16  ;;  %v10240_v16 = vsel %vm14338_vm13, %v10235_v37, %v10239_v54 }
 0x60b   : > { %13400 = vmatprep.mubr.msk.bf16.mxu1 %vm1532_vm12, %v12399_v31  ;;  %v10080_v31 = vld [vmem:[#allocation2 + $0x6c] sm:$0xf]  ;;  %v12403_v49 = vcombine.low %v10216_v8, %v10226_v42  ;;  %v10250_v18 = vsel %vm14338_vm13, %v10245_v5, %v10249_v17  ;;  %v10264_v44 = vsel %vm14338_vm13, %v10259_v53, %v10263_v60  ;;  %v10295_v8 = vshll.u32 %v19183_v9, 16 }
 0x60c   : > { %v10276_v6 = vshrl.u32 %v10080_v31, 16  ;;  %v10279_v33 = vshll.u32 %v10080_v31, 16  ;;  %v10267_v59 = vrot.slane %v10265_v25, 4  ;;  %v10273_v25 = vrot.slane %v10271_v36, 5 }
 0x60d   : > { %v10327_v31 = vshll.u32 %v10086_v48, 16  ;;  %v10326_v61 = vrot.slane %v10324_v38, 4  ;;  %v12404_v4 = vcombine.low %v10240_v16, %v10250_v18  ;;  %v10316_v37 = vor.u32 %v10315_v32, %v10311_v63  ;;  %v19186_v18 = vld [vmem:[#allocation51_spill] sm:$0xff] }
 0x60e   : > { %v10278_v58 = vrot.slane %v10276_v6, 4  ;;  %v19184_v6 = vld [vmem:[#allocation48_spill] sm:$0xff]  ;;  %v10297_v36 = vrot.slane %v10295_v8, 5  ;;  %v10357_v48 = vshll.u32 %v17785_v22, 16  ;;  %v10350_v5 = vrot.slane %v10348_v26, 4 }
 0x60f   : > { %v10317_v16 = vrot.slane %v10316_v37, 4  ;;  %v10409_v37 = vshrl.u32 %v17817_v1, 16 }
 0x610   : > { %v10359_v32 = vrot.slane %v10357_v48, 5 }
 0x612   : > { %13401 = vmatmul.mubr.msk.bf16.vlgmr.msra.gmra.mrb[0].mxu1 %vm1532_vm12, %v12400_v47  ;;  %v10289_v47 = vshrl.u32 %v17729_v21, 16  ;;  %v10268_v21 = vor.u32 %v10267_v59, %v10263_v60  ;;  %v19185_v59 = vld [vmem:[#allocation49_spill] sm:$0xff] }
 0x613   : > { %13433 = vmatpush3.bf16.msra.mxu1 %v11060_v40  ;;  %13404 = vmatprep.mubr.msk.bf16.mxu1 %vm1532_vm12, %v12401_v14  ;;  %v10281_v14 = vrot.slane %v10279_v33, 5  ;;  %v10302_v40 = vrot.slane %v10300_v11, 4  ;;  %v10319_v33 = vshll.u32 %v19184_v6, 16  ;;  %v10333_v62 = vshll.u32 %v19185_v59, 16 }
 0x614   : > { %v10291_v50 = vrot.slane %v10289_v47, 4  ;;  %v10269_v2 = vrot.slane %v10268_v21, 4  ;;  %v10329_v47 = vrot.slane %v10327_v31, 5  ;;  %v10337_v42 = vshrl.u32 %v19185_v59, 16  ;;  %v19187_v59 = vld [vmem:[#allocation57_spill] sm:$0xff] }
 0x615   : > { %v10282_v3 = vor.u32 %v10281_v14, %v10278_v58  ;;  %v10306_v54 = vor.u32 %v10305_v52, %v10302_v40  ;;  %v10351_v11 = vshll.u32 %v10089_v46, 16  ;;  %v10361_v58 = vshrl.u32 %v17785_v22, 16  ;;  %v10092_v14 = vld [vmem:[#allocation2 + $0x9c] sm:$0xf]  ;;  %v10095_v52 = vld [vmem:[#allocation2 + $0xa8] sm:$0xf] }
 0x616   : > { %v10274_v60 = vsel %vm14338_vm13, %v10269_v2, %v10273_v25  ;;  %v10321_v29 = vrot.slane %v10319_v33, 5  ;;  %v10335_v53 = vrot.slane %v10333_v62, 5  ;;  %v10330_v21 = vor.u32 %v10329_v47, %v10326_v61 }
 0x617   : > { %v12405_v17 = vcombine.low %v10264_v44, %v10274_v60  ;;  %v10307_v15 = vrot.slane %v10306_v54, 4  ;;  %v10353_v40 = vrot.slane %v10351_v11, 5  ;;  %v10372_v22 = vshrl.u32 %v10092_v14, 16 }
 0x618   : > { %v10375_v25 = vshll.u32 %v10092_v14, 16  ;;  %v10363_v46 = vrot.slane %v10361_v58, 4  ;;  %v10322_v2 = vsel %vm14338_vm13, %v10317_v16, %v10321_v29  ;;  %v10399_v9 = vshll.u32 %v10095_v52, 16  ;;  %v10101_v29 = vld [vmem:[#allocation2 + $0xc0] sm:$0xf] }
 0x619   : > { %v10312_v44 = vsel %vm14338_vm13, %v10307_v15, %v10311_v63  ;;  %v10331_v8 = vrot.slane %v10330_v21, 4  ;;  %v10354_v54 = vor.u32 %v10353_v40, %v10350_v5  ;;  %v10367_v6 = vshll.u32 %v17787_v13, 16 }
 0x61a   : > { %13405 = vmatmul.mubr.msk.bf16.gmra.mrb[4].mxu1 %vm1532_vm12, %v12402_v27  ;;  %v10292_v27 = vor.u32 %v10291_v50, %v18182_v35  ;;  %v10339_v50 = vrot.slane %v10337_v42, 4  ;;  %v10374_v33 = vrot.slane %v10372_v22, 4  ;;  %v10377_v61 = vrot.slane %v10375_v25, 5 }
 0x61b   : > { %13408 = vmatprep.mubr.msk.bf16.mxu1 %vm1532_vm12, %v12403_v49  ;;  %v10283_v49 = vrot.slane %v10282_v3, 4  ;;  %v10343_v3 = vshll.u32 %v19186_v18, 16  ;;  %v10381_v62 = vshll.u32 %v19187_v59, 16  ;;  %v10385_v47 = vshrl.u32 %v19187_v59, 16 }
 0x61c   : > { %v10293_v0 = vrot.slane %v10292_v27, 4  ;;  %v10396_v27 = vshrl.u32 %v10095_v52, 16  ;;  %v12407_v26 = vcombine.low %v10312_v44, %v10322_v2  ;;  %v10364_v63 = vor.u32 %v10363_v46, %v10359_v32 }
 0x61d   : > { %v10288_v38 = vsel %vm14338_vm13, %v10283_v49, %v18182_v35  ;;  %v10340_v35 = vor.u32 %v10339_v50, %v10335_v53  ;;  %v10345_v11 = vrot.slane %v10343_v3, 5  ;;  %v10401_v60 = vrot.slane %v10399_v9, 5  ;;  %v19188_v50 = vld [vmem:[#allocation59_spill] sm:$0xff] }
 0x61e   : > { %v10298_v31 = vsel %vm14338_vm13, %v10293_v0, %v10297_v36  ;;  %v10405_v49 = vshll.u32 %v17817_v1, 16  ;;  %v10336_v13 = vsel %vm14338_vm13, %v10331_v8, %v10335_v53  ;;  %v10355_v48 = vrot.slane %v10354_v54, 4  ;;  %v19189_v8 = vld [vmem:[#allocation63_spill] sm:$0xff] }
 0x61f   : > { %v12406_v42 = vcombine.low %v10288_v38, %v10298_v31  ;;  %v10341_v36 = vrot.slane %v10340_v35, 4  ;;  %v10369_v58 = vrot.slane %v10367_v6, 5  ;;  %v10378_v14 = vor.u32 %v10377_v61, %v10374_v33 }
 0x620   : > { %v10383_v0 = vrot.slane %v10381_v62, 5  ;;  %v10387_v15 = vrot.slane %v10385_v47, 4  ;;  %v10391_v1 = vshll.u32 %v19188_v50, 16  ;;  %v10365_v52 = vrot.slane %v10364_v63, 4 }
 0x621   : > { %v10346_v21 = vsel %vm14338_vm13, %v10341_v36, %v10345_v11  ;;  %v10407_v16 = vrot.slane %v10405_v49, 5  ;;  %v10411_v53 = vrot.slane %v10409_v37, 4  ;;  %v10360_v25 = vsel %vm14338_vm13, %v10355_v48, %v10359_v32 }
 0x622   : > { %13409 = vmatmul.mubr.msk.bf16.gmra.mrb[8].mxu1 %vm1532_vm12, %v12404_v4  ;;  %v10398_v4 = vrot.slane %v10396_v27, 4  ;;  %v12408_v22 = vcombine.low %v10336_v13, %v10346_v21  ;;  %v10444_v31 = vshrl.u32 %v10101_v29, 16  ;;  %v10447_v18 = vshll.u32 %v10101_v29, 16  ;;  %v14117_v29 = vld [vmem:[#allocation2 + $0xbc] sm:$0x1] }
 0x623   : > { %13412 = vmatprep.mubr.msk.bf16.mxu1 %vm1532_vm12, %v12405_v17  ;;  %v10098_v17 = vld [vmem:[#allocation2 + $0xb4] sm:$0xf]  ;;  %v10370_v3 = vsel %vm14338_vm13, %v10365_v52, %v10369_v58  ;;  %v10379_v46 = vrot.slane %v10378_v14, 4  ;;  %v10388_v44 = vor.u32 %v10387_v15, %v10383_v0  ;;  %v10415_v2 = vshll.u32 %v17828_v30, 16 }
 0x624   : > { %v10420_v5 = vshrl.u32 %v10098_v17, 16  ;;  %v10423_v40 = vshll.u32 %v10098_v17, 16  ;;  %v10402_v38 = vor.u32 %v10401_v60, %v10398_v4  ;;  %v10429_v35 = vshll.u32 %v19189_v8, 16 }
 0x625   : > { %v10433_v54 = vshrl.u32 %v19189_v8, 16  ;;  %v12409_v6 = vcombine.low %v10360_v25, %v10370_v3  ;;  %v10393_v33 = vrot.slane %v10391_v1, 5  ;;  %v10412_v59 = vor.u32 %v10411_v53, %v10407_v16 }
 0x626   : > { %v10422_v27 = vrot.slane %v10420_v5, 4  ;;  %v10425_v9 = vrot.slane %v10423_v40, 5  ;;  %v10403_v61 = vrot.slane %v10402_v38, 4  ;;  %v10446_v32 = vrot.slane %v10444_v31, 4  ;;  %v14118_v40 = vld [vmem:[#allocation2 + $0xc8] sm:$0x1] }
 0x627   : > { %v10449_v62 = vrot.slane %v10447_v18, 5  ;;  %v10453_v47 = vshll.u32 %v17852_v24, 16  ;;  %v10384_v30 = vsel %vm14338_vm13, %v10379_v46, %v10383_v0  ;;  %v10417_v11 = vrot.slane %v10415_v2, 5 }
 0x628   : > { %v10389_v63 = vrot.slane %v10388_v44, 4  ;;  %v10426_v4 = vor.u32 %v10425_v9, %v10422_v27  ;;  %v10431_v60 = vrot.slane %v10429_v35, 5  ;;  %v10435_v49 = vrot.slane %v10433_v54, 4  ;;  %v14119_v54 = vld [vmem:[#allocation2 + $0xd4] sm:$0x1] }
 0x629   : > { %v10408_v37 = vsel %vm14338_vm13, %v10403_v61, %v10407_v16  ;;  %v10413_v17 = vrot.slane %v10412_v59, 4  ;;  %v10450_v48 = vor.u32 %v10449_v62, %v10446_v32  ;;  %v10455_v58 = vrot.slane %v10453_v47, 5 }
 0x62a   : > { %13413 = vmatmul.mubr.msk.bf16.gmra.mrb[12].mxu1 %vm1532_vm12, %v12406_v42  ;;  %v10457_v42 = vshrl.u32 %v17852_v24, 16  ;;  %v10394_v24 = vsel %vm14338_vm13, %v10389_v63, %v10393_v33  ;;  %v10439_v21 = vshll.u32 %v14117_v29, 16  ;;  %v10427_v1 = vrot.slane %v10426_v4, 4 }
 0x62b   : > { %13416 = vmatprep.mubr.msk.bf16.mxu1 %vm1532_vm12, %v12407_v26  ;;  %v10104_v26 = vld [vmem:[#allocation2 + $0xcc] sm:$0xf]  ;;  %v12410_v15 = vcombine.low %v10384_v30, %v10394_v24  ;;  %v10418_v0 = vsel %vm14338_vm13, %v10413_v17, %v10417_v11  ;;  %v10436_v5 = vor.u32 %v10435_v49, %v10431_v60  ;;  %v10463_v52 = vshll.u32 %v14118_v40, 16 }
 0x62c   : > { %v10468_v13 = vshrl.u32 %v10104_v26, 16  ;;  %v10471_v36 = vshll.u32 %v10104_v26, 16  ;;  %v10459_v14 = vrot.slane %v10457_v42, 4  ;;  %v12411_v50 = vcombine.low %v10408_v37, %v10418_v0  ;;  %v10785_v42 = vld [vmem:[#allocation2 + $0x18] sm:$0xe] }
 0x62d   : > { %v10477_v53 = vshll.u32 %v17875_v20, 16  ;;  %v10451_v25 = vrot.slane %v10450_v48, 4  ;;  %v10441_v18 = vrot.slane %v10439_v21, 5  ;;  %v10432_v3 = vsel %vm14338_vm13, %v10427_v1, %v10431_v60  ;;  %v19191_v0 = vld [vmem:[#allocation43_spill] sm:$0xff]  ;;  %v19196_v1 = vld [vmem:[#allocation50_spill] sm:$0xff] }
 0x62e   : > { %v10470_v38 = vrot.slane %v10468_v13, 4  ;;  %v10473_v16 = vrot.slane %v10471_v36, 5  ;;  %v10460_v31 = vor.u32 %v10459_v14, %v10455_v58  ;;  %v10465_v46 = vrot.slane %v10463_v52, 5  ;;  %v10786_v13 = vld [vmem:[#allocation2 + $0x24] sm:$0xe]  ;;  %v19194_v21 = vld [vmem:[#allocation47_spill] sm:$0xff] }
 0x62f   : > { %v10437_v44 = vrot.slane %v10436_v5, 4  ;;  %v10479_v27 = vrot.slane %v10477_v53, 5  ;;  %v10456_v8 = vsel %vm14338_vm13, %v10451_v25, %v10455_v58  ;;  %v10851_v59 = vrot.slane %v18109_v10, 5  ;;  %v19197_v5 = vld [vmem:[#allocation52_spill] sm:$0xff]  ;;  %v19200_v52 = vld [vmem:[#allocation54_spill] sm:$0xff] }
 0x630   : > { %v10474_v2 = vor.u32 %v10473_v16, %v10470_v38  ;;  %v10461_v35 = vrot.slane %v10460_v31, 4  ;;  %v10854_v26 = vrot.slane %v18117_v45, 5  ;;  %v12431_v11 = vrot.slane %v10785_v42, 9  ;;  %v19202_v16 = vld [vmem:[#allocation55_spill] sm:$0xff]  ;;  %v19203_v53 = vld [vmem:[#allocation58_spill] sm:$0xff]  ;;  %v19205_v25 = vld [vmem:[#allocation56_spill] sm:$0xff] }
 0x631   : > { %v10853_v63 = vrot.slane %v10851_v59, 4  ;;  %v10858_v37 = vrot.slane %v18115_v23, 5  ;;  %v10861_v24 = vrot.slane %v18127_v39, 5  ;;  %v12432_v48 = vrot.slane %v10786_v13, 9  ;;  %v19193_v39 = vld [vmem:[#allocation46_spill] sm:$0xff]  ;;  %v19206_v31 = vld [vmem:[#allocation60_spill] sm:$0xff] }
 0x632   : > { %13417 = vmatmul.mubr.msk.bf16.gmra.mrb[16].mxu1 %vm1532_vm12, %v12408_v22  ;;  %v10481_v22 = vshrl.u32 %v17875_v20, 16  ;;  %v10442_v20 = vsel %vm14338_vm13, %v10437_v44, %v10441_v18  ;;  %v10466_v61 = vsel %vm14338_vm13, %v10461_v35, %v10465_v46  ;;  %v10475_v62 = vrot.slane %v10474_v2, 4  ;;  %v19209_v46 = vld [vmem:[#allocation64_spill] sm:$0xff]  ;;  %v19211_v2 = vld [vmem:[#allocation62_spill] sm:$0xff] }
 0x633   : > { %13420 = vmatprep.mubr.msk.bf16.mxu1 %vm1532_vm12, %v12409_v6  ;;  %v10487_v6 = vshll.u32 %v14119_v54, 16  ;;  %v12412_v33 = vcombine.low %v10432_v3, %v10442_v20  ;;  %v12413_v32 = vcombine.low %v10456_v8, %v10466_v61  ;;  %v10855_v10 = vsel %vm14878_vm1, %v10853_v63, %v10854_v26  ;;  %v19208_v3 = vld [vmem:[#allocation61_spill] sm:$0xff]  ;;  %v19214_v8 = vld [vmem:[#allocation66_spill] sm:$0xff]  ;;  %v19216_v20 = vld [vmem:[#allocation67_spill] sm:$0xff] }
 0x634   : > { %v10483_v9 = vrot.slane %v10481_v22, 4  ;;  %v10480_v4 = vsel %vm14338_vm13, %v10475_v62, %v10479_v27  ;;  %v10852_v45 = vsel %vm14878_vm1, %v12431_v11, %v10851_v59  ;;  %v10860_v58 = vrot.slane %v10858_v37, 4 }
 0x635   : > { %v10489_v30 = vrot.slane %v10487_v6, 5  ;;  %v12448_v36 = vcombine.low %v10852_v45, %v10855_v10  ;;  %v10859_v23 = vsel %vm14878_vm1, %v12432_v48, %v10858_v37  ;;  %v19198_v40 = vcombine.low %v19196_v1, %v19197_v5  ;;  %v19218_v6 = vld [vmem:[#allocation68_spill] sm:$0xff] }
 0x636   : > { %v10484_v47 = vor.u32 %v10483_v9, %v10479_v27  ;;  %v10862_v56 = vsel %vm14878_vm1, %v10860_v58, %v10861_v24  ;;  %v19201_v38 = vcombine.low %v19199_v19, %v19200_v52  ;;  %v19204_v22 = vcombine.low %v19202_v16, %v19203_v53  ;;  %v19212_v27 = vld [vmem:[#allocation65_spill] sm:$0xff] }
 0x637   : > { %v12449_v14 = vcombine.low %v10859_v23, %v10862_v56  ;;  %v19207_v18 = vcombine.low %v19205_v25, %v19206_v31  ;;  %v19210_v44 = vcombine.low %v19208_v3, %v19209_v46  ;;  %v19213_v9 = vcombine.low %v19211_v2, %v19212_v27 }
 0x638   : > { %v10485_v60 = vrot.slane %v10484_v47, 4  ;;  %v19215_v35 = vcombine.low %v17858_v57, %v19214_v8  ;;  %v19217_v54 = vcombine.low %v17864_v7, %v19216_v20  ;;  %v19221_v59 = vcombine.low %v17891_v34, %v17902_v12 }
 0x639   : > { %v19222_v57 = vcombine.low %v17932_v41, %v17936_v51 }
 0x63a   : > { %13421 = vmatmul.mubr.msk.bf16.gmra.mrb[20].mxu1 %vm1532_vm12, %v12410_v15  ;;  %v10490_v49 = vsel %vm14338_vm13, %v10485_v60, %v10489_v30  ;;  %v19190_v15 = vld [vmem:[#allocation42_spill] sm:$0xff] }
 0x63b   : > { %13424 = vmatprep.mubr.msk.bf16.mxu1 %vm1532_vm12, %v12411_v50  ;;  %v12414_v17 = vcombine.low %v10480_v4, %v10490_v49  ;;  %v19192_v29 = vcombine.low %v19190_v15, %v19191_v0  ;;  %v19195_v50 = vcombine.low %v19193_v39, %v19194_v21 }
 0x642   : > { %13425 = vmatmul.mubr.msk.bf16.gmra.mrb[24].mxu1 %vm1532_vm12, %v12412_v33  ;;  %v19219_v33 = vld [vmem:[#allocation69_spill] sm:$0xff] }
 0x643   : > { %13428 = vmatprep.mubr.msk.bf16.mxu1 %vm1532_vm12, %v12413_v32  ;;  %v19220_v61 = vcombine.low %v19218_v6, %v19219_v33 }
 0x64a   : > { %13429 = vmatmul.mubr.msk.bf16.gmra.mrb[28].mxu1 %vm1532_vm12, %v12414_v17 }
 0x64b   : > { %13434 = vmatprep.mubr.msk.bf16.mxu1 %vm1532_vm12, %v12448_v36 }
 0x652   : > { %13435 = vmatmul.mubr.msk.bf16.vlgmr.msra.gmra.mrb[0].mxu1 %vm1532_vm12, %v12449_v14 }
 0x653   : > { %13438 = vmatprep.mubr.msk.bf16.mxu1 %vm1532_vm12, %v19192_v29 }
 0x65a   : > { %13439 = vmatmul.mubr.msk.bf16.gmra.mrb[4].mxu1 %vm1532_vm12, %v19195_v50 }
 0x65b   : > { %13442 = vmatprep.mubr.msk.bf16.mxu1 %vm1532_vm12, %v19198_v40 }
 0x662   : > { %13443 = vmatmul.mubr.msk.bf16.gmra.mrb[8].mxu1 %vm1532_vm12, %v19201_v38 }
 0x663   : > { %13446 = vmatprep.mubr.msk.bf16.mxu1 %vm1532_vm12, %v19204_v22 }
 0x66a   : > { %13447 = vmatmul.mubr.msk.bf16.gmra.mrb[12].mxu1 %vm1532_vm12, %v19207_v18 }
 0x66b   : > { %13450 = vmatprep.mubr.msk.bf16.mxu1 %vm1532_vm12, %v19210_v44 }
 0x672   : > { %13451 = vmatmul.mubr.msk.bf16.gmra.mrb[16].mxu1 %vm1532_vm12, %v19213_v9 }
 0x673   : > { %13454 = vmatprep.mubr.msk.bf16.mxu1 %vm1532_vm12, %v19215_v35 }
 0x67a   : > { %13455 = vmatmul.mubr.msk.bf16.gmra.mrb[20].mxu1 %vm1532_vm12, %v19217_v54 }
 0x67b   : > { %13458 = vmatprep.mubr.msk.bf16.mxu1 %vm1532_vm12, %v19220_v61 }
 0x682   : > { %13459 = vmatmul.mubr.msk.bf16.gmra.mrb[24].mxu1 %vm1532_vm12, %v19221_v59 }
 0x683   : > { %13462 = vmatprep.mubr.msk.bf16.mxu1 %vm1532_vm12, %v12462_v55 }
 0x68a   : > { %13463 = vmatmul.mubr.msk.bf16.gmra.mrb[28].mxu1 %vm1532_vm12, %v19222_v57 }
 0x725   : > { %v18333_v7 = vpop.f32.mrb[0].mxu1 }
 0x726   : > { %v18335_v32 = vpop.f32.mrb[1].mxu1  ;;  %v11327_v43 = vmul.f32 %v18333_v7, %v18333_v7  ;;  %v11258_v47 = vsel %vm1532_vm12, %v18333_v7, 0.0 }
 0x727   : > { %v11325_v62 = vmul.f32 %v18335_v32, %v18335_v32  ;;  %v18339_v12 = vpop.f32.mrb[2].mxu1  ;;  %v11255_v28 = vsel %vm1532_vm12, %v18335_v32, 0.0 }
 0x728   : > { %v18341_v34 = vpop.f32.mrb[3].mxu1  ;;  %v11328_v26 = vmul.f32 %v18339_v12, %v18339_v12  ;;  %v11360_v4 = vsel %vm1532_vm12, %v11327_v43, 0.0  ;;  %v11260_v60 = vsel %vm1532_vm12, %v18339_v12, 0.0 }
 0x729   : > { %v11256_v55 = vsel %vm1532_vm12, %v18341_v34, 0.0  ;;  %v11326_v41 = vmul.f32 %v18341_v34, %v18341_v34  ;;  %v11357_v42 = vsel %vm1532_vm12, %v11325_v62, 0.0 }
 0x72a   : > { %v11257_v51 = vadd.f32 %v11256_v55, %v11255_v28  ;;  %v11362_v45 = vsel %vm1532_vm12, %v11328_v26, 0.0 }
 0x72b   : > { %v11358_v30 = vsel %vm1532_vm12, %v11326_v41, 0.0 }
 0x72c   : > { %v11259_v11 = vadd.f32 %v11258_v47, %v11257_v51  ;;  %v11359_v63 = vadd.f32 %v11358_v30, %v11357_v42 }
 0x72d   : > { %v18360_v10 = vpop.f32.mrb[4].mxu1 }
 0x72e   : > { %v11361_v49 = vadd.f32 %v11360_v4, %v11359_v63  ;;  %v18362_v37 = vpop.f32.mrb[5].mxu1  ;;  %v11261_v17 = vadd.f32 %v11260_v60, %v11259_v11  ;;  %v11331_v23 = vmul.f32 %v18360_v10, %v18360_v10  ;;  %v11266_v21 = vsel %vm1532_vm12, %v18360_v10, 0.0 }
 0x72f   : > { %v11262_v13 = vsel %vm1532_vm12, %v18362_v37, 0.0  ;;  %v11329_v36 = vmul.f32 %v18362_v37, %v18362_v37  ;;  %v18369_v24 = vpop.f32.mrb[6].mxu1 }
 0x730   : > { %v11263_v48 = vadd.f32 %v11262_v13, %v11261_v17  ;;  %v11363_v58 = vadd.f32 %v11362_v45, %v11361_v49  ;;  %v18371_v56 = vpop.f32.mrb[7].mxu1  ;;  %v11332_v50 = vmul.f32 %v18369_v24, %v18369_v24  ;;  %v11368_v19 = vsel %vm1532_vm12, %v11331_v23, 0.0 }
 0x731   : > { %v11364_v14 = vsel %vm1532_vm12, %v11329_v36, 0.0  ;;  %v11264_v15 = vsel %vm1532_vm12, %v18371_v56, 0.0  ;;  %v11330_v0 = vmul.f32 %v18371_v56, %v18371_v56  ;;  %v11268_v52 = vsel %vm1532_vm12, %v18369_v24, 0.0 }
 0x732   : > { %v11365_v29 = vadd.f32 %v11364_v14, %v11363_v58  ;;  %v11265_v39 = vadd.f32 %v11264_v15, %v11263_v48  ;;  %v11370_v25 = vsel %vm1532_vm12, %v11332_v50, 0.0 }
 0x733   : > { %v11366_v1 = vsel %vm1532_vm12, %v11330_v0, 0.0 }
 0x734   : > { %v11267_v5 = vadd.f32 %v11266_v21, %v11265_v39  ;;  %v11367_v40 = vadd.f32 %v11366_v1, %v11365_v29 }
 0x735   : > { %v18388_v38 = vpop.f32.mrb[8].mxu1 }
 0x736   : > { %v11369_v16 = vadd.f32 %v11368_v19, %v11367_v40  ;;  %v18390_v53 = vpop.f32.mrb[9].mxu1  ;;  %v11269_v22 = vadd.f32 %v11268_v52, %v11267_v5  ;;  %v11335_v27 = vmul.f32 %v18388_v38, %v18388_v38  ;;  %v11274_v6 = vsel %vm1532_vm12, %v18388_v38, 0.0 }
 0x737   : > { %v11270_v31 = vsel %vm1532_vm12, %v18390_v53, 0.0  ;;  %v11333_v18 = vmul.f32 %v18390_v53, %v18390_v53  ;;  %v18397_v3 = vpop.f32.mrb[10].mxu1 }
 0x738   : > { %v11271_v46 = vadd.f32 %v11270_v31, %v11269_v22  ;;  %v11371_v44 = vadd.f32 %v11370_v25, %v11369_v16  ;;  %v18399_v2 = vpop.f32.mrb[11].mxu1  ;;  %v11336_v33 = vmul.f32 %v18397_v3, %v18397_v3  ;;  %v11376_v62 = vsel %vm1532_vm12, %v11335_v27, 0.0 }
 0x739   : > { %v11372_v9 = vsel %vm1532_vm12, %v11333_v18, 0.0  ;;  %v11272_v8 = vsel %vm1532_vm12, %v18399_v2, 0.0  ;;  %v11334_v35 = vmul.f32 %v18399_v2, %v18399_v2  ;;  %v11276_v43 = vsel %vm1532_vm12, %v18397_v3, 0.0 }
 0x73a   : > { %v11373_v20 = vadd.f32 %v11372_v9, %v11371_v44  ;;  %v11273_v54 = vadd.f32 %v11272_v8, %v11271_v46  ;;  %v11378_v47 = vsel %vm1532_vm12, %v11336_v33, 0.0 }
 0x73b   : > { %v11374_v61 = vsel %vm1532_vm12, %v11334_v35, 0.0 }
 0x73c   : > { %v11275_v59 = vadd.f32 %v11274_v6, %v11273_v54  ;;  %v11375_v57 = vadd.f32 %v11374_v61, %v11373_v20 }
 0x73d   : > { %v18416_v28 = vpop.f32.mrb[12].mxu1 }
 0x73e   : > { %v11377_v55 = vadd.f32 %v11376_v62, %v11375_v57  ;;  %v18418_v41 = vpop.f32.mrb[13].mxu1  ;;  %v11277_v51 = vadd.f32 %v11276_v43, %v11275_v59  ;;  %v11339_v60 = vmul.f32 %v18416_v28, %v18416_v28  ;;  %v11282_v48 = vsel %vm1532_vm12, %v18416_v28, 0.0 }
 0x73f   : > { %v11278_v42 = vsel %vm1532_vm12, %v18418_v41, 0.0  ;;  %v11337_v26 = vmul.f32 %v18418_v41, %v18418_v41  ;;  %v18425_v30 = vpop.f32.mrb[14].mxu1 }
 0x740   : > { %v11279_v11 = vadd.f32 %v11278_v42, %v11277_v51  ;;  %v11379_v63 = vadd.f32 %v11378_v47, %v11377_v55  ;;  %v18427_v4 = vpop.f32.mrb[15].mxu1  ;;  %v11340_v58 = vmul.f32 %v18425_v30, %v18425_v30  ;;  %v11384_v0 = vsel %vm1532_vm12, %v11339_v60, 0.0 }
 0x741   : > { %v11380_v49 = vsel %vm1532_vm12, %v11337_v26, 0.0  ;;  %v11280_v17 = vsel %vm1532_vm12, %v18427_v4, 0.0  ;;  %v11338_v45 = vmul.f32 %v18427_v4, %v18427_v4  ;;  %v11284_v29 = vsel %vm1532_vm12, %v18425_v30, 0.0 }
 0x742   : > { %v11381_v13 = vadd.f32 %v11380_v49, %v11379_v63  ;;  %v11281_v36 = vadd.f32 %v11280_v17, %v11279_v11  ;;  %v11386_v5 = vsel %vm1532_vm12, %v11340_v58, 0.0 }
 0x743   : > { %v11382_v23 = vsel %vm1532_vm12, %v11338_v45, 0.0 }
 0x744   : > { %v11283_v14 = vadd.f32 %v11282_v48, %v11281_v36  ;;  %v11383_v15 = vadd.f32 %v11382_v23, %v11381_v13 }
 0x745   : > { %v18444_v39 = vpop.f32.mrb[16].mxu1 }
 0x746   : > { %v11385_v21 = vadd.f32 %v11384_v0, %v11383_v15  ;;  %v18446_v50 = vpop.f32.mrb[17].mxu1  ;;  %v11285_v1 = vadd.f32 %v11284_v29, %v11283_v14  ;;  %v11343_v31 = vmul.f32 %v18444_v39, %v18444_v39  ;;  %v11290_v8 = vsel %vm1532_vm12, %v18444_v39, 0.0 }
 0x747   : > { %v11286_v40 = vsel %vm1532_vm12, %v18446_v50, 0.0  ;;  %v11341_v19 = vmul.f32 %v18446_v50, %v18446_v50  ;;  %v18453_v52 = vpop.f32.mrb[18].mxu1 }
 0x748   : > { %v11287_v16 = vadd.f32 %v11286_v40, %v11285_v1  ;;  %v11387_v22 = vadd.f32 %v11386_v5, %v11385_v21  ;;  %v18455_v25 = vpop.f32.mrb[19].mxu1  ;;  %v11344_v35 = vmul.f32 %v18453_v52, %v18453_v52  ;;  %v11392_v33 = vsel %vm1532_vm12, %v11343_v31, 0.0 }
 0x749   : > { %v11388_v18 = vsel %vm1532_vm12, %v11341_v19, 0.0  ;;  %v11288_v46 = vsel %vm1532_vm12, %v18455_v25, 0.0  ;;  %v11342_v44 = vmul.f32 %v18455_v25, %v18455_v25  ;;  %v11292_v61 = vsel %vm1532_vm12, %v18453_v52, 0.0 }
 0x74a   : > { %v11389_v27 = vadd.f32 %v11388_v18, %v11387_v22  ;;  %v11289_v9 = vadd.f32 %v11288_v46, %v11287_v16  ;;  %v11394_v55 = vsel %vm1532_vm12, %v11344_v35, 0.0 }
 0x74b   : > { %v11390_v20 = vsel %vm1532_vm12, %v11342_v44, 0.0 }
 0x74c   : > { %v11291_v54 = vadd.f32 %v11290_v8, %v11289_v9  ;;  %v11391_v6 = vadd.f32 %v11390_v20, %v11389_v27 }
 0x74d   : > { %v18472_v59 = vpop.f32.mrb[20].mxu1 }
 0x74e   : > { %v11393_v57 = vadd.f32 %v11392_v33, %v11391_v6  ;;  %v18474_v62 = vpop.f32.mrb[21].mxu1  ;;  %v11293_v43 = vadd.f32 %v11292_v61, %v11291_v54  ;;  %v11347_v60 = vmul.f32 %v18472_v59, %v18472_v59  ;;  %v11298_v48 = vsel %vm1532_vm12, %v18472_v59, 0.0 }
 0x74f   : > { %v11294_v51 = vsel %vm1532_vm12, %v18474_v62, 0.0  ;;  %v11345_v47 = vmul.f32 %v18474_v62, %v18474_v62  ;;  %v18481_v42 = vpop.f32.mrb[22].mxu1 }
 0x750   : > { %v11295_v26 = vadd.f32 %v11294_v51, %v11293_v43  ;;  %v11395_v11 = vadd.f32 %v11394_v55, %v11393_v57  ;;  %v18483_v63 = vpop.f32.mrb[23].mxu1  ;;  %v11348_v58 = vmul.f32 %v18481_v42, %v18481_v42  ;;  %v11400_v0 = vsel %vm1532_vm12, %v11347_v60, 0.0 }
 0x751   : > { %v11396_v49 = vsel %vm1532_vm12, %v11345_v47, 0.0  ;;  %v11296_v17 = vsel %vm1532_vm12, %v18483_v63, 0.0  ;;  %v11346_v45 = vmul.f32 %v18483_v63, %v18483_v63  ;;  %v11300_v29 = vsel %vm1532_vm12, %v18481_v42, 0.0 }
 0x752   : > { %v11397_v13 = vadd.f32 %v11396_v49, %v11395_v11  ;;  %v11297_v36 = vadd.f32 %v11296_v17, %v11295_v26  ;;  %v11402_v19 = vsel %vm1532_vm12, %v11348_v58, 0.0 }
 0x753   : > { %v11398_v23 = vsel %vm1532_vm12, %v11346_v45, 0.0 }
 0x754   : > { %v11299_v14 = vadd.f32 %v11298_v48, %v11297_v36  ;;  %v11399_v15 = vadd.f32 %v11398_v23, %v11397_v13 }
 0x755   : > { %v18500_v21 = vpop.f32.mrb[24].mxu1 }
 0x756   : > { %v11401_v1 = vadd.f32 %v11400_v0, %v11399_v15  ;;  %v18502_v5 = vpop.f32.mrb[25].mxu1  ;;  %v11301_v40 = vadd.f32 %v11300_v29, %v11299_v14  ;;  %v11351_v27 = vmul.f32 %v18500_v21, %v18500_v21  ;;  %v11306_v6 = vsel %vm1532_vm12, %v18500_v21, 0.0 }
 0x757   : > { %v11302_v16 = vsel %vm1532_vm12, %v18502_v5, 0.0  ;;  %v11349_v22 = vmul.f32 %v18502_v5, %v18502_v5  ;;  %v18509_v31 = vpop.f32.mrb[26].mxu1 }
 0x758   : > { %v11303_v18 = vadd.f32 %v11302_v16, %v11301_v40  ;;  %v11403_v46 = vadd.f32 %v11402_v19, %v11401_v1  ;;  %v18511_v44 = vpop.f32.mrb[27].mxu1  ;;  %v11352_v33 = vmul.f32 %v18509_v31, %v18509_v31  ;;  %v11408_v55 = vsel %vm1532_vm12, %v11351_v27, 0.0 }
 0x759   : > { %v11404_v9 = vsel %vm1532_vm12, %v11349_v22, 0.0  ;;  %v11304_v8 = vsel %vm1532_vm12, %v18511_v44, 0.0  ;;  %v11350_v35 = vmul.f32 %v18511_v44, %v18511_v44  ;;  %v11308_v51 = vsel %vm1532_vm12, %v18509_v31, 0.0 }
 0x75a   : > { %v11405_v20 = vadd.f32 %v11404_v9, %v11403_v46  ;;  %v11305_v54 = vadd.f32 %v11304_v8, %v11303_v18  ;;  %v11410_v49 = vsel %vm1532_vm12, %v11352_v33, 0.0 }
 0x75b   : > { %v11406_v61 = vsel %vm1532_vm12, %v11350_v35, 0.0 }
 0x75c   : > { %v11307_v57 = vadd.f32 %v11306_v6, %v11305_v54  ;;  %v11407_v43 = vadd.f32 %v11406_v61, %v11405_v20 }
 0x75d   : > { %v18528_v47 = vpop.f32.mrb[28].mxu1 }
 0x75e   : > { %v11409_v26 = vadd.f32 %v11408_v55, %v11407_v43  ;;  %v18530_v11 = vpop.f32.mrb[29].mxu1  ;;  %v11309_v60 = vadd.f32 %v11308_v51, %v11307_v57  ;;  %v11355_v23 = vmul.f32 %v18528_v47, %v18528_v47  ;;  %v11314_v40 = vsel %vm1532_vm12, %v18528_v47, 0.0 }
 0x75f   : > { %v11310_v17 = vsel %vm1532_vm12, %v18530_v11, 0.0  ;;  %v11353_v45 = vmul.f32 %v18530_v11, %v18530_v11  ;;  %v18537_v13 = vpop.f32.mrb[30].mxu1 }
 0x760   : > { %v11311_v36 = vadd.f32 %v11310_v17, %v11309_v60  ;;  %v11411_v48 = vadd.f32 %v11410_v49, %v11409_v26  ;;  %v18539_v58 = vpop.f32.mrb[31].mxu1  ;;  %v11356_v19 = vmul.f32 %v18537_v13, %v18537_v13  ;;  %v11416_v46 = vsel %vm1532_vm12, %v11355_v23, 0.0 }
 0x761   : > { %v11412_v14 = vsel %vm1532_vm12, %v11353_v45, 0.0  ;;  %v11312_v15 = vsel %vm1532_vm12, %v18539_v58, 0.0  ;;  %v11354_v0 = vmul.f32 %v18539_v58, %v18539_v58  ;;  %v11316_v27 = vsel %vm1532_vm12, %v18537_v13, 0.0 }
 0x762   : > { %v11413_v29 = vadd.f32 %v11412_v14, %v11411_v48  ;;  %v11313_v1 = vadd.f32 %v11312_v15, %v11311_v36  ;;  %v11418_v35 = vsel %vm1532_vm12, %v11356_v19, 0.0 }
 0x763   : > { %v11414_v16 = vsel %vm1532_vm12, %v11354_v0, 0.0 }
 0x764   : > { %v11315_v22 = vadd.f32 %v11314_v40, %v11313_v1  ;;  %v11415_v18 = vadd.f32 %v11414_v16, %v11413_v29 }
 0x766   : > { %v11317_v9 = vadd.f32 %v11316_v27, %v11315_v22  ;;  %v11417_v8 = vadd.f32 %v11416_v46, %v11415_v18 }
 0x768   : > { %v11318_v20 = vrot.slane %v11317_v9, 4  ;;  %v11419_v54 = vadd.f32 %v11418_v35, %v11417_v8 }
 0x76a   : > { %v11319_v6 = vadd.f32 %v11318_v20, %v11317_v9  ;;  %v11420_v33 = vrot.slane %v11419_v54, 4 }
 0x76c   : > { %v11320_v61 = vrot.slane %v11319_v6, 2  ;;  %v11421_v57 = vadd.f32 %v11420_v33, %v11419_v54 }
 0x76e   : > { %v11321_v43 = vadd.f32 %v11320_v61, %v11319_v6  ;;  %v11422_v55 = vrot.slane %v11421_v57, 2 }
 0x770   : > { %v11322_v51 = vrot.slane %v11321_v43, 1  ;;  %v11423_v26 = vadd.f32 %v11422_v55, %v11421_v57 }
 0x772   : > { %v11323_v60 = vadd.f32 %v11322_v51, %v11321_v43  ;;  %v11424_v49 = vrot.slane %v11423_v26, 1 }
 0x774   : > { %v18557_v17 = vmul.f32 0.00390625, %v11323_v60  ;;  %v11425_v45 = vadd.f32 %v11424_v49, %v11423_v26 }
 0x776   : > { %v11426_v36 = vmul.f32 0.00390625, %v11425_v45  ;;  %v11427_v48 = vmul.f32 %v18557_v17, %v18557_v17  ;;  %v11430_v23 = vsub.f32 %v18335_v32, %v18557_v17  ;;  %v11431_v14 = vsub.f32 %v18341_v34, %v18557_v17 }
 0x777   : > { %v11432_v15 = vsub.f32 %v18333_v7, %v18557_v17  ;;  %v11433_v0 = vsub.f32 %v18339_v12, %v18557_v17  ;;  %v11434_v29 = vsub.f32 %v18362_v37, %v18557_v17  ;;  %v11435_v1 = vsub.f32 %v18371_v56, %v18557_v17 }
 0x778   : > { %v11428_v40 = vsub.f32 %v11426_v36, %v11427_v48  ;;  %v11436_v19 = vsub.f32 %v18360_v10, %v18557_v17  ;;  %v11437_v32 = vsub.f32 %v18369_v24, %v18557_v17  ;;  %v11438_v34 = vsub.f32 %v18390_v53, %v18557_v17 }
 0x779   : > { %v11439_v7 = vsub.f32 %v18399_v2, %v18557_v17  ;;  %v11440_v12 = vsub.f32 %v18388_v38, %v18557_v17  ;;  %v11441_v37 = vsub.f32 %v18397_v3, %v18557_v17  ;;  %v11442_v56 = vsub.f32 %v18418_v41, %v18557_v17 }
 0x77a   : > { %v11429_v16 = vmax.f32 %v11428_v40, 0.0  ;;  %v11443_v10 = vsub.f32 %v18427_v4, %v18557_v17  ;;  %v11444_v24 = vsub.f32 %v18416_v28, %v18557_v17  ;;  %v11445_v53 = vsub.f32 %v18425_v30, %v18557_v17  ;;  %v14121_v40 = vld [vmem:[%s14206_s21 + $0x8] sm:$0xff] }
 0x77b   : > { %v11446_v2 = vsub.f32 %v18446_v50, %v18557_v17  ;;  %v11447_v38 = vsub.f32 %v18455_v25, %v18557_v17  ;;  %v11448_v3 = vsub.f32 %v18444_v39, %v18557_v17  ;;  %v11449_v41 = vsub.f32 %v18453_v52, %v18557_v17 }
 0x77c   : > { %v11450_v4 = vsub.f32 %v18474_v62, %v18557_v17  ;;  %v11451_v28 = vsub.f32 %v18483_v63, %v18557_v17  ;;  %v11452_v30 = vsub.f32 %v18472_v59, %v18557_v17  ;;  %v11453_v50 = vsub.f32 %v18481_v42, %v18557_v17 }
 0x77d   : > { %v11454_v25 = vsub.f32 %v18502_v5, %v18557_v17  ;;  %v11455_v39 = vsub.f32 %v18511_v44, %v18557_v17  ;;  %v11456_v52 = vsub.f32 %v18500_v21, %v18557_v17  ;;  %v11457_v62 = vsub.f32 %v18509_v31, %v18557_v17 }
 0x77e   : > { %v11458_v63 = vsub.f32 %v18530_v11, %v18557_v17  ;;  %v11459_v59 = vsub.f32 %v18539_v58, %v18557_v17  ;;  %v11460_v42 = vsub.f32 %v18528_v47, %v18557_v17  ;;  %v11461_v5 = vsub.f32 %v18537_v13, %v18557_v17 }
 0x77f   : > { %v11462_v22 = vadd.f32 1e-05, %v11429_v16  ;;  %v14125_v16 = vld [vmem:[%s14206_s21 + $0x28] sm:$0xff] }
 0x781   : > { %14086 = vrsqrt.f32 %v11462_v22  ;;  %v14135_v22 = vld [vmem:[%s14206_s21 + $0x78] sm:$0xff] }
 0x78b   : > { %v14087_v44 = vpop.eup %14086 }
 0x78c   : > { %v11464_v18 = vmul.f32 %v14087_v44, %v11430_v23  ;;  %v11465_v21 = vmul.f32 %v14087_v44, %v11431_v14  ;;  %v11466_v46 = vmul.f32 %v14087_v44, %v11432_v15  ;;  %v11467_v27 = vmul.f32 %v14087_v44, %v11433_v0 }
 0x78d   : > { %v11468_v31 = vmul.f32 %v14087_v44, %v11434_v29  ;;  %v11469_v9 = vmul.f32 %v14087_v44, %v11435_v1  ;;  %v11470_v8 = vmul.f32 %v14087_v44, %v11436_v19  ;;  %v11471_v11 = vmul.f32 %v14087_v44, %v11437_v32  ;;  %v14120_v29 = vld [vmem:[%s14206_s21] sm:$0xff]  ;;  %v14122_v32 = vld [vmem:[%s14206_s21 + $0x10] sm:$0xff] }
 0x78e   : > { %v11472_v35 = vmul.f32 %v14087_v44, %v11438_v34  ;;  %v11473_v20 = vmul.f32 %v14087_v44, %v11439_v7  ;;  %v11474_v58 = vmul.f32 %v14087_v44, %v11440_v12  ;;  %v11475_v54 = vmul.f32 %v14087_v44, %v11441_v37  ;;  %v14123_v7 = vld [vmem:[%s14206_s21 + $0x18] sm:$0xff]  ;;  %v14124_v37 = vld [vmem:[%s14206_s21 + $0x20] sm:$0xff] }
 0x78f   : > { %v11476_v6 = vmul.f32 %v14087_v44, %v11442_v56  ;;  %v11477_v47 = vmul.f32 %v14087_v44, %v11443_v10  ;;  %v11478_v33 = vmul.f32 %v14087_v44, %v11444_v24  ;;  %v11479_v61 = vmul.f32 %v14087_v44, %v11445_v53  ;;  %v14126_v24 = vld [vmem:[%s14206_s21 + $0x30] sm:$0xff] }
 0x790   : > { %v11480_v13 = vmul.f32 %v14087_v44, %v11446_v2  ;;  %v11481_v57 = vmul.f32 %v14087_v44, %v11447_v38  ;;  %v11482_v43 = vmul.f32 %v14087_v44, %v11448_v3  ;;  %v11483_v55 = vmul.f32 %v14087_v44, %v11449_v41  ;;  %v14127_v2 = vld [vmem:[%s14206_s21 + $0x38] sm:$0xff]  ;;  %v14128_v3 = vld [vmem:[%s14206_s21 + $0x40] sm:$0xff] }
 0x791   : > { %v11484_v51 = vmul.f32 %v14087_v44, %v11450_v4  ;;  %v11485_v26 = vmul.f32 %v14087_v44, %v11451_v28  ;;  %v11486_v60 = vmul.f32 %v14087_v44, %v11452_v30  ;;  %v11487_v49 = vmul.f32 %v14087_v44, %v11453_v50  ;;  %v14129_v4 = vld [vmem:[%s14206_s21 + $0x48] sm:$0xff]  ;;  %v14130_v30 = vld [vmem:[%s14206_s21 + $0x50] sm:$0xff] }
 0x792   : > { %v11488_v17 = vmul.f32 %v14087_v44, %v11454_v25  ;;  %v11489_v45 = vmul.f32 %v14087_v44, %v11455_v39  ;;  %v11490_v36 = vmul.f32 %v14087_v44, %v11456_v52  ;;  %v11491_v48 = vmul.f32 %v14087_v44, %v11457_v62  ;;  %v14131_v25 = vld [vmem:[%s14206_s21 + $0x58] sm:$0xff]  ;;  %v14132_v52 = vld [vmem:[%s14206_s21 + $0x60] sm:$0xff] }
 0x793   : > { %v11492_v23 = vmul.f32 %v14087_v44, %v11458_v63  ;;  %v18625_v14 = vmul.f32 %v14087_v44, %v11459_v59  ;;  %v18627_v15 = vmul.f32 %v14087_v44, %v11460_v42  ;;  %v18629_v0 = vmul.f32 %v14087_v44, %v11461_v5  ;;  %v14133_v63 = vld [vmem:[%s14206_s21 + $0x68] sm:$0xff]  ;;  %v14134_v42 = vld [vmem:[%s14206_s21 + $0x70] sm:$0xff] }
 0x794   : > { %v18632_v1 = vadd.f32 %v14120_v29, %v11464_v18  ;;  %v18635_v19 = vadd.f32 %v14121_v40, %v11465_v21  ;;  %v18638_v34 = vadd.f32 %v14122_v32, %v11466_v46  ;;  %v18641_v12 = vadd.f32 %v14123_v7, %v11467_v27  ;;  %v14136_v18 = vld [vmem:[%s14206_s21 + $0x80] sm:$0xff]  ;;  %v14137_v46 = vld [vmem:[%s14206_s21 + $0x88] sm:$0xff] }
 0x795   : > { %v18644_v56 = vadd.f32 %v14124_v37, %v11468_v31  ;;  %v18647_v10 = vadd.f32 %v14125_v16, %v11469_v9  ;;  %v18650_v53 = vadd.f32 %v14126_v24, %v11470_v8  ;;  %v18653_v38 = vadd.f32 %v14127_v2, %v11471_v11  ;;  %v14138_v31 = vld [vmem:[%s14206_s21 + $0x90] sm:$0xff]  ;;  %v14139_v8 = vld [vmem:[%s14206_s21 + $0x98] sm:$0xff] }
 0x796   : > { %v18656_v41 = vadd.f32 %v14128_v3, %v11472_v35  ;;  %v18659_v28 = vadd.f32 %v14129_v4, %v11473_v20  ;;  %v18662_v50 = vadd.f32 %v14130_v30, %v11474_v58  ;;  %v18665_v39 = vadd.f32 %v14131_v25, %v11475_v54  ;;  %v14140_v35 = vld [vmem:[%s14206_s21 + $0xa0] sm:$0xff]  ;;  %v14141_v58 = vld [vmem:[%s14206_s21 + $0xa8] sm:$0xff] }
 0x797   : > { %v18668_v62 = vadd.f32 %v14132_v52, %v11476_v6  ;;  %v18671_v59 = vadd.f32 %v14133_v63, %v11477_v47  ;;  %v18674_v5 = vadd.f32 %v14134_v42, %v11478_v33  ;;  %v18677_v44 = vadd.f32 %v14135_v22, %v11479_v61  ;;  %v14142_v6 = vld [vmem:[%s14206_s21 + $0xb0] sm:$0xff]  ;;  %v14143_v33 = vld [vmem:[%s14206_s21 + $0xb8] sm:$0xff] }
 0x798   : > { %v18680_v21 = vadd.f32 %v14136_v18, %v11480_v13  ;;  %v18683_v27 = vadd.f32 %v14137_v46, %v11481_v57  ;;  %v18686_v9 = vadd.f32 %v14138_v31, %v11482_v43  ;;  %v18689_v11 = vadd.f32 %v14139_v8, %v11483_v55  ;;  %v14144_v13 = vld [vmem:[%s14206_s21 + $0xc0] sm:$0xff]  ;;  %v14145_v43 = vld [vmem:[%s14206_s21 + $0xc8] sm:$0xff] }
 0x799   : > { %v18692_v20 = vadd.f32 %v14140_v35, %v11484_v51  ;;  %v18695_v54 = vadd.f32 %v14141_v58, %v11485_v26  ;;  %v18698_v47 = vadd.f32 %v14142_v6, %v11486_v60  ;;  %v18701_v61 = vadd.f32 %v14143_v33, %v11487_v49  ;;  %v14146_v51 = vld [vmem:[%s14206_s21 + $0xd0] sm:$0xff]  ;;  %v14147_v26 = vld [vmem:[%s14206_s21 + $0xd8] sm:$0xff]  ;;  %v14148_v60 = vld [vmem:[%s14206_s21 + $0xe0] sm:$0xff] }
 0x79a   : > { %v18704_v57 = vadd.f32 %v14144_v13, %v11488_v17  ;;  %v18707_v55 = vadd.f32 %v14145_v43, %v11489_v45  ;;  %v18710_v29 = vadd.f32 %v14146_v51, %v11490_v36  ;;  %v18713_v40 = vadd.f32 %v14147_v26, %v11491_v48  ;;  %v14149_v17 = vld [vmem:[%s14206_s21 + $0xe8] sm:$0xff]  ;;  %v14150_v45 = vld [vmem:[%s14206_s21 + $0xf0] sm:$0xff]  ;;  %v14151_v48 = vld [vmem:[%s14206_s21 + $0xf8] sm:$0xff] }
 0x79b   : > { %v18723_v49 = vadd.f32 %v14148_v60, %v11492_v23  ;;  %v18727_v32 = vadd.f32 %v14149_v17, %v18625_v14  ;;  %v18731_v36 = vadd.f32 %v14150_v45, %v18627_v15  ;;  %v18735_v7 = vadd.f32 %v14151_v48, %v18629_v0 }
 0x79c   : > { %v11528_v37 = vmax.f32 %v18632_v1, 0.0  ;;  %v11529_v23 = vmax.f32 %v18635_v19, 0.0  ;;  %v11530_v16 = vmax.f32 %v18638_v34, 0.0  ;;  %v11531_v14 = vmax.f32 %v18641_v12, 0.0 }
 0x79d   : > { %v11532_v24 = vmax.f32 %v18644_v56, 0.0  ;;  %v11533_v15 = vmax.f32 %v18647_v10, 0.0  ;;  %v11534_v2 = vmax.f32 %v18650_v53, 0.0  ;;  %v11535_v0 = vmax.f32 %v18653_v38, 0.0 }
 0x79e   : > { %v11536_v1 = vmax.f32 %v18656_v41, 0.0  ;;  %v11537_v19 = vmax.f32 %v18659_v28, 0.0  ;;  %v11538_v34 = vmax.f32 %v18662_v50, 0.0  ;;  %v11539_v12 = vmax.f32 %v18665_v39, 0.0  ;;  %11560 = vst.msk [vmem:[%s18720_s10] sm:$0xff] %vm1532_vm12, %v11528_v37  ;;  %11561 = vst.msk [vmem:[%s18720_s10 + $0x8] sm:$0xff] %vm1532_vm12, %v11529_v23 }
 0x79f   : > { %11562 = vst.msk [vmem:[%s18720_s10 + $0x10] sm:$0xff] %vm1532_vm12, %v11530_v16  ;;  %11563 = vst.msk [vmem:[%s18720_s10 + $0x18] sm:$0xff] %vm1532_vm12, %v11531_v14  ;;  %v11540_v56 = vmax.f32 %v18668_v62, 0.0  ;;  %v11541_v10 = vmax.f32 %v18671_v59, 0.0  ;;  %v11542_v53 = vmax.f32 %v18674_v5, 0.0  ;;  %v11543_v38 = vmax.f32 %v18677_v44, 0.0 }
 0x7a0   : > { %11564 = vst.msk [vmem:[%s18720_s10 + $0x20] sm:$0xff] %vm1532_vm12, %v11532_v24  ;;  %11565 = vst.msk [vmem:[%s18720_s10 + $0x28] sm:$0xff] %vm1532_vm12, %v11533_v15  ;;  %v11544_v3 = vmax.f32 %v18680_v21, 0.0  ;;  %v11545_v41 = vmax.f32 %v18683_v27, 0.0  ;;  %v11546_v4 = vmax.f32 %v18686_v9, 0.0  ;;  %v11547_v28 = vmax.f32 %v18689_v11, 0.0 }
 0x7a1   : > { %11566 = vst.msk [vmem:[%s18720_s10 + $0x30] sm:$0xff] %vm1532_vm12, %v11534_v2  ;;  %11567 = vst.msk [vmem:[%s18720_s10 + $0x38] sm:$0xff] %vm1532_vm12, %v11535_v0  ;;  %v11548_v30 = vmax.f32 %v18692_v20, 0.0  ;;  %v11549_v50 = vmax.f32 %v18695_v54, 0.0  ;;  %v11550_v25 = vmax.f32 %v18698_v47, 0.0  ;;  %v11551_v39 = vmax.f32 %v18701_v61, 0.0 }
 0x7a2   : > { %11568 = vst.msk [vmem:[%s18720_s10 + $0x40] sm:$0xff] %vm1532_vm12, %v11536_v1  ;;  %11569 = vst.msk [vmem:[%s18720_s10 + $0x48] sm:$0xff] %vm1532_vm12, %v11537_v19  ;;  %v11552_v52 = vmax.f32 %v18704_v57, 0.0  ;;  %v11553_v62 = vmax.f32 %v18707_v55, 0.0  ;;  %v11554_v63 = vmax.f32 %v18710_v29, 0.0  ;;  %v11555_v59 = vmax.f32 %v18713_v40, 0.0 }
 0x7a3   : > { %11570 = vst.msk [vmem:[%s18720_s10 + $0x50] sm:$0xff] %vm1532_vm12, %v11538_v34  ;;  %11571 = vst.msk [vmem:[%s18720_s10 + $0x58] sm:$0xff] %vm1532_vm12, %v11539_v12  ;;  %v11556_v42 = vmax.f32 %v18723_v49, 0.0  ;;  %v11557_v5 = vmax.f32 %v18727_v32, 0.0  ;;  %v11558_v22 = vmax.f32 %v18731_v36, 0.0  ;;  %v11559_v44 = vmax.f32 %v18735_v7, 0.0 }
 0x7a4   : > { %11572 = vst.msk [vmem:[%s18720_s10 + $0x60] sm:$0xff] %vm1532_vm12, %v11540_v56  ;;  %11573 = vst.msk [vmem:[%s18720_s10 + $0x68] sm:$0xff] %vm1532_vm12, %v11541_v10 }
 0x7a5   : > { %11574 = vst.msk [vmem:[%s18720_s10 + $0x70] sm:$0xff] %vm1532_vm12, %v11542_v53  ;;  %11575 = vst.msk [vmem:[%s18720_s10 + $0x78] sm:$0xff] %vm1532_vm12, %v11543_v38 }
 0x7a6   : > { %11576 = vst.msk [vmem:[%s18720_s10 + $0x80] sm:$0xff] %vm1532_vm12, %v11544_v3  ;;  %11577 = vst.msk [vmem:[%s18720_s10 + $0x88] sm:$0xff] %vm1532_vm12, %v11545_v41 }
 0x7a7   : > { %11578 = vst.msk [vmem:[%s18720_s10 + $0x90] sm:$0xff] %vm1532_vm12, %v11546_v4  ;;  %11579 = vst.msk [vmem:[%s18720_s10 + $0x98] sm:$0xff] %vm1532_vm12, %v11547_v28 }
 0x7a8   : > { %11580 = vst.msk [vmem:[%s18720_s10 + $0xa0] sm:$0xff] %vm1532_vm12, %v11548_v30  ;;  %11581 = vst.msk [vmem:[%s18720_s10 + $0xa8] sm:$0xff] %vm1532_vm12, %v11549_v50 }
 0x7a9   : > { %11582 = vst.msk [vmem:[%s18720_s10 + $0xb0] sm:$0xff] %vm1532_vm12, %v11550_v25  ;;  %11583 = vst.msk [vmem:[%s18720_s10 + $0xb8] sm:$0xff] %vm1532_vm12, %v11551_v39 }
 0x7aa   : > { %11584 = vst.msk [vmem:[%s18720_s10 + $0xc0] sm:$0xff] %vm1532_vm12, %v11552_v52  ;;  %11585 = vst.msk [vmem:[%s18720_s10 + $0xc8] sm:$0xff] %vm1532_vm12, %v11553_v62 }
 0x7ab   : > { %11586 = vst.msk [vmem:[%s18720_s10 + $0xd0] sm:$0xff] %vm1532_vm12, %v11554_v63  ;;  %11587 = vst.msk [vmem:[%s18720_s10 + $0xd8] sm:$0xff] %vm1532_vm12, %v11555_v59 }
 0x7ac   : > { %11588 = vst.msk [vmem:[%s18720_s10 + $0xe0] sm:$0xff] %vm1532_vm12, %v11556_v42  ;;  %11589 = vst.msk [vmem:[%s18720_s10 + $0xe8] sm:$0xff] %vm1532_vm12, %v11557_v5 }
 0x7ad   : > { %11590 = vst.msk [vmem:[%s18720_s10 + $0xf0] sm:$0xff] %vm1532_vm12, %v11558_v22  ;;  %11591 = vst.msk [vmem:[%s18720_s10 + $0xf8] sm:$0xff] %vm1532_vm12, %v11559_v44 }
 0x7ae PF: > { %s13_s12 = sadd.s32 1, %s14158_s12  }
 0x7af   : > { %p10_p4 = scmp.ge.s32.totalorder %s13_s12, 4  }
 0x7b1   :  { %12 = sbr.rel (!%p10_p4) target bundleno = 1 (0x1), region = 81 }

</bundles_post_ra>
